<compile_context>
chip_gen: v6e
topology: v6e:2x2x1
jax: 0.10.0
libtpu: 0.0.40
codegen_flags: <defaults>
</compile_context>

<pallas_src>
import jax
import jax.numpy as jnp
from jax.experimental import pallas as pl
from jax.experimental.pallas import tpu as pltpu

NUM_CLASSES = 200


def _round_up(x, m):
    return ((x + m - 1) // m) * m


# ----------------------------------------------------------------------------
# Pallas kernel: tiled (M,K) @ (K,N) + bias, bf16 operands, f32 MXU accumulate.
# ----------------------------------------------------------------------------
def _mm_bias_kernel(a_ref, b_ref, bias_ref, o_ref, acc_ref):
    k = pl.program_id(2)

    @pl.when(k == 0)
    def _():
        acc_ref[...] = jnp.zeros_like(acc_ref)

    acc_ref[...] += jnp.dot(
        a_ref[...], b_ref[...], preferred_element_type=jnp.float32
    )

    @pl.when(k == pl.num_programs(2) - 1)
    def _():
        o_ref[...] = (acc_ref[...] + bias_ref[...]).astype(o_ref.dtype)


def _pick_tiles(M, K, N):
    Np = _round_up(N, 128)
    # Lane-dense output; single N pass (tn=256) when it divides Np evenly.
    tn = 256 if Np % 256 == 0 else 128
    if K > 4096:
        # fc1-like: tiny M, huge K.  8192*256*2B = 4 MB b tiles, 49 steps.
        tk = 8192
        tm = _round_up(min(M, 128), 8)
    else:
        # conv-like: full-K single reduction step, large M tiles.
        tk = _round_up(K, 16)
        tm = 2048 if K <= 128 else 512       # conv1 / conv2
        tm = min(tm, _round_up(M, 16))
    return tm, tk, tn, Np


def matmul_bias(a, b, bias, *, out_dtype=jnp.float32):
    """a @ b + bias via the Pallas kernel.  a:(M,K), b:(K,N), bias:(N,)."""
    M, K = a.shape
    K2, N = b.shape
    assert K == K2 and bias.shape == (N,)

    tm, tk, tn, Np = _pick_tiles(M, K, N)
    Mp, Kp = _round_up(M, tm), _round_up(K, tk)

    a_p = a.astype(jnp.bfloat16)
    if (Mp, Kp) != (M, K):
        a_p = jnp.pad(a_p, ((0, Mp - M), (0, Kp - K)))
    b_p = b.astype(jnp.bfloat16)           # no-op / no pad for prepared weights
    if (Kp, Np) != (K, N):
        b_p = jnp.pad(b_p, ((0, Kp - K), (0, Np - N)))
    bias_p = bias.astype(jnp.float32)
    if Np != N:
        bias_p = jnp.pad(bias_p, (0, Np - N))
    bias_p = bias_p.reshape(1, Np)

    grid = (Mp // tm, Np // tn, Kp // tk)

    out = pl.pallas_call(
        _mm_bias_kernel,
        out_shape=jax.ShapeDtypeStruct((Mp, Np), out_dtype),
        grid_spec=pltpu.PrefetchScalarGridSpec(
            num_scalar_prefetch=0,
            grid=grid,
            in_specs=[
                pl.BlockSpec((tm, tk), lambda i, j, k: (i, k)),
                pl.BlockSpec((tk, tn), lambda i, j, k: (k, j)),
                pl.BlockSpec((1, tn), lambda i, j, k: (0, j)),
            ],
            out_specs=pl.BlockSpec((tm, tn), lambda i, j, k: (i, j)),
            scratch_shapes=[pltpu.VMEM((tm, tn), jnp.float32)],
        ),
        compiler_params=pltpu.CompilerParams(
            dimension_semantics=("parallel", "parallel", "arbitrary"),
        ),
    )(a_p, b_p, bias_p)

    if (Mp, Np) != (M, N):
        out = out[:M, :N]
    return out


# ----------------------------------------------------------------------------
# Glue: NHWC im2col (pure pads/slices, no transposes) and the conv wrapper.
# ----------------------------------------------------------------------------
def im2col_nhwc(x, k, stride, pad):
    """x:(N,H,W,C) -> patches (N*OH*OW, C*k*k), columns in (c, kh, kw) order
    (matches torch weight.reshape(OC, -1) which is (ic, kh, kw))."""
    N, H, W, C = x.shape
    OH = (H + 2 * pad - k) // stride + 1
    OW = (W + 2 * pad - k) // stride + 1
    xp = jnp.pad(x, ((0, 0), (pad, pad), (pad, pad), (0, 0)))
    cols = []
    for kh in range(k):
        for kw in range(k):
            cols.append(
                xp[:, kh:kh + stride * OH:stride, kw:kw + stride * OW:stride, :]
            )
    col = jnp.stack(cols, axis=-1)          # (N, OH, OW, C, k*k)
    return col.reshape(N * OH * OW, C * k * k), OH, OW


def conv2d_nhwc(x, w_kn, b, *, stride=2, pad=1, k=3):
    """Conv2d with PyTorch semantics, NHWC activations.
    x: (N,H,W,C), w_kn: (C*k*k, OC) prepared bf16, b: (OC,) f32."""
    N = x.shape[0]
    col, OH, OW = im2col_nhwc(x, k, stride, pad)
    out = matmul_bias(col, w_kn, b, out_dtype=jnp.bfloat16)  # (N*OH*OW, OC)
    return out.reshape(N, OH, OW, -1)


@jax.jit
def custom_net_forward(params, x):
    # x: NCHW f32 (PyTorch boundary). One cheap cast + layout change up front.
    x = x.astype(jnp.bfloat16).transpose(0, 2, 3, 1)           # -> NHWC bf16
    x = conv2d_nhwc(x, params["conv1_w"], params["conv1_b"])   # (N,112,112,64)
    x = conv2d_nhwc(x, params["conv2_w"], params["conv2_b"])   # (N, 56, 56,128)
    x = x.reshape(x.shape[0], -1)        # NHWC flatten; fc1_w rows pre-permuted
    x = matmul_bias(x, params["fc1_w"], params["fc1_b"], out_dtype=jnp.float32)
    return x[:, :NUM_CLASSES]            # drop the N-padding columns (200..255)


# ----------------------------------------------------------------------------
# Parameters: torch-layout init, then one-time kernel-ready transformation.
# ----------------------------------------------------------------------------
def init_params(key):
    k1, k2, k3, k4, k5, k6 = jax.random.split(key, 6)
    return {
        "conv1_w": jax.random.normal(k1, (64, 3, 3, 3), jnp.float32)
        * (1.0 / jnp.sqrt(3 * 3 * 3)),
        "conv1_b": jax.random.normal(k2, (64,), jnp.float32) * 0.01,
        "conv2_w": jax.random.normal(k3, (128, 64, 3, 3), jnp.float32)
        * (1.0 / jnp.sqrt(64 * 3 * 3)),
        "conv2_b": jax.random.normal(k4, (128,), jnp.float32) * 0.01,
        "fc1_w": jax.random.normal(k5, (NUM_CLASSES, 128 * 56 * 56), jnp.float32)
        * (1.0 / jnp.sqrt(128 * 56 * 56)),
        "fc1_b": jax.random.normal(k6, (NUM_CLASSES,), jnp.float32) * 0.01,
    }


def prepare_params(p):
    """One-time (outside jit): reshape/transpose/permute/pad/cast the weights
    so the jitted forward never touches the big f32 tensors again."""

    def conv_w(w):  # (OC, IC, KH, KW) -> (IC*KH*KW, OC) bf16
        oc, ic, kh, kw = w.shape
        return w.transpose(1, 2, 3, 0).reshape(ic * kh * kw, oc).astype(jnp.bfloat16)

    # fc1: torch flatten order is (c, h, w); our activations are flattened
    # (h, w, c) (NHWC).  Fold that permutation into the weight rows.
    fw = p["fc1_w"].reshape(NUM_CLASSES, 128, 56, 56)      # [o, c, h, w]
    fw = fw.transpose(2, 3, 1, 0).reshape(128 * 56 * 56, NUM_CLASSES)  # [hwc, o]
    npad = _round_up(NUM_CLASSES, 128) - NUM_CLASSES       # 200 -> 256
    fw = jnp.pad(fw.astype(jnp.bfloat16), ((0, 0), (0, npad)))
    fb = jnp.pad(p["fc1_b"].astype(jnp.float32), (0, npad))

    return {
        "conv1_w": conv_w(p["conv1_w"]),
        "conv1_b": p["conv1_b"].astype(jnp.float32),
        "conv2_w": conv_w(p["conv2_w"]),
        "conv2_b": p["conv2_b"].astype(jnp.float32),
        "fc1_w": fw,     # (401408, 256) bf16, ready for the kernel
        "fc1_b": fb,     # (256,) f32
    }


if __name__ == "__main__":
    key = jax.random.PRNGKey(0)
    pkey, xkey = jax.random.split(key)
    params = prepare_params(init_params(pkey))
    # Smallest batch; spatial 224 is forced by fc1's 128*56*56 input features.
    x = jax.random.normal(xkey, (2, 3, 224, 224), jnp.float32)

    out = custom_net_forward(params, x)
    out = jax.block_until_ready(out)
    assert out.shape == (2, NUM_CLASSES), out.shape
    assert jnp.all(jnp.isfinite(out))
    print("KERNEL_OK")
</pallas_src>

<mosaic_0001>
module attributes {stable_mosaic.version = 11 : i64} {
  func.func @_mm_bias_kernel(%arg0: i32, %arg1: i32, %arg2: i32, %arg3: memref<2048x32xbf16, #tpu.memory_space<vmem>>, %arg4: memref<32x128xbf16, #tpu.memory_space<vmem>>, %arg5: memref<1x128xf32, #tpu.memory_space<vmem>>, %arg6: memref<2048x128xbf16, #tpu.memory_space<vmem>>, %arg7: memref<2048x128xf32, #tpu.memory_space<vmem>>) attributes {dimension_semantics = [#tpu.dimension_semantics<parallel>, #tpu.dimension_semantics<parallel>, #tpu.dimension_semantics<arbitrary>], iteration_bounds = array<i64: 13, 1, 1>, scalar_prefetch = 0 : i64, scratch_operands = 1 : i64, tpu.core_type = #tpu.core_type<tc>, window_params = [{transform_indices = @transform_0, window_bounds = array<i64: 2048, 32>}, {transform_indices = @transform_1, window_bounds = array<i64: 32, 128>}, {transform_indices = @transform_2, window_bounds = array<i64: 1, 128>}, {transform_indices = @transform_3, window_bounds = array<i64: 2048, 128>}]} {
    %c0_i32 = arith.constant 0 : i32
    %0 = arith.cmpi eq, %arg2, %c0_i32 : i32
    %1 = arith.extui %0 : i1 to i32
    %c0_i32_0 = arith.constant 0 : i32
    %2 = arith.cmpi ne, %1, %c0_i32_0 : i32
    scf.if %2 {
      %cst_10 = arith.constant 0.000000e+00 : f32
      %12 = vector.broadcast %cst_10 : f32 to vector<2048x128xf32>
      %c0_11 = arith.constant 0 : index
      %c0_12 = arith.constant 0 : index
      %13 = vector.load %arg7[%c0_11, %c0_12] : memref<2048x128xf32, #tpu.memory_space<vmem>>, vector<2048x128xf32>
      tpu.vector_store %arg7[%c0_11, %c0_12], %12 {strides = array<i32>} : memref<2048x128xf32, #tpu.memory_space<vmem>>, vector<2048x128xf32>,
    } else {
    }
    %c0 = arith.constant 0 : index
    %c0_1 = arith.constant 0 : index
    %3 = vector.load %arg7[%c0, %c0_1] : memref<2048x128xf32, #tpu.memory_space<vmem>>, vector<2048x128xf32>
    %c0_2 = arith.constant 0 : index
    %c0_3 = arith.constant 0 : index
    %4 = vector.load %arg3[%c0_2, %c0_3] : memref<2048x32xbf16, #tpu.memory_space<vmem>>, vector<2048x32xbf16>
    %c0_4 = arith.constant 0 : index
    %c0_5 = arith.constant 0 : index
    %5 = vector.load %arg4[%c0_4, %c0_5] : memref<32x128xbf16, #tpu.memory_space<vmem>>, vector<32x128xbf16>
    %cst = arith.constant dense<0.000000e+00> : vector<2048x128xf32>
    %6 = tpu.matmul %4, %5, %cst {dimension_numbers = #tpu.dot_dimension_numbers<[1], [0], [0], [1], [0, 0, 1, 1], [], []>} : vector<2048x32xbf16>, vector<32x128xbf16>, vector<2048x128xf32> -> vector<2048x128xf32>
    %7 = arith.addf %3, %6 : vector<2048x128xf32>
    %c0_6 = arith.constant 0 : index
    %c0_7 = arith.constant 0 : index
    %8 = vector.load %arg7[%c0_6, %c0_7] : memref<2048x128xf32, #tpu.memory_space<vmem>>, vector<2048x128xf32>
    tpu.vector_store %arg7[%c0_6, %c0_7], %7 {strides = array<i32>} : memref<2048x128xf32, #tpu.memory_space<vmem>>, vector<2048x128xf32>,
    %c0_i32_8 = arith.constant 0 : i32
    %9 = arith.cmpi eq, %arg2, %c0_i32_8 : i32
    %10 = arith.extui %9 : i1 to i32
    %c0_i32_9 = arith.constant 0 : i32
    %11 = arith.cmpi ne, %10, %c0_i32_9 : i32
    scf.if %11 {
      %c0_10 = arith.constant 0 : index
      %c0_11 = arith.constant 0 : index
      %12 = vector.load %arg7[%c0_10, %c0_11] : memref<2048x128xf32, #tpu.memory_space<vmem>>, vector<2048x128xf32>
      %c0_12 = arith.constant 0 : index
      %c0_13 = arith.constant 0 : index
      %13 = vector.load %arg5[%c0_12, %c0_13] : memref<1x128xf32, #tpu.memory_space<vmem>>, vector<1x128xf32>
      %14 = vector.broadcast %13 : vector<1x128xf32> to vector<2048x128xf32>
      %15 = arith.addf %12, %14 : vector<2048x128xf32>
      %16 = arith.truncf %15 : vector<2048x128xf32> to vector<2048x128xbf16>
      %c0_14 = arith.constant 0 : index
      %c0_15 = arith.constant 0 : index
      %17 = vector.load %arg6[%c0_14, %c0_15] : memref<2048x128xbf16, #tpu.memory_space<vmem>>, vector<2048x128xbf16>
      tpu.vector_store %arg6[%c0_14, %c0_15], %16 {strides = array<i32>} : memref<2048x128xbf16, #tpu.memory_space<vmem>>, vector<2048x128xbf16>,
    } else {
    }
    return
  }
  func.func @transform_0(%arg0: i32, %arg1: i32, %arg2: i32) -> (i32, i32) {
    %c0_i32 = arith.constant 0 : i32
    return %arg0, %arg2 : i32, i32
  }
  func.func @transform_1(%arg0: i32, %arg1: i32, %arg2: i32) -> (i32, i32) {
    %c0_i32 = arith.constant 0 : i32
    return %arg2, %arg1 : i32, i32
  }
  func.func @transform_2(%arg0: i32, %arg1: i32, %arg2: i32) -> (i32, i32) {
    %c0_i32 = arith.constant 0 : i32
    %c0_i32_0 = arith.constant 0 : i32
    return %c0_i32, %arg1 : i32, i32
  }
  func.func @transform_3(%arg0: i32, %arg1: i32, %arg2: i32) -> (i32, i32) {
    %c0_i32 = arith.constant 0 : i32
    return %arg0, %arg1 : i32, i32
  }
}

module attributes {stable_mosaic.version = 11 : i64} {
  func.func @_mm_bias_kernel(%arg0: i32, %arg1: i32, %arg2: i32, %arg3: memref<512x576xbf16, #tpu.memory_space<vmem>>, %arg4: memref<576x128xbf16, #tpu.memory_space<vmem>>, %arg5: memref<1x128xf32, #tpu.memory_space<vmem>>, %arg6: memref<512x128xbf16, #tpu.memory_space<vmem>>, %arg7: memref<512x128xf32, #tpu.memory_space<vmem>>) attributes {dimension_semantics = [#tpu.dimension_semantics<parallel>, #tpu.dimension_semantics<parallel>, #tpu.dimension_semantics<arbitrary>], iteration_bounds = array<i64: 13, 1, 1>, scalar_prefetch = 0 : i64, scratch_operands = 1 : i64, tpu.core_type = #tpu.core_type<tc>, window_params = [{transform_indices = @transform_0, window_bounds = array<i64: 512, 576>}, {transform_indices = @transform_1, window_bounds = array<i64: 576, 128>}, {transform_indices = @transform_2, window_bounds = array<i64: 1, 128>}, {transform_indices = @transform_3, window_bounds = array<i64: 512, 128>}]} {
    %c0_i32 = arith.constant 0 : i32
    %0 = arith.cmpi eq, %arg2, %c0_i32 : i32
    %1 = arith.extui %0 : i1 to i32
    %c0_i32_0 = arith.constant 0 : i32
    %2 = arith.cmpi ne, %1, %c0_i32_0 : i32
    scf.if %2 {
      %cst_10 = arith.constant 0.000000e+00 : f32
      %12 = vector.broadcast %cst_10 : f32 to vector<512x128xf32>
      %c0_11 = arith.constant 0 : index
      %c0_12 = arith.constant 0 : index
      %13 = vector.load %arg7[%c0_11, %c0_12] : memref<512x128xf32, #tpu.memory_space<vmem>>, vector<512x128xf32>
      tpu.vector_store %arg7[%c0_11, %c0_12], %12 {strides = array<i32>} : memref<512x128xf32, #tpu.memory_space<vmem>>, vector<512x128xf32>,
    } else {
    }
    %c0 = arith.constant 0 : index
    %c0_1 = arith.constant 0 : index
    %3 = vector.load %arg7[%c0, %c0_1] : memref<512x128xf32, #tpu.memory_space<vmem>>, vector<512x128xf32>
    %c0_2 = arith.constant 0 : index
    %c0_3 = arith.constant 0 : index
    %4 = vector.load %arg3[%c0_2, %c0_3] : memref<512x576xbf16, #tpu.memory_space<vmem>>, vector<512x576xbf16>
    %c0_4 = arith.constant 0 : index
    %c0_5 = arith.constant 0 : index
    %5 = vector.load %arg4[%c0_4, %c0_5] : memref<576x128xbf16, #tpu.memory_space<vmem>>, vector<576x128xbf16>
    %cst = arith.constant dense<0.000000e+00> : vector<512x128xf32>
    %6 = tpu.matmul %4, %5, %cst {dimension_numbers = #tpu.dot_dimension_numbers<[1], [0], [0], [1], [0, 0, 1, 1], [], []>} : vector<512x576xbf16>, vector<576x128xbf16>, vector<512x128xf32> -> vector<512x128xf32>
    %7 = arith.addf %3, %6 : vector<512x128xf32>
    %c0_6 = arith.constant 0 : index
    %c0_7 = arith.constant 0 : index
    %8 = vector.load %arg7[%c0_6, %c0_7] : memref<512x128xf32, #tpu.memory_space<vmem>>, vector<512x128xf32>
    tpu.vector_store %arg7[%c0_6, %c0_7], %7 {strides = array<i32>} : memref<512x128xf32, #tpu.memory_space<vmem>>, vector<512x128xf32>,
    %c0_i32_8 = arith.constant 0 : i32
    %9 = arith.cmpi eq, %arg2, %c0_i32_8 : i32
    %10 = arith.extui %9 : i1 to i32
    %c0_i32_9 = arith.constant 0 : i32
    %11 = arith.cmpi ne, %10, %c0_i32_9 : i32
    scf.if %11 {
      %c0_10 = arith.constant 0 : index
      %c0_11 = arith.constant 0 : index
      %12 = vector.load %arg7[%c0_10, %c0_11] : memref<512x128xf32, #tpu.memory_space<vmem>>, vector<512x128xf32>
      %c0_12 = arith.constant 0 : index
      %c0_13 = arith.constant 0 : index
      %13 = vector.load %arg5[%c0_12, %c0_13] : memref<1x128xf32, #tpu.memory_space<vmem>>, vector<1x128xf32>
      %14 = vector.broadcast %13 : vector<1x128xf32> to vector<512x128xf32>
      %15 = arith.addf %12, %14 : vector<512x128xf32>
      %16 = arith.truncf %15 : vector<512x128xf32> to vector<512x128xbf16>
      %c0_14 = arith.constant 0 : index
      %c0_15 = arith.constant 0 : index
      %17 = vector.load %arg6[%c0_14, %c0_15] : memref<512x128xbf16, #tpu.memory_space<vmem>>, vector<512x128xbf16>
      tpu.vector_store %arg6[%c0_14, %c0_15], %16 {strides = array<i32>} : memref<512x128xbf16, #tpu.memory_space<vmem>>, vector<512x128xbf16>,
    } else {
    }
    return
  }
  func.func @transform_0(%arg0: i32, %arg1: i32, %arg2: i32) -> (i32, i32) {
    %c0_i32 = arith.constant 0 : i32
    return %arg0, %arg2 : i32, i32
  }
  func.func @transform_1(%arg0: i32, %arg1: i32, %arg2: i32) -> (i32, i32) {
    %c0_i32 = arith.constant 0 : i32
    return %arg2, %arg1 : i32, i32
  }
  func.func @transform_2(%arg0: i32, %arg1: i32, %arg2: i32) -> (i32, i32) {
    %c0_i32 = arith.constant 0 : i32
    %c0_i32_0 = arith.constant 0 : i32
    return %c0_i32, %arg1 : i32, i32
  }
  func.func @transform_3(%arg0: i32, %arg1: i32, %arg2: i32) -> (i32, i32) {
    %c0_i32 = arith.constant 0 : i32
    return %arg0, %arg1 : i32, i32
  }
}

module attributes {stable_mosaic.version = 11 : i64} {
  func.func @_mm_bias_kernel(%arg0: i32, %arg1: i32, %arg2: i32, %arg3: memref<8x8192xbf16, #tpu.memory_space<vmem>>, %arg4: memref<8192x256xbf16, #tpu.memory_space<vmem>>, %arg5: memref<1x256xf32, #tpu.memory_space<vmem>>, %arg6: memref<8x256xf32, #tpu.memory_space<vmem>>, %arg7: memref<8x256xf32, #tpu.memory_space<vmem>>) attributes {dimension_semantics = [#tpu.dimension_semantics<parallel>, #tpu.dimension_semantics<parallel>, #tpu.dimension_semantics<arbitrary>], iteration_bounds = array<i64: 1, 1, 49>, scalar_prefetch = 0 : i64, scratch_operands = 1 : i64, tpu.core_type = #tpu.core_type<tc>, window_params = [{transform_indices = @transform_0, window_bounds = array<i64: 8, 8192>}, {transform_indices = @transform_1, window_bounds = array<i64: 8192, 256>}, {transform_indices = @transform_2, window_bounds = array<i64: 1, 256>}, {transform_indices = @transform_3, window_bounds = array<i64: 8, 256>}]} {
    %c0_i32 = arith.constant 0 : i32
    %0 = arith.cmpi eq, %arg2, %c0_i32 : i32
    %1 = arith.extui %0 : i1 to i32
    %c0_i32_0 = arith.constant 0 : i32
    %2 = arith.cmpi ne, %1, %c0_i32_0 : i32
    scf.if %2 {
      %cst_9 = arith.constant 0.000000e+00 : f32
      %12 = vector.broadcast %cst_9 : f32 to vector<8x256xf32>
      %c0_10 = arith.constant 0 : index
      %c0_11 = arith.constant 0 : index
      %13 = vector.load %arg7[%c0_10, %c0_11] : memref<8x256xf32, #tpu.memory_space<vmem>>, vector<8x256xf32>
      tpu.vector_store %arg7[%c0_10, %c0_11], %12 {strides = array<i32>} : memref<8x256xf32, #tpu.memory_space<vmem>>, vector<8x256xf32>,
    } else {
    }
    %c0 = arith.constant 0 : index
    %c0_1 = arith.constant 0 : index
    %3 = vector.load %arg7[%c0, %c0_1] : memref<8x256xf32, #tpu.memory_space<vmem>>, vector<8x256xf32>
    %c0_2 = arith.constant 0 : index
    %c0_3 = arith.constant 0 : index
    %4 = vector.load %arg3[%c0_2, %c0_3] : memref<8x8192xbf16, #tpu.memory_space<vmem>>, vector<8x8192xbf16>
    %c0_4 = arith.constant 0 : index
    %c0_5 = arith.constant 0 : index
    %5 = vector.load %arg4[%c0_4, %c0_5] : memref<8192x256xbf16, #tpu.memory_space<vmem>>, vector<8192x256xbf16>
    %cst = arith.constant dense<0.000000e+00> : vector<8x256xf32>
    %6 = tpu.matmul %4, %5, %cst {dimension_numbers = #tpu.dot_dimension_numbers<[1], [0], [0], [1], [0, 0, 1, 1], [], []>} : vector<8x8192xbf16>, vector<8192x256xbf16>, vector<8x256xf32> -> vector<8x256xf32>
    %7 = arith.addf %3, %6 : vector<8x256xf32>
    %c0_6 = arith.constant 0 : index
    %c0_7 = arith.constant 0 : index
    %8 = vector.load %arg7[%c0_6, %c0_7] : memref<8x256xf32, #tpu.memory_space<vmem>>, vector<8x256xf32>
    tpu.vector_store %arg7[%c0_6, %c0_7], %7 {strides = array<i32>} : memref<8x256xf32, #tpu.memory_space<vmem>>, vector<8x256xf32>,
    %c48_i32 = arith.constant 48 : i32
    %9 = arith.cmpi eq, %arg2, %c48_i32 : i32
    %10 = arith.extui %9 : i1 to i32
    %c0_i32_8 = arith.constant 0 : i32
    %11 = arith.cmpi ne, %10, %c0_i32_8 : i32
    scf.if %11 {
      %c0_9 = arith.constant 0 : index
      %c0_10 = arith.constant 0 : index
      %12 = vector.load %arg7[%c0_9, %c0_10] : memref<8x256xf32, #tpu.memory_space<vmem>>, vector<8x256xf32>
      %c0_11 = arith.constant 0 : index
      %c0_12 = arith.constant 0 : index
      %13 = vector.load %arg5[%c0_11, %c0_12] : memref<1x256xf32, #tpu.memory_space<vmem>>, vector<1x256xf32>
      %14 = vector.broadcast %13 : vector<1x256xf32> to vector<8x256xf32>
      %15 = arith.addf %12, %14 : vector<8x256xf32>
      %c0_13 = arith.constant 0 : index
      %c0_14 = arith.constant 0 : index
      %16 = vector.load %arg6[%c0_13, %c0_14] : memref<8x256xf32, #tpu.memory_space<vmem>>, vector<8x256xf32>
      tpu.vector_store %arg6[%c0_13, %c0_14], %15 {strides = array<i32>} : memref<8x256xf32, #tpu.memory_space<vmem>>, vector<8x256xf32>,
    } else {
    }
    return
  }
  func.func @transform_0(%arg0: i32, %arg1: i32, %arg2: i32) -> (i32, i32) {
    %c0_i32 = arith.constant 0 : i32
    return %arg0, %arg2 : i32, i32
  }
  func.func @transform_1(%arg0: i32, %arg1: i32, %arg2: i32) -> (i32, i32) {
    %c0_i32 = arith.constant 0 : i32
    return %arg2, %arg1 : i32, i32
  }
  func.func @transform_2(%arg0: i32, %arg1: i32, %arg2: i32) -> (i32, i32) {
    %c0_i32 = arith.constant 0 : i32
    %c0_i32_0 = arith.constant 0 : i32
    return %c0_i32, %arg1 : i32, i32
  }
  func.func @transform_3(%arg0: i32, %arg1: i32, %arg2: i32) -> (i32, i32) {
    %c0_i32 = arith.constant 0 : i32
    return %arg0, %arg1 : i32, i32
  }
}

</mosaic_0001>

<bundles_post_ra>
// kernel: custom_net_forward.3
= control target key start
LH: loop header
LB: loop body
LE: loop exit
PB: predicated region body
PF: predicated region fallthrough
CT: control target
= control target key end

     0   :  { %s7699_s12 = smov 0   ;;  %s7701_s13 = smov 0   ;;  %s8399_s0 = inlined_call_operand.vmem [shape: bf16[26624,32], index: 0, kind: input, shape index: {}]   ;;  %s8400_s1 = inlined_call_operand.vmem [shape: bf16[32,128], index: 1, kind: input, shape index: {}]   ;;  %s8401_s2 = inlined_call_operand.vmem [shape: f32[1,128], index: 2, kind: input, shape index: {}]   ;;  %s8402_s3 = inlined_call_operand.vmem [shape: bf16[26624,128], index: 3, kind: output, shape index: {}]  }
   0x1   :  { %s7703_s14 = smov 0  }
   0x2 LB: > { %s32_s15 = sadd.s32 1, %s7673_s13  ;;  %p5561_p0 = scmp.ge.s32.totalorder %s7677_s14, 1  ;;  %s7677_s14 = sphi %s7703_s14, %s13_s14   ;;  %s7673_s13 = sphi %s7701_s13, %s8404_s13   ;;  %s7669_s12 = sphi %s7699_s12, %s8403_s12  }
   0x3   : > { %p34_p1 = scmp.ge.s32.totalorder %s32_s15, 13  ;;  %p188_p2 = scmp.lt.s32.totalorder %s7677_s14, 14 }
   0x5   : > { %s8406_s15 = smov (%p34_p1, %s32_s15), 0  ;;  %p189_p3 = pnand %p5561_p0, %p188_p2 }
   0x6   : > { %s5562_s18 = sshll.u32 (!%p189_p3), %s7669_s12, 8 }
   0x7   : > { %192 = sbr.rel (%p189_p3) target bundleno = 473 (0x1d9), region = 32  ;;  %p230_p4 = scmp.lt.s32.totalorder (!%p189_p3), %s5562_s18, 3327 }
   0xc   : > { %v7524_v0 = vld [vmem:[%s8400_s1 + $0x8] sm:$0xff]   ;;  %v7525_v1 = vld [vmem:[%s8400_s1] sm:$0xff]   ;;  %s8408_s18 = smov (!%p230_p4, %s5562_s18), 3327  ;;  %vm1688_vm0 = vcmask 261120  }
   0xd   : > { %7236 = vmatprep.subr.bf16.mxu0 %v7524_v0  ;;  %7496 = vmatprep.subr.bf16.mxu1 %v7524_v0  ;;  %s5563_s21 = sshll.u32 %s8408_s18, 2 }
   0xe   : > { %7237 = vmatpush3.bf16.msra.mxu0 %v7524_v0  ;;  %7498 = vmatpush3.bf16.msra.mxu1 %v7524_v0  ;;  %s7731_s24 = scalar_lea.vmem %s8399_s0, %s5563_s21  ;;  %s7953_s29 = scalar_lea.vmem %s8402_s3, %s5563_s21 }
   0xf   : > { %7238 = vmatprep.subr.bf16.mxu0 %v7525_v1  ;;  %7497 = vmatprep.subr.bf16.mxu1 %v7525_v1  ;;  %v7526_v2 = vld [vmem:[%s7731_s24] sm:$0xff]   ;;  %v7528_v4 = vld [vmem:[%s7731_s24 + $0x8] sm:$0xff]   ;;  %v7530_v6 = vld [vmem:[%s7731_s24 + $0x10] sm:$0xff]  }
  0x10   : > { %v7527_v3 = vld [vmem:[%s7731_s24 + $0x200] sm:$0xff]   ;;  %7240 = vmatprep.mubr.msk.bf16.mxu0 %vm1688_vm0, %v7526_v2  ;;  %v7529_v5 = vld [vmem:[%s7731_s24 + $0x208] sm:$0xff]   ;;  %v7531_v7 = vld [vmem:[%s7731_s24 + $0x210] sm:$0xff]  }
  0x11   : > { %7368 = vmatprep.mubr.msk.bf16.mxu1 %vm1688_vm0, %v7527_v3  ;;  %v7532_v8 = vld [vmem:[%s7731_s24 + $0x18] sm:$0xff]   ;;  %v7534_v10 = vld [vmem:[%s7731_s24 + $0x20] sm:$0xff]   ;;  %v7536_v12 = vld [vmem:[%s7731_s24 + $0x28] sm:$0xff]  }
  0x12   : > { %7239 = vmatpush3.bf16.msra.mxu0 %v7525_v1  ;;  %7499 = vmatpush3.bf16.msra.mxu1 %v7525_v1  ;;  %v7533_v9 = vld [vmem:[%s7731_s24 + $0x218] sm:$0xff]   ;;  %v7535_v11 = vld [vmem:[%s7731_s24 + $0x220] sm:$0xff]   ;;  %v7537_v13 = vld [vmem:[%s7731_s24 + $0x228] sm:$0xff]  }
  0x13   : > { %v7538_v14 = vld [vmem:[%s7731_s24 + $0x30] sm:$0xff]   ;;  %v7540_v16 = vld [vmem:[%s7731_s24 + $0x38] sm:$0xff]   ;;  %v7542_v18 = vld [vmem:[%s7731_s24 + $0x40] sm:$0xff]  }
  0x14   : > { %v7539_v15 = vld [vmem:[%s7731_s24 + $0x230] sm:$0xff]   ;;  %v7541_v17 = vld [vmem:[%s7731_s24 + $0x238] sm:$0xff]   ;;  %v7543_v19 = vld [vmem:[%s7731_s24 + $0x240] sm:$0xff]  }
  0x15   : > { %7241 = vmatmul.mubr.msk.bf16.vlgmr.msra.gmra.mxu0 %vm1688_vm0, %v7528_v4  ;;  %7369 = vmatmul.mubr.msk.bf16.vlgmr.msra.gmra.mxu1 %vm1688_vm0, %v7529_v5  ;;  %v7544_v20 = vld [vmem:[%s7731_s24 + $0x48] sm:$0xff]   ;;  %v7546_v22 = vld [vmem:[%s7731_s24 + $0x50] sm:$0xff]   ;;  %v7548_v24 = vld [vmem:[%s7731_s24 + $0x58] sm:$0xff]  }
  0x16   : > { %7244 = vmatprep.mubr.msk.bf16.mxu0 %vm1688_vm0, %v7530_v6  ;;  %7372 = vmatprep.mubr.msk.bf16.mxu1 %vm1688_vm0, %v7531_v7  ;;  %v7545_v21 = vld [vmem:[%s7731_s24 + $0x248] sm:$0xff]   ;;  %v7547_v23 = vld [vmem:[%s7731_s24 + $0x250] sm:$0xff]   ;;  %v7549_v25 = vld [vmem:[%s7731_s24 + $0x258] sm:$0xff]  }
  0x17   : > { %v7550_v26 = vld [vmem:[%s7731_s24 + $0x60] sm:$0xff]   ;;  %v7552_v28 = vld [vmem:[%s7731_s24 + $0x68] sm:$0xff]   ;;  %v7554_v30 = vld [vmem:[%s7731_s24 + $0x70] sm:$0xff]  }
  0x18   : > { %v7551_v27 = vld [vmem:[%s7731_s24 + $0x260] sm:$0xff]   ;;  %v7553_v29 = vld [vmem:[%s7731_s24 + $0x268] sm:$0xff]   ;;  %v7555_v31 = vld [vmem:[%s7731_s24 + $0x270] sm:$0xff]  }
  0x19   : > { %v7556_v32 = vld [vmem:[%s7731_s24 + $0x78] sm:$0xff]   ;;  %v7558_v34 = vld [vmem:[%s7731_s24 + $0x80] sm:$0xff]   ;;  %v7560_v36 = vld [vmem:[%s7731_s24 + $0x88] sm:$0xff]  }
  0x1a   : > { %v7557_v33 = vld [vmem:[%s7731_s24 + $0x278] sm:$0xff]   ;;  %v7559_v35 = vld [vmem:[%s7731_s24 + $0x280] sm:$0xff]   ;;  %v7561_v37 = vld [vmem:[%s7731_s24 + $0x288] sm:$0xff]  }
  0x1b   : > { %v7562_v38 = vld [vmem:[%s7731_s24 + $0x90] sm:$0xff]   ;;  %v7564_v40 = vld [vmem:[%s7731_s24 + $0x98] sm:$0xff]   ;;  %v7566_v42 = vld [vmem:[%s7731_s24 + $0xa0] sm:$0xff]  }
  0x1c   : > { %v7563_v39 = vld [vmem:[%s7731_s24 + $0x290] sm:$0xff]   ;;  %v7565_v41 = vld [vmem:[%s7731_s24 + $0x298] sm:$0xff]   ;;  %v7567_v43 = vld [vmem:[%s7731_s24 + $0x2a0] sm:$0xff]  }
  0x1d   : > { %7245 = vmatmul.mubr.msk.bf16.gmra.mxu0 %vm1688_vm0, %v7532_v8  ;;  %7373 = vmatmul.mubr.msk.bf16.gmra.mxu1 %vm1688_vm0, %v7533_v9  ;;  %v7568_v44 = vld [vmem:[%s7731_s24 + $0xa8] sm:$0xff]   ;;  %v7570_v46 = vld [vmem:[%s7731_s24 + $0xb0] sm:$0xff]   ;;  %v7572_v48 = vld [vmem:[%s7731_s24 + $0xb8] sm:$0xff]  }
  0x1e   : > { %7248 = vmatprep.mubr.msk.bf16.mxu0 %vm1688_vm0, %v7534_v10  ;;  %7376 = vmatprep.mubr.msk.bf16.mxu1 %vm1688_vm0, %v7535_v11  ;;  %v7569_v45 = vld [vmem:[%s7731_s24 + $0x2a8] sm:$0xff]   ;;  %v7571_v47 = vld [vmem:[%s7731_s24 + $0x2b0] sm:$0xff]   ;;  %v7573_v49 = vld [vmem:[%s7731_s24 + $0x2b8] sm:$0xff]  }
  0x1f   : > { %v7574_v50 = vld [vmem:[%s7731_s24 + $0xc0] sm:$0xff]   ;;  %v7576_v52 = vld [vmem:[%s7731_s24 + $0xc8] sm:$0xff]   ;;  %v7578_v54 = vld [vmem:[%s7731_s24 + $0xd0] sm:$0xff]  }
  0x20   : > { %v7575_v51 = vld [vmem:[%s7731_s24 + $0x2c0] sm:$0xff]   ;;  %v7577_v53 = vld [vmem:[%s7731_s24 + $0x2c8] sm:$0xff]   ;;  %v7579_v55 = vld [vmem:[%s7731_s24 + $0x2d0] sm:$0xff]  }
  0x21   : > { %v7580_v56 = vld [vmem:[%s7731_s24 + $0xd8] sm:$0xff]   ;;  %v7582_v58 = vld [vmem:[%s7731_s24 + $0xe0] sm:$0xff]   ;;  %v7584_v60 = vld [vmem:[%s7731_s24 + $0xe8] sm:$0xff]  }
  0x22   : > { %v7581_v57 = vld [vmem:[%s7731_s24 + $0x2d8] sm:$0xff]   ;;  %v7583_v59 = vld [vmem:[%s7731_s24 + $0x2e0] sm:$0xff]   ;;  %v7585_v61 = vld [vmem:[%s7731_s24 + $0x2e8] sm:$0xff]  }
  0x23   : > { %v7586_v62 = vld [vmem:[%s7731_s24 + $0xf0] sm:$0xff]   ;;  %v7588_v0 = vld [vmem:[%s7731_s24 + $0xf8] sm:$0xff]   ;;  %v7590_v2 = vld [vmem:[%s7731_s24 + $0x100] sm:$0xff]  }
  0x24   : > { %v7587_v63 = vld [vmem:[%s7731_s24 + $0x2f0] sm:$0xff]   ;;  %v7589_v1 = vld [vmem:[%s7731_s24 + $0x2f8] sm:$0xff]   ;;  %v7591_v3 = vld [vmem:[%s7731_s24 + $0x300] sm:$0xff]  }
  0x25   : > { %7249 = vmatmul.mubr.msk.bf16.gmra.mxu0 %vm1688_vm0, %v7536_v12  ;;  %7377 = vmatmul.mubr.msk.bf16.gmra.mxu1 %vm1688_vm0, %v7537_v13  ;;  %v7592_v4 = vld [vmem:[%s7731_s24 + $0x108] sm:$0xff]   ;;  %v7594_v6 = vld [vmem:[%s7731_s24 + $0x110] sm:$0xff]   ;;  %v7596_v8 = vld [vmem:[%s7731_s24 + $0x118] sm:$0xff]  }
  0x26   : > { %7252 = vmatprep.mubr.msk.bf16.mxu0 %vm1688_vm0, %v7538_v14  ;;  %7380 = vmatprep.mubr.msk.bf16.mxu1 %vm1688_vm0, %v7539_v15  ;;  %v7593_v5 = vld [vmem:[%s7731_s24 + $0x308] sm:$0xff]   ;;  %v7595_v7 = vld [vmem:[%s7731_s24 + $0x310] sm:$0xff]   ;;  %v7597_v9 = vld [vmem:[%s7731_s24 + $0x318] sm:$0xff]  }
  0x27   : > { %v7598_v10 = vld [vmem:[%s7731_s24 + $0x120] sm:$0xff]   ;;  %v7600_v12 = vld [vmem:[%s7731_s24 + $0x128] sm:$0xff]   ;;  %v7602_v14 = vld [vmem:[%s7731_s24 + $0x130] sm:$0xff]  }
  0x28   : > { %v7599_v11 = vld [vmem:[%s7731_s24 + $0x320] sm:$0xff]   ;;  %v7601_v13 = vld [vmem:[%s7731_s24 + $0x328] sm:$0xff]   ;;  %v7603_v15 = vld [vmem:[%s7731_s24 + $0x330] sm:$0xff]  }
  0x2d   : > { %7253 = vmatmul.mubr.msk.bf16.gmra.mxu0 %vm1688_vm0, %v7540_v16  ;;  %7381 = vmatmul.mubr.msk.bf16.gmra.mxu1 %vm1688_vm0, %v7541_v17  ;;  %v7604_v16 = vld [vmem:[%s7731_s24 + $0x138] sm:$0xff]  }
  0x2e   : > { %7256 = vmatprep.mubr.msk.bf16.mxu0 %vm1688_vm0, %v7542_v18  ;;  %7384 = vmatprep.mubr.msk.bf16.mxu1 %vm1688_vm0, %v7543_v19  ;;  %v7605_v17 = vld [vmem:[%s7731_s24 + $0x338] sm:$0xff]   ;;  %v7606_v18 = vld [vmem:[%s7731_s24 + $0x140] sm:$0xff]  }
  0x2f   : > { %v7607_v19 = vld [vmem:[%s7731_s24 + $0x340] sm:$0xff]  }
  0x35   : > { %7257 = vmatmul.mubr.msk.bf16.gmra.mxu0 %vm1688_vm0, %v7544_v20  ;;  %7385 = vmatmul.mubr.msk.bf16.gmra.mxu1 %vm1688_vm0, %v7545_v21  ;;  %v7608_v20 = vld [vmem:[%s7731_s24 + $0x148] sm:$0xff]  }
  0x36   : > { %7260 = vmatprep.mubr.msk.bf16.mxu0 %vm1688_vm0, %v7546_v22  ;;  %7388 = vmatprep.mubr.msk.bf16.mxu1 %vm1688_vm0, %v7547_v23  ;;  %v7609_v21 = vld [vmem:[%s7731_s24 + $0x348] sm:$0xff]   ;;  %v7610_v22 = vld [vmem:[%s7731_s24 + $0x150] sm:$0xff]  }
  0x37   : > { %v7611_v23 = vld [vmem:[%s7731_s24 + $0x350] sm:$0xff]  }
  0x3d   : > { %7261 = vmatmul.mubr.msk.bf16.gmra.mxu0 %vm1688_vm0, %v7548_v24  ;;  %7389 = vmatmul.mubr.msk.bf16.gmra.mxu1 %vm1688_vm0, %v7549_v25  ;;  %v7612_v24 = vld [vmem:[%s7731_s24 + $0x158] sm:$0xff]  }
  0x3e   : > { %7264 = vmatprep.mubr.msk.bf16.mxu0 %vm1688_vm0, %v7550_v26  ;;  %7392 = vmatprep.mubr.msk.bf16.mxu1 %vm1688_vm0, %v7551_v27  ;;  %v7613_v25 = vld [vmem:[%s7731_s24 + $0x358] sm:$0xff]   ;;  %v7614_v26 = vld [vmem:[%s7731_s24 + $0x160] sm:$0xff]  }
  0x3f   : > { %v7615_v27 = vld [vmem:[%s7731_s24 + $0x360] sm:$0xff]  }
  0x45   : > { %7265 = vmatmul.mubr.msk.bf16.gmra.mxu0 %vm1688_vm0, %v7552_v28  ;;  %7393 = vmatmul.mubr.msk.bf16.gmra.mxu1 %vm1688_vm0, %v7553_v29  ;;  %v7616_v28 = vld [vmem:[%s7731_s24 + $0x168] sm:$0xff]  }
  0x46   : > { %7268 = vmatprep.mubr.msk.bf16.mxu0 %vm1688_vm0, %v7554_v30  ;;  %7396 = vmatprep.mubr.msk.bf16.mxu1 %vm1688_vm0, %v7555_v31  ;;  %v7617_v29 = vld [vmem:[%s7731_s24 + $0x368] sm:$0xff]   ;;  %v7618_v30 = vld [vmem:[%s7731_s24 + $0x170] sm:$0xff]  }
  0x47   : > { %v7619_v31 = vld [vmem:[%s7731_s24 + $0x370] sm:$0xff]  }
  0x4d   : > { %7269 = vmatmul.mubr.msk.bf16.gmra.mxu0 %vm1688_vm0, %v7556_v32  ;;  %7397 = vmatmul.mubr.msk.bf16.gmra.mxu1 %vm1688_vm0, %v7557_v33  ;;  %v7620_v32 = vld [vmem:[%s7731_s24 + $0x178] sm:$0xff]  }
  0x4e   : > { %7272 = vmatprep.mubr.msk.bf16.mxu0 %vm1688_vm0, %v7558_v34  ;;  %7400 = vmatprep.mubr.msk.bf16.mxu1 %vm1688_vm0, %v7559_v35  ;;  %v7621_v33 = vld [vmem:[%s7731_s24 + $0x378] sm:$0xff]   ;;  %v7622_v34 = vld [vmem:[%s7731_s24 + $0x180] sm:$0xff]  }
  0x4f   : > { %v7623_v35 = vld [vmem:[%s7731_s24 + $0x380] sm:$0xff]  }
  0x55   : > { %7273 = vmatmul.mubr.msk.bf16.gmra.mxu0 %vm1688_vm0, %v7560_v36  ;;  %7401 = vmatmul.mubr.msk.bf16.gmra.mxu1 %vm1688_vm0, %v7561_v37  ;;  %v7624_v36 = vld [vmem:[%s7731_s24 + $0x188] sm:$0xff]  }
  0x56   : > { %7276 = vmatprep.mubr.msk.bf16.mxu0 %vm1688_vm0, %v7562_v38  ;;  %7404 = vmatprep.mubr.msk.bf16.mxu1 %vm1688_vm0, %v7563_v39  ;;  %v7625_v37 = vld [vmem:[%s7731_s24 + $0x388] sm:$0xff]   ;;  %v7626_v38 = vld [vmem:[%s7731_s24 + $0x190] sm:$0xff]  }
  0x57   : > { %v7627_v39 = vld [vmem:[%s7731_s24 + $0x390] sm:$0xff]  }
  0x5d   : > { %7277 = vmatmul.mubr.msk.bf16.gmra.mxu0 %vm1688_vm0, %v7564_v40  ;;  %7405 = vmatmul.mubr.msk.bf16.gmra.mxu1 %vm1688_vm0, %v7565_v41 }
  0x5e   : > { %7280 = vmatprep.mubr.msk.bf16.mxu0 %vm1688_vm0, %v7566_v42  ;;  %7408 = vmatprep.mubr.msk.bf16.mxu1 %vm1688_vm0, %v7567_v43  ;;  %v7939_v42 = vld [vmem:[%s8401_s2] ss:$0 sm:$0xff] }
  0x65   : > { %7281 = vmatmul.mubr.msk.bf16.gmra.mxu0 %vm1688_vm0, %v7568_v44  ;;  %7409 = vmatmul.mubr.msk.bf16.gmra.mxu1 %vm1688_vm0, %v7569_v45 }
  0x66   : > { %7284 = vmatprep.mubr.msk.bf16.mxu0 %vm1688_vm0, %v7570_v46  ;;  %7412 = vmatprep.mubr.msk.bf16.mxu1 %vm1688_vm0, %v7571_v47  ;;  %v7628_v46 = vld [vmem:[%s7731_s24 + $0x198] sm:$0xff]  }
  0x6d   : > { %7285 = vmatmul.mubr.msk.bf16.gmra.mxu0 %vm1688_vm0, %v7572_v48  ;;  %7413 = vmatmul.mubr.msk.bf16.gmra.mxu1 %vm1688_vm0, %v7573_v49 }
  0x6e   : > { %7288 = vmatprep.mubr.msk.bf16.mxu0 %vm1688_vm0, %v7574_v50  ;;  %7416 = vmatprep.mubr.msk.bf16.mxu1 %vm1688_vm0, %v7575_v51  ;;  %v7629_v50 = vld [vmem:[%s7731_s24 + $0x398] sm:$0xff]   ;;  %v7630_v51 = vld [vmem:[%s7731_s24 + $0x1a0] sm:$0xff]  }
  0x75   : > { %7289 = vmatmul.mubr.msk.bf16.gmra.mxu0 %vm1688_vm0, %v7576_v52  ;;  %7417 = vmatmul.mubr.msk.bf16.gmra.mxu1 %vm1688_vm0, %v7577_v53 }
  0x76   : > { %7292 = vmatprep.mubr.msk.bf16.mxu0 %vm1688_vm0, %v7578_v54  ;;  %7420 = vmatprep.mubr.msk.bf16.mxu1 %vm1688_vm0, %v7579_v55  ;;  %v7631_v55 = vld [vmem:[%s7731_s24 + $0x3a0] sm:$0xff]  }
  0x7d   : > { %7293 = vmatmul.mubr.msk.bf16.gmra.mxu0 %vm1688_vm0, %v7580_v56  ;;  %7421 = vmatmul.mubr.msk.bf16.gmra.mxu1 %vm1688_vm0, %v7581_v57 }
  0x7e   : > { %7296 = vmatprep.mubr.msk.bf16.mxu0 %vm1688_vm0, %v7582_v58  ;;  %7424 = vmatprep.mubr.msk.bf16.mxu1 %vm1688_vm0, %v7583_v59 }
  0x85   : > { %7297 = vmatmul.mubr.msk.bf16.gmra.mxu0 %vm1688_vm0, %v7584_v60  ;;  %7425 = vmatmul.mubr.msk.bf16.gmra.mxu1 %vm1688_vm0, %v7585_v61 }
  0x86   : > { %7300 = vmatprep.mubr.msk.bf16.mxu0 %vm1688_vm0, %v7586_v62  ;;  %7428 = vmatprep.mubr.msk.bf16.mxu1 %vm1688_vm0, %v7587_v63 }
  0x8d   : > { %7301 = vmatmul.mubr.msk.bf16.gmra.mxu0 %vm1688_vm0, %v7588_v0  ;;  %7429 = vmatmul.mubr.msk.bf16.gmra.mxu1 %vm1688_vm0, %v7589_v1 }
  0x8e   : > { %7304 = vmatprep.mubr.msk.bf16.mxu0 %vm1688_vm0, %v7590_v2  ;;  %7432 = vmatprep.mubr.msk.bf16.mxu1 %vm1688_vm0, %v7591_v3 }
  0x95   : > { %7305 = vmatmul.mubr.msk.bf16.gmra.mxu0 %vm1688_vm0, %v7592_v4  ;;  %7433 = vmatmul.mubr.msk.bf16.gmra.mxu1 %vm1688_vm0, %v7593_v5 }
  0x96   : > { %7308 = vmatprep.mubr.msk.bf16.mxu0 %vm1688_vm0, %v7594_v6  ;;  %7436 = vmatprep.mubr.msk.bf16.mxu1 %vm1688_vm0, %v7595_v7  ;;  %v7632_v6 = vld [vmem:[%s7731_s24 + $0x1a8] sm:$0xff]  }
  0x9d   : > { %7309 = vmatmul.mubr.msk.bf16.gmra.mxu0 %vm1688_vm0, %v7596_v8  ;;  %7437 = vmatmul.mubr.msk.bf16.gmra.mxu1 %vm1688_vm0, %v7597_v9 }
  0x9e   : > { %7312 = vmatprep.mubr.msk.bf16.mxu0 %vm1688_vm0, %v7598_v10  ;;  %7440 = vmatprep.mubr.msk.bf16.mxu1 %vm1688_vm0, %v7599_v11  ;;  %v7633_v10 = vld [vmem:[%s7731_s24 + $0x3a8] sm:$0xff]   ;;  %v7634_v11 = vld [vmem:[%s7731_s24 + $0x1b0] sm:$0xff]  }
  0xa5   : > { %7313 = vmatmul.mubr.msk.bf16.gmra.mxu0 %vm1688_vm0, %v7600_v12  ;;  %7441 = vmatmul.mubr.msk.bf16.gmra.mxu1 %vm1688_vm0, %v7601_v13 }
  0xa6   : > { %7316 = vmatprep.mubr.msk.bf16.mxu0 %vm1688_vm0, %v7602_v14  ;;  %7444 = vmatprep.mubr.msk.bf16.mxu1 %vm1688_vm0, %v7603_v15  ;;  %v7635_v15 = vld [vmem:[%s7731_s24 + $0x3b0] sm:$0xff]  }
  0xad   : > { %7317 = vmatmul.mubr.msk.bf16.gmra.mxu0 %vm1688_vm0, %v7604_v16  ;;  %7445 = vmatmul.mubr.msk.bf16.gmra.mxu1 %vm1688_vm0, %v7605_v17 }
  0xae   : > { %7320 = vmatprep.mubr.msk.bf16.mxu0 %vm1688_vm0, %v7606_v18  ;;  %7448 = vmatprep.mubr.msk.bf16.mxu1 %vm1688_vm0, %v7607_v19 }
  0xb5   : > { %7321 = vmatmul.mubr.msk.bf16.gmra.mxu0 %vm1688_vm0, %v7608_v20  ;;  %7449 = vmatmul.mubr.msk.bf16.gmra.mxu1 %vm1688_vm0, %v7609_v21 }
  0xb6   : > { %7324 = vmatprep.mubr.msk.bf16.mxu0 %vm1688_vm0, %v7610_v22  ;;  %7452 = vmatprep.mubr.msk.bf16.mxu1 %vm1688_vm0, %v7611_v23 }
  0xbd   : > { %7325 = vmatmul.mubr.msk.bf16.gmra.mxu0 %vm1688_vm0, %v7612_v24  ;;  %7453 = vmatmul.mubr.msk.bf16.gmra.mxu1 %vm1688_vm0, %v7613_v25 }
  0xbe   : > { %7328 = vmatprep.mubr.msk.bf16.mxu0 %vm1688_vm0, %v7614_v26  ;;  %7456 = vmatprep.mubr.msk.bf16.mxu1 %vm1688_vm0, %v7615_v27 }
  0xc5   : > { %7329 = vmatmul.mubr.msk.bf16.gmra.mxu0 %vm1688_vm0, %v7616_v28  ;;  %7457 = vmatmul.mubr.msk.bf16.gmra.mxu1 %vm1688_vm0, %v7617_v29 }
  0xc6   : > { %7332 = vmatprep.mubr.msk.bf16.mxu0 %vm1688_vm0, %v7618_v30  ;;  %7460 = vmatprep.mubr.msk.bf16.mxu1 %vm1688_vm0, %v7619_v31  ;;  %v7636_v30 = vld [vmem:[%s7731_s24 + $0x1b8] sm:$0xff]  }
  0xcd   : > { %7333 = vmatmul.mubr.msk.bf16.gmra.mxu0 %vm1688_vm0, %v7620_v32  ;;  %7461 = vmatmul.mubr.msk.bf16.gmra.mxu1 %vm1688_vm0, %v7621_v33 }
  0xce   : > { %7336 = vmatprep.mubr.msk.bf16.mxu0 %vm1688_vm0, %v7622_v34  ;;  %7464 = vmatprep.mubr.msk.bf16.mxu1 %vm1688_vm0, %v7623_v35  ;;  %v7637_v34 = vld [vmem:[%s7731_s24 + $0x3b8] sm:$0xff]   ;;  %v7638_v35 = vld [vmem:[%s7731_s24 + $0x1c0] sm:$0xff]  }
  0xd5   : > { %v7242_v40 = vpop.f32.mrf.mxu0  ;;  %7337 = vmatmul.mubr.msk.bf16.gmra.mxu0 %vm1688_vm0, %v7624_v36  ;;  %v7370_v41 = vpop.f32.mrf.mxu1  ;;  %7465 = vmatmul.mubr.msk.bf16.gmra.mxu1 %vm1688_vm0, %v7625_v37 }
  0xd6   : > { %7340 = vmatprep.mubr.msk.bf16.mxu0 %vm1688_vm0, %v7626_v38  ;;  %7468 = vmatprep.mubr.msk.bf16.mxu1 %vm1688_vm0, %v7627_v39  ;;  %v3910_v47 = vadd.f32 %v7242_v40, %v7939_v42  ;;  %v4038_v52 = vadd.f32 %v7370_v41, %v7939_v42  ;;  %v7639_v39 = vld [vmem:[%s7731_s24 + $0x3c0] sm:$0xff]  }
  0xd7   : > { %v2107_v43 = vpop.f32.mrf.mxu0  ;;  %v2619_v44 = vpop.f32.mrf.mxu1 }
  0xd8   : > { %v3908_v56 = vadd.f32 %v7939_v42, %v2107_v43  ;;  %v4036_v60 = vadd.f32 %v7939_v42, %v2619_v44 }
  0xd9   : > { %v7243_v45 = vpop.f32.mrf.mxu0  ;;  %v7371_v49 = vpop.f32.mrf.mxu1 }
  0xda   : > { %v3911_v48 = vadd.f32 %v7243_v45, %v7939_v42  ;;  %v4039_v53 = vadd.f32 %v7371_v49, %v7939_v42 }
  0xdb   : > { %v2110_v54 = vpop.f32.mrf.mxu0  ;;  %v2622_v59 = vpop.f32.mrf.mxu1 }
  0xdc   : > { %v6347_v57 = vpack.c.bf16 %v3911_v48, %v3910_v47  ;;  %v3909_v58 = vadd.f32 %v7939_v42, %v2110_v54  ;;  %v6667_v61 = vpack.c.bf16 %v4039_v53, %v4038_v52  ;;  %v4037_v62 = vadd.f32 %v7939_v42, %v2622_v59  ;;  %v7641_v59 = vld [vmem:[%s7731_s24 + $0x3c8] sm:$0xff]  }
  0xdd   : > { %v7246_v63 = vpop.f32.mrf.mxu0  ;;  %7341 = vmatmul.mubr.msk.bf16.gmra.mxu0 %vm1688_vm0, %v7628_v46  ;;  %v7374_v1 = vpop.f32.mrf.mxu1  ;;  %7469 = vmatmul.mubr.msk.bf16.gmra.mxu1 %vm1688_vm0, %v7629_v50 }
  0xde   : > { %6979 = vst [vmem:[%s7953_s29 + $0x8] sm:$0xff] %v6347_v57   ;;  %v6342_v0 = vpack.c.bf16 %v3909_v58, %v3908_v56  ;;  %7344 = vmatprep.mubr.msk.bf16.mxu0 %vm1688_vm0, %v7630_v51  ;;  %7043 = vst [vmem:[%s7953_s29 + $0x208] sm:$0xff] %v6667_v61   ;;  %v6662_v2 = vpack.c.bf16 %v4037_v62, %v4036_v60  ;;  %7472 = vmatprep.mubr.msk.bf16.mxu1 %vm1688_vm0, %v7631_v55  ;;  %v7640_v55 = vld [vmem:[%s7731_s24 + $0x1c8] sm:$0xff]   ;;  %v7642_v60 = vld [vmem:[%s7731_s24 + $0x1d0] sm:$0xff]  }
  0xdf   : > { %v2123_v3 = vpop.f32.mrf.mxu0  ;;  %v2635_v4 = vpop.f32.mrf.mxu1  ;;  %v3914_v7 = vadd.f32 %v7246_v63, %v7939_v42  ;;  %v4042_v12 = vadd.f32 %v7374_v1, %v7939_v42 }
  0xe0   : > { %6343 = vst [vmem:[%s7953_s29] sm:$0xff] %v6342_v0   ;;  %7042 = vst [vmem:[%s7953_s29 + $0x200] sm:$0xff] %v6662_v2   ;;  %v3912_v16 = vadd.f32 %v7939_v42, %v2123_v3  ;;  %v4040_v20 = vadd.f32 %v7939_v42, %v2635_v4  ;;  %v7643_v0 = vld [vmem:[%s7731_s24 + $0x3d0] sm:$0xff]  }
  0xe1   : > { %v7247_v5 = vpop.f32.mrf.mxu0  ;;  %v7375_v9 = vpop.f32.mrf.mxu1 }
  0xe2   : > { %v3915_v8 = vadd.f32 %v7247_v5, %v7939_v42  ;;  %v4043_v13 = vadd.f32 %v7375_v9, %v7939_v42 }
  0xe3   : > { %v2126_v14 = vpop.f32.mrf.mxu0  ;;  %v2638_v19 = vpop.f32.mrf.mxu1 }
  0xe4   : > { %v6357_v17 = vpack.c.bf16 %v3915_v8, %v3914_v7  ;;  %v3913_v18 = vadd.f32 %v7939_v42, %v2126_v14  ;;  %v6677_v21 = vpack.c.bf16 %v4043_v13, %v4042_v12  ;;  %v4041_v22 = vadd.f32 %v7939_v42, %v2638_v19  ;;  %v7645_v19 = vld [vmem:[%s7731_s24 + $0x3d8] sm:$0xff]  }
  0xe5   : > { %v7250_v23 = vpop.f32.mrf.mxu0  ;;  %7345 = vmatmul.mubr.msk.bf16.gmra.mxu0 %vm1688_vm0, %v7632_v6  ;;  %v7378_v25 = vpop.f32.mrf.mxu1  ;;  %7473 = vmatmul.mubr.msk.bf16.gmra.mxu1 %vm1688_vm0, %v7633_v10 }
  0xe6   : > { %6981 = vst [vmem:[%s7953_s29 + $0x18] sm:$0xff] %v6357_v17   ;;  %v6352_v24 = vpack.c.bf16 %v3913_v18, %v3912_v16  ;;  %7348 = vmatprep.mubr.msk.bf16.mxu0 %vm1688_vm0, %v7634_v11  ;;  %7045 = vst [vmem:[%s7953_s29 + $0x218] sm:$0xff] %v6677_v21   ;;  %v6672_v26 = vpack.c.bf16 %v4041_v22, %v4040_v20  ;;  %7476 = vmatprep.mubr.msk.bf16.mxu1 %vm1688_vm0, %v7635_v15  ;;  %v7644_v15 = vld [vmem:[%s7731_s24 + $0x1d8] sm:$0xff]   ;;  %v7646_v20 = vld [vmem:[%s7731_s24 + $0x1e0] sm:$0xff]  }
  0xe7   : > { %v2139_v27 = vpop.f32.mrf.mxu0  ;;  %v2651_v28 = vpop.f32.mrf.mxu1  ;;  %v3918_v31 = vadd.f32 %v7250_v23, %v7939_v42  ;;  %v4046_v36 = vadd.f32 %v7378_v25, %v7939_v42 }
  0xe8   : > { %6980 = vst [vmem:[%s7953_s29 + $0x10] sm:$0xff] %v6352_v24   ;;  %7044 = vst [vmem:[%s7953_s29 + $0x210] sm:$0xff] %v6672_v26   ;;  %v3916_v40 = vadd.f32 %v7939_v42, %v2139_v27  ;;  %v4044_v45 = vadd.f32 %v7939_v42, %v2651_v28  ;;  %v7647_v24 = vld [vmem:[%s7731_s24 + $0x3e0] sm:$0xff]  }
  0xe9   : > { %v7251_v29 = vpop.f32.mrf.mxu0  ;;  %v7379_v33 = vpop.f32.mrf.mxu1 }
  0xea   : > { %v3919_v32 = vadd.f32 %v7251_v29, %v7939_v42  ;;  %v4047_v37 = vadd.f32 %v7379_v33, %v7939_v42 }
  0xeb   : > { %v2142_v38 = vpop.f32.mrf.mxu0  ;;  %v2654_v44 = vpop.f32.mrf.mxu1 }
  0xec   : > { %v6367_v41 = vpack.c.bf16 %v3919_v32, %v3918_v31  ;;  %v3917_v43 = vadd.f32 %v7939_v42, %v2142_v38  ;;  %v6687_v46 = vpack.c.bf16 %v4047_v37, %v4046_v36  ;;  %v4045_v47 = vadd.f32 %v7939_v42, %v2654_v44  ;;  %v7649_v44 = vld [vmem:[%s7731_s24 + $0x3e8] sm:$0xff]  }
  0xed   : > { %v7254_v48 = vpop.f32.mrf.mxu0  ;;  %7349 = vmatmul.mubr.msk.bf16.gmra.mxu0 %vm1688_vm0, %v7636_v30  ;;  %v7382_v50 = vpop.f32.mrf.mxu1  ;;  %7477 = vmatmul.mubr.msk.bf16.gmra.mxu1 %vm1688_vm0, %v7637_v34 }
  0xee   : > { %6983 = vst [vmem:[%s7953_s29 + $0x28] sm:$0xff] %v6367_v41   ;;  %v6362_v49 = vpack.c.bf16 %v3917_v43, %v3916_v40  ;;  %7352 = vmatprep.mubr.msk.bf16.mxu0 %vm1688_vm0, %v7638_v35  ;;  %7047 = vst [vmem:[%s7953_s29 + $0x228] sm:$0xff] %v6687_v46   ;;  %v6682_v51 = vpack.c.bf16 %v4045_v47, %v4044_v45  ;;  %7480 = vmatprep.mubr.msk.bf16.mxu1 %vm1688_vm0, %v7639_v39  ;;  %v7648_v39 = vld [vmem:[%s7731_s24 + $0x1e8] sm:$0xff]   ;;  %v7650_v45 = vld [vmem:[%s7731_s24 + $0x1f0] sm:$0xff]  }
  0xef   : > { %v2155_v52 = vpop.f32.mrf.mxu0  ;;  %v2667_v53 = vpop.f32.mrf.mxu1  ;;  %v3922_v56 = vadd.f32 %v7254_v48, %v7939_v42  ;;  %v4050_v61 = vadd.f32 %v7382_v50, %v7939_v42 }
  0xf0   : > { %6982 = vst [vmem:[%s7953_s29 + $0x20] sm:$0xff] %v6362_v49   ;;  %7046 = vst [vmem:[%s7953_s29 + $0x220] sm:$0xff] %v6682_v51   ;;  %v3920_v1 = vadd.f32 %v7939_v42, %v2155_v52  ;;  %v4048_v5 = vadd.f32 %v7939_v42, %v2667_v53  ;;  %v7651_v49 = vld [vmem:[%s7731_s24 + $0x3f0] sm:$0xff]  }
  0xf1   : > { %v7255_v54 = vpop.f32.mrf.mxu0  ;;  %v7383_v58 = vpop.f32.mrf.mxu1 }
  0xf2   : > { %v3923_v57 = vadd.f32 %v7255_v54, %v7939_v42  ;;  %v4051_v62 = vadd.f32 %v7383_v58, %v7939_v42 }
  0xf3   : > { %v2158_v63 = vpop.f32.mrf.mxu0  ;;  %v2670_v4 = vpop.f32.mrf.mxu1 }
  0xf4   : > { %v6377_v2 = vpack.c.bf16 %v3923_v57, %v3922_v56  ;;  %v3921_v3 = vadd.f32 %v7939_v42, %v2158_v63  ;;  %v6697_v6 = vpack.c.bf16 %v4051_v62, %v4050_v61  ;;  %v4049_v7 = vadd.f32 %v7939_v42, %v2670_v4  ;;  %v7653_v4 = vld [vmem:[%s7731_s24 + $0x3f8] sm:$0xff]  }
  0xf5   : > { %v7258_v8 = vpop.f32.mrf.mxu0  ;;  %7353 = vmatmul.mubr.msk.bf16.gmra.mxu0 %vm1688_vm0, %v7640_v55  ;;  %v7386_v10 = vpop.f32.mrf.mxu1  ;;  %7481 = vmatmul.mubr.msk.bf16.gmra.mxu1 %vm1688_vm0, %v7641_v59 }
  0xf6   : > { %6985 = vst [vmem:[%s7953_s29 + $0x38] sm:$0xff] %v6377_v2   ;;  %v6372_v9 = vpack.c.bf16 %v3921_v3, %v3920_v1  ;;  %7356 = vmatprep.mubr.msk.bf16.mxu0 %vm1688_vm0, %v7642_v60  ;;  %7049 = vst [vmem:[%s7953_s29 + $0x238] sm:$0xff] %v6697_v6   ;;  %v6692_v11 = vpack.c.bf16 %v4049_v7, %v4048_v5  ;;  %7484 = vmatprep.mubr.msk.bf16.mxu1 %vm1688_vm0, %v7643_v0  ;;  %v7652_v0 = vld [vmem:[%s7731_s24 + $0x1f8] sm:$0xff]  }
  0xf7   : > { %v2171_v12 = vpop.f32.mrf.mxu0  ;;  %v2683_v13 = vpop.f32.mrf.mxu1  ;;  %v3926_v16 = vadd.f32 %v7258_v8, %v7939_v42  ;;  %v4054_v21 = vadd.f32 %v7386_v10, %v7939_v42 }
  0xf8   : > { %6984 = vst [vmem:[%s7953_s29 + $0x30] sm:$0xff] %v6372_v9   ;;  %7048 = vst [vmem:[%s7953_s29 + $0x230] sm:$0xff] %v6692_v11   ;;  %v3924_v25 = vadd.f32 %v7939_v42, %v2171_v12  ;;  %v4052_v29 = vadd.f32 %v7939_v42, %v2683_v13 }
  0xf9   : > { %v7259_v14 = vpop.f32.mrf.mxu0  ;;  %v7387_v18 = vpop.f32.mrf.mxu1 }
  0xfa   : > { %v3927_v17 = vadd.f32 %v7259_v14, %v7939_v42  ;;  %v4055_v22 = vadd.f32 %v7387_v18, %v7939_v42 }
  0xfb   : > { %v2174_v23 = vpop.f32.mrf.mxu0  ;;  %v2686_v28 = vpop.f32.mrf.mxu1 }
  0xfc   : > { %v6387_v26 = vpack.c.bf16 %v3927_v17, %v3926_v16  ;;  %v3925_v27 = vadd.f32 %v7939_v42, %v2174_v23  ;;  %v6707_v30 = vpack.c.bf16 %v4055_v22, %v4054_v21  ;;  %v4053_v31 = vadd.f32 %v7939_v42, %v2686_v28 }
  0xfd   : > { %v7262_v32 = vpop.f32.mrf.mxu0  ;;  %7357 = vmatmul.mubr.msk.bf16.gmra.mxu0 %vm1688_vm0, %v7644_v15  ;;  %v7390_v34 = vpop.f32.mrf.mxu1  ;;  %7485 = vmatmul.mubr.msk.bf16.gmra.mxu1 %vm1688_vm0, %v7645_v19 }
  0xfe   : > { %6987 = vst [vmem:[%s7953_s29 + $0x48] sm:$0xff] %v6387_v26   ;;  %v6382_v33 = vpack.c.bf16 %v3925_v27, %v3924_v25  ;;  %7360 = vmatprep.mubr.msk.bf16.mxu0 %vm1688_vm0, %v7646_v20  ;;  %7051 = vst [vmem:[%s7953_s29 + $0x248] sm:$0xff] %v6707_v30   ;;  %v6702_v35 = vpack.c.bf16 %v4053_v31, %v4052_v29  ;;  %7488 = vmatprep.mubr.msk.bf16.mxu1 %vm1688_vm0, %v7647_v24 }
  0xff   : > { %v2187_v36 = vpop.f32.mrf.mxu0  ;;  %v2699_v37 = vpop.f32.mrf.mxu1  ;;  %v3930_v40 = vadd.f32 %v7262_v32, %v7939_v42  ;;  %v4058_v46 = vadd.f32 %v7390_v34, %v7939_v42 }
 0x100   : > { %6986 = vst [vmem:[%s7953_s29 + $0x40] sm:$0xff] %v6382_v33   ;;  %7050 = vst [vmem:[%s7953_s29 + $0x240] sm:$0xff] %v6702_v35   ;;  %v3928_v50 = vadd.f32 %v7939_v42, %v2187_v36  ;;  %v4056_v54 = vadd.f32 %v7939_v42, %v2699_v37 }
 0x101   : > { %v7263_v38 = vpop.f32.mrf.mxu0  ;;  %v7391_v43 = vpop.f32.mrf.mxu1 }
 0x102   : > { %v3931_v41 = vadd.f32 %v7263_v38, %v7939_v42  ;;  %v4059_v47 = vadd.f32 %v7391_v43, %v7939_v42 }
 0x103   : > { %v2190_v48 = vpop.f32.mrf.mxu0  ;;  %v2702_v53 = vpop.f32.mrf.mxu1 }
 0x104   : > { %v6397_v51 = vpack.c.bf16 %v3931_v41, %v3930_v40  ;;  %v3929_v52 = vadd.f32 %v7939_v42, %v2190_v48  ;;  %v6717_v55 = vpack.c.bf16 %v4059_v47, %v4058_v46  ;;  %v4057_v56 = vadd.f32 %v7939_v42, %v2702_v53 }
 0x105   : > { %v7266_v57 = vpop.f32.mrf.mxu0  ;;  %7361 = vmatmul.mubr.msk.bf16.gmra.mxu0 %vm1688_vm0, %v7648_v39  ;;  %v7394_v59 = vpop.f32.mrf.mxu1  ;;  %7489 = vmatmul.mubr.msk.bf16.gmra.mxu1 %vm1688_vm0, %v7649_v44 }
 0x106   : > { %6989 = vst [vmem:[%s7953_s29 + $0x58] sm:$0xff] %v6397_v51   ;;  %v6392_v58 = vpack.c.bf16 %v3929_v52, %v3928_v50  ;;  %7364 = vmatprep.mubr.msk.bf16.mxu0 %vm1688_vm0, %v7650_v45  ;;  %7053 = vst [vmem:[%s7953_s29 + $0x258] sm:$0xff] %v6717_v55   ;;  %v6712_v60 = vpack.c.bf16 %v4057_v56, %v4056_v54  ;;  %7492 = vmatprep.mubr.msk.bf16.mxu1 %vm1688_vm0, %v7651_v49 }
 0x107   : > { %v2203_v61 = vpop.f32.mrf.mxu0  ;;  %v2715_v62 = vpop.f32.mrf.mxu1  ;;  %v3934_v1 = vadd.f32 %v7266_v57, %v7939_v42  ;;  %v4062_v5 = vadd.f32 %v7394_v59, %v7939_v42 }
 0x108   : > { %6988 = vst [vmem:[%s7953_s29 + $0x50] sm:$0xff] %v6392_v58   ;;  %7052 = vst [vmem:[%s7953_s29 + $0x250] sm:$0xff] %v6712_v60   ;;  %v3932_v8 = vadd.f32 %v7939_v42, %v2203_v61  ;;  %v4060_v12 = vadd.f32 %v7939_v42, %v2715_v62 }
 0x109   : > { %v7267_v63 = vpop.f32.mrf.mxu0  ;;  %v7395_v3 = vpop.f32.mrf.mxu1 }
 0x10a   : > { %v3935_v2 = vadd.f32 %v7267_v63, %v7939_v42  ;;  %v4063_v6 = vadd.f32 %v7395_v3, %v7939_v42 }
 0x10b   : > { %v2206_v7 = vpop.f32.mrf.mxu0  ;;  %v2718_v11 = vpop.f32.mrf.mxu1 }
 0x10c   : > { %v6407_v9 = vpack.c.bf16 %v3935_v2, %v3934_v1  ;;  %v3933_v10 = vadd.f32 %v7939_v42, %v2206_v7  ;;  %v6727_v13 = vpack.c.bf16 %v4063_v6, %v4062_v5  ;;  %v4061_v14 = vadd.f32 %v7939_v42, %v2718_v11 }
 0x10d   : > { %v7270_v15 = vpop.f32.mrf.mxu0  ;;  %7365 = vmatmul.mubr.msk.bf16.gmra.mxu0 %vm1688_vm0, %v7652_v0  ;;  %v7398_v17 = vpop.f32.mrf.mxu1  ;;  %7493 = vmatmul.mubr.msk.bf16.gmra.mxu1 %vm1688_vm0, %v7653_v4 }
 0x10e   : > { %6991 = vst [vmem:[%s7953_s29 + $0x68] sm:$0xff] %v6407_v9   ;;  %v6402_v16 = vpack.c.bf16 %v3933_v10, %v3932_v8  ;;  %7055 = vst [vmem:[%s7953_s29 + $0x268] sm:$0xff] %v6727_v13   ;;  %v6722_v18 = vpack.c.bf16 %v4061_v14, %v4060_v12  ;;  %v3938_v22 = vadd.f32 %v7270_v15, %v7939_v42 }
 0x10f   : > { %v2219_v19 = vpop.f32.mrf.mxu0  ;;  %v2731_v20 = vpop.f32.mrf.mxu1  ;;  %v4066_v25 = vadd.f32 %v7398_v17, %v7939_v42 }
 0x110   : > { %6990 = vst [vmem:[%s7953_s29 + $0x60] sm:$0xff] %v6402_v16   ;;  %7054 = vst [vmem:[%s7953_s29 + $0x260] sm:$0xff] %v6722_v18   ;;  %v3936_v28 = vadd.f32 %v7939_v42, %v2219_v19  ;;  %v4064_v32 = vadd.f32 %v7939_v42, %v2731_v20 }
 0x111   : > { %v7271_v21 = vpop.f32.mrf.mxu0  ;;  %v7399_v24 = vpop.f32.mrf.mxu1 }
 0x112   : > { %v3939_v23 = vadd.f32 %v7271_v21, %v7939_v42  ;;  %v4067_v26 = vadd.f32 %v7399_v24, %v7939_v42 }
 0x113   : > { %v2222_v27 = vpop.f32.mrf.mxu0  ;;  %v2734_v31 = vpop.f32.mrf.mxu1 }
 0x114   : > { %v6417_v29 = vpack.c.bf16 %v3939_v23, %v3938_v22  ;;  %v3937_v30 = vadd.f32 %v7939_v42, %v2222_v27  ;;  %v6737_v33 = vpack.c.bf16 %v4067_v26, %v4066_v25  ;;  %v4065_v34 = vadd.f32 %v7939_v42, %v2734_v31 }
 0x115   : > { %v7274_v35 = vpop.f32.mrf.mxu0  ;;  %v7402_v37 = vpop.f32.mrf.mxu1 }
 0x116   : > { %6993 = vst [vmem:[%s7953_s29 + $0x78] sm:$0xff] %v6417_v29   ;;  %v6412_v36 = vpack.c.bf16 %v3937_v30, %v3936_v28  ;;  %7057 = vst [vmem:[%s7953_s29 + $0x278] sm:$0xff] %v6737_v33   ;;  %v6732_v38 = vpack.c.bf16 %v4065_v34, %v4064_v32  ;;  %v3942_v43 = vadd.f32 %v7274_v35, %v7939_v42 }
 0x117   : > { %v2235_v39 = vpop.f32.mrf.mxu0  ;;  %v2747_v40 = vpop.f32.mrf.mxu1  ;;  %v4070_v46 = vadd.f32 %v7402_v37, %v7939_v42 }
 0x118   : > { %6992 = vst [vmem:[%s7953_s29 + $0x70] sm:$0xff] %v6412_v36   ;;  %7056 = vst [vmem:[%s7953_s29 + $0x270] sm:$0xff] %v6732_v38   ;;  %v3940_v49 = vadd.f32 %v7939_v42, %v2235_v39  ;;  %v4068_v53 = vadd.f32 %v7939_v42, %v2747_v40 }
 0x119   : > { %v7275_v41 = vpop.f32.mrf.mxu0  ;;  %v7403_v45 = vpop.f32.mrf.mxu1 }
 0x11a   : > { %v3943_v44 = vadd.f32 %v7275_v41, %v7939_v42  ;;  %v4071_v47 = vadd.f32 %v7403_v45, %v7939_v42 }
 0x11b   : > { %v2238_v48 = vpop.f32.mrf.mxu0  ;;  %v2750_v52 = vpop.f32.mrf.mxu1 }
 0x11c   : > { %v6427_v50 = vpack.c.bf16 %v3943_v44, %v3942_v43  ;;  %v3941_v51 = vadd.f32 %v7939_v42, %v2238_v48  ;;  %v6747_v54 = vpack.c.bf16 %v4071_v47, %v4070_v46  ;;  %v4069_v55 = vadd.f32 %v7939_v42, %v2750_v52 }
 0x11d   : > { %v7278_v56 = vpop.f32.mrf.mxu0  ;;  %v7406_v58 = vpop.f32.mrf.mxu1 }
 0x11e   : > { %6995 = vst [vmem:[%s7953_s29 + $0x88] sm:$0xff] %v6427_v50   ;;  %v6422_v57 = vpack.c.bf16 %v3941_v51, %v3940_v49  ;;  %7059 = vst [vmem:[%s7953_s29 + $0x288] sm:$0xff] %v6747_v54   ;;  %v6742_v59 = vpack.c.bf16 %v4069_v55, %v4068_v53  ;;  %v3946_v63 = vadd.f32 %v7278_v56, %v7939_v42 }
 0x11f   : > { %v2251_v60 = vpop.f32.mrf.mxu0  ;;  %v2763_v61 = vpop.f32.mrf.mxu1  ;;  %v4074_v2 = vadd.f32 %v7406_v58, %v7939_v42 }
 0x120   : > { %6994 = vst [vmem:[%s7953_s29 + $0x80] sm:$0xff] %v6422_v57   ;;  %7058 = vst [vmem:[%s7953_s29 + $0x280] sm:$0xff] %v6742_v59   ;;  %v3944_v5 = vadd.f32 %v7939_v42, %v2251_v60  ;;  %v4072_v9 = vadd.f32 %v7939_v42, %v2763_v61 }
 0x121   : > { %v7279_v62 = vpop.f32.mrf.mxu0  ;;  %v7407_v1 = vpop.f32.mrf.mxu1 }
 0x122   : > { %v3947_v0 = vadd.f32 %v7279_v62, %v7939_v42  ;;  %v4075_v3 = vadd.f32 %v7407_v1, %v7939_v42 }
 0x123   : > { %v2254_v4 = vpop.f32.mrf.mxu0  ;;  %v2766_v8 = vpop.f32.mrf.mxu1 }
 0x124   : > { %v6437_v6 = vpack.c.bf16 %v3947_v0, %v3946_v63  ;;  %v3945_v7 = vadd.f32 %v7939_v42, %v2254_v4  ;;  %v6757_v10 = vpack.c.bf16 %v4075_v3, %v4074_v2  ;;  %v4073_v11 = vadd.f32 %v7939_v42, %v2766_v8 }
 0x125   : > { %v7282_v12 = vpop.f32.mrf.mxu0  ;;  %v7410_v14 = vpop.f32.mrf.mxu1 }
 0x126   : > { %6997 = vst [vmem:[%s7953_s29 + $0x98] sm:$0xff] %v6437_v6   ;;  %v6432_v13 = vpack.c.bf16 %v3945_v7, %v3944_v5  ;;  %7061 = vst [vmem:[%s7953_s29 + $0x298] sm:$0xff] %v6757_v10   ;;  %v6752_v15 = vpack.c.bf16 %v4073_v11, %v4072_v9  ;;  %v3950_v19 = vadd.f32 %v7282_v12, %v7939_v42 }
 0x127   : > { %v2267_v16 = vpop.f32.mrf.mxu0  ;;  %v2779_v17 = vpop.f32.mrf.mxu1  ;;  %v4078_v22 = vadd.f32 %v7410_v14, %v7939_v42 }
 0x128   : > { %6996 = vst [vmem:[%s7953_s29 + $0x90] sm:$0xff] %v6432_v13   ;;  %7060 = vst [vmem:[%s7953_s29 + $0x290] sm:$0xff] %v6752_v15   ;;  %v3948_v25 = vadd.f32 %v7939_v42, %v2267_v16  ;;  %v4076_v29 = vadd.f32 %v7939_v42, %v2779_v17 }
 0x129   : > { %v7283_v18 = vpop.f32.mrf.mxu0  ;;  %v7411_v21 = vpop.f32.mrf.mxu1 }
 0x12a   : > { %v3951_v20 = vadd.f32 %v7283_v18, %v7939_v42  ;;  %v4079_v23 = vadd.f32 %v7411_v21, %v7939_v42 }
 0x12b   : > { %v2270_v24 = vpop.f32.mrf.mxu0  ;;  %v2782_v28 = vpop.f32.mrf.mxu1 }
 0x12c   : > { %v6447_v26 = vpack.c.bf16 %v3951_v20, %v3950_v19  ;;  %v3949_v27 = vadd.f32 %v7939_v42, %v2270_v24  ;;  %v6767_v30 = vpack.c.bf16 %v4079_v23, %v4078_v22  ;;  %v4077_v31 = vadd.f32 %v7939_v42, %v2782_v28 }
 0x12d   : > { %v7286_v32 = vpop.f32.mrf.mxu0  ;;  %v7414_v34 = vpop.f32.mrf.mxu1 }
 0x12e   : > { %6999 = vst [vmem:[%s7953_s29 + $0xa8] sm:$0xff] %v6447_v26   ;;  %v6442_v33 = vpack.c.bf16 %v3949_v27, %v3948_v25  ;;  %7063 = vst [vmem:[%s7953_s29 + $0x2a8] sm:$0xff] %v6767_v30   ;;  %v6762_v35 = vpack.c.bf16 %v4077_v31, %v4076_v29  ;;  %v3954_v39 = vadd.f32 %v7286_v32, %v7939_v42 }
 0x12f   : > { %v2283_v36 = vpop.f32.mrf.mxu0  ;;  %v2795_v37 = vpop.f32.mrf.mxu1  ;;  %v4082_v43 = vadd.f32 %v7414_v34, %v7939_v42 }
 0x130   : > { %6998 = vst [vmem:[%s7953_s29 + $0xa0] sm:$0xff] %v6442_v33   ;;  %7062 = vst [vmem:[%s7953_s29 + $0x2a0] sm:$0xff] %v6762_v35   ;;  %v3952_v46 = vadd.f32 %v7939_v42, %v2283_v36  ;;  %v4080_v50 = vadd.f32 %v7939_v42, %v2795_v37 }
 0x131   : > { %v7287_v38 = vpop.f32.mrf.mxu0  ;;  %v7415_v41 = vpop.f32.mrf.mxu1 }
 0x132   : > { %v3955_v40 = vadd.f32 %v7287_v38, %v7939_v42  ;;  %v4083_v44 = vadd.f32 %v7415_v41, %v7939_v42 }
 0x133   : > { %v2286_v45 = vpop.f32.mrf.mxu0  ;;  %v2798_v49 = vpop.f32.mrf.mxu1 }
 0x134   : > { %v6457_v47 = vpack.c.bf16 %v3955_v40, %v3954_v39  ;;  %v3953_v48 = vadd.f32 %v7939_v42, %v2286_v45  ;;  %v6777_v51 = vpack.c.bf16 %v4083_v44, %v4082_v43  ;;  %v4081_v52 = vadd.f32 %v7939_v42, %v2798_v49 }
 0x135   : > { %v7290_v53 = vpop.f32.mrf.mxu0  ;;  %v7418_v55 = vpop.f32.mrf.mxu1 }
 0x136   : > { %7001 = vst [vmem:[%s7953_s29 + $0xb8] sm:$0xff] %v6457_v47   ;;  %v6452_v54 = vpack.c.bf16 %v3953_v48, %v3952_v46  ;;  %7065 = vst [vmem:[%s7953_s29 + $0x2b8] sm:$0xff] %v6777_v51   ;;  %v6772_v56 = vpack.c.bf16 %v4081_v52, %v4080_v50  ;;  %v3958_v60 = vadd.f32 %v7290_v53, %v7939_v42 }
 0x137   : > { %v2299_v57 = vpop.f32.mrf.mxu0  ;;  %v2811_v58 = vpop.f32.mrf.mxu1  ;;  %v4086_v63 = vadd.f32 %v7418_v55, %v7939_v42 }
 0x138   : > { %7000 = vst [vmem:[%s7953_s29 + $0xb0] sm:$0xff] %v6452_v54   ;;  %7064 = vst [vmem:[%s7953_s29 + $0x2b0] sm:$0xff] %v6772_v56   ;;  %v3956_v2 = vadd.f32 %v7939_v42, %v2299_v57  ;;  %v4084_v6 = vadd.f32 %v7939_v42, %v2811_v58 }
 0x139   : > { %v7291_v59 = vpop.f32.mrf.mxu0  ;;  %v7419_v62 = vpop.f32.mrf.mxu1 }
 0x13a   : > { %v3959_v61 = vadd.f32 %v7291_v59, %v7939_v42  ;;  %v4087_v0 = vadd.f32 %v7419_v62, %v7939_v42 }
 0x13b   : > { %v2302_v1 = vpop.f32.mrf.mxu0  ;;  %v2814_v5 = vpop.f32.mrf.mxu1 }
 0x13c   : > { %v6467_v3 = vpack.c.bf16 %v3959_v61, %v3958_v60  ;;  %v3957_v4 = vadd.f32 %v7939_v42, %v2302_v1  ;;  %v6787_v7 = vpack.c.bf16 %v4087_v0, %v4086_v63  ;;  %v4085_v8 = vadd.f32 %v7939_v42, %v2814_v5 }
 0x13d   : > { %v7294_v9 = vpop.f32.mrf.mxu0  ;;  %v7422_v11 = vpop.f32.mrf.mxu1 }
 0x13e   : > { %7003 = vst [vmem:[%s7953_s29 + $0xc8] sm:$0xff] %v6467_v3   ;;  %v6462_v10 = vpack.c.bf16 %v3957_v4, %v3956_v2  ;;  %7067 = vst [vmem:[%s7953_s29 + $0x2c8] sm:$0xff] %v6787_v7   ;;  %v6782_v12 = vpack.c.bf16 %v4085_v8, %v4084_v6  ;;  %v3962_v16 = vadd.f32 %v7294_v9, %v7939_v42 }
 0x13f   : > { %v2315_v13 = vpop.f32.mrf.mxu0  ;;  %v2827_v14 = vpop.f32.mrf.mxu1  ;;  %v4090_v19 = vadd.f32 %v7422_v11, %v7939_v42 }
 0x140   : > { %7002 = vst [vmem:[%s7953_s29 + $0xc0] sm:$0xff] %v6462_v10   ;;  %7066 = vst [vmem:[%s7953_s29 + $0x2c0] sm:$0xff] %v6782_v12   ;;  %v3960_v22 = vadd.f32 %v7939_v42, %v2315_v13  ;;  %v4088_v26 = vadd.f32 %v7939_v42, %v2827_v14 }
 0x141   : > { %v7295_v15 = vpop.f32.mrf.mxu0  ;;  %v7423_v18 = vpop.f32.mrf.mxu1 }
 0x142   : > { %v3963_v17 = vadd.f32 %v7295_v15, %v7939_v42  ;;  %v4091_v20 = vadd.f32 %v7423_v18, %v7939_v42 }
 0x143   : > { %v2318_v21 = vpop.f32.mrf.mxu0  ;;  %v2830_v25 = vpop.f32.mrf.mxu1 }
 0x144   : > { %v6477_v23 = vpack.c.bf16 %v3963_v17, %v3962_v16  ;;  %v3961_v24 = vadd.f32 %v7939_v42, %v2318_v21  ;;  %v6797_v27 = vpack.c.bf16 %v4091_v20, %v4090_v19  ;;  %v4089_v28 = vadd.f32 %v7939_v42, %v2830_v25 }
 0x145   : > { %v7298_v29 = vpop.f32.mrf.mxu0  ;;  %v7426_v31 = vpop.f32.mrf.mxu1 }
 0x146   : > { %7005 = vst [vmem:[%s7953_s29 + $0xd8] sm:$0xff] %v6477_v23   ;;  %v6472_v30 = vpack.c.bf16 %v3961_v24, %v3960_v22  ;;  %7069 = vst [vmem:[%s7953_s29 + $0x2d8] sm:$0xff] %v6797_v27   ;;  %v6792_v32 = vpack.c.bf16 %v4089_v28, %v4088_v26  ;;  %v3966_v36 = vadd.f32 %v7298_v29, %v7939_v42 }
 0x147   : > { %v2331_v33 = vpop.f32.mrf.mxu0  ;;  %v2843_v34 = vpop.f32.mrf.mxu1  ;;  %v4094_v39 = vadd.f32 %v7426_v31, %v7939_v42 }
 0x148   : > { %7004 = vst [vmem:[%s7953_s29 + $0xd0] sm:$0xff] %v6472_v30   ;;  %7068 = vst [vmem:[%s7953_s29 + $0x2d0] sm:$0xff] %v6792_v32   ;;  %v3964_v43 = vadd.f32 %v7939_v42, %v2331_v33  ;;  %v4092_v47 = vadd.f32 %v7939_v42, %v2843_v34 }
 0x149   : > { %v7299_v35 = vpop.f32.mrf.mxu0  ;;  %v7427_v38 = vpop.f32.mrf.mxu1 }
 0x14a   : > { %v3967_v37 = vadd.f32 %v7299_v35, %v7939_v42  ;;  %v4095_v40 = vadd.f32 %v7427_v38, %v7939_v42 }
 0x14b   : > { %v2334_v41 = vpop.f32.mrf.mxu0  ;;  %v2846_v46 = vpop.f32.mrf.mxu1 }
 0x14c   : > { %v6487_v44 = vpack.c.bf16 %v3967_v37, %v3966_v36  ;;  %v3965_v45 = vadd.f32 %v7939_v42, %v2334_v41  ;;  %v6807_v48 = vpack.c.bf16 %v4095_v40, %v4094_v39  ;;  %v4093_v49 = vadd.f32 %v7939_v42, %v2846_v46 }
 0x14d   : > { %v7302_v50 = vpop.f32.mrf.mxu0  ;;  %v7430_v52 = vpop.f32.mrf.mxu1 }
 0x14e   : > { %7007 = vst [vmem:[%s7953_s29 + $0xe8] sm:$0xff] %v6487_v44   ;;  %v6482_v51 = vpack.c.bf16 %v3965_v45, %v3964_v43  ;;  %7071 = vst [vmem:[%s7953_s29 + $0x2e8] sm:$0xff] %v6807_v48   ;;  %v6802_v53 = vpack.c.bf16 %v4093_v49, %v4092_v47  ;;  %v3970_v57 = vadd.f32 %v7302_v50, %v7939_v42 }
 0x14f   : > { %v2347_v54 = vpop.f32.mrf.mxu0  ;;  %v2859_v55 = vpop.f32.mrf.mxu1  ;;  %v4098_v60 = vadd.f32 %v7430_v52, %v7939_v42 }
 0x150   : > { %7006 = vst [vmem:[%s7953_s29 + $0xe0] sm:$0xff] %v6482_v51   ;;  %7070 = vst [vmem:[%s7953_s29 + $0x2e0] sm:$0xff] %v6802_v53   ;;  %v3968_v63 = vadd.f32 %v7939_v42, %v2347_v54  ;;  %v4096_v3 = vadd.f32 %v7939_v42, %v2859_v55 }
 0x151   : > { %v7303_v56 = vpop.f32.mrf.mxu0  ;;  %v7431_v59 = vpop.f32.mrf.mxu1 }
 0x152   : > { %v3971_v58 = vadd.f32 %v7303_v56, %v7939_v42  ;;  %v4099_v61 = vadd.f32 %v7431_v59, %v7939_v42 }
 0x153   : > { %v2350_v62 = vpop.f32.mrf.mxu0  ;;  %v2862_v2 = vpop.f32.mrf.mxu1 }
 0x154   : > { %v6497_v0 = vpack.c.bf16 %v3971_v58, %v3970_v57  ;;  %v3969_v1 = vadd.f32 %v7939_v42, %v2350_v62  ;;  %v6817_v4 = vpack.c.bf16 %v4099_v61, %v4098_v60  ;;  %v4097_v5 = vadd.f32 %v7939_v42, %v2862_v2 }
 0x155   : > { %v7306_v6 = vpop.f32.mrf.mxu0  ;;  %v7434_v8 = vpop.f32.mrf.mxu1 }
 0x156   : > { %7009 = vst [vmem:[%s7953_s29 + $0xf8] sm:$0xff] %v6497_v0   ;;  %v6492_v7 = vpack.c.bf16 %v3969_v1, %v3968_v63  ;;  %7073 = vst [vmem:[%s7953_s29 + $0x2f8] sm:$0xff] %v6817_v4   ;;  %v6812_v9 = vpack.c.bf16 %v4097_v5, %v4096_v3  ;;  %v3974_v13 = vadd.f32 %v7306_v6, %v7939_v42 }
 0x157   : > { %v2363_v10 = vpop.f32.mrf.mxu0  ;;  %v2875_v11 = vpop.f32.mrf.mxu1  ;;  %v4102_v16 = vadd.f32 %v7434_v8, %v7939_v42 }
 0x158   : > { %7008 = vst [vmem:[%s7953_s29 + $0xf0] sm:$0xff] %v6492_v7   ;;  %7072 = vst [vmem:[%s7953_s29 + $0x2f0] sm:$0xff] %v6812_v9   ;;  %v3972_v19 = vadd.f32 %v7939_v42, %v2363_v10  ;;  %v4100_v23 = vadd.f32 %v7939_v42, %v2875_v11  ;;  %v8232_v10 = vld [vmem:[%s8401_s2] ss:$0 sm:$0xff] }
 0x159   : > { %v7307_v12 = vpop.f32.mrf.mxu0  ;;  %v7435_v15 = vpop.f32.mrf.mxu1 }
 0x15a   : > { %v3975_v14 = vadd.f32 %v7307_v12, %v7939_v42  ;;  %v4103_v17 = vadd.f32 %v7435_v15, %v7939_v42 }
 0x15b   : > { %v2366_v18 = vpop.f32.mrf.mxu0  ;;  %v2878_v22 = vpop.f32.mrf.mxu1 }
 0x15c   : > { %v6507_v20 = vpack.c.bf16 %v3975_v14, %v3974_v13  ;;  %v3973_v21 = vadd.f32 %v7939_v42, %v2366_v18  ;;  %v6827_v24 = vpack.c.bf16 %v4103_v17, %v4102_v16  ;;  %v4101_v25 = vadd.f32 %v7939_v42, %v2878_v22 }
 0x15d   : > { %v7310_v26 = vpop.f32.mrf.mxu0  ;;  %v7438_v28 = vpop.f32.mrf.mxu1 }
 0x15e   : > { %7011 = vst [vmem:[%s7953_s29 + $0x108] sm:$0xff] %v6507_v20   ;;  %v6502_v27 = vpack.c.bf16 %v3973_v21, %v3972_v19  ;;  %7075 = vst [vmem:[%s7953_s29 + $0x308] sm:$0xff] %v6827_v24   ;;  %v6822_v29 = vpack.c.bf16 %v4101_v25, %v4100_v23  ;;  %v3978_v33 = vadd.f32 %v7310_v26, %v7939_v42 }
 0x15f   : > { %v2379_v30 = vpop.f32.mrf.mxu0  ;;  %v2891_v31 = vpop.f32.mrf.mxu1  ;;  %v4106_v36 = vadd.f32 %v7438_v28, %v7939_v42 }
 0x160   : > { %7010 = vst [vmem:[%s7953_s29 + $0x100] sm:$0xff] %v6502_v27   ;;  %7074 = vst [vmem:[%s7953_s29 + $0x300] sm:$0xff] %v6822_v29   ;;  %v3976_v39 = vadd.f32 %v7939_v42, %v2379_v30  ;;  %v4104_v44 = vadd.f32 %v7939_v42, %v2891_v31 }
 0x161   : > { %v7311_v32 = vpop.f32.mrf.mxu0  ;;  %v7439_v35 = vpop.f32.mrf.mxu1 }
 0x162   : > { %v3979_v34 = vadd.f32 %v7311_v32, %v7939_v42  ;;  %v4107_v37 = vadd.f32 %v7439_v35, %v7939_v42 }
 0x163   : > { %v2382_v38 = vpop.f32.mrf.mxu0  ;;  %v2894_v43 = vpop.f32.mrf.mxu1 }
 0x164   : > { %v6517_v40 = vpack.c.bf16 %v3979_v34, %v3978_v33  ;;  %v3977_v41 = vadd.f32 %v7939_v42, %v2382_v38  ;;  %v6837_v45 = vpack.c.bf16 %v4107_v37, %v4106_v36  ;;  %v4105_v46 = vadd.f32 %v7939_v42, %v2894_v43 }
 0x165   : > { %v7314_v47 = vpop.f32.mrf.mxu0  ;;  %v7442_v49 = vpop.f32.mrf.mxu1 }
 0x166   : > { %7013 = vst [vmem:[%s7953_s29 + $0x118] sm:$0xff] %v6517_v40   ;;  %v6512_v48 = vpack.c.bf16 %v3977_v41, %v3976_v39  ;;  %7077 = vst [vmem:[%s7953_s29 + $0x318] sm:$0xff] %v6837_v45   ;;  %v6832_v50 = vpack.c.bf16 %v4105_v46, %v4104_v44  ;;  %v3982_v54 = vadd.f32 %v7314_v47, %v7939_v42 }
 0x167   : > { %v2395_v51 = vpop.f32.mrf.mxu0  ;;  %v2907_v52 = vpop.f32.mrf.mxu1  ;;  %v4110_v57 = vadd.f32 %v7442_v49, %v7939_v42 }
 0x168   : > { %7012 = vst [vmem:[%s7953_s29 + $0x110] sm:$0xff] %v6512_v48   ;;  %7076 = vst [vmem:[%s7953_s29 + $0x310] sm:$0xff] %v6832_v50   ;;  %v3980_v60 = vadd.f32 %v7939_v42, %v2395_v51  ;;  %v4108_v0 = vadd.f32 %v7939_v42, %v2907_v52 }
 0x169   : > { %v7315_v53 = vpop.f32.mrf.mxu0  ;;  %v7443_v56 = vpop.f32.mrf.mxu1 }
 0x16a   : > { %v3983_v55 = vadd.f32 %v7315_v53, %v7939_v42  ;;  %v4111_v58 = vadd.f32 %v7443_v56, %v7939_v42 }
 0x16b   : > { %v2398_v59 = vpop.f32.mrf.mxu0  ;;  %v2910_v63 = vpop.f32.mrf.mxu1 }
 0x16c   : > { %v6527_v61 = vpack.c.bf16 %v3983_v55, %v3982_v54  ;;  %v3981_v62 = vadd.f32 %v7939_v42, %v2398_v59  ;;  %v6847_v1 = vpack.c.bf16 %v4111_v58, %v4110_v57  ;;  %v4109_v2 = vadd.f32 %v7939_v42, %v2910_v63 }
 0x16d   : > { %v7318_v3 = vpop.f32.mrf.mxu0  ;;  %v7446_v5 = vpop.f32.mrf.mxu1 }
 0x16e   : > { %7015 = vst [vmem:[%s7953_s29 + $0x128] sm:$0xff] %v6527_v61   ;;  %v6522_v4 = vpack.c.bf16 %v3981_v62, %v3980_v60  ;;  %7079 = vst [vmem:[%s7953_s29 + $0x328] sm:$0xff] %v6847_v1   ;;  %v6842_v6 = vpack.c.bf16 %v4109_v2, %v4108_v0  ;;  %v3986_v11 = vadd.f32 %v8232_v10, %v7318_v3 }
 0x16f   : > { %v2411_v7 = vpop.f32.mrf.mxu0  ;;  %v2923_v8 = vpop.f32.mrf.mxu1  ;;  %v4114_v13 = vadd.f32 %v8232_v10, %v7446_v5 }
 0x170   : > { %7014 = vst [vmem:[%s7953_s29 + $0x120] sm:$0xff] %v6522_v4   ;;  %7078 = vst [vmem:[%s7953_s29 + $0x320] sm:$0xff] %v6842_v6   ;;  %v3984_v16 = vadd.f32 %v8232_v10, %v2411_v7  ;;  %v4112_v20 = vadd.f32 %v8232_v10, %v2923_v8 }
 0x171   : > { %v7319_v9 = vpop.f32.mrf.mxu0  ;;  %v7447_v12 = vpop.f32.mrf.mxu1 }
 0x172   : > { %v3987_v42 = vadd.f32 %v8232_v10, %v7319_v9  ;;  %v4115_v14 = vadd.f32 %v8232_v10, %v7447_v12 }
 0x173   : > { %v2414_v15 = vpop.f32.mrf.mxu0  ;;  %v2926_v19 = vpop.f32.mrf.mxu1 }
 0x174   : > { %v6537_v17 = vpack.c.bf16 %v3987_v42, %v3986_v11  ;;  %v3985_v18 = vadd.f32 %v8232_v10, %v2414_v15  ;;  %v6857_v21 = vpack.c.bf16 %v4115_v14, %v4114_v13  ;;  %v4113_v22 = vadd.f32 %v8232_v10, %v2926_v19 }
 0x175   : > { %v7322_v23 = vpop.f32.mrf.mxu0  ;;  %v7450_v25 = vpop.f32.mrf.mxu1 }
 0x176   : > { %7017 = vst [vmem:[%s7953_s29 + $0x138] sm:$0xff] %v6537_v17   ;;  %v6532_v24 = vpack.c.bf16 %v3985_v18, %v3984_v16  ;;  %7081 = vst [vmem:[%s7953_s29 + $0x338] sm:$0xff] %v6857_v21   ;;  %v6852_v26 = vpack.c.bf16 %v4113_v22, %v4112_v20  ;;  %v3990_v30 = vadd.f32 %v8232_v10, %v7322_v23 }
 0x177   : > { %v2427_v27 = vpop.f32.mrf.mxu0  ;;  %v2939_v28 = vpop.f32.mrf.mxu1  ;;  %v4118_v33 = vadd.f32 %v8232_v10, %v7450_v25 }
 0x178   : > { %7016 = vst [vmem:[%s7953_s29 + $0x130] sm:$0xff] %v6532_v24   ;;  %7080 = vst [vmem:[%s7953_s29 + $0x330] sm:$0xff] %v6852_v26   ;;  %v3988_v36 = vadd.f32 %v8232_v10, %v2427_v27  ;;  %v4116_v40 = vadd.f32 %v8232_v10, %v2939_v28 }
 0x179   : > { %v7323_v29 = vpop.f32.mrf.mxu0  ;;  %v7451_v32 = vpop.f32.mrf.mxu1 }
 0x17a   : > { %v3991_v31 = vadd.f32 %v8232_v10, %v7323_v29  ;;  %v4119_v34 = vadd.f32 %v8232_v10, %v7451_v32 }
 0x17b   : > { %v2430_v35 = vpop.f32.mrf.mxu0  ;;  %v2942_v39 = vpop.f32.mrf.mxu1 }
 0x17c   : > { %v6547_v37 = vpack.c.bf16 %v3991_v31, %v3990_v30  ;;  %v3989_v38 = vadd.f32 %v8232_v10, %v2430_v35  ;;  %v6867_v41 = vpack.c.bf16 %v4119_v34, %v4118_v33  ;;  %v4117_v43 = vadd.f32 %v8232_v10, %v2942_v39 }
 0x17d   : > { %v7326_v44 = vpop.f32.mrf.mxu0  ;;  %v7454_v46 = vpop.f32.mrf.mxu1 }
 0x17e   : > { %7019 = vst [vmem:[%s7953_s29 + $0x148] sm:$0xff] %v6547_v37   ;;  %v6542_v45 = vpack.c.bf16 %v3989_v38, %v3988_v36  ;;  %7083 = vst [vmem:[%s7953_s29 + $0x348] sm:$0xff] %v6867_v41   ;;  %v6862_v47 = vpack.c.bf16 %v4117_v43, %v4116_v40  ;;  %v3994_v51 = vadd.f32 %v8232_v10, %v7326_v44 }
 0x17f   : > { %v2443_v48 = vpop.f32.mrf.mxu0  ;;  %v2955_v49 = vpop.f32.mrf.mxu1  ;;  %v4122_v54 = vadd.f32 %v8232_v10, %v7454_v46 }
 0x180   : > { %7018 = vst [vmem:[%s7953_s29 + $0x140] sm:$0xff] %v6542_v45   ;;  %7082 = vst [vmem:[%s7953_s29 + $0x340] sm:$0xff] %v6862_v47   ;;  %v3992_v57 = vadd.f32 %v8232_v10, %v2443_v48  ;;  %v4120_v61 = vadd.f32 %v8232_v10, %v2955_v49 }
 0x181   : > { %v7327_v50 = vpop.f32.mrf.mxu0  ;;  %v7455_v53 = vpop.f32.mrf.mxu1 }
 0x182   : > { %v3995_v52 = vadd.f32 %v8232_v10, %v7327_v50  ;;  %v4123_v55 = vadd.f32 %v8232_v10, %v7455_v53 }
 0x183   : > { %v2446_v56 = vpop.f32.mrf.mxu0  ;;  %v2958_v60 = vpop.f32.mrf.mxu1 }
 0x184   : > { %v6557_v58 = vpack.c.bf16 %v3995_v52, %v3994_v51  ;;  %v3993_v59 = vadd.f32 %v8232_v10, %v2446_v56  ;;  %v6877_v62 = vpack.c.bf16 %v4123_v55, %v4122_v54  ;;  %v4121_v63 = vadd.f32 %v8232_v10, %v2958_v60 }
 0x185   : > { %v7330_v0 = vpop.f32.mrf.mxu0  ;;  %v7458_v2 = vpop.f32.mrf.mxu1 }
 0x186   : > { %7021 = vst [vmem:[%s7953_s29 + $0x158] sm:$0xff] %v6557_v58   ;;  %v6552_v1 = vpack.c.bf16 %v3993_v59, %v3992_v57  ;;  %7085 = vst [vmem:[%s7953_s29 + $0x358] sm:$0xff] %v6877_v62   ;;  %v6872_v3 = vpack.c.bf16 %v4121_v63, %v4120_v61  ;;  %v3998_v7 = vadd.f32 %v8232_v10, %v7330_v0 }
 0x187   : > { %v2459_v4 = vpop.f32.mrf.mxu0  ;;  %v2971_v5 = vpop.f32.mrf.mxu1  ;;  %v4126_v11 = vadd.f32 %v8232_v10, %v7458_v2 }
 0x188   : > { %7020 = vst [vmem:[%s7953_s29 + $0x150] sm:$0xff] %v6552_v1   ;;  %7084 = vst [vmem:[%s7953_s29 + $0x350] sm:$0xff] %v6872_v3   ;;  %v3996_v13 = vadd.f32 %v8232_v10, %v2459_v4  ;;  %v4124_v17 = vadd.f32 %v8232_v10, %v2971_v5 }
 0x189   : > { %v7331_v6 = vpop.f32.mrf.mxu0  ;;  %v7459_v9 = vpop.f32.mrf.mxu1 }
 0x18a   : > { %v3999_v8 = vadd.f32 %v8232_v10, %v7331_v6  ;;  %v4127_v42 = vadd.f32 %v8232_v10, %v7459_v9 }
 0x18b   : > { %v2462_v12 = vpop.f32.mrf.mxu0  ;;  %v2974_v16 = vpop.f32.mrf.mxu1 }
 0x18c   : > { %v6567_v14 = vpack.c.bf16 %v3999_v8, %v3998_v7  ;;  %v3997_v15 = vadd.f32 %v8232_v10, %v2462_v12  ;;  %v6887_v18 = vpack.c.bf16 %v4127_v42, %v4126_v11  ;;  %v4125_v19 = vadd.f32 %v8232_v10, %v2974_v16 }
 0x18d   : > { %v7334_v20 = vpop.f32.mrf.mxu0  ;;  %v7462_v22 = vpop.f32.mrf.mxu1 }
 0x18e   : > { %7023 = vst [vmem:[%s7953_s29 + $0x168] sm:$0xff] %v6567_v14   ;;  %v6562_v21 = vpack.c.bf16 %v3997_v15, %v3996_v13  ;;  %7087 = vst [vmem:[%s7953_s29 + $0x368] sm:$0xff] %v6887_v18   ;;  %v6882_v23 = vpack.c.bf16 %v4125_v19, %v4124_v17  ;;  %v4002_v27 = vadd.f32 %v8232_v10, %v7334_v20 }
 0x18f   : > { %v2475_v24 = vpop.f32.mrf.mxu0  ;;  %v2987_v25 = vpop.f32.mrf.mxu1  ;;  %v4130_v30 = vadd.f32 %v8232_v10, %v7462_v22 }
 0x190   : > { %7022 = vst [vmem:[%s7953_s29 + $0x160] sm:$0xff] %v6562_v21   ;;  %7086 = vst [vmem:[%s7953_s29 + $0x360] sm:$0xff] %v6882_v23   ;;  %v4000_v33 = vadd.f32 %v8232_v10, %v2475_v24  ;;  %v4128_v37 = vadd.f32 %v8232_v10, %v2987_v25 }
 0x191   : > { %v7335_v26 = vpop.f32.mrf.mxu0  ;;  %v7463_v29 = vpop.f32.mrf.mxu1 }
 0x192   : > { %v4003_v28 = vadd.f32 %v8232_v10, %v7335_v26  ;;  %v4131_v31 = vadd.f32 %v8232_v10, %v7463_v29 }
 0x193   : > { %v2478_v32 = vpop.f32.mrf.mxu0  ;;  %v2990_v36 = vpop.f32.mrf.mxu1 }
 0x194   : > { %v6577_v34 = vpack.c.bf16 %v4003_v28, %v4002_v27  ;;  %v4001_v35 = vadd.f32 %v8232_v10, %v2478_v32  ;;  %v6897_v38 = vpack.c.bf16 %v4131_v31, %v4130_v30  ;;  %v4129_v39 = vadd.f32 %v8232_v10, %v2990_v36 }
 0x195   : > { %v7338_v40 = vpop.f32.mrf.mxu0  ;;  %v7466_v43 = vpop.f32.mrf.mxu1 }
 0x196   : > { %7025 = vst [vmem:[%s7953_s29 + $0x178] sm:$0xff] %v6577_v34   ;;  %v6572_v41 = vpack.c.bf16 %v4001_v35, %v4000_v33  ;;  %7089 = vst [vmem:[%s7953_s29 + $0x378] sm:$0xff] %v6897_v38   ;;  %v6892_v44 = vpack.c.bf16 %v4129_v39, %v4128_v37  ;;  %v4006_v48 = vadd.f32 %v8232_v10, %v7338_v40 }
 0x197   : > { %v2491_v45 = vpop.f32.mrf.mxu0  ;;  %v3003_v46 = vpop.f32.mrf.mxu1  ;;  %v4134_v51 = vadd.f32 %v8232_v10, %v7466_v43 }
 0x198   : > { %7024 = vst [vmem:[%s7953_s29 + $0x170] sm:$0xff] %v6572_v41   ;;  %7088 = vst [vmem:[%s7953_s29 + $0x370] sm:$0xff] %v6892_v44   ;;  %v4004_v54 = vadd.f32 %v8232_v10, %v2491_v45  ;;  %v4132_v58 = vadd.f32 %v8232_v10, %v3003_v46 }
 0x199   : > { %v7339_v47 = vpop.f32.mrf.mxu0  ;;  %v7467_v50 = vpop.f32.mrf.mxu1 }
 0x19a   : > { %v4007_v49 = vadd.f32 %v8232_v10, %v7339_v47  ;;  %v4135_v52 = vadd.f32 %v8232_v10, %v7467_v50 }
 0x19b   : > { %v2494_v53 = vpop.f32.mrf.mxu0  ;;  %v3006_v57 = vpop.f32.mrf.mxu1 }
 0x19c   : > { %v6587_v55 = vpack.c.bf16 %v4007_v49, %v4006_v48  ;;  %v4005_v56 = vadd.f32 %v8232_v10, %v2494_v53  ;;  %v6907_v59 = vpack.c.bf16 %v4135_v52, %v4134_v51  ;;  %v4133_v60 = vadd.f32 %v8232_v10, %v3006_v57 }
 0x19d   : > { %v7342_v61 = vpop.f32.mrf.mxu0  ;;  %v7470_v63 = vpop.f32.mrf.mxu1 }
 0x19e   : > { %7027 = vst [vmem:[%s7953_s29 + $0x188] sm:$0xff] %v6587_v55   ;;  %v6582_v62 = vpack.c.bf16 %v4005_v56, %v4004_v54  ;;  %7091 = vst [vmem:[%s7953_s29 + $0x388] sm:$0xff] %v6907_v59   ;;  %v6902_v0 = vpack.c.bf16 %v4133_v60, %v4132_v58  ;;  %v4010_v4 = vadd.f32 %v8232_v10, %v7342_v61 }
 0x19f   : > { %v2507_v1 = vpop.f32.mrf.mxu0  ;;  %v3019_v2 = vpop.f32.mrf.mxu1  ;;  %v4138_v7 = vadd.f32 %v8232_v10, %v7470_v63 }
 0x1a0   : > { %7026 = vst [vmem:[%s7953_s29 + $0x180] sm:$0xff] %v6582_v62   ;;  %7090 = vst [vmem:[%s7953_s29 + $0x380] sm:$0xff] %v6902_v0   ;;  %v4008_v11 = vadd.f32 %v8232_v10, %v2507_v1  ;;  %v4136_v14 = vadd.f32 %v8232_v10, %v3019_v2 }
 0x1a1   : > { %v7343_v3 = vpop.f32.mrf.mxu0  ;;  %v7471_v6 = vpop.f32.mrf.mxu1 }
 0x1a2   : > { %v4011_v5 = vadd.f32 %v8232_v10, %v7343_v3  ;;  %v4139_v8 = vadd.f32 %v8232_v10, %v7471_v6 }
 0x1a3   : > { %v2510_v9 = vpop.f32.mrf.mxu0  ;;  %v3022_v13 = vpop.f32.mrf.mxu1 }
 0x1a4   : > { %v6597_v42 = vpack.c.bf16 %v4011_v5, %v4010_v4  ;;  %v4009_v12 = vadd.f32 %v8232_v10, %v2510_v9  ;;  %v6917_v15 = vpack.c.bf16 %v4139_v8, %v4138_v7  ;;  %v4137_v16 = vadd.f32 %v8232_v10, %v3022_v13 }
 0x1a5   : > { %v7346_v17 = vpop.f32.mrf.mxu0  ;;  %v7474_v19 = vpop.f32.mrf.mxu1 }
 0x1a6   : > { %7029 = vst [vmem:[%s7953_s29 + $0x198] sm:$0xff] %v6597_v42   ;;  %v6592_v18 = vpack.c.bf16 %v4009_v12, %v4008_v11  ;;  %7093 = vst [vmem:[%s7953_s29 + $0x398] sm:$0xff] %v6917_v15   ;;  %v6912_v20 = vpack.c.bf16 %v4137_v16, %v4136_v14  ;;  %v4014_v24 = vadd.f32 %v8232_v10, %v7346_v17 }
 0x1a7   : > { %v2523_v21 = vpop.f32.mrf.mxu0  ;;  %v3035_v22 = vpop.f32.mrf.mxu1  ;;  %v4142_v27 = vadd.f32 %v8232_v10, %v7474_v19 }
 0x1a8   : > { %7028 = vst [vmem:[%s7953_s29 + $0x190] sm:$0xff] %v6592_v18   ;;  %7092 = vst [vmem:[%s7953_s29 + $0x390] sm:$0xff] %v6912_v20   ;;  %v4012_v30 = vadd.f32 %v8232_v10, %v2523_v21  ;;  %v4140_v34 = vadd.f32 %v8232_v10, %v3035_v22 }
 0x1a9   : > { %v7347_v23 = vpop.f32.mrf.mxu0  ;;  %v7475_v26 = vpop.f32.mrf.mxu1 }
 0x1aa   : > { %v4015_v25 = vadd.f32 %v8232_v10, %v7347_v23  ;;  %v4143_v28 = vadd.f32 %v8232_v10, %v7475_v26 }
 0x1ab   : > { %v2526_v29 = vpop.f32.mrf.mxu0  ;;  %v3038_v33 = vpop.f32.mrf.mxu1 }
 0x1ac   : > { %v6607_v31 = vpack.c.bf16 %v4015_v25, %v4014_v24  ;;  %v4013_v32 = vadd.f32 %v8232_v10, %v2526_v29  ;;  %v6927_v35 = vpack.c.bf16 %v4143_v28, %v4142_v27  ;;  %v4141_v36 = vadd.f32 %v8232_v10, %v3038_v33 }
 0x1ad   : > { %v7350_v37 = vpop.f32.mrf.mxu0  ;;  %v7478_v39 = vpop.f32.mrf.mxu1 }
 0x1ae   : > { %7031 = vst [vmem:[%s7953_s29 + $0x1a8] sm:$0xff] %v6607_v31   ;;  %v6602_v38 = vpack.c.bf16 %v4013_v32, %v4012_v30  ;;  %7095 = vst [vmem:[%s7953_s29 + $0x3a8] sm:$0xff] %v6927_v35   ;;  %v6922_v40 = vpack.c.bf16 %v4141_v36, %v4140_v34  ;;  %v4018_v45 = vadd.f32 %v8232_v10, %v7350_v37 }
 0x1af   : > { %v2539_v41 = vpop.f32.mrf.mxu0  ;;  %v3051_v43 = vpop.f32.mrf.mxu1  ;;  %v4146_v48 = vadd.f32 %v8232_v10, %v7478_v39 }
 0x1b0   : > { %7030 = vst [vmem:[%s7953_s29 + $0x1a0] sm:$0xff] %v6602_v38   ;;  %7094 = vst [vmem:[%s7953_s29 + $0x3a0] sm:$0xff] %v6922_v40   ;;  %v4016_v51 = vadd.f32 %v8232_v10, %v2539_v41  ;;  %v4144_v55 = vadd.f32 %v8232_v10, %v3051_v43 }
 0x1b1   : > { %v7351_v44 = vpop.f32.mrf.mxu0  ;;  %v7479_v47 = vpop.f32.mrf.mxu1 }
 0x1b2   : > { %v4019_v46 = vadd.f32 %v8232_v10, %v7351_v44  ;;  %v4147_v49 = vadd.f32 %v8232_v10, %v7479_v47 }
 0x1b3   : > { %v2542_v50 = vpop.f32.mrf.mxu0  ;;  %v3054_v54 = vpop.f32.mrf.mxu1 }
 0x1b4   : > { %v6617_v52 = vpack.c.bf16 %v4019_v46, %v4018_v45  ;;  %v4017_v53 = vadd.f32 %v8232_v10, %v2542_v50  ;;  %v6937_v56 = vpack.c.bf16 %v4147_v49, %v4146_v48  ;;  %v4145_v57 = vadd.f32 %v8232_v10, %v3054_v54 }
 0x1b5   : > { %v7354_v58 = vpop.f32.mrf.mxu0  ;;  %v7482_v60 = vpop.f32.mrf.mxu1 }
 0x1b6   : > { %7033 = vst [vmem:[%s7953_s29 + $0x1b8] sm:$0xff] %v6617_v52   ;;  %v6612_v59 = vpack.c.bf16 %v4017_v53, %v4016_v51  ;;  %7097 = vst [vmem:[%s7953_s29 + $0x3b8] sm:$0xff] %v6937_v56   ;;  %v6932_v61 = vpack.c.bf16 %v4145_v57, %v4144_v55  ;;  %v4022_v1 = vadd.f32 %v8232_v10, %v7354_v58 }
 0x1b7   : > { %v2555_v62 = vpop.f32.mrf.mxu0  ;;  %v3067_v63 = vpop.f32.mrf.mxu1  ;;  %v4150_v4 = vadd.f32 %v8232_v10, %v7482_v60 }
 0x1b8   : > { %7032 = vst [vmem:[%s7953_s29 + $0x1b0] sm:$0xff] %v6612_v59   ;;  %7096 = vst [vmem:[%s7953_s29 + $0x3b0] sm:$0xff] %v6932_v61   ;;  %v4020_v7 = vadd.f32 %v8232_v10, %v2555_v62  ;;  %v4148_v42 = vadd.f32 %v8232_v10, %v3067_v63 }
 0x1b9   : > { %v7355_v0 = vpop.f32.mrf.mxu0  ;;  %v7483_v3 = vpop.f32.mrf.mxu1 }
 0x1ba   : > { %v4023_v2 = vadd.f32 %v8232_v10, %v7355_v0  ;;  %v4151_v5 = vadd.f32 %v8232_v10, %v7483_v3 }
 0x1bb   : > { %v2558_v6 = vpop.f32.mrf.mxu0  ;;  %v3070_v11 = vpop.f32.mrf.mxu1 }
 0x1bc   : > { %v6627_v8 = vpack.c.bf16 %v4023_v2, %v4022_v1  ;;  %v4021_v9 = vadd.f32 %v8232_v10, %v2558_v6  ;;  %v6947_v12 = vpack.c.bf16 %v4151_v5, %v4150_v4  ;;  %v4149_v13 = vadd.f32 %v8232_v10, %v3070_v11 }
 0x1bd   : > { %v7358_v14 = vpop.f32.mrf.mxu0  ;;  %v7486_v16 = vpop.f32.mrf.mxu1 }
 0x1be   : > { %7035 = vst [vmem:[%s7953_s29 + $0x1c8] sm:$0xff] %v6627_v8   ;;  %v6622_v15 = vpack.c.bf16 %v4021_v9, %v4020_v7  ;;  %7099 = vst [vmem:[%s7953_s29 + $0x3c8] sm:$0xff] %v6947_v12   ;;  %v6942_v17 = vpack.c.bf16 %v4149_v13, %v4148_v42  ;;  %v4026_v21 = vadd.f32 %v8232_v10, %v7358_v14 }
 0x1bf   : > { %v2571_v18 = vpop.f32.mrf.mxu0  ;;  %v3083_v19 = vpop.f32.mrf.mxu1  ;;  %v4154_v24 = vadd.f32 %v8232_v10, %v7486_v16 }
 0x1c0   : > { %7034 = vst [vmem:[%s7953_s29 + $0x1c0] sm:$0xff] %v6622_v15   ;;  %7098 = vst [vmem:[%s7953_s29 + $0x3c0] sm:$0xff] %v6942_v17   ;;  %v4024_v27 = vadd.f32 %v8232_v10, %v2571_v18  ;;  %v4152_v31 = vadd.f32 %v8232_v10, %v3083_v19 }
 0x1c1   : > { %v7359_v20 = vpop.f32.mrf.mxu0  ;;  %v7487_v23 = vpop.f32.mrf.mxu1 }
 0x1c2   : > { %v4027_v22 = vadd.f32 %v8232_v10, %v7359_v20  ;;  %v4155_v25 = vadd.f32 %v8232_v10, %v7487_v23 }
 0x1c3   : > { %v2574_v26 = vpop.f32.mrf.mxu0  ;;  %v3086_v30 = vpop.f32.mrf.mxu1 }
 0x1c4   : > { %v6637_v28 = vpack.c.bf16 %v4027_v22, %v4026_v21  ;;  %v4025_v29 = vadd.f32 %v8232_v10, %v2574_v26  ;;  %v6957_v32 = vpack.c.bf16 %v4155_v25, %v4154_v24  ;;  %v4153_v33 = vadd.f32 %v8232_v10, %v3086_v30 }
 0x1c5   : > { %v7362_v34 = vpop.f32.mrf.mxu0  ;;  %v7490_v36 = vpop.f32.mrf.mxu1 }
 0x1c6   : > { %7037 = vst [vmem:[%s7953_s29 + $0x1d8] sm:$0xff] %v6637_v28   ;;  %v6632_v35 = vpack.c.bf16 %v4025_v29, %v4024_v27  ;;  %7101 = vst [vmem:[%s7953_s29 + $0x3d8] sm:$0xff] %v6957_v32   ;;  %v6952_v37 = vpack.c.bf16 %v4153_v33, %v4152_v31  ;;  %v4030_v41 = vadd.f32 %v8232_v10, %v7362_v34 }
 0x1c7   : > { %v2587_v38 = vpop.f32.mrf.mxu0  ;;  %v3099_v39 = vpop.f32.mrf.mxu1  ;;  %v4158_v45 = vadd.f32 %v8232_v10, %v7490_v36 }
 0x1c8   : > { %7036 = vst [vmem:[%s7953_s29 + $0x1d0] sm:$0xff] %v6632_v35   ;;  %7100 = vst [vmem:[%s7953_s29 + $0x3d0] sm:$0xff] %v6952_v37   ;;  %v4028_v48 = vadd.f32 %v8232_v10, %v2587_v38  ;;  %v4156_v52 = vadd.f32 %v8232_v10, %v3099_v39 }
 0x1c9   : > { %v7363_v40 = vpop.f32.mrf.mxu0  ;;  %v7491_v44 = vpop.f32.mrf.mxu1 }
 0x1ca   : > { %v4031_v43 = vadd.f32 %v8232_v10, %v7363_v40  ;;  %v4159_v46 = vadd.f32 %v8232_v10, %v7491_v44 }
 0x1cb   : > { %v2590_v47 = vpop.f32.mrf.mxu0  ;;  %v3102_v51 = vpop.f32.mrf.mxu1 }
 0x1cc   : > { %v6647_v49 = vpack.c.bf16 %v4031_v43, %v4030_v41  ;;  %v4029_v50 = vadd.f32 %v8232_v10, %v2590_v47  ;;  %v6967_v53 = vpack.c.bf16 %v4159_v46, %v4158_v45  ;;  %v4157_v54 = vadd.f32 %v8232_v10, %v3102_v51 }
 0x1cd   : > { %v7366_v55 = vpop.f32.mrf.mxu0  ;;  %v7494_v57 = vpop.f32.mrf.mxu1 }
 0x1ce   : > { %7039 = vst [vmem:[%s7953_s29 + $0x1e8] sm:$0xff] %v6647_v49   ;;  %v6642_v56 = vpack.c.bf16 %v4029_v50, %v4028_v48  ;;  %7103 = vst [vmem:[%s7953_s29 + $0x3e8] sm:$0xff] %v6967_v53   ;;  %v6962_v58 = vpack.c.bf16 %v4157_v54, %v4156_v52  ;;  %v4034_v62 = vadd.f32 %v8232_v10, %v7366_v55 }
 0x1cf   : > { %v2603_v59 = vpop.f32.mrf.mxu0  ;;  %v3115_v60 = vpop.f32.mrf.mxu1  ;;  %v4162_v1 = vadd.f32 %v8232_v10, %v7494_v57 }
 0x1d0   : > { %7038 = vst [vmem:[%s7953_s29 + $0x1e0] sm:$0xff] %v6642_v56   ;;  %7102 = vst [vmem:[%s7953_s29 + $0x3e0] sm:$0xff] %v6962_v58   ;;  %v4032_v4 = vadd.f32 %v8232_v10, %v2603_v59  ;;  %v4160_v8 = vadd.f32 %v8232_v10, %v3115_v60 }
 0x1d1   : > { %v7367_v61 = vpop.f32.mrf.mxu0  ;;  %v7495_v0 = vpop.f32.mrf.mxu1 }
 0x1d2   : > { %v4035_v63 = vadd.f32 %v8232_v10, %v7367_v61  ;;  %v4163_v2 = vadd.f32 %v8232_v10, %v7495_v0 }
 0x1d3   : > { %v2606_v3 = vpop.f32.mrf.mxu0  ;;  %v3118_v7 = vpop.f32.mrf.mxu1 }
 0x1d4   : > { %v6657_v5 = vpack.c.bf16 %v4035_v63, %v4034_v62  ;;  %v4033_v6 = vadd.f32 %v8232_v10, %v2606_v3  ;;  %v6977_v9 = vpack.c.bf16 %v4163_v2, %v4162_v1  ;;  %v4161_v11 = vadd.f32 %v8232_v10, %v3118_v7 }
 0x1d6   : > { %7041 = vst [vmem:[%s7953_s29 + $0x1f8] sm:$0xff] %v6657_v5   ;;  %v6652_v42 = vpack.c.bf16 %v4033_v6, %v4032_v4  ;;  %7105 = vst [vmem:[%s7953_s29 + $0x3f8] sm:$0xff] %v6977_v9   ;;  %v6972_v12 = vpack.c.bf16 %v4161_v11, %v4160_v8 }
 0x1d8   : > { %7040 = vst [vmem:[%s7953_s29 + $0x1f0] sm:$0xff] %v6652_v42   ;;  %7104 = vst [vmem:[%s7953_s29 + $0x3f0] sm:$0xff] %v6972_v12  }
 0x1d9 PF: > { %s13_s14 = sadd.s32 1, %s7677_s14   ;;  %s8403_s12 = smov %s7673_s13 }
 0x1da   : > { %p10_p5 = scmp.ge.s32.totalorder %s13_s14, 15   ;;  %s8404_s13 = smov %s8406_s15 }
 0x1dc   :  { %12 = sbr.rel (!%p10_p5) target bundleno = 2 (0x2), region = 76 }

// kernel: custom_net_forward.4
= control target key start
LH: loop header
LB: loop body
LE: loop exit
PB: predicated region body
PF: predicated region fallthrough
CT: control target
= control target key end

     0   :  { %s4376_s12 = smov 0   ;;  %s4378_s13 = smov 0   ;;  %s5220_s0 = inlined_call_operand.vmem [shape: bf16[6656,576], index: 0, kind: input, shape index: {}]   ;;  %s5221_s1 = inlined_call_operand.vmem [shape: bf16[576,128], index: 1, kind: input, shape index: {}]   ;;  %s5222_s2 = inlined_call_operand.vmem [shape: f32[1,128], index: 2, kind: input, shape index: {}]   ;;  %s5223_s3 = inlined_call_operand.vmem [shape: bf16[6656,128], index: 3, kind: output, shape index: {}]  }
   0x1   :  { %s4380_s14 = smov 0  }
   0x2 LB: > { %s32_s15 = sadd.s32 1, %s4349_s13  ;;  %p3350_p0 = scmp.ge.s32.totalorder %s4353_s14, 1  ;;  %s4353_s14 = sphi %s4380_s14, %s13_s14   ;;  %s4349_s13 = sphi %s4378_s13, %s5257_s13   ;;  %s4345_s12 = sphi %s4376_s12, %s5256_s12  }
   0x3   : > { %p34_p1 = scmp.ge.s32.totalorder %s32_s15, 13  ;;  %p191_p2 = scmp.lt.s32.totalorder %s4353_s14, 14 }
   0x5   : > { %s5259_s15 = smov (%p34_p1, %s32_s15), 0  ;;  %p192_p3 = pnand %p3350_p0, %p191_p2 }
   0x7   : > { %195 = sbr.rel (%p192_p3) target bundleno = 595 (0x253), region = 32 }
   0xc   : > { %v4071_v0 = vld [vmem:[%s5221_s1 + $0x38] sm:$0xff]   ;;  %v4355_v1 = vmov 0   ;;  %s3351_s18 = sshll.u32 %s4345_s12, 6  ;;  %v4072_v2 = vld [vmem:[%s5221_s1 + $0x30] sm:$0xff]   ;;  %v4073_v3 = vld [vmem:[%s5221_s1 + $0x28] sm:$0xff]   ;;  %vm1680_vm0 = vcmask 523264  }
   0xd   : > { %1777 = vmatprep.subr.bf16.mxu0 %v4355_v1  ;;  %4013 = vmatprep.subr.bf16.mxu1 %v4355_v1  ;;  %p236_p4 = scmp.lt.s32.totalorder %s3351_s18, 831  ;;  %v4074_v4 = vld [vmem:[%s5221_s1 + $0x20] sm:$0xff]   ;;  %v4075_v5 = vld [vmem:[%s5221_s1 + $0x18] sm:$0xff]   ;;  %v4076_v7 = vld [vmem:[%s5221_s1 + $0x10] sm:$0xff]  }
   0xe   : > { %1778 = vmatpush1.bf16.msra.mxu0 %v4071_v0  ;;  %4029 = vmatpush1.bf16.msra.mxu1 %v4071_v0  ;;  %v4077_v9 = vld [vmem:[%s5221_s1 + $0x8] sm:$0xff]   ;;  %v4078_v10 = vld [vmem:[%s5221_s1] sm:$0xff]   ;;  %v4079_v11 = vld [vmem:[%s5221_s1 + $0x78] sm:$0xff]  }
   0xf   : > { %1779 = vmatprep.subr.bf16.mxu0 %v4355_v1  ;;  %4014 = vmatprep.subr.bf16.mxu1 %v4355_v1  ;;  %s5261_s18 = smov (!%p236_p4, %s3351_s18), 831  ;;  %v4080_v12 = vld [vmem:[%s5221_s1 + $0x70] sm:$0xff]   ;;  %v4081_v13 = vld [vmem:[%s5221_s1 + $0x68] sm:$0xff]   ;;  %v4082_v14 = vld [vmem:[%s5221_s1 + $0x60] sm:$0xff]  }
  0x10   : > { %s4045_s25 = smul.u32 20, %s5261_s18  ;;  %v4083_v15 = vld [vmem:[%s5221_s1 + $0x58] sm:$0xff]   ;;  %v4084_v16 = vld [vmem:[%s5221_s1 + $0x50] sm:$0xff]   ;;  %v4085_v17 = vld [vmem:[%s5221_s1 + $0x48] sm:$0xff]   ;;  %s3354_s27 = sshll.u32 %s5261_s18, 2 }
  0x11   : > { %v4086_v18 = vld [vmem:[%s5221_s1 + $0x40] sm:$0xff]   ;;  %v4093_v19 = vld [vmem:[%s5221_s1 + $0x118] sm:$0xff]   ;;  %v4142_v25 = vld [vmem:[%s5221_s1 + $0x110] sm:$0xff]   ;;  %s4994_s4 = scalar_lea.vmem %s5223_s3, %s3354_s27 }
  0x12   : > { %1780 = vmatpush1.bf16.msra.mxu0 %v4072_v2  ;;  %4030 = vmatpush1.bf16.msra.mxu1 %v4072_v2  ;;  %s4423_s30 = scalar_lea.vmem %s5220_s0, %s4045_s25  ;;  %v4094_v22 = vld [vmem:[%s5221_s1 + $0xb8] sm:$0xff]   ;;  %v4095_v26 = vld [vmem:[%s5221_s1 + $0xb0] sm:$0xff]   ;;  %v4102_v29 = vld [vmem:[%s5221_s1 + $0xa8] sm:$0xff]  }
  0x13   : > { %1781 = vmatprep.subr.bf16.mxu0 %v4355_v1  ;;  %4015 = vmatprep.subr.bf16.mxu1 %v4355_v1  ;;  %v4089_v6 = vld [vmem:[%s4423_s30 + $0x4] ss:$20 sps:$4 sm:$0xff]   ;;  %v4087_v20 = vld [vmem:[%s4423_s30] ss:$20 sps:$4 sm:$0xff]   ;;  %v4100_v27 = vld [vmem:[%s4423_s30 + $0x28] ss:$20 sps:$4 sm:$0xff]  }
  0x14   : > { %v4092_v8 = vld [vmem:[%s4423_s30 + $0x3c4] ss:$20 sps:$4 sm:$0xff]   ;;  %1809 = vmatprep.mubr.bf16.mxu0 %v4089_v6  ;;  %v4090_v21 = vld [vmem:[%s4423_s30 + $0x3c0] ss:$20 sps:$4 sm:$0xff]   ;;  %v4101_v28 = vld [vmem:[%s4423_s30 + $0x3e8] ss:$20 sps:$4 sm:$0xff]  }
  0x15   : > { %2001 = vmatprep.mubr.bf16.mxu1 %v4092_v8  ;;  %v4096_v23 = vld [vmem:[%s4423_s30 + $0x2c] ss:$20 sps:$4 sm:$0xff]   ;;  %v4104_v31 = vld [vmem:[%s4423_s30 + $0x54] ss:$20 sps:$4 sm:$0xff]   ;;  %v4108_v34 = vld [vmem:[%s4423_s30 + $0x50] ss:$20 sps:$4 sm:$0xff]  }
  0x16   : > { %1782 = vmatpush1.bf16.msra.mxu0 %v4073_v3  ;;  %4031 = vmatpush1.bf16.msra.mxu1 %v4073_v3  ;;  %v4098_v24 = vld [vmem:[%s4423_s30 + $0x3ec] ss:$20 sps:$4 sm:$0xff]   ;;  %v4106_v32 = vld [vmem:[%s4423_s30 + $0x414] ss:$20 sps:$4 sm:$0xff]   ;;  %v4109_v35 = vld [vmem:[%s4423_s30 + $0x410] ss:$20 sps:$4 sm:$0xff]  }
  0x17   : > { %1783 = vmatprep.subr.bf16.mxu0 %v4355_v1  ;;  %4016 = vmatprep.subr.bf16.mxu1 %v4355_v1  ;;  %v4183_v30 = vld [vmem:[%s5221_s1 + $0x108] sm:$0xff]   ;;  %v4103_v33 = vld [vmem:[%s5221_s1 + $0xa0] sm:$0xff]   ;;  %v4110_v36 = vld [vmem:[%s5221_s1 + $0x98] sm:$0xff]  }
  0x18   : > { %v4112_v37 = vld [vmem:[%s4423_s30 + $0x7c] ss:$20 sps:$4 sm:$0xff]   ;;  %v4116_v40 = vld [vmem:[%s4423_s30 + $0x78] ss:$20 sps:$4 sm:$0xff]   ;;  %v4220_v44 = vld [vmem:[%s5221_s1 + $0x100] sm:$0xff]  }
  0x19   : > { %v4114_v38 = vld [vmem:[%s4423_s30 + $0x43c] ss:$20 sps:$4 sm:$0xff]   ;;  %v4117_v41 = vld [vmem:[%s4423_s30 + $0x438] ss:$20 sps:$4 sm:$0xff]   ;;  %v4119_v46 = vld [vmem:[%s5221_s1 + $0x80] sm:$0xff]  }
  0x1a   : > { %1784 = vmatpush1.bf16.msra.mxu0 %v4074_v4  ;;  %4032 = vmatpush1.bf16.msra.mxu1 %v4074_v4  ;;  %v4111_v39 = vld [vmem:[%s5221_s1 + $0x90] sm:$0xff]   ;;  %v4118_v42 = vld [vmem:[%s5221_s1 + $0x88] sm:$0xff]   ;;  %v4120_v43 = vld [vmem:[%s4423_s30 + $0xa4] ss:$20 sps:$4 sm:$0xff]  }
  0x1b   : > { %1785 = vmatprep.subr.bf16.mxu0 %v4355_v1  ;;  %4017 = vmatprep.subr.bf16.mxu1 %v4355_v1  ;;  %v4122_v45 = vld [vmem:[%s4423_s30 + $0x464] ss:$20 sps:$4 sm:$0xff]   ;;  %v4124_v47 = vld [vmem:[%s4423_s30 + $0xa0] ss:$20 sps:$4 sm:$0xff]   ;;  %v4132_v53 = vld [vmem:[%s4423_s30 + $0xc8] ss:$20 sps:$4 sm:$0xff]  }
  0x1c   : > { %v4125_v48 = vld [vmem:[%s4423_s30 + $0x460] ss:$20 sps:$4 sm:$0xff]   ;;  %v4126_v49 = vld [vmem:[%s5221_s1 + $0xf8] sm:$0xff]   ;;  %v4134_v55 = vld [vmem:[%s5221_s1 + $0xe8] sm:$0xff]  }
  0x1d   : > { %v4128_v50 = vld [vmem:[%s4423_s30 + $0xcc] ss:$20 sps:$4 sm:$0xff]   ;;  %v4127_v52 = vld [vmem:[%s5221_s1 + $0xf0] sm:$0xff]   ;;  %v4133_v54 = vld [vmem:[%s4423_s30 + $0x488] ss:$20 sps:$4 sm:$0xff]  }
  0x1e   : > { %1786 = vmatpush1.bf16.msra.mxu0 %v4075_v5  ;;  %4033 = vmatpush1.bf16.msra.mxu1 %v4075_v5  ;;  %v4130_v51 = vld [vmem:[%s4423_s30 + $0x48c] ss:$20 sps:$4 sm:$0xff]   ;;  %v4136_v56 = vld [vmem:[%s4423_s30 + $0xf4] ss:$20 sps:$4 sm:$0xff]   ;;  %v4140_v59 = vld [vmem:[%s4423_s30 + $0xf0] ss:$20 sps:$4 sm:$0xff]  }
  0x1f   : > { %1787 = vmatprep.subr.bf16.mxu0 %v4355_v1  ;;  %4018 = vmatprep.subr.bf16.mxu1 %v4355_v1  ;;  %v4138_v57 = vld [vmem:[%s4423_s30 + $0x4b4] ss:$20 sps:$4 sm:$0xff]   ;;  %v4135_v58 = vld [vmem:[%s5221_s1 + $0xe0] sm:$0xff]   ;;  %v4143_v61 = vld [vmem:[%s5221_s1 + $0xd8] sm:$0xff]  }
  0x20   : > { %v4141_v60 = vld [vmem:[%s4423_s30 + $0x4b0] ss:$20 sps:$4 sm:$0xff]   ;;  %v4149_v2 = vld [vmem:[%s4423_s30 + $0x118] ss:$20 sps:$4 sm:$0xff]   ;;  %v4155_v8 = vld [vmem:[%s4423_s30 + $0x8] ss:$20 sps:$4 sm:$0xff]  }
  0x21   : > { %v4145_v62 = vld [vmem:[%s4423_s30 + $0x11c] ss:$20 sps:$4 sm:$0xff]   ;;  %v4150_v3 = vld [vmem:[%s4423_s30 + $0x4d8] ss:$20 sps:$4 sm:$0xff]  }
  0x22   : > { %1788 = vmatpush1.bf16.msra.mxu0 %v4076_v7  ;;  %4034 = vmatpush1.bf16.msra.mxu1 %v4076_v7  ;;  %v4147_v63 = vld [vmem:[%s4423_s30 + $0x4dc] ss:$20 sps:$4 sm:$0xff]   ;;  %v4151_v4 = vld [vmem:[%s5221_s1 + $0xc8] sm:$0xff]   ;;  %v4153_v5 = vld [vmem:[%s4423_s30 + $0x144] ss:$20 sps:$4 sm:$0xff]  }
  0x23   : > { %1789 = vmatprep.subr.bf16.mxu0 %v4355_v1  ;;  %4019 = vmatprep.subr.bf16.mxu1 %v4355_v1  ;;  %v4144_v0 = vld [vmem:[%s5221_s1 + $0xd0] sm:$0xff]   ;;  %v4157_v6 = vld [vmem:[%s4423_s30 + $0xc] ss:$20 sps:$4 sm:$0xff]  }
  0x24   : > { %v4152_v7 = vld [vmem:[%s5221_s1 + $0xc0] sm:$0xff]  }
  0x26   : > { %1790 = vmatpush1.bf16.msra.mxu0 %v4077_v9  ;;  %4035 = vmatpush1.bf16.msra.mxu1 %v4077_v9  ;;  %v4158_v9 = vld [vmem:[%s4423_s30 + $0x140] ss:$20 sps:$4 sm:$0xff]  }
  0x27   : > { %1791 = vmatprep.subr.bf16.mxu0 %v4355_v1  ;;  %4020 = vmatprep.subr.bf16.mxu1 %v4355_v1 }
  0x2a   : > { %1792 = vmatpush1.bf16.msra.mxu0 %v4078_v10  ;;  %4036 = vmatpush1.bf16.msra.mxu1 %v4078_v10  ;;  %v4159_v10 = vld [vmem:[%s4423_s30 + $0x16c] ss:$20 sps:$4 sm:$0xff]  }
  0x2b   : > { %1793 = vmatprep.subr.bf16.mxu0 %v4355_v1  ;;  %4021 = vmatprep.subr.bf16.mxu1 %v4355_v1 }
  0x2e   : > { %1794 = vmatpush2.bf16.msra.mxu0 %v4079_v11  ;;  %4037 = vmatpush2.bf16.msra.mxu1 %v4079_v11  ;;  %v4161_v11 = vld [vmem:[%s4423_s30 + $0x34] ss:$20 sps:$4 sm:$0xff]  }
  0x2f   : > { %1795 = vmatprep.subr.bf16.mxu0 %v4355_v1  ;;  %4022 = vmatprep.subr.bf16.mxu1 %v4355_v1 }
  0x32   : > { %1796 = vmatpush2.bf16.msra.mxu0 %v4080_v12  ;;  %4038 = vmatpush2.bf16.msra.mxu1 %v4080_v12  ;;  %v4163_v12 = vld [vmem:[%s4423_s30 + $0x168] ss:$20 sps:$4 sm:$0xff]  }
  0x33   : > { %1797 = vmatprep.subr.bf16.mxu0 %v4355_v1  ;;  %4023 = vmatprep.subr.bf16.mxu1 %v4355_v1 }
  0x36   : > { %1798 = vmatpush2.bf16.msra.mxu0 %v4081_v13  ;;  %4039 = vmatpush2.bf16.msra.mxu1 %v4081_v13  ;;  %v4164_v13 = vld [vmem:[%s4423_s30 + $0x30] ss:$20 sps:$4 sm:$0xff]  }
  0x37   : > { %1799 = vmatprep.subr.bf16.mxu0 %v4355_v1  ;;  %4024 = vmatprep.subr.bf16.mxu1 %v4355_v1 }
  0x3a   : > { %1800 = vmatpush2.bf16.msra.mxu0 %v4082_v14  ;;  %4040 = vmatpush2.bf16.msra.mxu1 %v4082_v14  ;;  %v4165_v14 = vld [vmem:[%s4423_s30 + $0x194] ss:$20 sps:$4 sm:$0xff]  }
  0x3b   : > { %1801 = vmatprep.subr.bf16.mxu0 %v4355_v1  ;;  %4025 = vmatprep.subr.bf16.mxu1 %v4355_v1 }
  0x3e   : > { %1802 = vmatpush2.bf16.msra.mxu0 %v4083_v15  ;;  %4041 = vmatpush2.bf16.msra.mxu1 %v4083_v15  ;;  %v4169_v15 = vld [vmem:[%s4423_s30 + $0x190] ss:$20 sps:$4 sm:$0xff]  }
  0x3f   : > { %1803 = vmatprep.subr.bf16.mxu0 %v4355_v1  ;;  %4026 = vmatprep.subr.bf16.mxu1 %v4355_v1 }
  0x42   : > { %1804 = vmatpush2.bf16.msra.mxu0 %v4084_v16  ;;  %4042 = vmatpush2.bf16.msra.mxu1 %v4084_v16  ;;  %v4170_v16 = vld [vmem:[%s4423_s30 + $0x58] ss:$20 sps:$4 sm:$0xff]  }
  0x43   : > { %1805 = vmatprep.subr.bf16.mxu0 %v4355_v1  ;;  %4027 = vmatprep.subr.bf16.mxu1 %v4355_v1 }
  0x46   : > { %1806 = vmatpush2.bf16.msra.mxu0 %v4085_v17  ;;  %4043 = vmatpush2.bf16.msra.mxu1 %v4085_v17  ;;  %v4171_v17 = vld [vmem:[%s4423_s30 + $0x1bc] ss:$20 sps:$4 sm:$0xff]  }
  0x47   : > { %1807 = vmatprep.subr.bf16.mxu0 %v4355_v1  ;;  %4028 = vmatprep.subr.bf16.mxu1 %v4355_v1 }
  0x4a   : > { %1808 = vmatpush2.bf16.msra.mxu0 %v4086_v18  ;;  %4044 = vmatpush2.bf16.msra.mxu1 %v4086_v18  ;;  %v4173_v18 = vld [vmem:[%s4423_s30 + $0x84] ss:$20 sps:$4 sm:$0xff]  }
  0x4b   : > { %2066 = vmatprep.subr.bf16.mxu1 %v4355_v1  ;;  %3941 = vmatprep.subr.bf16.mxu0 %v4093_v19 }
  0x4d   : > { %1810 = vmatmul.mubr.bf16.vlgmr.msra.gmra.mxu0 %v4087_v20  ;;  %2002 = vmatmul.mubr.bf16.vlgmr.msra.gmra.mxu1 %v4090_v21  ;;  %v4176_v20 = vld [vmem:[%s4423_s30 + $0x80] ss:$20 sps:$4 sm:$0xff]   ;;  %v4177_v21 = vld [vmem:[%s4423_s30 + $0x1e4] ss:$20 sps:$4 sm:$0xff]  }
  0x4e   : > { %2067 = vmatpush1.bf16.msra.mxu1 %v4094_v22  ;;  %3942 = vmatpush3.bf16.msra.mxu0 %v4093_v19  ;;  %v4175_v19 = vld [vmem:[%s4423_s30 + $0x1b8] ss:$20 sps:$4 sm:$0xff]  }
  0x4f   : > { %2068 = vmatprep.subr.bf16.mxu1 %v4355_v1  ;;  %1817 = vmatprep.mubr.bf16.mxu0 %v4096_v23  ;;  %v4179_v22 = vld [vmem:[%s4423_s30 + $0xac] ss:$20 sps:$4 sm:$0xff]  }
  0x50   : > { %2009 = vmatprep.mubr.bf16.mxu1 %v4098_v24  ;;  %3943 = vmatprep.subr.bf16.mxu0 %v4142_v25  ;;  %v4181_v23 = vld [vmem:[%s4423_s30 + $0x1e0] ss:$20 sps:$4 sm:$0xff]   ;;  %v4182_v24 = vld [vmem:[%s4423_s30 + $0xa8] ss:$20 sps:$4 sm:$0xff]  }
  0x52   : > { %2069 = vmatpush1.bf16.msra.mxu1 %v4095_v26  ;;  %3944 = vmatpush3.bf16.msra.mxu0 %v4142_v25  ;;  %v4184_v25 = vld [vmem:[%s4423_s30 + $0x20c] ss:$20 sps:$4 sm:$0xff]   ;;  %v4186_v26 = vld [vmem:[%s4423_s30 + $0xd4] ss:$20 sps:$4 sm:$0xff]  }
  0x53   : > { %2070 = vmatprep.subr.bf16.mxu1 %v4355_v1  ;;  %3945 = vmatprep.subr.bf16.mxu0 %v4183_v30 }
  0x55   : > { %1818 = vmatmul.mubr.bf16.gmra.mxu0 %v4100_v27  ;;  %2010 = vmatmul.mubr.bf16.gmra.mxu1 %v4101_v28  ;;  %v4188_v27 = vld [vmem:[%s4423_s30 + $0x208] ss:$20 sps:$4 sm:$0xff]   ;;  %v4189_v28 = vld [vmem:[%s4423_s30 + $0xd0] ss:$20 sps:$4 sm:$0xff]  }
  0x56   : > { %2071 = vmatpush1.bf16.msra.mxu1 %v4102_v29  ;;  %1825 = vmatprep.mubr.bf16.mxu0 %v4104_v31  ;;  %v4190_v29 = vld [vmem:[%s4423_s30 + $0x234] ss:$20 sps:$4 sm:$0xff]   ;;  %v4194_v31 = vld [vmem:[%s4423_s30 + $0x230] ss:$20 sps:$4 sm:$0xff]  }
  0x57   : > { %2072 = vmatprep.subr.bf16.mxu1 %v4355_v1  ;;  %2017 = vmatprep.mubr.bf16.mxu1 %v4106_v32  ;;  %v4195_v32 = vld [vmem:[%s4423_s30 + $0xf8] ss:$20 sps:$4 sm:$0xff]  }
  0x58   : > { %3946 = vmatpush3.bf16.msra.mxu0 %v4183_v30  ;;  %v4192_v30 = vld [vmem:[%s4423_s30 + $0xfc] ss:$20 sps:$4 sm:$0xff]  }
  0x59   : > { %3947 = vmatprep.subr.bf16.mxu0 %v4220_v44 }
  0x5a   : > { %2073 = vmatpush1.bf16.msra.mxu1 %v4103_v33  ;;  %v4196_v33 = vld [vmem:[%s4423_s30 + $0x25c] ss:$20 sps:$4 sm:$0xff]  }
  0x5b   : > { %2074 = vmatprep.subr.bf16.mxu1 %v4355_v1 }
  0x5c   : > { %3948 = vmatpush3.bf16.msra.mxu0 %v4220_v44  ;;  %v4213_v44 = vld [vmem:[%s4423_s30 + $0x170] ss:$20 sps:$4 sm:$0xff]  }
  0x5d   : > { %1826 = vmatmul.mubr.bf16.gmra.mxu0 %v4108_v34  ;;  %2018 = vmatmul.mubr.bf16.gmra.mxu1 %v4109_v35  ;;  %v4198_v34 = vld [vmem:[%s4423_s30 + $0x124] ss:$20 sps:$4 sm:$0xff]  }
  0x5e   : > { %2075 = vmatpush1.bf16.msra.mxu1 %v4110_v36  ;;  %1833 = vmatprep.mubr.bf16.mxu0 %v4112_v37  ;;  %v4200_v35 = vld [vmem:[%s4423_s30 + $0x258] ss:$20 sps:$4 sm:$0xff]   ;;  %v4201_v36 = vld [vmem:[%s4423_s30 + $0x120] ss:$20 sps:$4 sm:$0xff]  }
  0x5f   : > { %2076 = vmatprep.subr.bf16.mxu1 %v4355_v1  ;;  %2025 = vmatprep.mubr.bf16.mxu1 %v4114_v38  ;;  %v4202_v37 = vld [vmem:[%s4423_s30 + $0x284] ss:$20 sps:$4 sm:$0xff]   ;;  %v4204_v38 = vld [vmem:[%s4423_s30 + $0x14c] ss:$20 sps:$4 sm:$0xff]  }
  0x62   : > { %2077 = vmatpush1.bf16.msra.mxu1 %v4111_v39  ;;  %v4206_v39 = vld [vmem:[%s4423_s30 + $0x280] ss:$20 sps:$4 sm:$0xff]  }
  0x63   : > { %2078 = vmatprep.subr.bf16.mxu1 %v4355_v1 }
  0x65   : > { %1834 = vmatmul.mubr.bf16.gmra.mxu0 %v4116_v40  ;;  %2026 = vmatmul.mubr.bf16.gmra.mxu1 %v4117_v41  ;;  %v4207_v40 = vld [vmem:[%s4423_s30 + $0x148] ss:$20 sps:$4 sm:$0xff]   ;;  %v4208_v41 = vld [vmem:[%s4423_s30 + $0x2ac] ss:$20 sps:$4 sm:$0xff]  }
  0x66   : > { %2079 = vmatpush1.bf16.msra.mxu1 %v4118_v42  ;;  %1841 = vmatprep.mubr.bf16.mxu0 %v4120_v43  ;;  %v4210_v42 = vld [vmem:[%s4423_s30 + $0x174] ss:$20 sps:$4 sm:$0xff]  }
  0x67   : > { %2080 = vmatprep.subr.bf16.mxu1 %v4355_v1  ;;  %2033 = vmatprep.mubr.bf16.mxu1 %v4122_v45  ;;  %v4212_v43 = vld [vmem:[%s4423_s30 + $0x2a8] ss:$20 sps:$4 sm:$0xff]  }
  0x68   : > { %v4214_v45 = vld [vmem:[%s4423_s30 + $0x2d4] ss:$20 sps:$4 sm:$0xff]  }
  0x6a   : > { %2081 = vmatpush1.bf16.msra.mxu1 %v4119_v46  ;;  %v4216_v46 = vld [vmem:[%s4423_s30 + $0x19c] ss:$20 sps:$4 sm:$0xff]  }
  0x6b   : > { %2082 = vmatprep.subr.bf16.mxu1 %v4355_v1 }
  0x6d   : > { %1842 = vmatmul.mubr.bf16.gmra.mxu0 %v4124_v47  ;;  %2034 = vmatmul.mubr.bf16.gmra.mxu1 %v4125_v48  ;;  %v4218_v47 = vld [vmem:[%s4423_s30 + $0x2d0] ss:$20 sps:$4 sm:$0xff]   ;;  %v4219_v48 = vld [vmem:[%s4423_s30 + $0x198] ss:$20 sps:$4 sm:$0xff]  }
  0x6e   : > { %2083 = vmatpush2.bf16.msra.mxu1 %v4126_v49  ;;  %1849 = vmatprep.mubr.bf16.mxu0 %v4128_v50  ;;  %v4221_v49 = vld [vmem:[%s4423_s30 + $0x2fc] ss:$20 sps:$4 sm:$0xff]   ;;  %v4223_v50 = vld [vmem:[%s4423_s30 + $0x1c4] ss:$20 sps:$4 sm:$0xff]  }
  0x6f   : > { %2084 = vmatprep.subr.bf16.mxu1 %v4355_v1  ;;  %2041 = vmatprep.mubr.bf16.mxu1 %v4130_v51  ;;  %v4225_v51 = vld [vmem:[%s4423_s30 + $0x2f8] ss:$20 sps:$4 sm:$0xff]  }
  0x72   : > { %2085 = vmatpush2.bf16.msra.mxu1 %v4127_v52  ;;  %v4226_v52 = vld [vmem:[%s4423_s30 + $0x1c0] ss:$20 sps:$4 sm:$0xff]  }
  0x73   : > { %2086 = vmatprep.subr.bf16.mxu1 %v4355_v1 }
  0x75   : > { %1850 = vmatmul.mubr.bf16.gmra.mxu0 %v4132_v53  ;;  %2042 = vmatmul.mubr.bf16.gmra.mxu1 %v4133_v54  ;;  %v4227_v53 = vld [vmem:[%s4423_s30 + $0x324] ss:$20 sps:$4 sm:$0xff]   ;;  %v4229_v54 = vld [vmem:[%s4423_s30 + $0x1ec] ss:$20 sps:$4 sm:$0xff]  }
  0x76   : > { %2087 = vmatpush2.bf16.msra.mxu1 %v4134_v55  ;;  %1857 = vmatprep.mubr.bf16.mxu0 %v4136_v56  ;;  %v4231_v55 = vld [vmem:[%s4423_s30 + $0x320] ss:$20 sps:$4 sm:$0xff]   ;;  %v4232_v56 = vld [vmem:[%s4423_s30 + $0x1e8] ss:$20 sps:$4 sm:$0xff]  }
  0x77   : > { %2088 = vmatprep.subr.bf16.mxu1 %v4355_v1  ;;  %2049 = vmatprep.mubr.bf16.mxu1 %v4138_v57  ;;  %v4233_v57 = vld [vmem:[%s4423_s30 + $0x34c] ss:$20 sps:$4 sm:$0xff]  }
  0x7a   : > { %2089 = vmatpush2.bf16.msra.mxu1 %v4135_v58  ;;  %v4235_v58 = vld [vmem:[%s4423_s30 + $0x214] ss:$20 sps:$4 sm:$0xff]  }
  0x7b   : > { %2090 = vmatprep.subr.bf16.mxu1 %v4355_v1 }
  0x7d   : > { %1858 = vmatmul.mubr.bf16.gmra.mxu0 %v4140_v59  ;;  %2050 = vmatmul.mubr.bf16.gmra.mxu1 %v4141_v60  ;;  %v4237_v59 = vld [vmem:[%s4423_s30 + $0x348] ss:$20 sps:$4 sm:$0xff]   ;;  %v4238_v60 = vld [vmem:[%s4423_s30 + $0x210] ss:$20 sps:$4 sm:$0xff]  }
  0x7e   : > { %2091 = vmatpush2.bf16.msra.mxu1 %v4143_v61  ;;  %1865 = vmatprep.mubr.bf16.mxu0 %v4145_v62  ;;  %v4239_v61 = vld [vmem:[%s4423_s30 + $0x374] ss:$20 sps:$4 sm:$0xff]   ;;  %v4241_v62 = vld [vmem:[%s4423_s30 + $0x23c] ss:$20 sps:$4 sm:$0xff]  }
  0x7f   : > { %2092 = vmatprep.subr.bf16.mxu1 %v4355_v1  ;;  %2057 = vmatprep.mubr.bf16.mxu1 %v4147_v63  ;;  %v4243_v63 = vld [vmem:[%s4423_s30 + $0x370] ss:$20 sps:$4 sm:$0xff]  }
  0x82   : > { %2093 = vmatpush2.bf16.msra.mxu1 %v4144_v0  ;;  %v4244_v0 = vld [vmem:[%s4423_s30 + $0x238] ss:$20 sps:$4 sm:$0xff]  }
  0x83   : > { %2094 = vmatprep.subr.bf16.mxu1 %v4355_v1 }
  0x85   : > { %1866 = vmatmul.mubr.bf16.gmra.mxu0 %v4149_v2  ;;  %2058 = vmatmul.mubr.bf16.gmra.mxu1 %v4150_v3  ;;  %v4245_v2 = vld [vmem:[%s4423_s30 + $0x39c] ss:$20 sps:$4 sm:$0xff]   ;;  %v4247_v3 = vld [vmem:[%s4423_s30 + $0x264] ss:$20 sps:$4 sm:$0xff]  }
  0x86   : > { %2095 = vmatpush2.bf16.msra.mxu1 %v4151_v4  ;;  %1873 = vmatprep.mubr.bf16.mxu0 %v4153_v5  ;;  %v4249_v4 = vld [vmem:[%s4423_s30 + $0x398] ss:$20 sps:$4 sm:$0xff]   ;;  %v4250_v5 = vld [vmem:[%s4423_s30 + $0x260] ss:$20 sps:$4 sm:$0xff]  }
  0x87   : > { %2096 = vmatprep.subr.bf16.mxu1 %v4355_v1  ;;  %2098 = vmatprep.mubr.bf16.mxu1 %v4157_v6  ;;  %v4167_v1 = vld [vmem:[%s4423_s30 + $0x5c] ss:$20 sps:$4 sm:$0xff]   ;;  %v4251_v6 = vld [vmem:[%s4423_s30 + $0x28c] ss:$20 sps:$4 sm:$0xff]  }
  0x8a   : > { %2097 = vmatpush2.bf16.msra.mxu1 %v4152_v7  ;;  %v4253_v7 = vld [vmem:[%s4423_s30 + $0x10] ss:$20 sps:$4 sm:$0xff]  }
  0x8d   : > { %1874 = vmatmul.mubr.bf16.gmra.mxu0 %v4158_v9  ;;  %2099 = vmatmul.mubr.bf16.vlgmr.msra.gmra.mxu1 %v4155_v8  ;;  %v4254_v8 = vld [vmem:[%s4423_s30 + $0x288] ss:$20 sps:$4 sm:$0xff]   ;;  %v4255_v9 = vld [vmem:[%s4423_s30 + $0x38] ss:$20 sps:$4 sm:$0xff]  }
  0x8e   : > { %1881 = vmatprep.mubr.bf16.mxu0 %v4159_v10  ;;  %2106 = vmatprep.mubr.bf16.mxu1 %v4161_v11  ;;  %v4256_v10 = vld [vmem:[%s4423_s30 + $0x2b4] ss:$20 sps:$4 sm:$0xff]  }
  0x8f   : > { %v4258_v11 = vld [vmem:[%s4423_s30 + $0x60] ss:$20 sps:$4 sm:$0xff]  }
  0x95   : > { %1882 = vmatmul.mubr.bf16.gmra.mxu0 %v4163_v12  ;;  %2107 = vmatmul.mubr.bf16.gmra.mxu1 %v4164_v13 }
  0x96   : > { %1889 = vmatprep.mubr.bf16.mxu0 %v4165_v14  ;;  %2114 = vmatprep.mubr.bf16.mxu1 %v4167_v1 }
  0x9d   : > { %1890 = vmatmul.mubr.bf16.gmra.mxu0 %v4169_v15  ;;  %2115 = vmatmul.mubr.bf16.gmra.mxu1 %v4170_v16 }
  0x9e   : > { %1897 = vmatprep.mubr.bf16.mxu0 %v4171_v17  ;;  %2122 = vmatprep.mubr.bf16.mxu1 %v4173_v18  ;;  %v4259_v17 = vld [vmem:[%s4423_s30 + $0x2b0] ss:$20 sps:$4 sm:$0xff]   ;;  %v4260_v18 = vld [vmem:[%s4423_s30 + $0x88] ss:$20 sps:$4 sm:$0xff]  }
  0xa5   : > { %1898 = vmatmul.mubr.bf16.gmra.mxu0 %v4175_v19  ;;  %2123 = vmatmul.mubr.bf16.gmra.mxu1 %v4176_v20  ;;  %v4261_v19 = vld [vmem:[%s4423_s30 + $0x2dc] ss:$20 sps:$4 sm:$0xff]  }
  0xa6   : > { %1905 = vmatprep.mubr.bf16.mxu0 %v4177_v21  ;;  %2130 = vmatprep.mubr.bf16.mxu1 %v4179_v22  ;;  %v4263_v20 = vld [vmem:[%s4423_s30 + $0xb0] ss:$20 sps:$4 sm:$0xff]  }
  0xad   : > { %1906 = vmatmul.mubr.bf16.gmra.mxu0 %v4181_v23  ;;  %2131 = vmatmul.mubr.bf16.gmra.mxu1 %v4182_v24 }
  0xae   : > { %1913 = vmatprep.mubr.bf16.mxu0 %v4184_v25  ;;  %2138 = vmatprep.mubr.bf16.mxu1 %v4186_v26 }
  0xb5   : > { %1914 = vmatmul.mubr.bf16.gmra.mxu0 %v4188_v27  ;;  %2139 = vmatmul.mubr.bf16.gmra.mxu1 %v4189_v28 }
  0xb6   : > { %1921 = vmatprep.mubr.bf16.mxu0 %v4190_v29  ;;  %2146 = vmatprep.mubr.bf16.mxu1 %v4192_v30  ;;  %v4264_v29 = vld [vmem:[%s4423_s30 + $0x2d8] ss:$20 sps:$4 sm:$0xff]  }
  0xb7   : > { %v4265_v30 = vld [vmem:[%s4423_s30 + $0xd8] ss:$20 sps:$4 sm:$0xff]  }
  0xbd   : > { %1922 = vmatmul.mubr.bf16.gmra.mxu0 %v4194_v31  ;;  %2147 = vmatmul.mubr.bf16.gmra.mxu1 %v4195_v32  ;;  %v4266_v31 = vld [vmem:[%s4423_s30 + $0x304] ss:$20 sps:$4 sm:$0xff]   ;;  %v4268_v32 = vld [vmem:[%s4423_s30 + $0x100] ss:$20 sps:$4 sm:$0xff]  }
  0xbe   : > { %1929 = vmatprep.mubr.bf16.mxu0 %v4196_v33  ;;  %2154 = vmatprep.mubr.bf16.mxu1 %v4198_v34 }
  0xc5   : > { %1930 = vmatmul.mubr.bf16.gmra.mxu0 %v4200_v35  ;;  %2155 = vmatmul.mubr.bf16.gmra.mxu1 %v4201_v36 }
  0xc6   : > { %1937 = vmatprep.mubr.bf16.mxu0 %v4202_v37  ;;  %2162 = vmatprep.mubr.bf16.mxu1 %v4204_v38 }
  0xcd   : > { %1938 = vmatmul.mubr.bf16.gmra.mxu0 %v4206_v39  ;;  %2163 = vmatmul.mubr.bf16.gmra.mxu1 %v4207_v40 }
  0xce   : > { %1945 = vmatprep.mubr.bf16.mxu0 %v4208_v41  ;;  %2170 = vmatprep.mubr.bf16.mxu1 %v4210_v42  ;;  %v4269_v41 = vld [vmem:[%s4423_s30 + $0x300] ss:$20 sps:$4 sm:$0xff]   ;;  %v4270_v42 = vld [vmem:[%s4423_s30 + $0x128] ss:$20 sps:$4 sm:$0xff]  }
  0xd5   : > { %1946 = vmatmul.mubr.bf16.gmra.mxu0 %v4212_v43  ;;  %2171 = vmatmul.mubr.bf16.gmra.mxu1 %v4213_v44  ;;  %v4273_v43 = vld [vmem:[%s4423_s30 + $0x32c] ss:$20 sps:$4 sm:$0xff]   ;;  %v4274_v44 = vld [vmem:[%s4423_s30 + $0x150] ss:$20 sps:$4 sm:$0xff]  }
  0xd6   : > { %1953 = vmatprep.mubr.bf16.mxu0 %v4214_v45  ;;  %2178 = vmatprep.mubr.bf16.mxu1 %v4216_v46 }
  0xdd   : > { %1954 = vmatmul.mubr.bf16.gmra.mxu0 %v4218_v47  ;;  %2179 = vmatmul.mubr.bf16.gmra.mxu1 %v4219_v48 }
  0xde   : > { %1961 = vmatprep.mubr.bf16.mxu0 %v4221_v49  ;;  %2186 = vmatprep.mubr.bf16.mxu1 %v4223_v50 }
  0xe5   : > { %1962 = vmatmul.mubr.bf16.gmra.mxu0 %v4225_v51  ;;  %2187 = vmatmul.mubr.bf16.gmra.mxu1 %v4226_v52 }
  0xe6   : > { %1969 = vmatprep.mubr.bf16.mxu0 %v4227_v53  ;;  %2194 = vmatprep.mubr.bf16.mxu1 %v4229_v54  ;;  %v4271_v53 = vld [vmem:[%s4423_s30 + $0x328] ss:$20 sps:$4 sm:$0xff]   ;;  %v4275_v54 = vld [vmem:[%s4423_s30 + $0x178] ss:$20 sps:$4 sm:$0xff]  }
  0xed   : > { %1970 = vmatmul.mubr.bf16.gmra.mxu0 %v4231_v55  ;;  %2195 = vmatmul.mubr.bf16.gmra.mxu1 %v4232_v56  ;;  %v4278_v55 = vld [vmem:[%s4423_s30 + $0x354] ss:$20 sps:$4 sm:$0xff]  }
  0xee   : > { %1977 = vmatprep.mubr.bf16.mxu0 %v4233_v57  ;;  %2202 = vmatprep.mubr.bf16.mxu1 %v4235_v58  ;;  %v4279_v56 = vld [vmem:[%s4423_s30 + $0x1a0] ss:$20 sps:$4 sm:$0xff]  }
  0xf5   : > { %1978 = vmatmul.mubr.bf16.gmra.mxu0 %v4237_v59  ;;  %2203 = vmatmul.mubr.bf16.gmra.mxu1 %v4238_v60 }
  0xf6   : > { %1985 = vmatprep.mubr.bf16.mxu0 %v4239_v61  ;;  %2210 = vmatprep.mubr.bf16.mxu1 %v4241_v62 }
  0xfd   : > { %1986 = vmatmul.mubr.bf16.gmra.mxu0 %v4243_v63  ;;  %2211 = vmatmul.mubr.bf16.gmra.mxu1 %v4244_v0 }
  0xfe   : > { %1993 = vmatprep.mubr.bf16.mxu0 %v4245_v2  ;;  %2218 = vmatprep.mubr.bf16.mxu1 %v4247_v3  ;;  %v4276_v2 = vld [vmem:[%s4423_s30 + $0x350] ss:$20 sps:$4 sm:$0xff]   ;;  %v4280_v3 = vld [vmem:[%s4423_s30 + $0x1c8] ss:$20 sps:$4 sm:$0xff]  }
 0x105   : > { %1994 = vmatmul.mubr.bf16.gmra.mxu0 %v4249_v4  ;;  %2219 = vmatmul.mubr.bf16.gmra.mxu1 %v4250_v5  ;;  %v4283_v4 = vld [vmem:[%s4423_s30 + $0x37c] ss:$20 sps:$4 sm:$0xff]  }
 0x106   : > { %2226 = vmatprep.mubr.bf16.mxu1 %v4251_v6  ;;  %3949 = vmatprep.mubr.msk.bf16.mxu0 %vm1680_vm0, %v4253_v7  ;;  %v4284_v5 = vld [vmem:[%s4423_s30 + $0x1f0] ss:$20 sps:$4 sm:$0xff]  }
 0x10d   : > { %v4661_v12 = vpop.f32.mrf.mxu0  ;;  %v4663_v13 = vpop.f32.mrf.mxu1  ;;  %2227 = vmatmul.mubr.bf16.gmra.mxu1 %v4254_v8  ;;  %3950 = vmatmul.mubr.msk.bf16.vlgmr.msra.gmra.mxu0 %vm1680_vm0, %v4255_v9 }
 0x10e   : > { %5224 = vst [vmem:[#allocation3_spill] sm:$0xff] %v4663_v13  ;;  %2234 = vmatprep.mubr.bf16.mxu1 %v4256_v10  ;;  %3953 = vmatprep.mubr.msk.bf16.mxu0 %vm1680_vm0, %v4258_v11 }
 0x10f   : > { %v1813_v14 = vpop.f32.mrf.mxu0  ;;  %v2005_v1 = vpop.f32.mrf.mxu1 }
 0x111   : > { %v4667_v15 = vpop.f32.mrf.mxu0  ;;  %v4669_v16 = vpop.f32.mrf.mxu1 }
 0x112   : > { %5225 = vst [vmem:[#allocation4_spill] sm:$0xff] %v4669_v16 }
 0x113   : > { %v1816_v21 = vpop.f32.mrf.mxu0  ;;  %v2008_v22 = vpop.f32.mrf.mxu1 }
 0x115   : > { %v4675_v23 = vpop.f32.mrf.mxu0  ;;  %v4677_v24 = vpop.f32.mrf.mxu1  ;;  %2235 = vmatmul.mubr.bf16.gmra.mxu1 %v4259_v17  ;;  %3954 = vmatmul.mubr.msk.bf16.gmra.mxu0 %vm1680_vm0, %v4260_v18  ;;  %v4281_v17 = vld [vmem:[%s4423_s30 + $0x378] ss:$20 sps:$4 sm:$0xff]  }
 0x116   : > { %5226 = vst [vmem:[#allocation5_spill] sm:$0xff] %v4677_v24  ;;  %2242 = vmatprep.mubr.bf16.mxu1 %v4261_v19  ;;  %3957 = vmatprep.mubr.msk.bf16.mxu0 %vm1680_vm0, %v4263_v20  ;;  %v4285_v18 = vld [vmem:[%s4423_s30 + $0x218] ss:$20 sps:$4 sm:$0xff]   ;;  %v4289_v20 = vld [vmem:[%s4423_s30 + $0x240] ss:$20 sps:$4 sm:$0xff]  }
 0x117   : > { %v1821_v25 = vpop.f32.mrf.mxu0  ;;  %v2013_v26 = vpop.f32.mrf.mxu1  ;;  %v4288_v19 = vld [vmem:[%s4423_s30 + $0x3a4] ss:$20 sps:$4 sm:$0xff]  }
 0x119   : > { %v4681_v27 = vpop.f32.mrf.mxu0  ;;  %v4683_v28 = vpop.f32.mrf.mxu1 }
 0x11a   : > { %5227 = vst [vmem:[#allocation6_spill] sm:$0xff] %v4683_v28 }
 0x11b   : > { %v1824_v33 = vpop.f32.mrf.mxu0  ;;  %v2016_v34 = vpop.f32.mrf.mxu1 }
 0x11c   : > { %v4286_v33 = vld [vmem:[%s4423_s30 + $0x3a0] ss:$20 sps:$4 sm:$0xff]   ;;  %v4290_v34 = vld [vmem:[%s4423_s30 + $0x268] ss:$20 sps:$4 sm:$0xff]  }
 0x11d   : > { %v4689_v35 = vpop.f32.mrf.mxu0  ;;  %v4691_v36 = vpop.f32.mrf.mxu1  ;;  %2243 = vmatmul.mubr.bf16.gmra.mxu1 %v4264_v29  ;;  %3958 = vmatmul.mubr.msk.bf16.gmra.mxu0 %vm1680_vm0, %v4265_v30 }
 0x11e   : > { %5228 = vst [vmem:[#allocation7_spill] sm:$0xff] %v4691_v36  ;;  %2250 = vmatprep.mubr.bf16.mxu1 %v4266_v31  ;;  %3961 = vmatprep.mubr.msk.bf16.mxu0 %vm1680_vm0, %v4268_v32 }
 0x11f   : > { %v1829_v37 = vpop.f32.mrf.mxu0  ;;  %v2021_v38 = vpop.f32.mrf.mxu1 }
 0x120   : > { %v4293_v37 = vld [vmem:[%s4423_s30 + $0x3cc] ss:$20 sps:$4 sm:$0xff]   ;;  %v4294_v38 = vld [vmem:[%s4423_s30 + $0x290] ss:$20 sps:$4 sm:$0xff]  }
 0x121   : > { %v4695_v39 = vpop.f32.mrf.mxu0  ;;  %v4697_v40 = vpop.f32.mrf.mxu1 }
 0x122   : > { %5229 = vst [vmem:[#allocation8_spill] sm:$0xff] %v4697_v40 }
 0x123   : > { %v1832_v45 = vpop.f32.mrf.mxu0  ;;  %v2024_v46 = vpop.f32.mrf.mxu1 }
 0x125   : > { %v4703_v47 = vpop.f32.mrf.mxu0  ;;  %v4705_v48 = vpop.f32.mrf.mxu1  ;;  %2251 = vmatmul.mubr.bf16.gmra.mxu1 %v4269_v41  ;;  %3962 = vmatmul.mubr.msk.bf16.gmra.mxu0 %vm1680_vm0, %v4270_v42 }
 0x126   : > { %5230 = vst [vmem:[#allocation9_spill] sm:$0xff] %v4705_v48  ;;  %2258 = vmatprep.mubr.bf16.mxu1 %v4273_v43  ;;  %3965 = vmatprep.mubr.msk.bf16.mxu0 %vm1680_vm0, %v4274_v44 }
 0x127   : > { %v1837_v49 = vpop.f32.mrf.mxu0  ;;  %v2029_v50 = vpop.f32.mrf.mxu1 }
 0x129   : > { %v4709_v51 = vpop.f32.mrf.mxu0  ;;  %v4711_v52 = vpop.f32.mrf.mxu1 }
 0x12a   : > { %5231 = vst [vmem:[#allocation10_spill] sm:$0xff] %v4711_v52 }
 0x12b   : > { %v1840_v57 = vpop.f32.mrf.mxu0  ;;  %v2032_v58 = vpop.f32.mrf.mxu1 }
 0x12d   : > { %v4717_v59 = vpop.f32.mrf.mxu0  ;;  %v4719_v60 = vpop.f32.mrf.mxu1  ;;  %2259 = vmatmul.mubr.bf16.gmra.mxu1 %v4271_v53  ;;  %3966 = vmatmul.mubr.msk.bf16.gmra.mxu0 %vm1680_vm0, %v4275_v54  ;;  %v4291_v53 = vld [vmem:[%s4423_s30 + $0x3c8] ss:$20 sps:$4 sm:$0xff]   ;;  %v4295_v54 = vld [vmem:[%s4423_s30 + $0x2b8] ss:$20 sps:$4 sm:$0xff]  }
 0x12e   : > { %5232 = vst [vmem:[#allocation11_spill] sm:$0xff] %v4719_v60  ;;  %2266 = vmatprep.mubr.bf16.mxu1 %v4278_v55  ;;  %3969 = vmatprep.mubr.msk.bf16.mxu0 %vm1680_vm0, %v4279_v56  ;;  %v4298_v55 = vld [vmem:[%s4423_s30 + $0x3f4] ss:$20 sps:$4 sm:$0xff]  }
 0x12f   : > { %v1845_v61 = vpop.f32.mrf.mxu0  ;;  %v2037_v62 = vpop.f32.mrf.mxu1  ;;  %v4299_v56 = vld [vmem:[%s4423_s30 + $0x2e0] ss:$20 sps:$4 sm:$0xff]  }
 0x131   : > { %v4723_v63 = vpop.f32.mrf.mxu0  ;;  %v4725_v0 = vpop.f32.mrf.mxu1 }
 0x132   : > { %5233 = vst [vmem:[#allocation12_spill] sm:$0xff] %v4725_v0 }
 0x133   : > { %v1848_v6 = vpop.f32.mrf.mxu0  ;;  %v2040_v7 = vpop.f32.mrf.mxu1 }
 0x134   : > { %v4296_v7 = vld [vmem:[%s4423_s30 + $0x3f0] ss:$20 sps:$4 sm:$0xff]  }
 0x135   : > { %v4731_v8 = vpop.f32.mrf.mxu0  ;;  %v4733_v9 = vpop.f32.mrf.mxu1  ;;  %2267 = vmatmul.mubr.bf16.gmra.mxu1 %v4276_v2  ;;  %3970 = vmatmul.mubr.msk.bf16.gmra.mxu0 %vm1680_vm0, %v4280_v3 }
 0x136   : > { %5234 = vst [vmem:[#allocation13_spill] sm:$0xff] %v4733_v9  ;;  %2274 = vmatprep.mubr.bf16.mxu1 %v4283_v4  ;;  %3973 = vmatprep.mubr.msk.bf16.mxu0 %vm1680_vm0, %v4284_v5 }
 0x137   : > { %v1853_v10 = vpop.f32.mrf.mxu0  ;;  %v2045_v11 = vpop.f32.mrf.mxu1 }
 0x138   : > { %v4300_v10 = vld [vmem:[%s4423_s30 + $0x308] ss:$20 sps:$4 sm:$0xff]  }
 0x139   : > { %v4737_v14 = vpop.f32.mrf.mxu0  ;;  %v4739_v1 = vpop.f32.mrf.mxu1 }
 0x13a   : > { %5235 = vst [vmem:[#allocation14_spill] sm:$0xff] %v4739_v1 }
 0x13b   : > { %v1856_v21 = vpop.f32.mrf.mxu0  ;;  %v2048_v22 = vpop.f32.mrf.mxu1 }
 0x13d   : > { %v4745_v25 = vpop.f32.mrf.mxu0  ;;  %v4747_v26 = vpop.f32.mrf.mxu1  ;;  %2275 = vmatmul.mubr.bf16.gmra.mxu1 %v4281_v17  ;;  %3974 = vmatmul.mubr.msk.bf16.gmra.mxu0 %vm1680_vm0, %v4285_v18  ;;  %v4303_v17 = vld [vmem:[%s4423_s30 + $0x41c] ss:$20 sps:$4 sm:$0xff]  }
 0x13e   : > { %5236 = vst [vmem:[#allocation15_spill] sm:$0xff] %v4747_v26  ;;  %2282 = vmatprep.mubr.bf16.mxu1 %v4288_v19  ;;  %3977 = vmatprep.mubr.msk.bf16.mxu0 %vm1680_vm0, %v4289_v20  ;;  %v4304_v18 = vld [vmem:[%s4423_s30 + $0x330] ss:$20 sps:$4 sm:$0xff]  }
 0x13f   : > { %v1861_v29 = vpop.f32.mrf.mxu0  ;;  %v2053_v30 = vpop.f32.mrf.mxu1 }
 0x141   : > { %v4751_v31 = vpop.f32.mrf.mxu0  ;;  %v4753_v32 = vpop.f32.mrf.mxu1 }
 0x142   : > { %5237 = vst [vmem:[#allocation16_spill] sm:$0xff] %v4753_v32 }
 0x143   : > { %v1864_v41 = vpop.f32.mrf.mxu0  ;;  %v2056_v42 = vpop.f32.mrf.mxu1 }
 0x144   : > { %v4308_v41 = vld [vmem:[%s4423_s30 + $0x444] ss:$20 sps:$4 sm:$0xff]   ;;  %v4309_v42 = vld [vmem:[%s4423_s30 + $0x380] ss:$20 sps:$4 sm:$0xff]  }
 0x145   : > { %v4759_v43 = vpop.f32.mrf.mxu0  ;;  %v4761_v44 = vpop.f32.mrf.mxu1  ;;  %2283 = vmatmul.mubr.bf16.gmra.mxu1 %v4286_v33  ;;  %3978 = vmatmul.mubr.msk.bf16.gmra.mxu0 %vm1680_vm0, %v4290_v34  ;;  %v4301_v34 = vld [vmem:[%s4423_s30 + $0x418] ss:$20 sps:$4 sm:$0xff]  }
 0x146   : > { %5238 = vst [vmem:[#allocation17_spill] sm:$0xff] %v4761_v44  ;;  %2290 = vmatprep.mubr.bf16.mxu1 %v4293_v37  ;;  %3981 = vmatprep.mubr.msk.bf16.mxu0 %vm1680_vm0, %v4294_v38  ;;  %v4305_v37 = vld [vmem:[%s4423_s30 + $0x358] ss:$20 sps:$4 sm:$0xff]  }
 0x147   : > { %v1869_v45 = vpop.f32.mrf.mxu0  ;;  %v2061_v46 = vpop.f32.mrf.mxu1 }
 0x149   : > { %v4765_v49 = vpop.f32.mrf.mxu0  ;;  %v4767_v50 = vpop.f32.mrf.mxu1 }
 0x14a   : > { %5239 = vst [vmem:[#allocation18_spill] sm:$0xff] %v4767_v50 }
 0x14b   : > { %v1872_v57 = vpop.f32.mrf.mxu0  ;;  %v2064_v58 = vpop.f32.mrf.mxu1 }
 0x14c   : > { %v4306_v58 = vld [vmem:[%s4423_s30 + $0x440] ss:$20 sps:$4 sm:$0xff]  }
 0x14d   : > { %v4773_v61 = vpop.f32.mrf.mxu0  ;;  %v2100_v62 = vpop.f32.mrf.mxu1  ;;  %2291 = vmatmul.mubr.bf16.gmra.mxu1 %v4291_v53  ;;  %3982 = vmatmul.mubr.msk.bf16.gmra.mxu0 %vm1680_vm0, %v4295_v54 }
 0x14e   : > { %v4777_v2 = vadd.f32 %v2100_v62, %v4661_v12  ;;  %2298 = vmatprep.mubr.bf16.mxu1 %v4298_v55  ;;  %3985 = vmatprep.mubr.msk.bf16.mxu0 %vm1680_vm0, %v4299_v56  ;;  %v4310_v62 = vld [vmem:[%s4423_s30 + $0x3a8] ss:$20 sps:$4 sm:$0xff]  }
 0x14f   : > { %v1877_v3 = vpop.f32.mrf.mxu0  ;;  %v2102_v4 = vpop.f32.mrf.mxu1 }
 0x150   : > { %v4313_v4 = vld [vmem:[%s4423_s30 + $0x46c] ss:$20 sps:$4 sm:$0xff]  }
 0x151   : > { %v4780_v5 = vpop.f32.mrf.mxu0  ;;  %v2103_v6 = vpop.f32.mrf.mxu1 }
 0x152   : > { %v4785_v11 = vadd.f32 %v2103_v6, %v4667_v15  ;;  %v4314_v6 = vld [vmem:[%s4423_s30 + $0x3d0] ss:$20 sps:$4 sm:$0xff]  }
 0x153   : > { %v1880_v19 = vpop.f32.mrf.mxu0  ;;  %v2105_v12 = vpop.f32.mrf.mxu1 }
 0x155   : > { %v4789_v20 = vpop.f32.mrf.mxu0  ;;  %v2108_v21 = vpop.f32.mrf.mxu1  ;;  %2299 = vmatmul.mubr.bf16.gmra.mxu1 %v4296_v7  ;;  %3986 = vmatmul.mubr.msk.bf16.gmra.mxu0 %vm1680_vm0, %v4300_v10 }
 0x156   : > { %v4793_v22 = vadd.f32 %v2108_v21, %v4675_v23  ;;  %2306 = vmatprep.mubr.bf16.mxu1 %v4303_v17  ;;  %3989 = vmatprep.mubr.msk.bf16.mxu0 %vm1680_vm0, %v4304_v18 }
 0x157   : > { %v1885_v15 = vpop.f32.mrf.mxu0  ;;  %v2110_v29 = vpop.f32.mrf.mxu1 }
 0x158   : > { %v4311_v15 = vld [vmem:[%s4423_s30 + $0x468] ss:$20 sps:$4 sm:$0xff]   ;;  %v4315_v29 = vld [vmem:[%s4423_s30 + $0x3f8] ss:$20 sps:$4 sm:$0xff]  }
 0x159   : > { %v4796_v30 = vpop.f32.mrf.mxu0  ;;  %v2111_v33 = vpop.f32.mrf.mxu1 }
 0x15a   : > { %v4801_v38 = vadd.f32 %v2111_v33, %v4681_v27 }
 0x15b   : > { %v1888_v45 = vpop.f32.mrf.mxu0  ;;  %v2113_v23 = vpop.f32.mrf.mxu1 }
 0x15d   : > { %v4805_v46 = vpop.f32.mrf.mxu0  ;;  %v2116_v53 = vpop.f32.mrf.mxu1  ;;  %2307 = vmatmul.mubr.bf16.gmra.mxu1 %v4301_v34  ;;  %3990 = vmatmul.mubr.msk.bf16.gmra.mxu0 %vm1680_vm0, %v4305_v37  ;;  %v4318_v34 = vld [vmem:[%s4423_s30 + $0x494] ss:$20 sps:$4 sm:$0xff]  }
 0x15e   : > { %v4809_v54 = vadd.f32 %v2116_v53, %v4689_v35  ;;  %2314 = vmatprep.mubr.bf16.mxu1 %v4308_v41  ;;  %3993 = vmatprep.mubr.msk.bf16.mxu0 %vm1680_vm0, %v4309_v42  ;;  %v4319_v37 = vld [vmem:[%s4423_s30 + $0x420] ss:$20 sps:$4 sm:$0xff]  }
 0x15f   : > { %v1893_v27 = vpop.f32.mrf.mxu0  ;;  %v2118_v55 = vpop.f32.mrf.mxu1 }
 0x161   : > { %v4812_v56 = vpop.f32.mrf.mxu0  ;;  %v2119_v57 = vpop.f32.mrf.mxu1 }
 0x162   : > { %v4817_v3 = vadd.f32 %v2119_v57, %v4695_v39  ;;  %v4316_v57 = vld [vmem:[%s4423_s30 + $0x490] ss:$20 sps:$4 sm:$0xff]  }
 0x163   : > { %v1896_v7 = vpop.f32.mrf.mxu0  ;;  %v2121_v35 = vpop.f32.mrf.mxu1 }
 0x165   : > { %v4821_v10 = vpop.f32.mrf.mxu0  ;;  %v2124_v17 = vpop.f32.mrf.mxu1  ;;  %2315 = vmatmul.mubr.bf16.gmra.mxu1 %v4306_v58  ;;  %3994 = vmatmul.mubr.msk.bf16.gmra.mxu0 %vm1680_vm0, %v4310_v62  ;;  %v4320_v58 = vld [vmem:[%s4423_s30 + $0x448] ss:$20 sps:$4 sm:$0xff]  }
 0x166   : > { %v4825_v18 = vadd.f32 %v2124_v17, %v4703_v47  ;;  %2322 = vmatprep.mubr.bf16.mxu1 %v4313_v4  ;;  %3997 = vmatprep.mubr.msk.bf16.mxu0 %vm1680_vm0, %v4314_v6  ;;  %v4323_v4 = vld [vmem:[%s4423_s30 + $0x4bc] ss:$20 sps:$4 sm:$0xff]  }
 0x167   : > { %v1901_v39 = vpop.f32.mrf.mxu0  ;;  %v2126_v19 = vpop.f32.mrf.mxu1  ;;  %v4324_v6 = vld [vmem:[%s4423_s30 + $0x470] ss:$20 sps:$4 sm:$0xff]  }
 0x169   : > { %v4828_v12 = vpop.f32.mrf.mxu0  ;;  %v2127_v21 = vpop.f32.mrf.mxu1 }
 0x16a   : > { %v4833_v33 = vadd.f32 %v2127_v21, %v4709_v51 }
 0x16b   : > { %v1904_v41 = vpop.f32.mrf.mxu0  ;;  %v2129_v47 = vpop.f32.mrf.mxu1 }
 0x16c   : > { %v4328_v41 = vld [vmem:[%s4423_s30 + $0x4e4] ss:$20 sps:$4 sm:$0xff]   ;;  %v4329_v47 = vld [vmem:[%s4423_s30 + $0x4c0] ss:$20 sps:$4 sm:$0xff]  }
 0x16d   : > { %v4837_v42 = vpop.f32.mrf.mxu0  ;;  %v2132_v45 = vpop.f32.mrf.mxu1  ;;  %2323 = vmatmul.mubr.bf16.gmra.mxu1 %v4311_v15  ;;  %3998 = vmatmul.mubr.msk.bf16.gmra.mxu0 %vm1680_vm0, %v4315_v29  ;;  %v4321_v29 = vld [vmem:[%s4423_s30 + $0x4b8] ss:$20 sps:$4 sm:$0xff]  }
 0x16e   : > { %v4841_v23 = vadd.f32 %v2132_v45, %v4717_v59  ;;  %2330 = vmatprep.mubr.bf16.mxu1 %v4318_v34  ;;  %4001 = vmatprep.mubr.msk.bf16.mxu0 %vm1680_vm0, %v4319_v37  ;;  %v4325_v34 = vld [vmem:[%s4423_s30 + $0x498] ss:$20 sps:$4 sm:$0xff]  }
 0x16f   : > { %v1909_v51 = vpop.f32.mrf.mxu0  ;;  %v2134_v53 = vpop.f32.mrf.mxu1 }
 0x171   : > { %v4844_v27 = vpop.f32.mrf.mxu0  ;;  %v2135_v55 = vpop.f32.mrf.mxu1 }
 0x172   : > { %v4849_v62 = vadd.f32 %v2135_v55, %v4723_v63 }
 0x173   : > { %v1912_v7 = vpop.f32.mrf.mxu0  ;;  %v2137_v59 = vpop.f32.mrf.mxu1 }
 0x174   : > { %v4330_v7 = vld [vmem:[%s4423_s30 + $0x4e8] ss:$20 sps:$4 sm:$0xff]  }
 0x175   : > { %v4853_v35 = vpop.f32.mrf.mxu0  ;;  %v2140_v17 = vpop.f32.mrf.mxu1  ;;  %2331 = vmatmul.mubr.bf16.gmra.mxu1 %v4316_v57  ;;  %4002 = vmatmul.mubr.msk.bf16.gmra.mxu0 %vm1680_vm0, %v4320_v58 }
 0x176   : > { %v4857_v39 = vadd.f32 %v2140_v17, %v4731_v8  ;;  %2338 = vmatprep.mubr.bf16.mxu1 %v4323_v4  ;;  %4005 = vmatprep.mubr.msk.bf16.mxu0 %vm1680_vm0, %v4324_v6  ;;  %v4326_v6 = vld [vmem:[%s4423_s30 + $0x4e0] ss:$20 sps:$4 sm:$0xff]  }
 0x177   : > { %v1917_v63 = vpop.f32.mrf.mxu0  ;;  %v2142_v19 = vpop.f32.mrf.mxu1 }
 0x179   : > { %v4860_v21 = vpop.f32.mrf.mxu0  ;;  %v2143_v15 = vpop.f32.mrf.mxu1 }
 0x17a   : > { %v4865_v37 = vadd.f32 %v2143_v15, %v4737_v14 }
 0x17b   : > { %v1920_v45 = vpop.f32.mrf.mxu0  ;;  %v2145_v8 = vpop.f32.mrf.mxu1 }
 0x17d   : > { %v4869_v51 = vpop.f32.mrf.mxu0  ;;  %v2148_v53 = vpop.f32.mrf.mxu1  ;;  %2339 = vmatmul.mubr.bf16.gmra.mxu1 %v4321_v29  ;;  %4006 = vmatmul.mubr.msk.bf16.gmra.mxu0 %vm1680_vm0, %v4325_v34 }
 0x17e   : > { %v4873_v55 = vadd.f32 %v2148_v53, %v4745_v25  ;;  %2346 = vmatprep.mubr.bf16.mxu1 %v4328_v41  ;;  %4009 = vmatprep.mubr.msk.bf16.mxu0 %vm1680_vm0, %v4329_v47 }
 0x17f   : > { %v1925_v14 = vpop.f32.mrf.mxu0  ;;  %v2150_v57 = vpop.f32.mrf.mxu1 }
 0x181   : > { %v4876_v58 = vpop.f32.mrf.mxu0  ;;  %v2151_v4 = vpop.f32.mrf.mxu1 }
 0x182   : > { %v4881_v59 = vadd.f32 %v2151_v4, %v4751_v31 }
 0x183   : > { %v1928_v17 = vpop.f32.mrf.mxu0  ;;  %v2153_v63 = vpop.f32.mrf.mxu1 }
 0x185   : > { %v4883_v19 = vpop.f32.mrf.mxu0  ;;  %v2156_v15 = vpop.f32.mrf.mxu1  ;;  %2347 = vmatmul.mubr.bf16.gmra.mxu1 %v4326_v6  ;;  %4010 = vmatmul.mubr.msk.bf16.gmra.mxu0 %vm1680_vm0, %v4330_v7 }
 0x186   : > { %v4887_v25 = vadd.f32 %v2156_v15, %v4759_v43 }
 0x187   : > { %v1933_v29 = vpop.f32.mrf.mxu0  ;;  %v2158_v34 = vpop.f32.mrf.mxu1 }
 0x189   : > { %v4889_v41 = vpop.f32.mrf.mxu0  ;;  %v2159_v47 = vpop.f32.mrf.mxu1 }
 0x18a   : > { %v4892_v45 = vadd.f32 %v2159_v47, %v4765_v49 }
 0x18b   : > { %v1936_v31 = vpop.f32.mrf.mxu0  ;;  %v2161_v8 = vpop.f32.mrf.mxu1 }
 0x18d   : > { %v4894_v53 = vpop.f32.mrf.mxu0  ;;  %v2164_v14 = vpop.f32.mrf.mxu1 }
 0x18e   : > { %v4897_v57 = vadd.f32 %v2164_v14, %v4773_v61 }
 0x18f   : > { %v1941_v4 = vpop.f32.mrf.mxu0  ;;  %v2166_v6 = vpop.f32.mrf.mxu1 }
 0x191   : > { %v4899_v43 = vpop.f32.mrf.mxu0  ;;  %v2167_v7 = vpop.f32.mrf.mxu1 }
 0x192   : > { %v4902_v17 = vadd.f32 %v2167_v7, %v4780_v5 }
 0x193   : > { %v1944_v63 = vpop.f32.mrf.mxu0  ;;  %v2169_v15 = vpop.f32.mrf.mxu1 }
 0x195   : > { %v4904_v49 = vpop.f32.mrf.mxu0  ;;  %v2172_v29 = vpop.f32.mrf.mxu1 }
 0x196   : > { %v4907_v34 = vadd.f32 %v2172_v29, %v4789_v20 }
 0x197   : > { %v1949_v47 = vpop.f32.mrf.mxu0  ;;  %v2174_v31 = vpop.f32.mrf.mxu1 }
 0x199   : > { %v4909_v61 = vpop.f32.mrf.mxu0  ;;  %v2175_v8 = vpop.f32.mrf.mxu1 }
 0x19a   : > { %v4912_v14 = vadd.f32 %v2175_v8, %v4796_v30 }
 0x19b   : > { %v1952_v4 = vpop.f32.mrf.mxu0  ;;  %v2177_v6 = vpop.f32.mrf.mxu1 }
 0x19d   : > { %v4914_v5 = vpop.f32.mrf.mxu0  ;;  %v2180_v7 = vpop.f32.mrf.mxu1 }
 0x19e   : > { %v4917_v63 = vadd.f32 %v2180_v7, %v4805_v46 }
 0x19f   : > { %v1957_v15 = vpop.f32.mrf.mxu0  ;;  %v2182_v50 = vpop.f32.mrf.mxu1 }
 0x1a1   : > { %v4919_v20 = vpop.f32.mrf.mxu0  ;;  %v2183_v29 = vpop.f32.mrf.mxu1 }
 0x1a2   : > { %v4922_v47 = vadd.f32 %v2183_v29, %v4812_v56 }
 0x1a3   : > { %v1960_v31 = vpop.f32.mrf.mxu0  ;;  %v2185_v32 = vpop.f32.mrf.mxu1 }
 0x1a5   : > { %v4924_v30 = vpop.f32.mrf.mxu0  ;;  %v2188_v8 = vpop.f32.mrf.mxu1 }
 0x1a6   : > { %v4927_v4 = vadd.f32 %v2188_v8, %v4821_v10 }
 0x1a7   : > { %v1965_v6 = vpop.f32.mrf.mxu0  ;;  %v2190_v26 = vpop.f32.mrf.mxu1 }
 0x1a9   : > { %v4929_v46 = vpop.f32.mrf.mxu0  ;;  %v2191_v7 = vpop.f32.mrf.mxu1 }
 0x1aa   : > { %v4932_v50 = vadd.f32 %v2191_v7, %v4828_v12 }
 0x1ab   : > { %v1968_v15 = vpop.f32.mrf.mxu0  ;;  %v2193_v44 = vpop.f32.mrf.mxu1 }
 0x1ad   : > { %v4934_v56 = vpop.f32.mrf.mxu0  ;;  %v2196_v29 = vpop.f32.mrf.mxu1 }
 0x1ae   : > { %v4937_v32 = vadd.f32 %v2196_v29, %v4837_v42 }
 0x1af   : > { %v1973_v31 = vpop.f32.mrf.mxu0  ;;  %v2198_v0 = vpop.f32.mrf.mxu1 }
 0x1b1   : > { %v4939_v10 = vpop.f32.mrf.mxu0  ;;  %v2199_v8 = vpop.f32.mrf.mxu1 }
 0x1b2   : > { %v4942_v26 = vadd.f32 %v2199_v8, %v4844_v27 }
 0x1b3   : > { %v1976_v6 = vpop.f32.mrf.mxu0  ;;  %v2201_v1 = vpop.f32.mrf.mxu1 }
 0x1b5   : > { %v4944_v12 = vpop.f32.mrf.mxu0  ;;  %v2204_v7 = vpop.f32.mrf.mxu1 }
 0x1b6   : > { %v4947_v44 = vadd.f32 %v2204_v7, %v4853_v35 }
 0x1b7   : > { %v1981_v15 = vpop.f32.mrf.mxu0  ;;  %v2206_v60 = vpop.f32.mrf.mxu1 }
 0x1b9   : > { %v4949_v42 = vpop.f32.mrf.mxu0  ;;  %v2207_v29 = vpop.f32.mrf.mxu1 }
 0x1ba   : > { %v4952_v0 = vadd.f32 %v2207_v29, %v4860_v21 }
 0x1bb   : > { %v1984_v31 = vpop.f32.mrf.mxu0  ;;  %v2209_v9 = vpop.f32.mrf.mxu1 }
 0x1bd   : > { %v4954_v27 = vpop.f32.mrf.mxu0  ;;  %v2212_v8 = vpop.f32.mrf.mxu1 }
 0x1be   : > { %v4957_v1 = vadd.f32 %v2212_v8, %v4869_v51 }
 0x1bf   : > { %v1989_v6 = vpop.f32.mrf.mxu0  ;;  %v2214_v40 = vpop.f32.mrf.mxu1 }
 0x1c1   : > { %v4959_v35 = vpop.f32.mrf.mxu0  ;;  %v2215_v7 = vpop.f32.mrf.mxu1 }
 0x1c2   : > { %v4962_v60 = vadd.f32 %v2215_v7, %v4876_v58 }
 0x1c3   : > { %v1992_v15 = vpop.f32.mrf.mxu0  ;;  %v2217_v52 = vpop.f32.mrf.mxu1 }
 0x1c5   : > { %v4964_v21 = vpop.f32.mrf.mxu0  ;;  %v2220_v29 = vpop.f32.mrf.mxu1 }
 0x1c6   : > { %v4967_v9 = vadd.f32 %v2220_v29, %v4883_v19 }
 0x1c7   : > { %v1997_v31 = vpop.f32.mrf.mxu0  ;;  %v2222_v36 = vpop.f32.mrf.mxu1 }
 0x1c8   : > { %v4980_v36 = vld [vmem:[%s5222_s2] ss:$0 sm:$0xff] }
 0x1c9   : > { %v4969_v51 = vpop.f32.mrf.mxu0  ;;  %v4971_v40 = vpop.f32.mrf.mxu1 }
 0x1cb   : > { %v2000_v8 = vpop.f32.mrf.mxu0  ;;  %v2225_v6 = vpop.f32.mrf.mxu1 }
 0x1cd   : > { %v2228_v48 = vpop.f32.mrf.mxu1  ;;  %v3951_v58 = vpop.f32.mrf.mxu0 }
 0x1ce   : > { %v4974_v7 = vadd.f32 %v2228_v48, %v4894_v53  ;;  %v2398_v16 = vadd.f32 %v3951_v58, %v4793_v22 }
 0x1cf   : > { %v2230_v52 = vpop.f32.mrf.mxu1  ;;  %v2389_v15 = vpop.f32.mrf.mxu0 }
 0x1d0   : > { %v2390_v31 = vadd.f32 %v2389_v15, %v4777_v2  ;;  %v2848_v52 = vadd.f32 %v4980_v36, %v2398_v16 }
 0x1d1   : > { %v2231_v19 = vpop.f32.mrf.mxu1  ;;  %v3952_v29 = vpop.f32.mrf.mxu0 }
 0x1d2   : > { %v4984_v8 = vadd.f32 %v2231_v19, %v4899_v43  ;;  %v2401_v48 = vadd.f32 %v3952_v29, %v4801_v38  ;;  %v2846_v38 = vadd.f32 %v4980_v36, %v2390_v31 }
 0x1d3   : > { %v2233_v53 = vpop.f32.mrf.mxu1  ;;  %v2392_v6 = vpop.f32.mrf.mxu0 }
 0x1d4   : > { %v2849_v22 = vadd.f32 %v4980_v36, %v2401_v48  ;;  %v2393_v58 = vadd.f32 %v2392_v6, %v4785_v11 }
 0x1d5   : > { %v4996_v2 = vpop.f32.mrf.mxu1  ;;  %v3955_v43 = vpop.f32.mrf.mxu0 }
 0x1d6   : > { %v3722_v15 = vpack.c.bf16 %v2849_v22, %v2848_v52  ;;  %v2847_v19 = vadd.f32 %v4980_v36, %v2393_v58  ;;  %v2414_v11 = vadd.f32 %v3955_v43, %v4825_v18 }
 0x1d7   : > { %v2238_v16 = vpop.f32.mrf.mxu1  ;;  %v2405_v29 = vpop.f32.mrf.mxu0 }
 0x1d8   : > { %3874 = vst [vmem:[%s4994_s4 + $0x8] sm:$0xff] %v3722_v15   ;;  %v3717_v48 = vpack.c.bf16 %v2847_v19, %v2846_v38  ;;  %v2406_v28 = vadd.f32 %v2405_v29, %v4809_v54  ;;  %v2852_v52 = vadd.f32 %v4980_v36, %v2414_v11 }
 0x1d9   : > { %v5002_v53 = vpop.f32.mrf.mxu1  ;;  %v3956_v6 = vpop.f32.mrf.mxu0 }
 0x1da   : > { %3718 = vst [vmem:[%s4994_s4] sm:$0xff] %v3717_v48   ;;  %v2417_v13 = vadd.f32 %v3956_v6, %v4833_v33  ;;  %v2850_v43 = vadd.f32 %v4980_v36, %v2406_v28 }
 0x1db   : > { %v2241_v24 = vpop.f32.mrf.mxu1  ;;  %v2408_v31 = vpop.f32.mrf.mxu0 }
 0x1dc   : > { %v2853_v22 = vadd.f32 %v4980_v36, %v2417_v13  ;;  %v2409_v58 = vadd.f32 %v2408_v31, %v4817_v3 }
 0x1dd   : > { %v5010_v38 = vpop.f32.mrf.mxu1  ;;  %v3959_v18 = vpop.f32.mrf.mxu0 }
 0x1de   : > { %v3732_v15 = vpack.c.bf16 %v2853_v22, %v2852_v52  ;;  %v2851_v19 = vadd.f32 %v4980_v36, %v2409_v58  ;;  %v2430_v33 = vadd.f32 %v3959_v18, %v4857_v39 }
 0x1df   : > { %v2246_v54 = vpop.f32.mrf.mxu1  ;;  %v2421_v16 = vpop.f32.mrf.mxu0 }
 0x1e0   : > { %3876 = vst [vmem:[%s4994_s4 + $0x18] sm:$0xff] %v3732_v15   ;;  %v3727_v24 = vpack.c.bf16 %v2851_v19, %v2850_v43  ;;  %v2422_v13 = vadd.f32 %v2421_v16, %v4841_v23  ;;  %v2856_v6 = vadd.f32 %v4980_v36, %v2430_v33 }
 0x1e1   : > { %v5016_v29 = vpop.f32.mrf.mxu1  ;;  %v3960_v48 = vpop.f32.mrf.mxu0 }
 0x1e2   : > { %3875 = vst [vmem:[%s4994_s4 + $0x10] sm:$0xff] %v3727_v24   ;;  %v2433_v3 = vadd.f32 %v3960_v48, %v4865_v37  ;;  %v2854_v58 = vadd.f32 %v4980_v36, %v2422_v13 }
 0x1e3   : > { %v2249_v11 = vpop.f32.mrf.mxu1  ;;  %v2424_v28 = vpop.f32.mrf.mxu0 }
 0x1e4   : > { %v2857_v31 = vadd.f32 %v4980_v36, %v2433_v3  ;;  %v2425_v52 = vadd.f32 %v2424_v28, %v4849_v62 }
 0x1e5   : > { %v5024_v22 = vpop.f32.mrf.mxu1  ;;  %v3963_v39 = vpop.f32.mrf.mxu0 }
 0x1e6   : > { %v3742_v18 = vpack.c.bf16 %v2857_v31, %v2856_v6  ;;  %v2855_v43 = vadd.f32 %v4980_v36, %v2425_v52  ;;  %v2446_v19 = vadd.f32 %v3963_v39, %v4887_v25 }
 0x1e7   : > { %v2254_v23 = vpop.f32.mrf.mxu1  ;;  %v2437_v15 = vpop.f32.mrf.mxu0 }
 0x1e8   : > { %3878 = vst [vmem:[%s4994_s4 + $0x28] sm:$0xff] %v3742_v18   ;;  %v3737_v37 = vpack.c.bf16 %v2855_v43, %v2854_v58  ;;  %v2438_v62 = vadd.f32 %v2437_v15, %v4873_v55  ;;  %v2860_v13 = vadd.f32 %v4980_v36, %v2446_v19 }
 0x1e9   : > { %v5030_v54 = vpop.f32.mrf.mxu1  ;;  %v3964_v16 = vpop.f32.mrf.mxu0 }
 0x1ea   : > { %3877 = vst [vmem:[%s4994_s4 + $0x20] sm:$0xff] %v3737_v37   ;;  %v2449_v24 = vadd.f32 %v3964_v16, %v4892_v45  ;;  %v2858_v6 = vadd.f32 %v4980_v36, %v2438_v62 }
 0x1eb   : > { %v2257_v33 = vpop.f32.mrf.mxu1  ;;  %v2440_v48 = vpop.f32.mrf.mxu0 }
 0x1ec   : > { %v2861_v3 = vadd.f32 %v4980_v36, %v2449_v24  ;;  %v2441_v11 = vadd.f32 %v2440_v48, %v4881_v59 }
 0x1ed   : > { %v5038_v28 = vpop.f32.mrf.mxu1  ;;  %v3967_v25 = vpop.f32.mrf.mxu0 }
 0x1ee   : > { %v3752_v31 = vpack.c.bf16 %v2861_v3, %v2860_v13  ;;  %v2859_v52 = vadd.f32 %v4980_v36, %v2441_v11  ;;  %v2462_v58 = vadd.f32 %v3967_v25, %v4907_v34 }
 0x1ef   : > { %v2262_v55 = vpop.f32.mrf.mxu1  ;;  %v2453_v39 = vpop.f32.mrf.mxu0 }
 0x1f0   : > { %3880 = vst [vmem:[%s4994_s4 + $0x38] sm:$0xff] %v3752_v31   ;;  %v3747_v45 = vpack.c.bf16 %v2859_v52, %v2858_v6  ;;  %v2454_v59 = vadd.f32 %v2453_v39, %v4897_v57  ;;  %v2864_v19 = vadd.f32 %v4980_v36, %v2462_v58 }
 0x1f1   : > { %v5044_v18 = vpop.f32.mrf.mxu1  ;;  %v3968_v43 = vpop.f32.mrf.mxu0 }
 0x1f2   : > { %3879 = vst [vmem:[%s4994_s4 + $0x30] sm:$0xff] %v3747_v45   ;;  %v2465_v23 = vadd.f32 %v3968_v43, %v4912_v14  ;;  %v2862_v33 = vadd.f32 %v4980_v36, %v2454_v59 }
 0x1f3   : > { %v2265_v15 = vpop.f32.mrf.mxu1  ;;  %v2456_v37 = vpop.f32.mrf.mxu0 }
 0x1f4   : > { %v2865_v16 = vadd.f32 %v4980_v36, %v2465_v23  ;;  %v2457_v62 = vadd.f32 %v2456_v37, %v4902_v17 }
 0x1f5   : > { %v5052_v24 = vpop.f32.mrf.mxu1  ;;  %v3971_v34 = vpop.f32.mrf.mxu0 }
 0x1f6   : > { %v3762_v48 = vpack.c.bf16 %v2865_v16, %v2864_v19  ;;  %v2863_v13 = vadd.f32 %v4980_v36, %v2457_v62  ;;  %v2478_v11 = vadd.f32 %v3971_v34, %v4927_v4 }
 0x1f7   : > { %v2270_v57 = vpop.f32.mrf.mxu1  ;;  %v2469_v3 = vpop.f32.mrf.mxu0 }
 0x1f8   : > { %3882 = vst [vmem:[%s4994_s4 + $0x48] sm:$0xff] %v3762_v48   ;;  %v3757_v14 = vpack.c.bf16 %v2863_v13, %v2862_v33  ;;  %v2470_v17 = vadd.f32 %v2469_v3, %v4917_v63  ;;  %v2868_v39 = vadd.f32 %v4980_v36, %v2478_v11 }
 0x1f9   : > { %v5058_v25 = vpop.f32.mrf.mxu1  ;;  %v3972_v6 = vpop.f32.mrf.mxu0 }
 0x1fa   : > { %3881 = vst [vmem:[%s4994_s4 + $0x40] sm:$0xff] %v3757_v14   ;;  %v2481_v31 = vadd.f32 %v3972_v6, %v4932_v50  ;;  %v2866_v59 = vadd.f32 %v4980_v36, %v2470_v17 }
 0x1fb   : > { %v2273_v52 = vpop.f32.mrf.mxu1  ;;  %v2472_v55 = vpop.f32.mrf.mxu0 }
 0x1fc   : > { %v2869_v45 = vadd.f32 %v4980_v36, %v2481_v31  ;;  %v2473_v58 = vadd.f32 %v2472_v55, %v4922_v47 }
 0x1fd   : > { %v5066_v43 = vpop.f32.mrf.mxu1  ;;  %v3975_v4 = vpop.f32.mrf.mxu0 }
 0x1fe   : > { %v3772_v23 = vpack.c.bf16 %v2869_v45, %v2868_v39  ;;  %v2867_v15 = vadd.f32 %v4980_v36, %v2473_v58  ;;  %v2494_v19 = vadd.f32 %v3975_v4, %v4947_v44 }
 0x1ff   : > { %v2278_v63 = vpop.f32.mrf.mxu1  ;;  %v2485_v37 = vpop.f32.mrf.mxu0 }
 0x200   : > { %3884 = vst [vmem:[%s4994_s4 + $0x58] sm:$0xff] %v3772_v23   ;;  %v3767_v50 = vpack.c.bf16 %v2867_v15, %v2866_v59  ;;  %v2486_v47 = vadd.f32 %v2485_v37, %v4937_v32  ;;  %v2872_v13 = vadd.f32 %v4980_v36, %v2494_v19  ;;  %v2237_v63 = vadd.f32 %v4996_v2, %v4904_v49 }
 0x201   : > { %v5072_v16 = vpop.f32.mrf.mxu1  ;;  %v3976_v62 = vpop.f32.mrf.mxu0 }
 0x202   : > { %3883 = vst [vmem:[%s4994_s4 + $0x50] sm:$0xff] %v3767_v50   ;;  %v2497_v34 = vadd.f32 %v3976_v62, %v4952_v0  ;;  %v2870_v11 = vadd.f32 %v4980_v36, %v2486_v47  ;;  %v2224_v0 = vadd.f32 %v4971_v40, %v4889_v41  ;;  %v2240_v47 = vadd.f32 %v5002_v53, %v4909_v61 }
 0x203   : > { %v2281_v33 = vpop.f32.mrf.mxu1  ;;  %v2488_v48 = vpop.f32.mrf.mxu0 }
 0x204   : > { %v2873_v57 = vadd.f32 %v4980_v36, %v2497_v34  ;;  %v2489_v3 = vadd.f32 %v2488_v48, %v4942_v26 }
 0x205   : > { %v5080_v14 = vpop.f32.mrf.mxu1  ;;  %v3979_v44 = vpop.f32.mrf.mxu0 }
 0x206   : > { %v3782_v6 = vpack.c.bf16 %v2873_v57, %v2872_v13  ;;  %v2871_v17 = vadd.f32 %v4980_v36, %v2489_v3  ;;  %v2510_v55 = vadd.f32 %v3979_v44, %v4967_v9 }
 0x207   : > { %v2286_v32 = vpop.f32.mrf.mxu1  ;;  %v2501_v31 = vpop.f32.mrf.mxu0 }
 0x208   : > { %3886 = vst [vmem:[%s4994_s4 + $0x68] sm:$0xff] %v3782_v6   ;;  %v3777_v52 = vpack.c.bf16 %v2871_v17, %v2870_v11  ;;  %v2502_v45 = vadd.f32 %v2501_v31, %v4957_v1  ;;  %v2876_v23 = vadd.f32 %v4980_v36, %v2510_v55  ;;  %v2253_v6 = vadd.f32 %v5024_v22, %v4924_v30 }
 0x209   : > { %v5088_v39 = vpop.f32.mrf.mxu1  ;;  %v3980_v26 = vpop.f32.mrf.mxu0  ;;  %v2248_v30 = vadd.f32 %v5016_v29, %v4919_v20 }
 0x20a   : > { %3885 = vst [vmem:[%s4994_s4 + $0x60] sm:$0xff] %v3777_v52   ;;  %v2513_v58 = vadd.f32 %v3980_v26, %v2224_v0  ;;  %v2874_v37 = vadd.f32 %v4980_v36, %v2502_v45  ;;  %v2245_v52 = vadd.f32 %v5010_v38, %v4914_v5 }
 0x20b   : > { %v2289_v4 = vpop.f32.mrf.mxu1  ;;  %v2504_v59 = vpop.f32.mrf.mxu0 }
 0x20c   : > { %v2877_v15 = vadd.f32 %v4980_v36, %v2513_v58  ;;  %v2505_v41 = vadd.f32 %v2504_v59, %v4962_v60 }
 0x20d   : > { %v5095_v40 = vpop.f32.mrf.mxu1  ;;  %v3983_v9 = vpop.f32.mrf.mxu0 }
 0x20e   : > { %v3792_v1 = vpack.c.bf16 %v2877_v15, %v2876_v23  ;;  %v2875_v50 = vadd.f32 %v4980_v36, %v2505_v41  ;;  %v2526_v33 = vadd.f32 %v3983_v9, %v2237_v63  ;;  %v2269_v41 = vadd.f32 %v5052_v24, %v4944_v12 }
 0x20f   : > { %v2294_v19 = vpop.f32.mrf.mxu1  ;;  %v2517_v62 = vpop.f32.mrf.mxu0  ;;  %v2264_v12 = vadd.f32 %v5044_v18, %v4939_v10 }
 0x210   : > { %3888 = vst [vmem:[%s4994_s4 + $0x78] sm:$0xff] %v3792_v1   ;;  %v3787_v34 = vpack.c.bf16 %v2875_v50, %v2874_v37  ;;  %v2518_v13 = vadd.f32 %v2517_v62, %v4974_v7  ;;  %v2880_v3 = vadd.f32 %v4980_v36, %v2526_v33  ;;  %v2261_v1 = vadd.f32 %v5038_v28, %v4934_v56 }
 0x211   : > { %v5104_v60 = vpop.f32.mrf.mxu1  ;;  %v3984_v48 = vpop.f32.mrf.mxu0  ;;  %v2272_v50 = vadd.f32 %v5058_v25, %v4949_v42 }
 0x212   : > { %3887 = vst [vmem:[%s4994_s4 + $0x70] sm:$0xff] %v3787_v34   ;;  %v2529_v49 = vadd.f32 %v3984_v48, %v2240_v47  ;;  %v2878_v17 = vadd.f32 %v4980_v36, %v2518_v13 }
 0x213   : > { %v2297_v2 = vpop.f32.mrf.mxu1  ;;  %v2520_v57 = vpop.f32.mrf.mxu0 }
 0x214   : > { %v2881_v44 = vadd.f32 %v4980_v36, %v2529_v49  ;;  %v2521_v11 = vadd.f32 %v2520_v57, %v4984_v8  ;;  %v2256_v8 = vadd.f32 %v5030_v54, %v4929_v46  ;;  %v2285_v2 = vadd.f32 %v5080_v14, %v4964_v21 }
 0x215   : > { %v5111_v61 = vpop.f32.mrf.mxu1  ;;  %v3987_v53 = vpop.f32.mrf.mxu0  ;;  %v2280_v21 = vadd.f32 %v5072_v16, %v4959_v35 }
 0x216   : > { %v3802_v7 = vpack.c.bf16 %v2881_v44, %v2880_v3  ;;  %v2879_v32 = vadd.f32 %v4980_v36, %v2521_v11  ;;  %v2542_v26 = vadd.f32 %v3987_v53, %v2253_v6  ;;  %v2277_v11 = vadd.f32 %v5066_v43, %v4954_v27 }
 0x217   : > { %v2302_v31 = vpop.f32.mrf.mxu1  ;;  %v2533_v0 = vpop.f32.mrf.mxu0  ;;  %v2288_v53 = vadd.f32 %v5088_v39, %v4969_v51 }
 0x218   : > { %3890 = vst [vmem:[%s4994_s4 + $0x88] sm:$0xff] %v3802_v7   ;;  %v3797_v55 = vpack.c.bf16 %v2879_v32, %v2878_v17  ;;  %v2534_v22 = vadd.f32 %v2533_v0, %v2245_v52  ;;  %v2884_v5 = vadd.f32 %v4980_v36, %v2542_v26 }
 0x219   : > { %v5122_v45 = vpop.f32.mrf.mxu1  ;;  %v3988_v58 = vpop.f32.mrf.mxu0 }
 0x21a   : > { %3889 = vst [vmem:[%s4994_s4 + $0x80] sm:$0xff] %v3797_v55   ;;  %v2545_v4 = vadd.f32 %v3988_v58, %v2256_v8  ;;  %v2882_v20 = vadd.f32 %v4980_v36, %v2534_v22  ;;  %v5240_v55 = vld [vmem:[#allocation5_spill] sm:$0xff] }
 0x21b   : > { %v2305_v59 = vpop.f32.mrf.mxu1  ;;  %v2536_v23 = vpop.f32.mrf.mxu0  ;;  %v2301_v26 = vadd.f32 %v5111_v61, %v5240_v55 }
 0x21c   : > { %v2885_v38 = vadd.f32 %v4980_v36, %v2545_v4  ;;  %v2537_v46 = vadd.f32 %v2536_v23, %v2248_v30  ;;  %v5241_v4 = vld [vmem:[#allocation3_spill] sm:$0xff]  ;;  %v5242_v23 = vld [vmem:[#allocation6_spill] sm:$0xff] }
 0x21d   : > { %v5129_v54 = vpop.f32.mrf.mxu1  ;;  %v3991_v15 = vpop.f32.mrf.mxu0  ;;  %v2293_v59 = vadd.f32 %v5095_v40, %v5241_v4 }
 0x21e   : > { %v3812_v29 = vpack.c.bf16 %v2885_v38, %v2884_v5  ;;  %v2883_v9 = vadd.f32 %v4980_v36, %v2537_v46  ;;  %v2558_v62 = vadd.f32 %v3991_v15, %v2269_v41  ;;  %v2304_v5 = vadd.f32 %v5122_v45, %v5242_v23 }
 0x21f   : > { %v2310_v63 = vpop.f32.mrf.mxu1  ;;  %v2549_v37 = vpop.f32.mrf.mxu0 }
 0x220   : > { %3892 = vst [vmem:[%s4994_s4 + $0x98] sm:$0xff] %v3812_v29   ;;  %v3807_v19 = vpack.c.bf16 %v2883_v9, %v2882_v20  ;;  %v2550_v24 = vadd.f32 %v2549_v37, %v2261_v1  ;;  %v2888_v56 = vadd.f32 %v4980_v36, %v2558_v62  ;;  %v5243_v20 = vld [vmem:[#allocation4_spill] sm:$0xff]  ;;  %v5244_v62 = vld [vmem:[#allocation9_spill] sm:$0xff] }
 0x221   : > { %v5140_v47 = vpop.f32.mrf.mxu1  ;;  %v3992_v34 = vpop.f32.mrf.mxu0  ;;  %v2296_v61 = vadd.f32 %v5104_v60, %v5243_v20 }
 0x222   : > { %3891 = vst [vmem:[%s4994_s4 + $0x90] sm:$0xff] %v3807_v19   ;;  %v2561_v33 = vadd.f32 %v3992_v34, %v2272_v50  ;;  %v2886_v57 = vadd.f32 %v4980_v36, %v2550_v24 }
 0x223   : > { %v2313_v48 = vpop.f32.mrf.mxu1  ;;  %v2552_v13 = vpop.f32.mrf.mxu0 }
 0x224   : > { %v2889_v28 = vadd.f32 %v4980_v36, %v2561_v33  ;;  %v2553_v42 = vadd.f32 %v2552_v13, %v2264_v12  ;;  %v5245_v13 = vld [vmem:[#allocation7_spill] sm:$0xff] }
 0x225   : > { %v2316_v25 = vpop.f32.mrf.mxu1  ;;  %v3995_v49 = vpop.f32.mrf.mxu0 }
 0x226   : > { %v3822_v10 = vpack.c.bf16 %v2889_v28, %v2888_v56  ;;  %v2887_v18 = vadd.f32 %v4980_v36, %v2553_v42  ;;  %v2574_v17 = vadd.f32 %v3995_v49, %v2285_v2  ;;  %v2317_v34 = vadd.f32 %v2316_v25, %v5244_v62  ;;  %v5246_v28 = vld [vmem:[#allocation10_spill] sm:$0xff] }
 0x227   : > { %v2318_v3 = vpop.f32.mrf.mxu1  ;;  %v2565_v44 = vpop.f32.mrf.mxu0  ;;  %v2309_v56 = vadd.f32 %v5129_v54, %v5245_v13 }
 0x228   : > { %3894 = vst [vmem:[%s4994_s4 + $0xa8] sm:$0xff] %v3822_v10   ;;  %v3817_v6 = vpack.c.bf16 %v2887_v18, %v2886_v57  ;;  %v2566_v14 = vadd.f32 %v2565_v44, %v2277_v11  ;;  %v2892_v8 = vadd.f32 %v4980_v36, %v2574_v17  ;;  %v5247_v18 = vld [vmem:[#allocation8_spill] sm:$0xff] }
 0x229   : > { %v2319_v7 = vpop.f32.mrf.mxu1  ;;  %v3996_v32 = vpop.f32.mrf.mxu0  ;;  %v2312_v25 = vadd.f32 %v5140_v47, %v5247_v18 }
 0x22a   : > { %3893 = vst [vmem:[%s4994_s4 + $0xa0] sm:$0xff] %v3817_v6   ;;  %v2577_v31 = vadd.f32 %v3996_v32, %v2288_v53  ;;  %v2890_v58 = vadd.f32 %v4980_v36, %v2566_v14  ;;  %v2320_v42 = vadd.f32 %v2319_v7, %v5246_v28 }
 0x22b   : > { %v2321_v0 = vpop.f32.mrf.mxu1  ;;  %v2568_v52 = vpop.f32.mrf.mxu0 }
 0x22c   : > { %v2893_v27 = vadd.f32 %v4980_v36, %v2577_v31  ;;  %v2569_v43 = vadd.f32 %v2568_v52, %v2280_v21  ;;  %v5248_v21 = vld [vmem:[#allocation13_spill] sm:$0xff] }
 0x22d   : > { %v2324_v51 = vpop.f32.mrf.mxu1  ;;  %v3999_v39 = vpop.f32.mrf.mxu0 }
 0x22e   : > { %v3832_v35 = vpack.c.bf16 %v2893_v27, %v2892_v8  ;;  %v2891_v16 = vadd.f32 %v4980_v36, %v2569_v43  ;;  %v2590_v46 = vadd.f32 %v3999_v39, %v2301_v26  ;;  %v5249_v27 = vld [vmem:[#allocation11_spill] sm:$0xff]  ;;  %v5250_v39 = vld [vmem:[#allocation14_spill] sm:$0xff] }
 0x22f   : > { %v2326_v30 = vpop.f32.mrf.mxu1  ;;  %v2581_v22 = vpop.f32.mrf.mxu0  ;;  %v2325_v43 = vadd.f32 %v2324_v51, %v5249_v27 }
 0x230   : > { %3896 = vst [vmem:[%s4994_s4 + $0xb8] sm:$0xff] %v3832_v35   ;;  %v3827_v38 = vpack.c.bf16 %v2891_v16, %v2890_v58  ;;  %v2582_v29 = vadd.f32 %v2581_v22, %v2293_v59  ;;  %v2896_v1 = vadd.f32 %v4980_v36, %v2590_v46  ;;  %v5251_v30 = vld [vmem:[#allocation12_spill] sm:$0xff] }
 0x231   : > { %v2327_v15 = vpop.f32.mrf.mxu1  ;;  %v4000_v41 = vpop.f32.mrf.mxu0 }
 0x232   : > { %3895 = vst [vmem:[%s4994_s4 + $0xb0] sm:$0xff] %v3827_v38   ;;  %v2593_v9 = vadd.f32 %v4000_v41, %v2304_v5  ;;  %v2894_v12 = vadd.f32 %v4980_v36, %v2582_v29  ;;  %v2328_v22 = vadd.f32 %v2327_v15, %v5251_v30  ;;  %v5252_v15 = vld [vmem:[#allocation17_spill] sm:$0xff] }
 0x233   : > { %v2329_v63 = vpop.f32.mrf.mxu1  ;;  %v2584_v37 = vpop.f32.mrf.mxu0 }
 0x234   : > { %v2897_v40 = vadd.f32 %v4980_v36, %v2593_v9  ;;  %v2585_v50 = vadd.f32 %v2584_v37, %v2296_v61 }
 0x235   : > { %v2332_v45 = vpop.f32.mrf.mxu1  ;;  %v4003_v19 = vpop.f32.mrf.mxu0 }
 0x236   : > { %v3842_v24 = vpack.c.bf16 %v2897_v40, %v2896_v1  ;;  %v2895_v60 = vadd.f32 %v4980_v36, %v2585_v50  ;;  %v2606_v2 = vadd.f32 %v4003_v19, %v2317_v34  ;;  %v2333_v14 = vadd.f32 %v2332_v45, %v5248_v21  ;;  %v5253_v40 = vld [vmem:[#allocation15_spill] sm:$0xff]  ;;  %v5254_v34 = vld [vmem:[#allocation16_spill] sm:$0xff] }
 0x237   : > { %v2334_v33 = vpop.f32.mrf.mxu1  ;;  %v2597_v48 = vpop.f32.mrf.mxu0 }
 0x238   : > { %3898 = vst [vmem:[%s4994_s4 + $0xc8] sm:$0xff] %v3842_v24   ;;  %v3837_v49 = vpack.c.bf16 %v2895_v60, %v2894_v12  ;;  %v2598_v3 = vadd.f32 %v2597_v48, %v2309_v56  ;;  %v2900_v6 = vadd.f32 %v4980_v36, %v2606_v2  ;;  %v5255_v33 = vld [vmem:[#allocation18_spill] sm:$0xff] }
 0x239   : > { %v2335_v57 = vpop.f32.mrf.mxu1  ;;  %v4004_v10 = vpop.f32.mrf.mxu0 }
 0x23a   : > { %3897 = vst [vmem:[%s4994_s4 + $0xc0] sm:$0xff] %v3837_v49   ;;  %v2609_v44 = vadd.f32 %v4004_v10, %v2320_v42  ;;  %v2898_v31 = vadd.f32 %v4980_v36, %v2598_v3  ;;  %v2336_v55 = vadd.f32 %v2335_v57, %v5250_v39 }
 0x23b   : > { %v2337_v11 = vpop.f32.mrf.mxu1  ;;  %v2600_v53 = vpop.f32.mrf.mxu0 }
 0x23c   : > { %v2901_v54 = vadd.f32 %v4980_v36, %v2609_v44  ;;  %v2601_v17 = vadd.f32 %v2600_v53, %v2312_v25 }
 0x23d   : > { %v2340_v7 = vpop.f32.mrf.mxu1  ;;  %v4007_v32 = vpop.f32.mrf.mxu0 }
 0x23e   : > { %v3852_v0 = vpack.c.bf16 %v2901_v54, %v2900_v6  ;;  %v2899_v47 = vadd.f32 %v4980_v36, %v2601_v17  ;;  %v2622_v58 = vadd.f32 %v4007_v32, %v2333_v14  ;;  %v2341_v50 = vadd.f32 %v2340_v7, %v5253_v40 }
 0x23f   : > { %v2342_v52 = vpop.f32.mrf.mxu1  ;;  %v2613_v8 = vpop.f32.mrf.mxu0 }
 0x240   : > { %3900 = vst [vmem:[%s4994_s4 + $0xd8] sm:$0xff] %v3852_v0   ;;  %v3847_v26 = vpack.c.bf16 %v2899_v47, %v2898_v31  ;;  %v2614_v4 = vadd.f32 %v2613_v8, %v2325_v43  ;;  %v2904_v38 = vadd.f32 %v4980_v36, %v2622_v58 }
 0x241   : > { %v2343_v35 = vpop.f32.mrf.mxu1  ;;  %v4008_v16 = vpop.f32.mrf.mxu0 }
 0x242   : > { %3899 = vst [vmem:[%s4994_s4 + $0xd0] sm:$0xff] %v3847_v26   ;;  %v2625_v59 = vadd.f32 %v4008_v16, %v2336_v55  ;;  %v2902_v61 = vadd.f32 %v4980_v36, %v2614_v4  ;;  %v2344_v12 = vadd.f32 %v2343_v35, %v5254_v34 }
 0x243   : > { %v2345_v23 = vpop.f32.mrf.mxu1  ;;  %v2616_v5 = vpop.f32.mrf.mxu0 }
 0x244   : > { %v2905_v46 = vadd.f32 %v4980_v36, %v2625_v59  ;;  %v2617_v51 = vadd.f32 %v2616_v5, %v2328_v22 }
 0x245   : > { %v2348_v41 = vpop.f32.mrf.mxu1  ;;  %v4011_v20 = vpop.f32.mrf.mxu0 }
 0x246   : > { %v3862_v29 = vpack.c.bf16 %v2905_v46, %v2904_v38  ;;  %v2903_v9 = vadd.f32 %v4980_v36, %v2617_v51  ;;  %v2349_v63 = vadd.f32 %v2348_v41, %v5252_v15 }
 0x247   : > { %v2350_v37 = vpop.f32.mrf.mxu1  ;;  %v2629_v1 = vpop.f32.mrf.mxu0 }
 0x248   : > { %3902 = vst [vmem:[%s4994_s4 + $0xe8] sm:$0xff] %v3862_v29   ;;  %v3857_v45 = vpack.c.bf16 %v2903_v9, %v2902_v61  ;;  %v2638_v24 = vadd.f32 %v4011_v20, %v2349_v63  ;;  %v2630_v60 = vadd.f32 %v2629_v1, %v2341_v50 }
 0x249   : > { %v2351_v19 = vpop.f32.mrf.mxu1  ;;  %v4012_v62 = vpop.f32.mrf.mxu0 }
 0x24a   : > { %3901 = vst [vmem:[%s4994_s4 + $0xe0] sm:$0xff] %v3857_v45   ;;  %v2352_v48 = vadd.f32 %v2351_v19, %v5255_v33  ;;  %v2908_v49 = vadd.f32 %v4980_v36, %v2638_v24  ;;  %v2906_v2 = vadd.f32 %v4980_v36, %v2630_v60 }
 0x24b   : > { %v2353_v13 = vpop.f32.mrf.mxu1  ;;  %v2632_v56 = vpop.f32.mrf.mxu0 }
 0x24c   : > { %v2641_v28 = vadd.f32 %v4012_v62, %v2352_v48  ;;  %v2633_v42 = vadd.f32 %v2632_v56, %v2344_v12 }
 0x24e   : > { %v2909_v57 = vadd.f32 %v4980_v36, %v2641_v28  ;;  %v2907_v10 = vadd.f32 %v4980_v36, %v2633_v42 }
 0x250   : > { %v3872_v18 = vpack.c.bf16 %v2909_v57, %v2908_v49  ;;  %v3867_v25 = vpack.c.bf16 %v2907_v10, %v2906_v2 }
 0x252   : > { %3904 = vst [vmem:[%s4994_s4 + $0xf8] sm:$0xff] %v3872_v18   ;;  %3903 = vst [vmem:[%s4994_s4 + $0xf0] sm:$0xff] %v3867_v25  }
 0x253 PF: > { %s13_s14 = sadd.s32 1, %s4353_s14   ;;  %s5256_s12 = smov %s4349_s13 }
 0x254   : > { %p10_p5 = scmp.ge.s32.totalorder %s13_s14, 15   ;;  %s5257_s13 = smov %s5259_s15 }
 0x256   :  { %12 = sbr.rel (!%p10_p5) target bundleno = 2 (0x2), region = 76 }

// kernel: custom_net_forward.5
= control target key start
LH: loop header
LB: loop body
LE: loop exit
PB: predicated region body
PF: predicated region fallthrough
CT: control target
= control target key end

     0   :  { %8 = vsyncpa [#allocation4], 0  ;;  %s12442_s0 = inlined_call_operand.vmem [shape: bf16[8,401408], index: 0, kind: input, shape index: {}]   ;;  %s12443_s1 = inlined_call_operand.hbm [shape: bf16[401408,256], index: 1, kind: input, shape index: {}]   ;;  %s12444_s2 = inlined_call_operand.vmem [shape: f32[1,256], index: 2, kind: input, shape index: {}]   ;;  %s12445_s3 = inlined_call_operand.vmem [shape: f32[8,256], index: 3, kind: output, shape index: {}]  }
   0x1   :  { %10 = vsyncpa [#allocation4 + $0x1], 0  ;;  %s11024_s12 = smov 0   ;;  %s11026_s13 = smov 0  }
   0x2   :  { %s11028_s14 = smov 0   ;;  %s11030_s15 = smov 0  }
   0x3   :  { %s11032_s16 = smov 0   ;;  %s11034_s17 = smov 0  }
   0x4 LB: > { %s8154_s18 = sadd.s32 4294967295, %s10998_s17   ;;  %s28_s19 = sadd.s32 1, %s10994_s16  ;;  %s10998_s17 = sphi %s11034_s17, %s16_s17   ;;  %s10994_s16 = sphi %s11032_s16, %s12453_s16   ;;  %s10990_s15 = sphi %s11030_s15, %s12452_s15   ;;  %s10986_s14 = sphi %s11028_s14, %s12451_s14   ;;  %s10982_s13 = sphi %s11026_s13, %s12450_s13   ;;  %s10978_s12 = sphi %s11024_s12, %s12449_s12  }
   0x5   : > { %p29_p0 = scmp.ge.s32.totalorder %s28_s19, 49  ;;  %s72_s20 = sadd.s32 1, %s10986_s14 }
   0x6   : > { %p79_p1 = scmp.ne.s32.totalorder %s10986_s14, %s10982_s13  ;;  %p80_p2 = scmp.eq.s32.totalorder %s10998_s17, 0 }
   0x7   : > { %s12455_s19 = smov (%p29_p0, %s28_s19), 0  ;;  %p85_p4 = scmp.ne.s32.totalorder %s10982_s13, %s10978_s12 }
   0x8   : > { %p11060_p3 = por %p80_p2, %p79_p1  ;;  %s67_s22 = ssub.s32 %s10994_s16, %s12455_s19 }
   0x9   : > { %p86_p5 = scmp.eq.s32.totalorder %s8154_s18, 0  ;;  %p70_p6 = scmp.eq.s32.totalorder %s67_s22, 0 }
   0xa   : > { %p9268_p8 = scmp.lt.s32.totalorder %s10998_s17, 49  ;;  %s184_s25 = sand.u32 1, %s10986_s14  }
   0xb   : > { %p11067_p7 = por %p86_p5, %p85_p4  ;;  %s9261_s26 = sshll.u32 %s10994_s16, 17 }
   0xc   : > { %s11073_s24 = scalar_select %p70_p6, %s10986_s14, %s72_s20  }
   0xd   : > { %s8158_s27 = sshll.u32 %s184_s25, 13  ;;  %s197_s30 = scalar_lea.hbm %s12443_s1, %s9261_s26 }
   0xe   : > { %s188_s4 = scalar_lea.vmem [#allocation3], %s8158_s27  ;;  %p11082_p9 = pnand %p9268_p8, %p11060_p3 }
   0xf   : > { %s198_s5 = sshll.u32 %s188_s4, 4  ;;  %s185_s7 = scalar_lea.sflag [#allocation4], %s184_s25  ;;  %s199_s5 = int_to_ptr.vmem [resolvable:$true] %s198_s5 }
  0x10   : > { %p10922_p10 = pneg %p11082_p9  ;;  %s10933_s8 = scalar_lea.vmem %s199_s5, 131072 }
  0x11   : > { %p10934_p11 = scmp.ne.s32.totalorder %s199_s5, %s10933_s8  ;;  %s11000_s9 = smov [#allocation3]  }
  0x12   : > { %s10938_s10 = sshll.u32 %s11000_s9, 4  ;;  %s10939_s10 = int_to_ptr.vmem [resolvable:$false] %s10938_s10 }
  0x13   : > { %p10936_p12 = pnand %p10934_p11, %p10922_p10  ;;  %s10940_s11 = scalar_lea.vmem %s10939_s10, 262144 }
  0x14   : > { %p10941_p0 = scmp.lt.s32.totalorder %s199_s5, %s10939_s10  ;;  %p10942_p1 = scmp.lt.s32.totalorder %s10940_s11, %s10933_s8 }
  0x15   : > { %p10937_p13 = pneg %p10936_p12 }
  0x16   : > { %p10943_p2 = por %p10942_p1, %p10941_p0 }
  0x18   : > { %p10944_p3 = pnand %p10943_p2, %p10937_p13 }
  0x1a   : > { %10947 = shalt.err (!%p10944_p3)
}
  0x1b   : > { %s11001_s12 = smov 128   ;;  %s11002_s18 = smov 8  }
  0x1c   : > { %9267 = dma.hbm_to_vmem [thread:$0]  (!%p11082_p9), %s197_s30, 131072, %s199_s5, %s185_s7, %s11001_s12, %s11001_s12, %s11002_s18  }
  0x1d   : > { %p8162_p4 = scmp.ge.s32.totalorder %s10998_s17, 1  ;;  %p206_p5 = scmp.lt.s32.totalorder %s10998_s17, 50 }
  0x1f   : > { %p207_p6 = pnand %p8162_p4, %p206_p5 }
  0x20   : > { %s212_s20 = sand.u32 (!%p207_p6), 1, %s10982_s13  }
  0x21   : > { %210 = sbr.rel (%p207_p6) target bundleno = 1286 (0x506), region = 32  ;;  %s8163_s21 = sshll.u32 (!%p207_p6), %s212_s20, 13 }
  0x22   : > { %s213_s22 = scalar_lea.sflag (!%p207_p6), [#allocation4], %s212_s20  ;;  %s11093_s25 = scalar_lea.vmem (!%p207_p6), [#allocation3], %s8163_s21 }
  0x26   : > { %10973 = dma.done.wait (%p11067_p7), %s213_s22, 131072  }
  0x27   : > { %10975 = vsyncadd (%p11067_p7), %s213_s22, 4294836224  ;;  %s8164_s26 = sshll.u32 %s10990_s15, 6  ;;  %p8166_p9 = scmp.ne.s32.totalorder %s10990_s15, 0 }
  0x28   : > { %p259_p8 = scmp.lt.s32.totalorder %s8164_s26, 3135 }
  0x29   : > { %286 = sbr.rel (%p8166_p9) target bundleno = 48 (0x30), region = 40 }
  0x2a   : > { %s12457_s26 = smov (!%p259_p8, %s8164_s26), 3135 }
  0x2b   : > { %s8165_s27 = sshll.u32 %s12457_s26, 2 }
  0x2c   : > { %s11103_s30 = scalar_lea.vmem %s12442_s0, %s8165_s27 }
  0x2e   : > { %v11003_v0 = vmov 0.0  }
  0x2f   : > { %287 = vst [vmem:[#allocation2] sm:$0xff] %v11003_v0  ;;  %288 = vst [vmem:[#allocation2 + $0x8] sm:$0xff] %v11003_v0 }
  0x30 PF: > { %v9320_v1 = vld [vmem:[%s11093_s25 + $0x74] ss:$8 sps:$4 sm:$0xff]   ;;  %v9324_v3 = vld [vmem:[%s11093_s25 + $0x70] ss:$8 sps:$4 sm:$0xff]   ;;  %v9326_v5 = vld [vmem:[%s11093_s25 + $0x64] ss:$8 sps:$4 sm:$0xff]  }
  0x31   : > { %v9322_v2 = vld [vmem:[%s11093_s25 + $0x174] ss:$8 sps:$4 sm:$0xff]   ;;  %6691 = vmatprep.subr.bf16.mxu0 %v9320_v1  ;;  %v9325_v4 = vld [vmem:[%s11093_s25 + $0x170] ss:$8 sps:$4 sm:$0xff]   ;;  %v9328_v6 = vld [vmem:[%s11093_s25 + $0x164] ss:$8 sps:$4 sm:$0xff]  }
  0x32   : > { %6732 = vmatprep.subr.bf16.mxu1 %v9322_v2  ;;  %6692 = vmatpush1.bf16.msra.mxu0 %v9324_v3  ;;  %v9330_v7 = vld [vmem:[%s11093_s25 + $0x60] ss:$8 sps:$4 sm:$0xff]   ;;  %v9332_v9 = vld [vmem:[%s11093_s25 + $0x54] ss:$8 sps:$4 sm:$0xff]   ;;  %v9336_v11 = vld [vmem:[%s11093_s25 + $0x50] ss:$8 sps:$4 sm:$0xff]  }
  0x33   : > { %6733 = vmatpush1.bf16.msra.mxu1 %v9325_v4  ;;  %6693 = vmatprep.subr.bf16.mxu0 %v9326_v5  ;;  %v9331_v8 = vld [vmem:[%s11093_s25 + $0x160] ss:$8 sps:$4 sm:$0xff]   ;;  %v9334_v10 = vld [vmem:[%s11093_s25 + $0x154] ss:$8 sps:$4 sm:$0xff]   ;;  %v9337_v12 = vld [vmem:[%s11093_s25 + $0x150] ss:$8 sps:$4 sm:$0xff]  }
  0x34   : > { %6734 = vmatprep.subr.bf16.mxu1 %v9328_v6  ;;  %v9338_v13 = vld [vmem:[%s11093_s25 + $0x44] ss:$8 sps:$4 sm:$0xff]   ;;  %v9342_v15 = vld [vmem:[%s11093_s25 + $0x40] ss:$8 sps:$4 sm:$0xff]   ;;  %v9344_v17 = vld [vmem:[%s11093_s25 + $0x34] ss:$8 sps:$4 sm:$0xff]  }
  0x35   : > { %v9340_v14 = vld [vmem:[%s11093_s25 + $0x144] ss:$8 sps:$4 sm:$0xff]   ;;  %v9343_v16 = vld [vmem:[%s11093_s25 + $0x140] ss:$8 sps:$4 sm:$0xff]   ;;  %v9346_v18 = vld [vmem:[%s11093_s25 + $0x134] ss:$8 sps:$4 sm:$0xff]  }
  0x36   : > { %6694 = vmatpush1.bf16.msra.mxu0 %v9330_v7  ;;  %v9348_v19 = vld [vmem:[%s11093_s25 + $0x30] ss:$8 sps:$4 sm:$0xff]   ;;  %v9350_v21 = vld [vmem:[%s11093_s25 + $0x24] ss:$8 sps:$4 sm:$0xff]   ;;  %v9354_v23 = vld [vmem:[%s11093_s25 + $0x20] ss:$8 sps:$4 sm:$0xff]  }
  0x37   : > { %6735 = vmatpush1.bf16.msra.mxu1 %v9331_v8  ;;  %6695 = vmatprep.subr.bf16.mxu0 %v9332_v9  ;;  %v9349_v20 = vld [vmem:[%s11093_s25 + $0x130] ss:$8 sps:$4 sm:$0xff]   ;;  %v9352_v22 = vld [vmem:[%s11093_s25 + $0x124] ss:$8 sps:$4 sm:$0xff]   ;;  %v9355_v24 = vld [vmem:[%s11093_s25 + $0x120] ss:$8 sps:$4 sm:$0xff]  }
  0x38   : > { %6736 = vmatprep.subr.bf16.mxu1 %v9334_v10  ;;  %v9356_v25 = vld [vmem:[%s11093_s25 + $0x14] ss:$8 sps:$4 sm:$0xff]   ;;  %v9360_v27 = vld [vmem:[%s11093_s25 + $0x10] ss:$8 sps:$4 sm:$0xff]   ;;  %v9362_v29 = vld [vmem:[%s11093_s25 + $0x4] ss:$8 sps:$4 sm:$0xff]  }
  0x39   : > { %v9358_v26 = vld [vmem:[%s11093_s25 + $0x114] ss:$8 sps:$4 sm:$0xff]   ;;  %v9361_v28 = vld [vmem:[%s11093_s25 + $0x110] ss:$8 sps:$4 sm:$0xff]   ;;  %v9364_v30 = vld [vmem:[%s11093_s25 + $0x104] ss:$8 sps:$4 sm:$0xff]  }
  0x3a   : > { %6696 = vmatpush1.bf16.msra.mxu0 %v9336_v11  ;;  %v9366_v31 = vld [vmem:[%s11093_s25] ss:$8 sps:$4 sm:$0xff]   ;;  %v9368_v33 = vld [vmem:[%s11093_s25 + $0xf4] ss:$8 sps:$4 sm:$0xff]   ;;  %v9372_v35 = vld [vmem:[%s11093_s25 + $0xf0] ss:$8 sps:$4 sm:$0xff]  }
  0x3b   : > { %6737 = vmatpush1.bf16.msra.mxu1 %v9337_v12  ;;  %6697 = vmatprep.subr.bf16.mxu0 %v9338_v13  ;;  %v9367_v32 = vld [vmem:[%s11093_s25 + $0x100] ss:$8 sps:$4 sm:$0xff]   ;;  %v9370_v34 = vld [vmem:[%s11093_s25 + $0x1f4] ss:$8 sps:$4 sm:$0xff]   ;;  %v9373_v36 = vld [vmem:[%s11093_s25 + $0x1f0] ss:$8 sps:$4 sm:$0xff]  }
  0x3c   : > { %6738 = vmatprep.subr.bf16.mxu1 %v9340_v14  ;;  %v9374_v37 = vld [vmem:[%s11093_s25 + $0xe4] ss:$8 sps:$4 sm:$0xff]   ;;  %v9378_v39 = vld [vmem:[%s11093_s25 + $0xe0] ss:$8 sps:$4 sm:$0xff]   ;;  %v9380_v41 = vld [vmem:[%s11093_s25 + $0xd4] ss:$8 sps:$4 sm:$0xff]  }
  0x3d   : > { %v9376_v38 = vld [vmem:[%s11093_s25 + $0x1e4] ss:$8 sps:$4 sm:$0xff]   ;;  %v9379_v40 = vld [vmem:[%s11093_s25 + $0x1e0] ss:$8 sps:$4 sm:$0xff]   ;;  %v9382_v42 = vld [vmem:[%s11093_s25 + $0x1d4] ss:$8 sps:$4 sm:$0xff]  }
  0x3e   : > { %6698 = vmatpush1.bf16.msra.mxu0 %v9342_v15  ;;  %v9384_v43 = vld [vmem:[%s11093_s25 + $0xd0] ss:$8 sps:$4 sm:$0xff]   ;;  %v9386_v45 = vld [vmem:[%s11093_s25 + $0xc4] ss:$8 sps:$4 sm:$0xff]   ;;  %v9390_v50 = vld [vmem:[%s11093_s25 + $0xc0] ss:$8 sps:$4 sm:$0xff]  }
  0x3f   : > { %6739 = vmatpush1.bf16.msra.mxu1 %v9343_v16  ;;  %6699 = vmatprep.subr.bf16.mxu0 %v9344_v17  ;;  %v9385_v44 = vld [vmem:[%s11093_s25 + $0x1d0] ss:$8 sps:$4 sm:$0xff]   ;;  %v9388_v46 = vld [vmem:[%s11093_s25 + $0x1c4] ss:$8 sps:$4 sm:$0xff]   ;;  %v9391_v51 = vld [vmem:[%s11093_s25 + $0x1c0] ss:$8 sps:$4 sm:$0xff]  }
  0x40   : > { %6740 = vmatprep.subr.bf16.mxu1 %v9346_v18  ;;  %v291_v47 = vld [vmem:[%s11103_s30] sm:$0xff]  ;;  %v292_v49 = vld [vmem:[%s11103_s30 + $0x8] sm:$0xff]  ;;  %v9398_v57 = vld [vmem:[%s11093_s25 + $0xa4] ss:$8 sps:$4 sm:$0xff]   ;;  %p9255_p7 = scmp.ne.s32.totalorder %s10990_s15, 48 }
  0x41   : > { %v8168_v48 = vcombine.high %v291_v47, %v291_v47  ;;  %v8170_v52 = vcombine.high %v292_v49, %v292_v49  ;;  %v9392_v53 = vld [vmem:[%s11093_s25 + $0xb4] ss:$8 sps:$4 sm:$0xff]   ;;  %v9396_v55 = vld [vmem:[%s11093_s25 + $0xb0] ss:$8 sps:$4 sm:$0xff]   ;;  %v9400_v58 = vld [vmem:[%s11093_s25 + $0x1a4] ss:$8 sps:$4 sm:$0xff]   ;;  %v8167_v7 = vcombine.low %v291_v47, %v291_v47  ;;  %v8169_v8 = vcombine.low %v292_v49, %v292_v49 }
  0x42   : > { %6700 = vmatpush1.bf16.msra.mxu0 %v9348_v19  ;;  %v9394_v54 = vld [vmem:[%s11093_s25 + $0x1b4] ss:$8 sps:$4 sm:$0xff]   ;;  %v9397_v56 = vld [vmem:[%s11093_s25 + $0x1b0] ss:$8 sps:$4 sm:$0xff]   ;;  %v9402_v59 = vld [vmem:[%s11093_s25 + $0xa0] ss:$8 sps:$4 sm:$0xff]  }
  0x43   : > { %6741 = vmatpush1.bf16.msra.mxu1 %v9349_v20  ;;  %6701 = vmatprep.subr.bf16.mxu0 %v9350_v21  ;;  %v9403_v60 = vld [vmem:[%s11093_s25 + $0x1a0] ss:$8 sps:$4 sm:$0xff]   ;;  %v9404_v61 = vld [vmem:[%s11093_s25 + $0x94] ss:$8 sps:$4 sm:$0xff]   ;;  %v9408_v63 = vld [vmem:[%s11093_s25 + $0x90] ss:$8 sps:$4 sm:$0xff]  }
  0x44   : > { %6742 = vmatprep.subr.bf16.mxu1 %v9352_v22  ;;  %6723 = vmatprep.mubr.bf16.mxu0 %v8168_v48  ;;  %v9406_v62 = vld [vmem:[%s11093_s25 + $0x194] ss:$8 sps:$4 sm:$0xff]   ;;  %v9409_v0 = vld [vmem:[%s11093_s25 + $0x190] ss:$8 sps:$4 sm:$0xff]   ;;  %v9410_v1 = vld [vmem:[%s11093_s25 + $0x84] ss:$8 sps:$4 sm:$0xff]  }
  0x45   : > { %6764 = vmatprep.mubr.bf16.mxu1 %v8170_v52  ;;  %v9412_v2 = vld [vmem:[%s11093_s25 + $0x184] ss:$8 sps:$4 sm:$0xff]   ;;  %v9414_v3 = vld [vmem:[%s11093_s25 + $0x80] ss:$8 sps:$4 sm:$0xff]   ;;  %v9422_v5 = vld [vmem:[%s11093_s25 + $0x274] ss:$8 sps:$4 sm:$0xff]  }
  0x46   : > { %6702 = vmatpush1.bf16.msra.mxu0 %v9354_v23  ;;  %v9415_v4 = vld [vmem:[%s11093_s25 + $0x180] ss:$8 sps:$4 sm:$0xff]   ;;  %v9425_v6 = vld [vmem:[%s11093_s25 + $0x374] ss:$8 sps:$4 sm:$0xff]   ;;  %v9420_v9 = vld [vmem:[%s11093_s25 + $0x270] ss:$8 sps:$4 sm:$0xff]  }
  0x47   : > { %6743 = vmatpush1.bf16.msra.mxu1 %v9355_v24  ;;  %6703 = vmatprep.subr.bf16.mxu0 %v9356_v25  ;;  %v9423_v10 = vld [vmem:[%s11093_s25 + $0x370] ss:$8 sps:$4 sm:$0xff]   ;;  %v9428_v11 = vld [vmem:[%s11093_s25 + $0x264] ss:$8 sps:$4 sm:$0xff]   ;;  %v9426_v13 = vld [vmem:[%s11093_s25 + $0x260] ss:$8 sps:$4 sm:$0xff]  }
  0x48   : > { %6744 = vmatprep.subr.bf16.mxu1 %v9358_v26  ;;  %v9431_v12 = vld [vmem:[%s11093_s25 + $0x364] ss:$8 sps:$4 sm:$0xff]   ;;  %v9429_v14 = vld [vmem:[%s11093_s25 + $0x360] ss:$8 sps:$4 sm:$0xff]   ;;  %v9434_v15 = vld [vmem:[%s11093_s25 + $0x254] ss:$8 sps:$4 sm:$0xff]  }
  0x49   : > { %v9437_v16 = vld [vmem:[%s11093_s25 + $0x354] ss:$8 sps:$4 sm:$0xff]   ;;  %v9432_v17 = vld [vmem:[%s11093_s25 + $0x250] ss:$8 sps:$4 sm:$0xff]   ;;  %v9440_v19 = vld [vmem:[%s11093_s25 + $0x244] ss:$8 sps:$4 sm:$0xff]  }
  0x4a   : > { %6704 = vmatpush1.bf16.msra.mxu0 %v9360_v27  ;;  %v9435_v18 = vld [vmem:[%s11093_s25 + $0x350] ss:$8 sps:$4 sm:$0xff]   ;;  %v9443_v20 = vld [vmem:[%s11093_s25 + $0x344] ss:$8 sps:$4 sm:$0xff]   ;;  %v9438_v21 = vld [vmem:[%s11093_s25 + $0x240] ss:$8 sps:$4 sm:$0xff]  }
  0x4b   : > { %6745 = vmatpush1.bf16.msra.mxu1 %v9361_v28  ;;  %6705 = vmatprep.subr.bf16.mxu0 %v9362_v29  ;;  %v9441_v22 = vld [vmem:[%s11093_s25 + $0x340] ss:$8 sps:$4 sm:$0xff]   ;;  %v9446_v23 = vld [vmem:[%s11093_s25 + $0x234] ss:$8 sps:$4 sm:$0xff]   ;;  %v9444_v25 = vld [vmem:[%s11093_s25 + $0x230] ss:$8 sps:$4 sm:$0xff]  }
  0x4c   : > { %6746 = vmatprep.subr.bf16.mxu1 %v9364_v30  ;;  %v9449_v24 = vld [vmem:[%s11093_s25 + $0x334] ss:$8 sps:$4 sm:$0xff]   ;;  %v9447_v26 = vld [vmem:[%s11093_s25 + $0x330] ss:$8 sps:$4 sm:$0xff]   ;;  %v9452_v27 = vld [vmem:[%s11093_s25 + $0x224] ss:$8 sps:$4 sm:$0xff]  }
  0x4d   : > { %v9455_v28 = vld [vmem:[%s11093_s25 + $0x324] ss:$8 sps:$4 sm:$0xff]   ;;  %v9450_v29 = vld [vmem:[%s11093_s25 + $0x220] ss:$8 sps:$4 sm:$0xff]   ;;  %v9485_v52 = vld [vmem:[%s11093_s25 + $0x3d4] ss:$8 sps:$4 sm:$0xff]  }
  0x4e   : > { %6706 = vmatpush1.bf16.msra.mxu0 %v9366_v31  ;;  %v9453_v30 = vld [vmem:[%s11093_s25 + $0x320] ss:$8 sps:$4 sm:$0xff]   ;;  %v9458_v31 = vld [vmem:[%s11093_s25 + $0x214] ss:$8 sps:$4 sm:$0xff]   ;;  %v9476_v47 = vld [vmem:[%s11093_s25 + $0x2e4] ss:$8 sps:$4 sm:$0xff]  }
  0x4f   : > { %6747 = vmatpush1.bf16.msra.mxu1 %v9367_v32  ;;  %6707 = vmatprep.subr.bf16.mxu0 %v9368_v33  ;;  %v9461_v32 = vld [vmem:[%s11093_s25 + $0x314] ss:$8 sps:$4 sm:$0xff]   ;;  %v11199_v33 = vld [vmem:[%s11103_s30 + $0x10] sm:$0xff] }
  0x50   : > { %6748 = vmatprep.subr.bf16.mxu1 %v9370_v34  ;;  %v11202_v34 = vld [vmem:[%s11103_s30 + $0x18] sm:$0xff] }
  0x51   : > { %v9479_v48 = vld [vmem:[%s11093_s25 + $0x3e4] ss:$8 sps:$4 sm:$0xff]   ;;  %v9474_v49 = vld [vmem:[%s11093_s25 + $0x2e0] ss:$8 sps:$4 sm:$0xff]  }
  0x52   : > { %6708 = vmatpush2.bf16.msra.mxu0 %v9372_v35  ;;  %v9456_v35 = vld [vmem:[%s11093_s25 + $0x210] ss:$8 sps:$4 sm:$0xff]  }
  0x53   : > { %6749 = vmatpush2.bf16.msra.mxu1 %v9373_v36  ;;  %6709 = vmatprep.subr.bf16.mxu0 %v9374_v37  ;;  %v9459_v36 = vld [vmem:[%s11093_s25 + $0x310] ss:$8 sps:$4 sm:$0xff]   ;;  %v8172_v37 = vcombine.high %v11199_v33, %v11199_v33 }
  0x54   : > { %6750 = vmatprep.subr.bf16.mxu1 %v9376_v38  ;;  %v8174_v38 = vcombine.high %v11202_v34, %v11202_v34 }
  0x56   : > { %6710 = vmatpush2.bf16.msra.mxu0 %v9378_v39  ;;  %v9464_v39 = vld [vmem:[%s11093_s25 + $0x204] ss:$8 sps:$4 sm:$0xff]  }
  0x57   : > { %6751 = vmatpush2.bf16.msra.mxu1 %v9379_v40  ;;  %6711 = vmatprep.subr.bf16.mxu0 %v9380_v41  ;;  %v9467_v40 = vld [vmem:[%s11093_s25 + $0x304] ss:$8 sps:$4 sm:$0xff]   ;;  %v9462_v41 = vld [vmem:[%s11093_s25 + $0x200] ss:$8 sps:$4 sm:$0xff]  }
  0x58   : > { %6752 = vmatprep.subr.bf16.mxu1 %v9382_v42  ;;  %v9465_v42 = vld [vmem:[%s11093_s25 + $0x300] ss:$8 sps:$4 sm:$0xff]  }
  0x5a   : > { %6712 = vmatpush2.bf16.msra.mxu0 %v9384_v43  ;;  %v9470_v43 = vld [vmem:[%s11093_s25 + $0x2f4] ss:$8 sps:$4 sm:$0xff]  }
  0x5b   : > { %6753 = vmatpush2.bf16.msra.mxu1 %v9385_v44  ;;  %6713 = vmatprep.subr.bf16.mxu0 %v9386_v45  ;;  %v9473_v44 = vld [vmem:[%s11093_s25 + $0x3f4] ss:$8 sps:$4 sm:$0xff]   ;;  %v9468_v45 = vld [vmem:[%s11093_s25 + $0x2f0] ss:$8 sps:$4 sm:$0xff]  }
  0x5c   : > { %6754 = vmatprep.subr.bf16.mxu1 %v9388_v46  ;;  %v9471_v46 = vld [vmem:[%s11093_s25 + $0x3f0] ss:$8 sps:$4 sm:$0xff]  }
  0x5e   : > { %6714 = vmatpush2.bf16.msra.mxu0 %v9390_v50  ;;  %v9477_v50 = vld [vmem:[%s11093_s25 + $0x3e0] ss:$8 sps:$4 sm:$0xff]  }
  0x5f   : > { %6755 = vmatpush2.bf16.msra.mxu1 %v9391_v51  ;;  %6715 = vmatprep.subr.bf16.mxu0 %v9392_v53  ;;  %v9482_v51 = vld [vmem:[%s11093_s25 + $0x2d4] ss:$8 sps:$4 sm:$0xff]   ;;  %v9480_v53 = vld [vmem:[%s11093_s25 + $0x2d0] ss:$8 sps:$4 sm:$0xff]  }
  0x60   : > { %6756 = vmatprep.subr.bf16.mxu1 %v9394_v54  ;;  %v9483_v54 = vld [vmem:[%s11093_s25 + $0x3d0] ss:$8 sps:$4 sm:$0xff]  }
  0x62   : > { %6716 = vmatpush2.bf16.msra.mxu0 %v9396_v55  ;;  %v9488_v55 = vld [vmem:[%s11093_s25 + $0x2c4] ss:$8 sps:$4 sm:$0xff]  }
  0x63   : > { %6757 = vmatpush2.bf16.msra.mxu1 %v9397_v56  ;;  %6717 = vmatprep.subr.bf16.mxu0 %v9398_v57  ;;  %v9491_v56 = vld [vmem:[%s11093_s25 + $0x3c4] ss:$8 sps:$4 sm:$0xff]   ;;  %v9486_v57 = vld [vmem:[%s11093_s25 + $0x2c0] ss:$8 sps:$4 sm:$0xff]  }
  0x64   : > { %6758 = vmatprep.subr.bf16.mxu1 %v9400_v58  ;;  %v9489_v58 = vld [vmem:[%s11093_s25 + $0x3c0] ss:$8 sps:$4 sm:$0xff]  }
  0x66   : > { %6718 = vmatpush2.bf16.msra.mxu0 %v9402_v59  ;;  %v9494_v59 = vld [vmem:[%s11093_s25 + $0x2b4] ss:$8 sps:$4 sm:$0xff]  }
  0x67   : > { %6759 = vmatpush2.bf16.msra.mxu1 %v9403_v60  ;;  %6719 = vmatprep.subr.bf16.mxu0 %v9404_v61  ;;  %v9497_v60 = vld [vmem:[%s11093_s25 + $0x3b4] ss:$8 sps:$4 sm:$0xff]   ;;  %v9492_v61 = vld [vmem:[%s11093_s25 + $0x2b0] ss:$8 sps:$4 sm:$0xff]  }
  0x68   : > { %6760 = vmatprep.subr.bf16.mxu1 %v9406_v62  ;;  %v9495_v62 = vld [vmem:[%s11093_s25 + $0x3b0] ss:$8 sps:$4 sm:$0xff]  }
  0x6a   : > { %6720 = vmatpush2.bf16.msra.mxu0 %v9408_v63  ;;  %v9500_v63 = vld [vmem:[%s11093_s25 + $0x2a4] ss:$8 sps:$4 sm:$0xff]  }
  0x6b   : > { %6761 = vmatpush2.bf16.msra.mxu1 %v9409_v0  ;;  %6721 = vmatprep.subr.bf16.mxu0 %v9410_v1  ;;  %v9503_v0 = vld [vmem:[%s11093_s25 + $0x3a4] ss:$8 sps:$4 sm:$0xff]   ;;  %v9498_v1 = vld [vmem:[%s11093_s25 + $0x2a0] ss:$8 sps:$4 sm:$0xff]  }
  0x6c   : > { %6762 = vmatprep.subr.bf16.mxu1 %v9412_v2  ;;  %v9501_v2 = vld [vmem:[%s11093_s25 + $0x3a0] ss:$8 sps:$4 sm:$0xff]  }
  0x6e   : > { %6722 = vmatpush2.bf16.msra.mxu0 %v9414_v3  ;;  %v9506_v3 = vld [vmem:[%s11093_s25 + $0x294] ss:$8 sps:$4 sm:$0xff]  }
  0x6f   : > { %6763 = vmatpush2.bf16.msra.mxu1 %v9415_v4  ;;  %6773 = vmatprep.subr.bf16.mxu0 %v9422_v5  ;;  %v9509_v4 = vld [vmem:[%s11093_s25 + $0x394] ss:$8 sps:$4 sm:$0xff]   ;;  %v9504_v5 = vld [vmem:[%s11093_s25 + $0x290] ss:$8 sps:$4 sm:$0xff]  }
  0x70   : > { %6814 = vmatprep.subr.bf16.mxu1 %v9425_v6  ;;  %v9507_v6 = vld [vmem:[%s11093_s25 + $0x390] ss:$8 sps:$4 sm:$0xff]  }
  0x71   : > { %6724 = vmatmul.mubr.bf16.vlgmr.msra.gmra.mxu0 %v8167_v7  ;;  %v9512_v7 = vld [vmem:[%s11093_s25 + $0x284] ss:$8 sps:$4 sm:$0xff]  }
  0x72   : > { %6765 = vmatmul.mubr.bf16.vlgmr.msra.gmra.mxu1 %v8169_v8  ;;  %6774 = vmatpush1.bf16.msra.mxu0 %v9420_v9  ;;  %v9515_v8 = vld [vmem:[%s11093_s25 + $0x384] ss:$8 sps:$4 sm:$0xff]   ;;  %v9510_v9 = vld [vmem:[%s11093_s25 + $0x280] ss:$8 sps:$4 sm:$0xff]  }
  0x73   : > { %6815 = vmatpush1.bf16.msra.mxu1 %v9423_v10  ;;  %6775 = vmatprep.subr.bf16.mxu0 %v9428_v11  ;;  %v9513_v10 = vld [vmem:[%s11093_s25 + $0x380] ss:$8 sps:$4 sm:$0xff]   ;;  %v9522_v11 = vld [vmem:[%s11093_s25 + $0x474] ss:$8 sps:$4 sm:$0xff]  }
  0x74   : > { %6816 = vmatprep.subr.bf16.mxu1 %v9431_v12  ;;  %6805 = vmatprep.mubr.bf16.mxu0 %v8172_v37  ;;  %v9525_v12 = vld [vmem:[%s11093_s25 + $0x574] ss:$8 sps:$4 sm:$0xff]   ;;  %v9552_v37 = vld [vmem:[%s11093_s25 + $0x424] ss:$8 sps:$4 sm:$0xff]  }
  0x75   : > { %6846 = vmatprep.mubr.bf16.mxu1 %v8174_v38  ;;  %v9555_v38 = vld [vmem:[%s11093_s25 + $0x524] ss:$8 sps:$4 sm:$0xff]  }
  0x76   : > { %6776 = vmatpush1.bf16.msra.mxu0 %v9426_v13  ;;  %v8171_v13 = vcombine.low %v11199_v33, %v11199_v33  ;;  %v9546_v33 = vld [vmem:[%s11093_s25 + $0x434] ss:$8 sps:$4 sm:$0xff]  }
  0x77   : > { %6817 = vmatpush1.bf16.msra.mxu1 %v9429_v14  ;;  %6777 = vmatprep.subr.bf16.mxu0 %v9434_v15  ;;  %v8173_v14 = vcombine.low %v11202_v34, %v11202_v34  ;;  %v9520_v15 = vld [vmem:[%s11093_s25 + $0x470] ss:$8 sps:$4 sm:$0xff]   ;;  %v9549_v34 = vld [vmem:[%s11093_s25 + $0x534] ss:$8 sps:$4 sm:$0xff]  }
  0x78   : > { %6818 = vmatprep.subr.bf16.mxu1 %v9437_v16  ;;  %v9523_v16 = vld [vmem:[%s11093_s25 + $0x570] ss:$8 sps:$4 sm:$0xff]  }
  0x7a   : > { %6778 = vmatpush1.bf16.msra.mxu0 %v9432_v17  ;;  %v9528_v17 = vld [vmem:[%s11093_s25 + $0x464] ss:$8 sps:$4 sm:$0xff]  }
  0x7b   : > { %6819 = vmatpush1.bf16.msra.mxu1 %v9435_v18  ;;  %6779 = vmatprep.subr.bf16.mxu0 %v9440_v19  ;;  %v9531_v18 = vld [vmem:[%s11093_s25 + $0x564] ss:$8 sps:$4 sm:$0xff]   ;;  %v11257_v19 = vld [vmem:[%s11103_s30 + $0x20] sm:$0xff] }
  0x7c   : > { %6820 = vmatprep.subr.bf16.mxu1 %v9443_v20  ;;  %v11260_v20 = vld [vmem:[%s11103_s30 + $0x28] sm:$0xff] }
  0x7e   : > { %6780 = vmatpush1.bf16.msra.mxu0 %v9438_v21  ;;  %v8176_v21 = vcombine.high %v11257_v19, %v11257_v19 }
  0x7f   : > { %6821 = vmatpush1.bf16.msra.mxu1 %v9441_v22  ;;  %6781 = vmatprep.subr.bf16.mxu0 %v9446_v23  ;;  %v8178_v22 = vcombine.high %v11260_v20, %v11260_v20  ;;  %v9526_v23 = vld [vmem:[%s11093_s25 + $0x460] ss:$8 sps:$4 sm:$0xff]  }
  0x80   : > { %6822 = vmatprep.subr.bf16.mxu1 %v9449_v24  ;;  %v9529_v24 = vld [vmem:[%s11093_s25 + $0x560] ss:$8 sps:$4 sm:$0xff]  }
  0x82   : > { %6782 = vmatpush1.bf16.msra.mxu0 %v9444_v25  ;;  %v9534_v25 = vld [vmem:[%s11093_s25 + $0x454] ss:$8 sps:$4 sm:$0xff]  }
  0x83   : > { %6823 = vmatpush1.bf16.msra.mxu1 %v9447_v26  ;;  %6783 = vmatprep.subr.bf16.mxu0 %v9452_v27  ;;  %v9537_v26 = vld [vmem:[%s11093_s25 + $0x554] ss:$8 sps:$4 sm:$0xff]   ;;  %v9532_v27 = vld [vmem:[%s11093_s25 + $0x450] ss:$8 sps:$4 sm:$0xff]  }
  0x84   : > { %6824 = vmatprep.subr.bf16.mxu1 %v9455_v28  ;;  %v9535_v28 = vld [vmem:[%s11093_s25 + $0x550] ss:$8 sps:$4 sm:$0xff]  }
  0x86   : > { %6784 = vmatpush1.bf16.msra.mxu0 %v9450_v29  ;;  %v9540_v29 = vld [vmem:[%s11093_s25 + $0x444] ss:$8 sps:$4 sm:$0xff]  }
  0x87   : > { %6825 = vmatpush1.bf16.msra.mxu1 %v9453_v30  ;;  %6785 = vmatprep.subr.bf16.mxu0 %v9458_v31  ;;  %v9543_v30 = vld [vmem:[%s11093_s25 + $0x544] ss:$8 sps:$4 sm:$0xff]   ;;  %v9538_v31 = vld [vmem:[%s11093_s25 + $0x440] ss:$8 sps:$4 sm:$0xff]  }
  0x88   : > { %6826 = vmatprep.subr.bf16.mxu1 %v9461_v32  ;;  %v9541_v32 = vld [vmem:[%s11093_s25 + $0x540] ss:$8 sps:$4 sm:$0xff]  }
  0x8a   : > { %6786 = vmatpush1.bf16.msra.mxu0 %v9456_v35  ;;  %v9544_v35 = vld [vmem:[%s11093_s25 + $0x430] ss:$8 sps:$4 sm:$0xff]  }
  0x8b   : > { %6827 = vmatpush1.bf16.msra.mxu1 %v9459_v36  ;;  %6787 = vmatprep.subr.bf16.mxu0 %v9464_v39  ;;  %v9547_v36 = vld [vmem:[%s11093_s25 + $0x530] ss:$8 sps:$4 sm:$0xff]   ;;  %v9550_v39 = vld [vmem:[%s11093_s25 + $0x420] ss:$8 sps:$4 sm:$0xff]  }
  0x8c   : > { %6828 = vmatprep.subr.bf16.mxu1 %v9467_v40  ;;  %v9553_v40 = vld [vmem:[%s11093_s25 + $0x520] ss:$8 sps:$4 sm:$0xff]  }
  0x8e   : > { %6788 = vmatpush1.bf16.msra.mxu0 %v9462_v41  ;;  %v9558_v41 = vld [vmem:[%s11093_s25 + $0x414] ss:$8 sps:$4 sm:$0xff]  }
  0x8f   : > { %6829 = vmatpush1.bf16.msra.mxu1 %v9465_v42  ;;  %6789 = vmatprep.subr.bf16.mxu0 %v9470_v43  ;;  %v9561_v42 = vld [vmem:[%s11093_s25 + $0x514] ss:$8 sps:$4 sm:$0xff]   ;;  %v9556_v43 = vld [vmem:[%s11093_s25 + $0x410] ss:$8 sps:$4 sm:$0xff]  }
  0x90   : > { %6830 = vmatprep.subr.bf16.mxu1 %v9473_v44  ;;  %v9559_v44 = vld [vmem:[%s11093_s25 + $0x510] ss:$8 sps:$4 sm:$0xff]  }
  0x92   : > { %6790 = vmatpush2.bf16.msra.mxu0 %v9468_v45  ;;  %v9564_v45 = vld [vmem:[%s11093_s25 + $0x404] ss:$8 sps:$4 sm:$0xff]  }
  0x93   : > { %6831 = vmatpush2.bf16.msra.mxu1 %v9471_v46  ;;  %6791 = vmatprep.subr.bf16.mxu0 %v9476_v47  ;;  %v9567_v46 = vld [vmem:[%s11093_s25 + $0x504] ss:$8 sps:$4 sm:$0xff]   ;;  %v9562_v47 = vld [vmem:[%s11093_s25 + $0x400] ss:$8 sps:$4 sm:$0xff]  }
  0x94   : > { %6832 = vmatprep.subr.bf16.mxu1 %v9479_v48  ;;  %v9565_v48 = vld [vmem:[%s11093_s25 + $0x500] ss:$8 sps:$4 sm:$0xff]  }
  0x96   : > { %6792 = vmatpush2.bf16.msra.mxu0 %v9474_v49  ;;  %v9570_v49 = vld [vmem:[%s11093_s25 + $0x4f4] ss:$8 sps:$4 sm:$0xff]  }
  0x97   : > { %6833 = vmatpush2.bf16.msra.mxu1 %v9477_v50  ;;  %6793 = vmatprep.subr.bf16.mxu0 %v9482_v51  ;;  %v9573_v50 = vld [vmem:[%s11093_s25 + $0x5f4] ss:$8 sps:$4 sm:$0xff]   ;;  %v9568_v51 = vld [vmem:[%s11093_s25 + $0x4f0] ss:$8 sps:$4 sm:$0xff]  }
  0x98   : > { %6834 = vmatprep.subr.bf16.mxu1 %v9485_v52  ;;  %v9571_v52 = vld [vmem:[%s11093_s25 + $0x5f0] ss:$8 sps:$4 sm:$0xff]  }
  0x9a   : > { %6794 = vmatpush2.bf16.msra.mxu0 %v9480_v53  ;;  %v9576_v53 = vld [vmem:[%s11093_s25 + $0x4e4] ss:$8 sps:$4 sm:$0xff]  }
  0x9b   : > { %6835 = vmatpush2.bf16.msra.mxu1 %v9483_v54  ;;  %6795 = vmatprep.subr.bf16.mxu0 %v9488_v55  ;;  %v9579_v54 = vld [vmem:[%s11093_s25 + $0x5e4] ss:$8 sps:$4 sm:$0xff]   ;;  %v9574_v55 = vld [vmem:[%s11093_s25 + $0x4e0] ss:$8 sps:$4 sm:$0xff]  }
  0x9c   : > { %6836 = vmatprep.subr.bf16.mxu1 %v9491_v56  ;;  %v9577_v56 = vld [vmem:[%s11093_s25 + $0x5e0] ss:$8 sps:$4 sm:$0xff]  }
  0x9e   : > { %6796 = vmatpush2.bf16.msra.mxu0 %v9486_v57  ;;  %v9582_v57 = vld [vmem:[%s11093_s25 + $0x4d4] ss:$8 sps:$4 sm:$0xff]  }
  0x9f   : > { %6837 = vmatpush2.bf16.msra.mxu1 %v9489_v58  ;;  %6797 = vmatprep.subr.bf16.mxu0 %v9494_v59  ;;  %v9585_v58 = vld [vmem:[%s11093_s25 + $0x5d4] ss:$8 sps:$4 sm:$0xff]   ;;  %v9580_v59 = vld [vmem:[%s11093_s25 + $0x4d0] ss:$8 sps:$4 sm:$0xff]  }
  0xa0   : > { %6838 = vmatprep.subr.bf16.mxu1 %v9497_v60  ;;  %v9583_v60 = vld [vmem:[%s11093_s25 + $0x5d0] ss:$8 sps:$4 sm:$0xff]  }
  0xa2   : > { %6798 = vmatpush2.bf16.msra.mxu0 %v9492_v61  ;;  %v9588_v61 = vld [vmem:[%s11093_s25 + $0x4c4] ss:$8 sps:$4 sm:$0xff]  }
  0xa3   : > { %6839 = vmatpush2.bf16.msra.mxu1 %v9495_v62  ;;  %6799 = vmatprep.subr.bf16.mxu0 %v9500_v63  ;;  %v9591_v62 = vld [vmem:[%s11093_s25 + $0x5c4] ss:$8 sps:$4 sm:$0xff]   ;;  %v9586_v63 = vld [vmem:[%s11093_s25 + $0x4c0] ss:$8 sps:$4 sm:$0xff]  }
  0xa4   : > { %6840 = vmatprep.subr.bf16.mxu1 %v9503_v0  ;;  %v9589_v0 = vld [vmem:[%s11093_s25 + $0x5c0] ss:$8 sps:$4 sm:$0xff]  }
  0xa6   : > { %6800 = vmatpush2.bf16.msra.mxu0 %v9498_v1  ;;  %v9594_v1 = vld [vmem:[%s11093_s25 + $0x4b4] ss:$8 sps:$4 sm:$0xff]  }
  0xa7   : > { %6841 = vmatpush2.bf16.msra.mxu1 %v9501_v2  ;;  %6801 = vmatprep.subr.bf16.mxu0 %v9506_v3  ;;  %v9597_v2 = vld [vmem:[%s11093_s25 + $0x5b4] ss:$8 sps:$4 sm:$0xff]   ;;  %v9592_v3 = vld [vmem:[%s11093_s25 + $0x4b0] ss:$8 sps:$4 sm:$0xff]  }
  0xa8   : > { %6842 = vmatprep.subr.bf16.mxu1 %v9509_v4  ;;  %v9595_v4 = vld [vmem:[%s11093_s25 + $0x5b0] ss:$8 sps:$4 sm:$0xff]  }
  0xaa   : > { %6802 = vmatpush2.bf16.msra.mxu0 %v9504_v5  ;;  %v9600_v5 = vld [vmem:[%s11093_s25 + $0x4a4] ss:$8 sps:$4 sm:$0xff]  }
  0xab   : > { %6843 = vmatpush2.bf16.msra.mxu1 %v9507_v6  ;;  %6803 = vmatprep.subr.bf16.mxu0 %v9512_v7  ;;  %v9603_v6 = vld [vmem:[%s11093_s25 + $0x5a4] ss:$8 sps:$4 sm:$0xff]   ;;  %v9598_v7 = vld [vmem:[%s11093_s25 + $0x4a0] ss:$8 sps:$4 sm:$0xff]  }
  0xac   : > { %6844 = vmatprep.subr.bf16.mxu1 %v9515_v8  ;;  %v9601_v8 = vld [vmem:[%s11093_s25 + $0x5a0] ss:$8 sps:$4 sm:$0xff]  }
  0xae   : > { %6804 = vmatpush2.bf16.msra.mxu0 %v9510_v9  ;;  %v9606_v9 = vld [vmem:[%s11093_s25 + $0x494] ss:$8 sps:$4 sm:$0xff]  }
  0xaf   : > { %6845 = vmatpush2.bf16.msra.mxu1 %v9513_v10  ;;  %6855 = vmatprep.subr.bf16.mxu0 %v9522_v11  ;;  %v9609_v10 = vld [vmem:[%s11093_s25 + $0x594] ss:$8 sps:$4 sm:$0xff]   ;;  %v9604_v11 = vld [vmem:[%s11093_s25 + $0x490] ss:$8 sps:$4 sm:$0xff]  }
  0xb0   : > { %6896 = vmatprep.subr.bf16.mxu1 %v9525_v12  ;;  %v9607_v12 = vld [vmem:[%s11093_s25 + $0x590] ss:$8 sps:$4 sm:$0xff]  }
  0xb1   : > { %6806 = vmatmul.mubr.bf16.vlgmr.msra.gmra.mxu0 %v8171_v13  ;;  %v9612_v13 = vld [vmem:[%s11093_s25 + $0x484] ss:$8 sps:$4 sm:$0xff]  }
  0xb2   : > { %6847 = vmatmul.mubr.bf16.vlgmr.msra.gmra.mxu1 %v8173_v14  ;;  %6856 = vmatpush1.bf16.msra.mxu0 %v9520_v15  ;;  %v9615_v14 = vld [vmem:[%s11093_s25 + $0x584] ss:$8 sps:$4 sm:$0xff]   ;;  %v9610_v15 = vld [vmem:[%s11093_s25 + $0x480] ss:$8 sps:$4 sm:$0xff]  }
  0xb3   : > { %6897 = vmatpush1.bf16.msra.mxu1 %v9523_v16  ;;  %6857 = vmatprep.subr.bf16.mxu0 %v9528_v17  ;;  %v9613_v16 = vld [vmem:[%s11093_s25 + $0x580] ss:$8 sps:$4 sm:$0xff]   ;;  %v9622_v17 = vld [vmem:[%s11093_s25 + $0x674] ss:$8 sps:$4 sm:$0xff]  }
  0xb4   : > { %6898 = vmatprep.subr.bf16.mxu1 %v9531_v18  ;;  %6887 = vmatprep.mubr.bf16.mxu0 %v8176_v21  ;;  %v9625_v18 = vld [vmem:[%s11093_s25 + $0x774] ss:$8 sps:$4 sm:$0xff]   ;;  %v9620_v21 = vld [vmem:[%s11093_s25 + $0x670] ss:$8 sps:$4 sm:$0xff]  }
  0xb5   : > { %6928 = vmatprep.mubr.bf16.mxu1 %v8178_v22  ;;  %v9623_v22 = vld [vmem:[%s11093_s25 + $0x770] ss:$8 sps:$4 sm:$0xff]  }
  0xb6   : > { %6858 = vmatpush1.bf16.msra.mxu0 %v9526_v23  ;;  %v8175_v23 = vcombine.low %v11257_v19, %v11257_v19 }
  0xb7   : > { %6899 = vmatpush1.bf16.msra.mxu1 %v9529_v24  ;;  %6859 = vmatprep.subr.bf16.mxu0 %v9534_v25  ;;  %v8177_v24 = vcombine.low %v11260_v20, %v11260_v20  ;;  %v11333_v25 = vld [vmem:[%s11103_s30 + $0x30] sm:$0xff] }
  0xb8   : > { %6900 = vmatprep.subr.bf16.mxu1 %v9537_v26  ;;  %v11336_v26 = vld [vmem:[%s11103_s30 + $0x38] sm:$0xff]  ;;  %v8180_v19 = vcombine.high %v11333_v25, %v11333_v25 }
  0xb9   : > { %v8182_v20 = vcombine.high %v11336_v26, %v11336_v26 }
  0xba   : > { %6860 = vmatpush1.bf16.msra.mxu0 %v9532_v27  ;;  %v9628_v27 = vld [vmem:[%s11093_s25 + $0x664] ss:$8 sps:$4 sm:$0xff]  }
  0xbb   : > { %6901 = vmatpush1.bf16.msra.mxu1 %v9535_v28  ;;  %6861 = vmatprep.subr.bf16.mxu0 %v9540_v29  ;;  %v9631_v28 = vld [vmem:[%s11093_s25 + $0x764] ss:$8 sps:$4 sm:$0xff]   ;;  %v9626_v29 = vld [vmem:[%s11093_s25 + $0x660] ss:$8 sps:$4 sm:$0xff]  }
  0xbc   : > { %6902 = vmatprep.subr.bf16.mxu1 %v9543_v30  ;;  %v9629_v30 = vld [vmem:[%s11093_s25 + $0x760] ss:$8 sps:$4 sm:$0xff]  }
  0xbe   : > { %6862 = vmatpush1.bf16.msra.mxu0 %v9538_v31  ;;  %v9634_v31 = vld [vmem:[%s11093_s25 + $0x654] ss:$8 sps:$4 sm:$0xff]  }
  0xbf   : > { %6903 = vmatpush1.bf16.msra.mxu1 %v9541_v32  ;;  %6863 = vmatprep.subr.bf16.mxu0 %v9546_v33  ;;  %v9637_v32 = vld [vmem:[%s11093_s25 + $0x754] ss:$8 sps:$4 sm:$0xff]   ;;  %v9632_v33 = vld [vmem:[%s11093_s25 + $0x650] ss:$8 sps:$4 sm:$0xff]  }
  0xc0   : > { %6904 = vmatprep.subr.bf16.mxu1 %v9549_v34  ;;  %v9635_v34 = vld [vmem:[%s11093_s25 + $0x750] ss:$8 sps:$4 sm:$0xff]  }
  0xc2   : > { %6864 = vmatpush1.bf16.msra.mxu0 %v9544_v35  ;;  %v9640_v35 = vld [vmem:[%s11093_s25 + $0x644] ss:$8 sps:$4 sm:$0xff]  }
  0xc3   : > { %6905 = vmatpush1.bf16.msra.mxu1 %v9547_v36  ;;  %6865 = vmatprep.subr.bf16.mxu0 %v9552_v37  ;;  %v9643_v36 = vld [vmem:[%s11093_s25 + $0x744] ss:$8 sps:$4 sm:$0xff]   ;;  %v9638_v37 = vld [vmem:[%s11093_s25 + $0x640] ss:$8 sps:$4 sm:$0xff]  }
  0xc4   : > { %6906 = vmatprep.subr.bf16.mxu1 %v9555_v38  ;;  %v9641_v38 = vld [vmem:[%s11093_s25 + $0x740] ss:$8 sps:$4 sm:$0xff]  }
  0xc6   : > { %6866 = vmatpush1.bf16.msra.mxu0 %v9550_v39  ;;  %v9646_v39 = vld [vmem:[%s11093_s25 + $0x634] ss:$8 sps:$4 sm:$0xff]  }
  0xc7   : > { %6907 = vmatpush1.bf16.msra.mxu1 %v9553_v40  ;;  %6867 = vmatprep.subr.bf16.mxu0 %v9558_v41  ;;  %v9649_v40 = vld [vmem:[%s11093_s25 + $0x734] ss:$8 sps:$4 sm:$0xff]   ;;  %v9644_v41 = vld [vmem:[%s11093_s25 + $0x630] ss:$8 sps:$4 sm:$0xff]  }
  0xc8   : > { %6908 = vmatprep.subr.bf16.mxu1 %v9561_v42  ;;  %v9647_v42 = vld [vmem:[%s11093_s25 + $0x730] ss:$8 sps:$4 sm:$0xff]  }
  0xca   : > { %6868 = vmatpush1.bf16.msra.mxu0 %v9556_v43  ;;  %v9652_v43 = vld [vmem:[%s11093_s25 + $0x624] ss:$8 sps:$4 sm:$0xff]  }
  0xcb   : > { %6909 = vmatpush1.bf16.msra.mxu1 %v9559_v44  ;;  %6869 = vmatprep.subr.bf16.mxu0 %v9564_v45  ;;  %v9655_v44 = vld [vmem:[%s11093_s25 + $0x724] ss:$8 sps:$4 sm:$0xff]   ;;  %v9650_v45 = vld [vmem:[%s11093_s25 + $0x620] ss:$8 sps:$4 sm:$0xff]  }
  0xcc   : > { %6910 = vmatprep.subr.bf16.mxu1 %v9567_v46  ;;  %v9653_v46 = vld [vmem:[%s11093_s25 + $0x720] ss:$8 sps:$4 sm:$0xff]  }
  0xce   : > { %6870 = vmatpush1.bf16.msra.mxu0 %v9562_v47  ;;  %v9658_v47 = vld [vmem:[%s11093_s25 + $0x614] ss:$8 sps:$4 sm:$0xff]  }
  0xcf   : > { %6911 = vmatpush1.bf16.msra.mxu1 %v9565_v48  ;;  %6871 = vmatprep.subr.bf16.mxu0 %v9570_v49  ;;  %v9661_v48 = vld [vmem:[%s11093_s25 + $0x714] ss:$8 sps:$4 sm:$0xff]   ;;  %v9656_v49 = vld [vmem:[%s11093_s25 + $0x610] ss:$8 sps:$4 sm:$0xff]  }
  0xd0   : > { %6912 = vmatprep.subr.bf16.mxu1 %v9573_v50  ;;  %v9659_v50 = vld [vmem:[%s11093_s25 + $0x710] ss:$8 sps:$4 sm:$0xff]  }
  0xd2   : > { %6872 = vmatpush2.bf16.msra.mxu0 %v9568_v51  ;;  %v9664_v51 = vld [vmem:[%s11093_s25 + $0x604] ss:$8 sps:$4 sm:$0xff]  }
  0xd3   : > { %6913 = vmatpush2.bf16.msra.mxu1 %v9571_v52  ;;  %6873 = vmatprep.subr.bf16.mxu0 %v9576_v53  ;;  %v9667_v52 = vld [vmem:[%s11093_s25 + $0x704] ss:$8 sps:$4 sm:$0xff]   ;;  %v9662_v53 = vld [vmem:[%s11093_s25 + $0x600] ss:$8 sps:$4 sm:$0xff]  }
  0xd4   : > { %6914 = vmatprep.subr.bf16.mxu1 %v9579_v54  ;;  %v9665_v54 = vld [vmem:[%s11093_s25 + $0x700] ss:$8 sps:$4 sm:$0xff]  }
  0xd6   : > { %6874 = vmatpush2.bf16.msra.mxu0 %v9574_v55  ;;  %v9670_v55 = vld [vmem:[%s11093_s25 + $0x6f4] ss:$8 sps:$4 sm:$0xff]  }
  0xd7   : > { %6915 = vmatpush2.bf16.msra.mxu1 %v9577_v56  ;;  %6875 = vmatprep.subr.bf16.mxu0 %v9582_v57  ;;  %v9673_v56 = vld [vmem:[%s11093_s25 + $0x7f4] ss:$8 sps:$4 sm:$0xff]   ;;  %v9668_v57 = vld [vmem:[%s11093_s25 + $0x6f0] ss:$8 sps:$4 sm:$0xff]  }
  0xd8   : > { %6916 = vmatprep.subr.bf16.mxu1 %v9585_v58  ;;  %v9671_v58 = vld [vmem:[%s11093_s25 + $0x7f0] ss:$8 sps:$4 sm:$0xff]  }
  0xda   : > { %6876 = vmatpush2.bf16.msra.mxu0 %v9580_v59  ;;  %v9676_v59 = vld [vmem:[%s11093_s25 + $0x6e4] ss:$8 sps:$4 sm:$0xff]  }
  0xdb   : > { %6917 = vmatpush2.bf16.msra.mxu1 %v9583_v60  ;;  %6877 = vmatprep.subr.bf16.mxu0 %v9588_v61  ;;  %v9679_v60 = vld [vmem:[%s11093_s25 + $0x7e4] ss:$8 sps:$4 sm:$0xff]   ;;  %v9674_v61 = vld [vmem:[%s11093_s25 + $0x6e0] ss:$8 sps:$4 sm:$0xff]  }
  0xdc   : > { %6918 = vmatprep.subr.bf16.mxu1 %v9591_v62  ;;  %v9677_v62 = vld [vmem:[%s11093_s25 + $0x7e0] ss:$8 sps:$4 sm:$0xff]  }
  0xde   : > { %6878 = vmatpush2.bf16.msra.mxu0 %v9586_v63  ;;  %v9682_v63 = vld [vmem:[%s11093_s25 + $0x6d4] ss:$8 sps:$4 sm:$0xff]  }
  0xdf   : > { %6919 = vmatpush2.bf16.msra.mxu1 %v9589_v0  ;;  %6879 = vmatprep.subr.bf16.mxu0 %v9594_v1  ;;  %v9685_v0 = vld [vmem:[%s11093_s25 + $0x7d4] ss:$8 sps:$4 sm:$0xff]   ;;  %v9680_v1 = vld [vmem:[%s11093_s25 + $0x6d0] ss:$8 sps:$4 sm:$0xff]  }
  0xe0   : > { %6920 = vmatprep.subr.bf16.mxu1 %v9597_v2  ;;  %v9683_v2 = vld [vmem:[%s11093_s25 + $0x7d0] ss:$8 sps:$4 sm:$0xff]  }
  0xe2   : > { %6880 = vmatpush2.bf16.msra.mxu0 %v9592_v3  ;;  %v9688_v3 = vld [vmem:[%s11093_s25 + $0x6c4] ss:$8 sps:$4 sm:$0xff]  }
  0xe3   : > { %6921 = vmatpush2.bf16.msra.mxu1 %v9595_v4  ;;  %6881 = vmatprep.subr.bf16.mxu0 %v9600_v5  ;;  %v9691_v4 = vld [vmem:[%s11093_s25 + $0x7c4] ss:$8 sps:$4 sm:$0xff]   ;;  %v9686_v5 = vld [vmem:[%s11093_s25 + $0x6c0] ss:$8 sps:$4 sm:$0xff]  }
  0xe4   : > { %6922 = vmatprep.subr.bf16.mxu1 %v9603_v6  ;;  %v9689_v6 = vld [vmem:[%s11093_s25 + $0x7c0] ss:$8 sps:$4 sm:$0xff]  }
  0xe6   : > { %6882 = vmatpush2.bf16.msra.mxu0 %v9598_v7  ;;  %v9694_v7 = vld [vmem:[%s11093_s25 + $0x6b4] ss:$8 sps:$4 sm:$0xff]  }
  0xe7   : > { %6923 = vmatpush2.bf16.msra.mxu1 %v9601_v8  ;;  %6883 = vmatprep.subr.bf16.mxu0 %v9606_v9  ;;  %v9697_v8 = vld [vmem:[%s11093_s25 + $0x7b4] ss:$8 sps:$4 sm:$0xff]   ;;  %v9692_v9 = vld [vmem:[%s11093_s25 + $0x6b0] ss:$8 sps:$4 sm:$0xff]  }
  0xe8   : > { %6924 = vmatprep.subr.bf16.mxu1 %v9609_v10  ;;  %v9695_v10 = vld [vmem:[%s11093_s25 + $0x7b0] ss:$8 sps:$4 sm:$0xff]  }
  0xea   : > { %6884 = vmatpush2.bf16.msra.mxu0 %v9604_v11  ;;  %v9700_v11 = vld [vmem:[%s11093_s25 + $0x6a4] ss:$8 sps:$4 sm:$0xff]  }
  0xeb   : > { %6925 = vmatpush2.bf16.msra.mxu1 %v9607_v12  ;;  %6885 = vmatprep.subr.bf16.mxu0 %v9612_v13  ;;  %v9703_v12 = vld [vmem:[%s11093_s25 + $0x7a4] ss:$8 sps:$4 sm:$0xff]   ;;  %v9698_v13 = vld [vmem:[%s11093_s25 + $0x6a0] ss:$8 sps:$4 sm:$0xff]  }
  0xec   : > { %6926 = vmatprep.subr.bf16.mxu1 %v9615_v14  ;;  %v9701_v14 = vld [vmem:[%s11093_s25 + $0x7a0] ss:$8 sps:$4 sm:$0xff]  }
  0xee   : > { %6886 = vmatpush2.bf16.msra.mxu0 %v9610_v15  ;;  %v9706_v15 = vld [vmem:[%s11093_s25 + $0x694] ss:$8 sps:$4 sm:$0xff]  }
  0xef   : > { %6927 = vmatpush2.bf16.msra.mxu1 %v9613_v16  ;;  %6937 = vmatprep.subr.bf16.mxu0 %v9622_v17  ;;  %v9709_v16 = vld [vmem:[%s11093_s25 + $0x794] ss:$8 sps:$4 sm:$0xff]   ;;  %v9704_v17 = vld [vmem:[%s11093_s25 + $0x690] ss:$8 sps:$4 sm:$0xff]  }
  0xf0   : > { %6978 = vmatprep.subr.bf16.mxu1 %v9625_v18  ;;  %v9707_v18 = vld [vmem:[%s11093_s25 + $0x790] ss:$8 sps:$4 sm:$0xff]  }
  0xf1   : > { %6888 = vmatmul.mubr.bf16.vlgmr.msra.gmra.mxu0 %v8175_v23  ;;  %v9710_v23 = vld [vmem:[%s11093_s25 + $0x680] ss:$8 sps:$4 sm:$0xff]  }
  0xf2   : > { %6929 = vmatmul.mubr.bf16.vlgmr.msra.gmra.mxu1 %v8177_v24  ;;  %6938 = vmatpush1.bf16.msra.mxu0 %v9620_v21  ;;  %v9712_v21 = vld [vmem:[%s11093_s25 + $0x684] ss:$8 sps:$4 sm:$0xff]   ;;  %v9713_v24 = vld [vmem:[%s11093_s25 + $0x780] ss:$8 sps:$4 sm:$0xff]  }
  0xf3   : > { %6979 = vmatpush1.bf16.msra.mxu1 %v9623_v22  ;;  %6939 = vmatprep.subr.bf16.mxu0 %v9628_v27  ;;  %v9715_v22 = vld [vmem:[%s11093_s25 + $0x784] ss:$8 sps:$4 sm:$0xff]   ;;  %v9722_v27 = vld [vmem:[%s11093_s25 + $0x874] ss:$8 sps:$4 sm:$0xff]  }
  0xf4   : > { %6980 = vmatprep.subr.bf16.mxu1 %v9631_v28  ;;  %6969 = vmatprep.mubr.bf16.mxu0 %v8180_v19  ;;  %v9725_v28 = vld [vmem:[%s11093_s25 + $0x974] ss:$8 sps:$4 sm:$0xff]  }
  0xf5   : > { %7010 = vmatprep.mubr.bf16.mxu1 %v8182_v20  ;;  %v11405_v19 = vld [vmem:[%s11103_s30 + $0x40] sm:$0xff]  ;;  %v8179_v20 = vcombine.low %v11333_v25, %v11333_v25 }
  0xf6   : > { %6940 = vmatpush1.bf16.msra.mxu0 %v9626_v29  ;;  %v8181_v29 = vcombine.low %v11336_v26, %v11336_v26 }
  0xf7   : > { %6981 = vmatpush1.bf16.msra.mxu1 %v9629_v30  ;;  %6941 = vmatprep.subr.bf16.mxu0 %v9634_v31  ;;  %v11412_v30 = vld [vmem:[%s11103_s30 + $0x48] sm:$0xff] }
  0xf8   : > { %6982 = vmatprep.subr.bf16.mxu1 %v9637_v32  ;;  %v9720_v31 = vld [vmem:[%s11093_s25 + $0x870] ss:$8 sps:$4 sm:$0xff]   ;;  %v8186_v25 = vcombine.high %v11412_v30, %v11412_v30 }
  0xf9   : > { %v9723_v32 = vld [vmem:[%s11093_s25 + $0x970] ss:$8 sps:$4 sm:$0xff]  }
  0xfa   : > { %6942 = vmatpush1.bf16.msra.mxu0 %v9632_v33  ;;  %v9728_v33 = vld [vmem:[%s11093_s25 + $0x864] ss:$8 sps:$4 sm:$0xff]  }
  0xfb   : > { %6983 = vmatpush1.bf16.msra.mxu1 %v9635_v34  ;;  %6943 = vmatprep.subr.bf16.mxu0 %v9640_v35  ;;  %v9731_v34 = vld [vmem:[%s11093_s25 + $0x964] ss:$8 sps:$4 sm:$0xff]   ;;  %v8184_v35 = vcombine.high %v11405_v19, %v11405_v19 }
  0xfc   : > { %6984 = vmatprep.subr.bf16.mxu1 %v9643_v36 }
  0xfe   : > { %6944 = vmatpush1.bf16.msra.mxu0 %v9638_v37  ;;  %v9726_v37 = vld [vmem:[%s11093_s25 + $0x860] ss:$8 sps:$4 sm:$0xff]  }
  0xff   : > { %6985 = vmatpush1.bf16.msra.mxu1 %v9641_v38  ;;  %6945 = vmatprep.subr.bf16.mxu0 %v9646_v39  ;;  %v9729_v38 = vld [vmem:[%s11093_s25 + $0x960] ss:$8 sps:$4 sm:$0xff]  }
 0x100   : > { %6986 = vmatprep.subr.bf16.mxu1 %v9649_v40  ;;  %v9734_v40 = vld [vmem:[%s11093_s25 + $0x854] ss:$8 sps:$4 sm:$0xff]  }
 0x102   : > { %6946 = vmatpush1.bf16.msra.mxu0 %v9644_v41 }
 0x103   : > { %6987 = vmatpush1.bf16.msra.mxu1 %v9647_v42  ;;  %6947 = vmatprep.subr.bf16.mxu0 %v9652_v43  ;;  %v9737_v43 = vld [vmem:[%s11093_s25 + $0x954] ss:$8 sps:$4 sm:$0xff]  }
 0x104   : > { %6988 = vmatprep.subr.bf16.mxu1 %v9655_v44 }
 0x106   : > { %6948 = vmatpush1.bf16.msra.mxu0 %v9650_v45 }
 0x107   : > { %6989 = vmatpush1.bf16.msra.mxu1 %v9653_v46  ;;  %6949 = vmatprep.subr.bf16.mxu0 %v9658_v47  ;;  %v9732_v47 = vld [vmem:[%s11093_s25 + $0x850] ss:$8 sps:$4 sm:$0xff]  }
 0x108   : > { %6990 = vmatprep.subr.bf16.mxu1 %v9661_v48  ;;  %v9735_v48 = vld [vmem:[%s11093_s25 + $0x950] ss:$8 sps:$4 sm:$0xff]  }
 0x10a   : > { %6950 = vmatpush1.bf16.msra.mxu0 %v9656_v49  ;;  %v9740_v49 = vld [vmem:[%s11093_s25 + $0x844] ss:$8 sps:$4 sm:$0xff]  }
 0x10b   : > { %6991 = vmatpush1.bf16.msra.mxu1 %v9659_v50  ;;  %6951 = vmatprep.subr.bf16.mxu0 %v9664_v51 }
 0x10c   : > { %6992 = vmatprep.subr.bf16.mxu1 %v9667_v52  ;;  %v9743_v52 = vld [vmem:[%s11093_s25 + $0x944] ss:$8 sps:$4 sm:$0xff]  }
 0x10e   : > { %6952 = vmatpush1.bf16.msra.mxu0 %v9662_v53  ;;  %v9738_v53 = vld [vmem:[%s11093_s25 + $0x840] ss:$8 sps:$4 sm:$0xff]  }
 0x10f   : > { %6993 = vmatpush1.bf16.msra.mxu1 %v9665_v54  ;;  %6953 = vmatprep.subr.bf16.mxu0 %v9670_v55  ;;  %v9741_v54 = vld [vmem:[%s11093_s25 + $0x940] ss:$8 sps:$4 sm:$0xff]   ;;  %v9746_v55 = vld [vmem:[%s11093_s25 + $0x834] ss:$8 sps:$4 sm:$0xff]  }
 0x110   : > { %6994 = vmatprep.subr.bf16.mxu1 %v9673_v56  ;;  %v9749_v56 = vld [vmem:[%s11093_s25 + $0x934] ss:$8 sps:$4 sm:$0xff]  }
 0x112   : > { %6954 = vmatpush2.bf16.msra.mxu0 %v9668_v57  ;;  %v9744_v57 = vld [vmem:[%s11093_s25 + $0x830] ss:$8 sps:$4 sm:$0xff]  }
 0x113   : > { %6995 = vmatpush2.bf16.msra.mxu1 %v9671_v58  ;;  %6955 = vmatprep.subr.bf16.mxu0 %v9676_v59  ;;  %v9747_v58 = vld [vmem:[%s11093_s25 + $0x930] ss:$8 sps:$4 sm:$0xff]   ;;  %v9752_v59 = vld [vmem:[%s11093_s25 + $0x824] ss:$8 sps:$4 sm:$0xff]  }
 0x114   : > { %6996 = vmatprep.subr.bf16.mxu1 %v9679_v60  ;;  %v9755_v60 = vld [vmem:[%s11093_s25 + $0x924] ss:$8 sps:$4 sm:$0xff]  }
 0x116   : > { %6956 = vmatpush2.bf16.msra.mxu0 %v9674_v61  ;;  %v9750_v61 = vld [vmem:[%s11093_s25 + $0x820] ss:$8 sps:$4 sm:$0xff]  }
 0x117   : > { %6997 = vmatpush2.bf16.msra.mxu1 %v9677_v62  ;;  %6957 = vmatprep.subr.bf16.mxu0 %v9682_v63  ;;  %v9753_v62 = vld [vmem:[%s11093_s25 + $0x920] ss:$8 sps:$4 sm:$0xff]   ;;  %v9758_v63 = vld [vmem:[%s11093_s25 + $0x814] ss:$8 sps:$4 sm:$0xff]  }
 0x118   : > { %6998 = vmatprep.subr.bf16.mxu1 %v9685_v0  ;;  %v9761_v0 = vld [vmem:[%s11093_s25 + $0x914] ss:$8 sps:$4 sm:$0xff]  }
 0x11a   : > { %6958 = vmatpush2.bf16.msra.mxu0 %v9680_v1  ;;  %v9756_v1 = vld [vmem:[%s11093_s25 + $0x810] ss:$8 sps:$4 sm:$0xff]  }
 0x11b   : > { %6999 = vmatpush2.bf16.msra.mxu1 %v9683_v2  ;;  %6959 = vmatprep.subr.bf16.mxu0 %v9688_v3  ;;  %v9759_v2 = vld [vmem:[%s11093_s25 + $0x910] ss:$8 sps:$4 sm:$0xff]   ;;  %v9764_v3 = vld [vmem:[%s11093_s25 + $0x804] ss:$8 sps:$4 sm:$0xff]  }
 0x11c   : > { %7000 = vmatprep.subr.bf16.mxu1 %v9691_v4  ;;  %v9767_v4 = vld [vmem:[%s11093_s25 + $0x904] ss:$8 sps:$4 sm:$0xff]  }
 0x11e   : > { %6960 = vmatpush2.bf16.msra.mxu0 %v9686_v5  ;;  %v9762_v5 = vld [vmem:[%s11093_s25 + $0x800] ss:$8 sps:$4 sm:$0xff]  }
 0x11f   : > { %7001 = vmatpush2.bf16.msra.mxu1 %v9689_v6  ;;  %6961 = vmatprep.subr.bf16.mxu0 %v9694_v7  ;;  %v9765_v6 = vld [vmem:[%s11093_s25 + $0x900] ss:$8 sps:$4 sm:$0xff]   ;;  %v9770_v7 = vld [vmem:[%s11093_s25 + $0x8f4] ss:$8 sps:$4 sm:$0xff]  }
 0x120   : > { %7002 = vmatprep.subr.bf16.mxu1 %v9697_v8  ;;  %v9773_v8 = vld [vmem:[%s11093_s25 + $0x9f4] ss:$8 sps:$4 sm:$0xff]  }
 0x122   : > { %6962 = vmatpush2.bf16.msra.mxu0 %v9692_v9  ;;  %v9768_v9 = vld [vmem:[%s11093_s25 + $0x8f0] ss:$8 sps:$4 sm:$0xff]  }
 0x123   : > { %7003 = vmatpush2.bf16.msra.mxu1 %v9695_v10  ;;  %6963 = vmatprep.subr.bf16.mxu0 %v9700_v11  ;;  %v9771_v10 = vld [vmem:[%s11093_s25 + $0x9f0] ss:$8 sps:$4 sm:$0xff]   ;;  %v9776_v11 = vld [vmem:[%s11093_s25 + $0x8e4] ss:$8 sps:$4 sm:$0xff]  }
 0x124   : > { %7004 = vmatprep.subr.bf16.mxu1 %v9703_v12  ;;  %v9779_v12 = vld [vmem:[%s11093_s25 + $0x9e4] ss:$8 sps:$4 sm:$0xff]  }
 0x126   : > { %6964 = vmatpush2.bf16.msra.mxu0 %v9698_v13  ;;  %v9774_v13 = vld [vmem:[%s11093_s25 + $0x8e0] ss:$8 sps:$4 sm:$0xff]  }
 0x127   : > { %7005 = vmatpush2.bf16.msra.mxu1 %v9701_v14  ;;  %6965 = vmatprep.subr.bf16.mxu0 %v9706_v15  ;;  %v9777_v14 = vld [vmem:[%s11093_s25 + $0x9e0] ss:$8 sps:$4 sm:$0xff]   ;;  %v9782_v15 = vld [vmem:[%s11093_s25 + $0x8d4] ss:$8 sps:$4 sm:$0xff]  }
 0x128   : > { %7006 = vmatprep.subr.bf16.mxu1 %v9709_v16  ;;  %v9785_v16 = vld [vmem:[%s11093_s25 + $0x9d4] ss:$8 sps:$4 sm:$0xff]  }
 0x12a   : > { %6966 = vmatpush2.bf16.msra.mxu0 %v9704_v17  ;;  %v9780_v17 = vld [vmem:[%s11093_s25 + $0x8d0] ss:$8 sps:$4 sm:$0xff]  }
 0x12b   : > { %7007 = vmatpush2.bf16.msra.mxu1 %v9707_v18  ;;  %6967 = vmatprep.subr.bf16.mxu0 %v9712_v21  ;;  %v9783_v18 = vld [vmem:[%s11093_s25 + $0x9d0] ss:$8 sps:$4 sm:$0xff]   ;;  %v9788_v21 = vld [vmem:[%s11093_s25 + $0x8c4] ss:$8 sps:$4 sm:$0xff]  }
 0x12c   : > { %7008 = vmatprep.subr.bf16.mxu1 %v9715_v22  ;;  %v9791_v22 = vld [vmem:[%s11093_s25 + $0x9c4] ss:$8 sps:$4 sm:$0xff]  }
 0x12e   : > { %6968 = vmatpush2.bf16.msra.mxu0 %v9710_v23  ;;  %v9786_v23 = vld [vmem:[%s11093_s25 + $0x8c0] ss:$8 sps:$4 sm:$0xff]  }
 0x12f   : > { %7009 = vmatpush2.bf16.msra.mxu1 %v9713_v24  ;;  %7019 = vmatprep.subr.bf16.mxu0 %v9722_v27  ;;  %v9789_v24 = vld [vmem:[%s11093_s25 + $0x9c0] ss:$8 sps:$4 sm:$0xff]   ;;  %v9794_v27 = vld [vmem:[%s11093_s25 + $0x8b4] ss:$8 sps:$4 sm:$0xff]  }
 0x130   : > { %7060 = vmatprep.subr.bf16.mxu1 %v9725_v28  ;;  %v9797_v28 = vld [vmem:[%s11093_s25 + $0x9b4] ss:$8 sps:$4 sm:$0xff]  }
 0x131   : > { %v6725_v26 = vpop.f32.mrf.mxu0  ;;  %6970 = vmatmul.mubr.bf16.vlgmr.msra.gmra.mxu0 %v8179_v20  ;;  %v9792_v20 = vld [vmem:[%s11093_s25 + $0x8b0] ss:$8 sps:$4 sm:$0xff]  }
 0x132   : > { %v6766_v36 = vpop.f32.mrf.mxu1  ;;  %7011 = vmatmul.mubr.bf16.vlgmr.msra.gmra.mxu1 %v8181_v29  ;;  %7020 = vmatpush1.bf16.msra.mxu0 %v9720_v31  ;;  %v9795_v29 = vld [vmem:[%s11093_s25 + $0x9b0] ss:$8 sps:$4 sm:$0xff]   ;;  %v9800_v31 = vld [vmem:[%s11093_s25 + $0x8a4] ss:$8 sps:$4 sm:$0xff]  }
 0x133   : > { %v11424_v39 = vadd.f32 %v6766_v36, %v6725_v26  ;;  %7061 = vmatpush1.bf16.msra.mxu1 %v9723_v32  ;;  %v6727_v41 = vpop.f32.mrf.mxu0  ;;  %7021 = vmatprep.subr.bf16.mxu0 %v9728_v33  ;;  %v9803_v32 = vld [vmem:[%s11093_s25 + $0x9a4] ss:$8 sps:$4 sm:$0xff]   ;;  %v9798_v33 = vld [vmem:[%s11093_s25 + $0x8a0] ss:$8 sps:$4 sm:$0xff]   ;;  %v9804_v26 = vld [vmem:[%s11093_s25 + $0x890] ss:$8 sps:$4 sm:$0xff]  }
 0x134   : > { %v6768_v42 = vpop.f32.mrf.mxu1  ;;  %7062 = vmatprep.subr.bf16.mxu1 %v9731_v34  ;;  %7051 = vmatprep.mubr.bf16.mxu0 %v8184_v35  ;;  %v9801_v34 = vld [vmem:[%s11093_s25 + $0x9a0] ss:$8 sps:$4 sm:$0xff]   ;;  %v9806_v35 = vld [vmem:[%s11093_s25 + $0x894] ss:$8 sps:$4 sm:$0xff]   ;;  %v9807_v36 = vld [vmem:[%s11093_s25 + $0x990] ss:$8 sps:$4 sm:$0xff]  }
 0x135   : > { %v11428_v44 = vadd.f32 %v6768_v42, %v6727_v41  ;;  %7092 = vmatprep.mubr.bf16.mxu1 %v8186_v25  ;;  %v6729_v45 = vpop.f32.mrf.mxu0  ;;  %v9809_v25 = vld [vmem:[%s11093_s25 + $0x994] ss:$8 sps:$4 sm:$0xff]   ;;  %v9813_v41 = vld [vmem:[%s11093_s25 + $0x980] ss:$8 sps:$4 sm:$0xff]  }
 0x136   : > { %v6770_v46 = vpop.f32.mrf.mxu1  ;;  %7022 = vmatpush1.bf16.msra.mxu0 %v9726_v37  ;;  %v9812_v37 = vld [vmem:[%s11093_s25 + $0x884] ss:$8 sps:$4 sm:$0xff]   ;;  %v9822_v42 = vld [vmem:[%s11093_s25 + $0xa74] ss:$8 sps:$4 sm:$0xff]   ;;  %v9820_v45 = vld [vmem:[%s11093_s25 + $0xa70] ss:$8 sps:$4 sm:$0xff]  }
 0x137   : > { %7063 = vmatpush1.bf16.msra.mxu1 %v9729_v38  ;;  %v6730_v50 = vpop.f32.mrf.mxu0  ;;  %7023 = vmatprep.subr.bf16.mxu0 %v9734_v40  ;;  %v9815_v38 = vld [vmem:[%s11093_s25 + $0x984] ss:$8 sps:$4 sm:$0xff]   ;;  %v9810_v40 = vld [vmem:[%s11093_s25 + $0x880] ss:$8 sps:$4 sm:$0xff]   ;;  %v9823_v46 = vld [vmem:[%s11093_s25 + $0xb70] ss:$8 sps:$4 sm:$0xff]  }
 0x138   : > { %v6771_v51 = vpop.f32.mrf.mxu1  ;;  %7064 = vmatprep.subr.bf16.mxu1 %v9737_v43  ;;  %v9825_v43 = vld [vmem:[%s11093_s25 + $0xb74] ss:$8 sps:$4 sm:$0xff]   ;;  %v11496_v50 = vld [vmem:[%s11103_s30 + $0x58] sm:$0xff] }
 0x139   : > { %v9828_v51 = vld [vmem:[%s11093_s25 + $0xa64] ss:$8 sps:$4 sm:$0xff]  }
 0x13a   : > { %7024 = vmatpush1.bf16.msra.mxu0 %v9732_v47  ;;  %v8183_v47 = vcombine.low %v11405_v19, %v11405_v19 }
 0x13b   : > { %7065 = vmatpush1.bf16.msra.mxu1 %v9735_v48  ;;  %7025 = vmatprep.subr.bf16.mxu0 %v9740_v49  ;;  %v8185_v48 = vcombine.low %v11412_v30, %v11412_v30  ;;  %v11493_v49 = vld [vmem:[%s11103_s30 + $0x50] sm:$0xff]  ;;  %v8190_v30 = vcombine.high %v11496_v50, %v11496_v50 }
 0x13c   : > { %7066 = vmatprep.subr.bf16.mxu1 %v9743_v52  ;;  %v9831_v52 = vld [vmem:[%s11093_s25 + $0xb64] ss:$8 sps:$4 sm:$0xff]   ;;  %v8188_v19 = vcombine.high %v11493_v49, %v11493_v49 }
 0x13e   : > { %7026 = vmatpush1.bf16.msra.mxu0 %v9738_v53  ;;  %v9826_v53 = vld [vmem:[%s11093_s25 + $0xa60] ss:$8 sps:$4 sm:$0xff]  }
 0x13f   : > { %7067 = vmatpush1.bf16.msra.mxu1 %v9741_v54  ;;  %7027 = vmatprep.subr.bf16.mxu0 %v9746_v55  ;;  %v9829_v54 = vld [vmem:[%s11093_s25 + $0xb60] ss:$8 sps:$4 sm:$0xff]  }
 0x140   : > { %7068 = vmatprep.subr.bf16.mxu1 %v9749_v56 }
 0x142   : > { %7028 = vmatpush1.bf16.msra.mxu0 %v9744_v57 }
 0x143   : > { %7069 = vmatpush1.bf16.msra.mxu1 %v9747_v58  ;;  %7029 = vmatprep.subr.bf16.mxu0 %v9752_v59 }
 0x144   : > { %7070 = vmatprep.subr.bf16.mxu1 %v9755_v60  ;;  %v9834_v60 = vld [vmem:[%s11093_s25 + $0xa54] ss:$8 sps:$4 sm:$0xff]  }
 0x146   : > { %7030 = vmatpush1.bf16.msra.mxu0 %v9750_v61  ;;  %v9837_v61 = vld [vmem:[%s11093_s25 + $0xb54] ss:$8 sps:$4 sm:$0xff]  }
 0x147   : > { %7071 = vmatpush1.bf16.msra.mxu1 %v9753_v62  ;;  %7031 = vmatprep.subr.bf16.mxu0 %v9758_v63 }
 0x148   : > { %7072 = vmatprep.subr.bf16.mxu1 %v9761_v0  ;;  %v9832_v0 = vld [vmem:[%s11093_s25 + $0xa50] ss:$8 sps:$4 sm:$0xff]  }
 0x14a   : > { %7032 = vmatpush1.bf16.msra.mxu0 %v9756_v1  ;;  %v9835_v1 = vld [vmem:[%s11093_s25 + $0xb50] ss:$8 sps:$4 sm:$0xff]  }
 0x14b   : > { %7073 = vmatpush1.bf16.msra.mxu1 %v9759_v2  ;;  %7033 = vmatprep.subr.bf16.mxu0 %v9764_v3 }
 0x14c   : > { %7074 = vmatprep.subr.bf16.mxu1 %v9767_v4 }
 0x14e   : > { %7034 = vmatpush1.bf16.msra.mxu0 %v9762_v5 }
 0x14f   : > { %7075 = vmatpush1.bf16.msra.mxu1 %v9765_v6  ;;  %7035 = vmatprep.subr.bf16.mxu0 %v9770_v7  ;;  %v9843_v6 = vld [vmem:[%s11093_s25 + $0xb44] ss:$8 sps:$4 sm:$0xff]   ;;  %v9838_v7 = vld [vmem:[%s11093_s25 + $0xa40] ss:$8 sps:$4 sm:$0xff]  }
 0x150   : > { %7076 = vmatprep.subr.bf16.mxu1 %v9773_v8  ;;  %v9841_v8 = vld [vmem:[%s11093_s25 + $0xb40] ss:$8 sps:$4 sm:$0xff]  }
 0x152   : > { %7036 = vmatpush2.bf16.msra.mxu0 %v9768_v9  ;;  %v9846_v9 = vld [vmem:[%s11093_s25 + $0xa34] ss:$8 sps:$4 sm:$0xff]  }
 0x153   : > { %7077 = vmatpush2.bf16.msra.mxu1 %v9771_v10  ;;  %7037 = vmatprep.subr.bf16.mxu0 %v9776_v11  ;;  %v9849_v10 = vld [vmem:[%s11093_s25 + $0xb34] ss:$8 sps:$4 sm:$0xff]   ;;  %v9844_v11 = vld [vmem:[%s11093_s25 + $0xa30] ss:$8 sps:$4 sm:$0xff]  }
 0x154   : > { %7078 = vmatprep.subr.bf16.mxu1 %v9779_v12  ;;  %v9847_v12 = vld [vmem:[%s11093_s25 + $0xb30] ss:$8 sps:$4 sm:$0xff]  }
 0x156   : > { %7038 = vmatpush2.bf16.msra.mxu0 %v9774_v13  ;;  %v9852_v13 = vld [vmem:[%s11093_s25 + $0xa24] ss:$8 sps:$4 sm:$0xff]  }
 0x157   : > { %7079 = vmatpush2.bf16.msra.mxu1 %v9777_v14  ;;  %7039 = vmatprep.subr.bf16.mxu0 %v9782_v15  ;;  %v9855_v14 = vld [vmem:[%s11093_s25 + $0xb24] ss:$8 sps:$4 sm:$0xff]   ;;  %v9850_v15 = vld [vmem:[%s11093_s25 + $0xa20] ss:$8 sps:$4 sm:$0xff]  }
 0x158   : > { %7080 = vmatprep.subr.bf16.mxu1 %v9785_v16  ;;  %v9853_v16 = vld [vmem:[%s11093_s25 + $0xb20] ss:$8 sps:$4 sm:$0xff]  }
 0x15a   : > { %7040 = vmatpush2.bf16.msra.mxu0 %v9780_v17  ;;  %v9858_v17 = vld [vmem:[%s11093_s25 + $0xa14] ss:$8 sps:$4 sm:$0xff]  }
 0x15b   : > { %7081 = vmatpush2.bf16.msra.mxu1 %v9783_v18  ;;  %7041 = vmatprep.subr.bf16.mxu0 %v9788_v21  ;;  %v9861_v18 = vld [vmem:[%s11093_s25 + $0xb14] ss:$8 sps:$4 sm:$0xff]   ;;  %v9856_v21 = vld [vmem:[%s11093_s25 + $0xa10] ss:$8 sps:$4 sm:$0xff]  }
 0x15c   : > { %7082 = vmatprep.subr.bf16.mxu1 %v9791_v22  ;;  %v9859_v22 = vld [vmem:[%s11093_s25 + $0xb10] ss:$8 sps:$4 sm:$0xff]  }
 0x15e   : > { %7042 = vmatpush2.bf16.msra.mxu0 %v9786_v23  ;;  %v9864_v23 = vld [vmem:[%s11093_s25 + $0xa04] ss:$8 sps:$4 sm:$0xff]  }
 0x15f   : > { %7083 = vmatpush2.bf16.msra.mxu1 %v9789_v24  ;;  %7043 = vmatprep.subr.bf16.mxu0 %v9794_v27  ;;  %v9867_v24 = vld [vmem:[%s11093_s25 + $0xb04] ss:$8 sps:$4 sm:$0xff]   ;;  %v9862_v27 = vld [vmem:[%s11093_s25 + $0xa00] ss:$8 sps:$4 sm:$0xff]  }
 0x160   : > { %7084 = vmatprep.subr.bf16.mxu1 %v9797_v28  ;;  %v9865_v28 = vld [vmem:[%s11093_s25 + $0xb00] ss:$8 sps:$4 sm:$0xff]  }
 0x162   : > { %7044 = vmatpush2.bf16.msra.mxu0 %v9792_v20  ;;  %v9870_v20 = vld [vmem:[%s11093_s25 + $0xaf4] ss:$8 sps:$4 sm:$0xff]  }
 0x163   : > { %7085 = vmatpush2.bf16.msra.mxu1 %v9795_v29  ;;  %7045 = vmatprep.subr.bf16.mxu0 %v9800_v31  ;;  %v9873_v29 = vld [vmem:[%s11093_s25 + $0xbf4] ss:$8 sps:$4 sm:$0xff]   ;;  %v9868_v31 = vld [vmem:[%s11093_s25 + $0xaf0] ss:$8 sps:$4 sm:$0xff]  }
 0x164   : > { %7086 = vmatprep.subr.bf16.mxu1 %v9803_v32  ;;  %v9871_v32 = vld [vmem:[%s11093_s25 + $0xbf0] ss:$8 sps:$4 sm:$0xff]  }
 0x166   : > { %7046 = vmatpush2.bf16.msra.mxu0 %v9798_v33  ;;  %v9876_v33 = vld [vmem:[%s11093_s25 + $0xae4] ss:$8 sps:$4 sm:$0xff]  }
 0x167   : > { %7087 = vmatpush2.bf16.msra.mxu1 %v9801_v34  ;;  %7047 = vmatprep.subr.bf16.mxu0 %v9806_v35  ;;  %v9879_v34 = vld [vmem:[%s11093_s25 + $0xbe4] ss:$8 sps:$4 sm:$0xff]   ;;  %v9874_v35 = vld [vmem:[%s11093_s25 + $0xae0] ss:$8 sps:$4 sm:$0xff]  }
 0x168   : > { %7088 = vmatprep.subr.bf16.mxu1 %v9809_v25  ;;  %v9877_v25 = vld [vmem:[%s11093_s25 + $0xbe0] ss:$8 sps:$4 sm:$0xff]  }
 0x16a   : > { %7048 = vmatpush2.bf16.msra.mxu0 %v9804_v26  ;;  %v9882_v26 = vld [vmem:[%s11093_s25 + $0xad4] ss:$8 sps:$4 sm:$0xff]  }
 0x16b   : > { %7089 = vmatpush2.bf16.msra.mxu1 %v9807_v36  ;;  %7049 = vmatprep.subr.bf16.mxu0 %v9812_v37  ;;  %v9885_v36 = vld [vmem:[%s11093_s25 + $0xbd4] ss:$8 sps:$4 sm:$0xff]   ;;  %v9880_v37 = vld [vmem:[%s11093_s25 + $0xad0] ss:$8 sps:$4 sm:$0xff]  }
 0x16c   : > { %7090 = vmatprep.subr.bf16.mxu1 %v9815_v38  ;;  %v9883_v38 = vld [vmem:[%s11093_s25 + $0xbd0] ss:$8 sps:$4 sm:$0xff]  }
 0x16e   : > { %7050 = vmatpush2.bf16.msra.mxu0 %v9810_v40  ;;  %v9888_v40 = vld [vmem:[%s11093_s25 + $0xac4] ss:$8 sps:$4 sm:$0xff]  }
 0x16f   : > { %7091 = vmatpush2.bf16.msra.mxu1 %v9813_v41  ;;  %7101 = vmatprep.subr.bf16.mxu0 %v9822_v42  ;;  %v9891_v41 = vld [vmem:[%s11093_s25 + $0xbc4] ss:$8 sps:$4 sm:$0xff]   ;;  %v9886_v42 = vld [vmem:[%s11093_s25 + $0xac0] ss:$8 sps:$4 sm:$0xff]  }
 0x170   : > { %7142 = vmatprep.subr.bf16.mxu1 %v9825_v43  ;;  %v9889_v43 = vld [vmem:[%s11093_s25 + $0xbc0] ss:$8 sps:$4 sm:$0xff]  }
 0x171   : > { %v6807_v55 = vpop.f32.mrf.mxu0  ;;  %7052 = vmatmul.mubr.bf16.vlgmr.msra.gmra.mxu0 %v8183_v47  ;;  %v9892_v47 = vld [vmem:[%s11093_s25 + $0xab0] ss:$8 sps:$4 sm:$0xff]  }
 0x172   : > { %v6848_v56 = vpop.f32.mrf.mxu1  ;;  %7093 = vmatmul.mubr.bf16.vlgmr.msra.gmra.mxu1 %v8185_v48  ;;  %v6808_v57 = vadd.f32 %v6807_v55, %v11424_v39  ;;  %7102 = vmatpush1.bf16.msra.mxu0 %v9820_v45  ;;  %v9894_v45 = vld [vmem:[%s11093_s25 + $0xab4] ss:$8 sps:$4 sm:$0xff]   ;;  %v9895_v48 = vld [vmem:[%s11093_s25 + $0xbb0] ss:$8 sps:$4 sm:$0xff]  }
 0x173   : > { %7143 = vmatpush1.bf16.msra.mxu1 %v9823_v46  ;;  %v6809_v58 = vpop.f32.mrf.mxu0  ;;  %7103 = vmatprep.subr.bf16.mxu0 %v9828_v51  ;;  %v9897_v46 = vld [vmem:[%s11093_s25 + $0xbb4] ss:$8 sps:$4 sm:$0xff]   ;;  %v9900_v51 = vld [vmem:[%s11093_s25 + $0xaa4] ss:$8 sps:$4 sm:$0xff]   ;;  %v9904_v55 = vld [vmem:[%s11093_s25 + $0xa90] ss:$8 sps:$4 sm:$0xff]  }
 0x174   : > { %v6850_v59 = vpop.f32.mrf.mxu1  ;;  %7144 = vmatprep.subr.bf16.mxu1 %v9831_v52  ;;  %v11509_v62 = vadd.f32 %v6848_v56, %v6808_v57  ;;  %v6810_v63 = vadd.f32 %v6809_v58, %v11428_v44  ;;  %7133 = vmatprep.mubr.bf16.mxu0 %v8188_v19  ;;  %v9840_v44 = vld [vmem:[%s11093_s25 + $0xa44] ss:$8 sps:$4 sm:$0xff]   ;;  %v9906_v19 = vld [vmem:[%s11093_s25 + $0xa94] ss:$8 sps:$4 sm:$0xff]   ;;  %v9907_v56 = vld [vmem:[%s11093_s25 + $0xb90] ss:$8 sps:$4 sm:$0xff]  }
 0x175   : > { %7174 = vmatprep.mubr.bf16.mxu1 %v8190_v30  ;;  %v6811_v39 = vpop.f32.mrf.mxu0  ;;  %v9903_v52 = vld [vmem:[%s11093_s25 + $0xba4] ss:$8 sps:$4 sm:$0xff]   ;;  %v9909_v30 = vld [vmem:[%s11093_s25 + $0xb94] ss:$8 sps:$4 sm:$0xff]  }
 0x176   : > { %v6852_v2 = vpop.f32.mrf.mxu1  ;;  %v11514_v3 = vadd.f32 %v6850_v59, %v6810_v63  ;;  %7104 = vmatpush1.bf16.msra.mxu0 %v9826_v53  ;;  %v9898_v53 = vld [vmem:[%s11093_s25 + $0xaa0] ss:$8 sps:$4 sm:$0xff]   ;;  %v9912_v57 = vld [vmem:[%s11093_s25 + $0xa84] ss:$8 sps:$4 sm:$0xff]   ;;  %v9925_v63 = vld [vmem:[%s11093_s25 + $0xd74] ss:$8 sps:$4 sm:$0xff]   ;;  %v8187_v39 = vcombine.low %v11493_v49, %v11493_v49 }
 0x177   : > { %7145 = vmatpush1.bf16.msra.mxu1 %v9829_v54  ;;  %v6812_v4 = vpop.f32.mrf.mxu0  ;;  %7105 = vmatprep.subr.bf16.mxu0 %v9834_v60  ;;  %v9901_v54 = vld [vmem:[%s11093_s25 + $0xba0] ss:$8 sps:$4 sm:$0xff]   ;;  %v9915_v58 = vld [vmem:[%s11093_s25 + $0xb84] ss:$8 sps:$4 sm:$0xff]   ;;  %v8189_v2 = vcombine.low %v11496_v50, %v11496_v50 }
 0x178   : > { %v6853_v5 = vpop.f32.mrf.mxu1  ;;  %7146 = vmatprep.subr.bf16.mxu1 %v9837_v61  ;;  %v9910_v59 = vld [vmem:[%s11093_s25 + $0xa80] ss:$8 sps:$4 sm:$0xff]   ;;  %v9922_v61 = vld [vmem:[%s11093_s25 + $0xc74] ss:$8 sps:$4 sm:$0xff]  }
 0x179   : > { %v9913_v60 = vld [vmem:[%s11093_s25 + $0xb80] ss:$8 sps:$4 sm:$0xff]   ;;  %v11577_v4 = vld [vmem:[%s11103_s30 + $0x60] sm:$0xff]  ;;  %v11580_v5 = vld [vmem:[%s11103_s30 + $0x68] sm:$0xff] }
 0x17a   : > { %7106 = vmatpush1.bf16.msra.mxu0 %v9832_v0  ;;  %v9920_v0 = vld [vmem:[%s11093_s25 + $0xc70] ss:$8 sps:$4 sm:$0xff]   ;;  %v8192_v49 = vcombine.high %v11577_v4, %v11577_v4  ;;  %v8194_v50 = vcombine.high %v11580_v5, %v11580_v5 }
 0x17b   : > { %7147 = vmatpush1.bf16.msra.mxu1 %v9835_v1  ;;  %7107 = vmatprep.subr.bf16.mxu0 %v9840_v44  ;;  %v9923_v1 = vld [vmem:[%s11093_s25 + $0xd70] ss:$8 sps:$4 sm:$0xff]   ;;  %v9928_v44 = vld [vmem:[%s11093_s25 + $0xc64] ss:$8 sps:$4 sm:$0xff]  }
 0x17c   : > { %7148 = vmatprep.subr.bf16.mxu1 %v9843_v6  ;;  %v9931_v6 = vld [vmem:[%s11093_s25 + $0xd64] ss:$8 sps:$4 sm:$0xff]  }
 0x17e   : > { %7108 = vmatpush1.bf16.msra.mxu0 %v9838_v7  ;;  %v9926_v7 = vld [vmem:[%s11093_s25 + $0xc60] ss:$8 sps:$4 sm:$0xff]  }
 0x17f   : > { %7149 = vmatpush1.bf16.msra.mxu1 %v9841_v8  ;;  %7109 = vmatprep.subr.bf16.mxu0 %v9846_v9  ;;  %v9929_v8 = vld [vmem:[%s11093_s25 + $0xd60] ss:$8 sps:$4 sm:$0xff]  }
 0x180   : > { %7150 = vmatprep.subr.bf16.mxu1 %v9849_v10 }
 0x182   : > { %7110 = vmatpush1.bf16.msra.mxu0 %v9844_v11 }
 0x183   : > { %7151 = vmatpush1.bf16.msra.mxu1 %v9847_v12  ;;  %7111 = vmatprep.subr.bf16.mxu0 %v9852_v13 }
 0x184   : > { %7152 = vmatprep.subr.bf16.mxu1 %v9855_v14  ;;  %v9934_v14 = vld [vmem:[%s11093_s25 + $0xc54] ss:$8 sps:$4 sm:$0xff]  }
 0x186   : > { %7112 = vmatpush1.bf16.msra.mxu0 %v9850_v15  ;;  %v9937_v15 = vld [vmem:[%s11093_s25 + $0xd54] ss:$8 sps:$4 sm:$0xff]  }
 0x187   : > { %7153 = vmatpush1.bf16.msra.mxu1 %v9853_v16  ;;  %7113 = vmatprep.subr.bf16.mxu0 %v9858_v17 }
 0x188   : > { %7154 = vmatprep.subr.bf16.mxu1 %v9861_v18  ;;  %v9932_v18 = vld [vmem:[%s11093_s25 + $0xc50] ss:$8 sps:$4 sm:$0xff]  }
 0x18a   : > { %7114 = vmatpush1.bf16.msra.mxu0 %v9856_v21  ;;  %v9935_v21 = vld [vmem:[%s11093_s25 + $0xd50] ss:$8 sps:$4 sm:$0xff]  }
 0x18b   : > { %7155 = vmatpush1.bf16.msra.mxu1 %v9859_v22  ;;  %7115 = vmatprep.subr.bf16.mxu0 %v9864_v23 }
 0x18c   : > { %7156 = vmatprep.subr.bf16.mxu1 %v9867_v24 }
 0x18e   : > { %7116 = vmatpush1.bf16.msra.mxu0 %v9862_v27 }
 0x18f   : > { %7157 = vmatpush1.bf16.msra.mxu1 %v9865_v28  ;;  %7117 = vmatprep.subr.bf16.mxu0 %v9870_v20  ;;  %v9943_v28 = vld [vmem:[%s11093_s25 + $0xd44] ss:$8 sps:$4 sm:$0xff]   ;;  %v9938_v20 = vld [vmem:[%s11093_s25 + $0xc40] ss:$8 sps:$4 sm:$0xff]  }
 0x190   : > { %7158 = vmatprep.subr.bf16.mxu1 %v9873_v29  ;;  %v9941_v29 = vld [vmem:[%s11093_s25 + $0xd40] ss:$8 sps:$4 sm:$0xff]  }
 0x192   : > { %7118 = vmatpush2.bf16.msra.mxu0 %v9868_v31  ;;  %v9946_v31 = vld [vmem:[%s11093_s25 + $0xc34] ss:$8 sps:$4 sm:$0xff]  }
 0x193   : > { %7159 = vmatpush2.bf16.msra.mxu1 %v9871_v32  ;;  %7119 = vmatprep.subr.bf16.mxu0 %v9876_v33  ;;  %v9949_v32 = vld [vmem:[%s11093_s25 + $0xd34] ss:$8 sps:$4 sm:$0xff]   ;;  %v9944_v33 = vld [vmem:[%s11093_s25 + $0xc30] ss:$8 sps:$4 sm:$0xff]  }
 0x194   : > { %7160 = vmatprep.subr.bf16.mxu1 %v9879_v34  ;;  %v9947_v34 = vld [vmem:[%s11093_s25 + $0xd30] ss:$8 sps:$4 sm:$0xff]  }
 0x196   : > { %7120 = vmatpush2.bf16.msra.mxu0 %v9874_v35  ;;  %v9952_v35 = vld [vmem:[%s11093_s25 + $0xc24] ss:$8 sps:$4 sm:$0xff]  }
 0x197   : > { %7161 = vmatpush2.bf16.msra.mxu1 %v9877_v25  ;;  %7121 = vmatprep.subr.bf16.mxu0 %v9882_v26  ;;  %v9955_v25 = vld [vmem:[%s11093_s25 + $0xd24] ss:$8 sps:$4 sm:$0xff]   ;;  %v9950_v26 = vld [vmem:[%s11093_s25 + $0xc20] ss:$8 sps:$4 sm:$0xff]  }
 0x198   : > { %7162 = vmatprep.subr.bf16.mxu1 %v9885_v36  ;;  %v9953_v36 = vld [vmem:[%s11093_s25 + $0xd20] ss:$8 sps:$4 sm:$0xff]  }
 0x19a   : > { %7122 = vmatpush2.bf16.msra.mxu0 %v9880_v37  ;;  %v9958_v37 = vld [vmem:[%s11093_s25 + $0xc14] ss:$8 sps:$4 sm:$0xff]  }
 0x19b   : > { %7163 = vmatpush2.bf16.msra.mxu1 %v9883_v38  ;;  %7123 = vmatprep.subr.bf16.mxu0 %v9888_v40  ;;  %v9961_v38 = vld [vmem:[%s11093_s25 + $0xd14] ss:$8 sps:$4 sm:$0xff]   ;;  %v9956_v40 = vld [vmem:[%s11093_s25 + $0xc10] ss:$8 sps:$4 sm:$0xff]  }
 0x19c   : > { %7164 = vmatprep.subr.bf16.mxu1 %v9891_v41  ;;  %v9959_v41 = vld [vmem:[%s11093_s25 + $0xd10] ss:$8 sps:$4 sm:$0xff]  }
 0x19e   : > { %7124 = vmatpush2.bf16.msra.mxu0 %v9886_v42  ;;  %v9964_v42 = vld [vmem:[%s11093_s25 + $0xc04] ss:$8 sps:$4 sm:$0xff]  }
 0x19f   : > { %7165 = vmatpush2.bf16.msra.mxu1 %v9889_v43  ;;  %7125 = vmatprep.subr.bf16.mxu0 %v9894_v45  ;;  %v9967_v43 = vld [vmem:[%s11093_s25 + $0xd04] ss:$8 sps:$4 sm:$0xff]   ;;  %v9962_v45 = vld [vmem:[%s11093_s25 + $0xc00] ss:$8 sps:$4 sm:$0xff]  }
 0x1a0   : > { %7166 = vmatprep.subr.bf16.mxu1 %v9897_v46  ;;  %v9965_v46 = vld [vmem:[%s11093_s25 + $0xd00] ss:$8 sps:$4 sm:$0xff]  }
 0x1a2   : > { %7126 = vmatpush2.bf16.msra.mxu0 %v9892_v47  ;;  %v9970_v47 = vld [vmem:[%s11093_s25 + $0xcf4] ss:$8 sps:$4 sm:$0xff]  }
 0x1a3   : > { %7167 = vmatpush2.bf16.msra.mxu1 %v9895_v48  ;;  %7127 = vmatprep.subr.bf16.mxu0 %v9900_v51  ;;  %v9973_v48 = vld [vmem:[%s11093_s25 + $0xdf4] ss:$8 sps:$4 sm:$0xff]   ;;  %v9968_v51 = vld [vmem:[%s11093_s25 + $0xcf0] ss:$8 sps:$4 sm:$0xff]  }
 0x1a4   : > { %7168 = vmatprep.subr.bf16.mxu1 %v9903_v52  ;;  %v9971_v52 = vld [vmem:[%s11093_s25 + $0xdf0] ss:$8 sps:$4 sm:$0xff]  }
 0x1a6   : > { %7128 = vmatpush2.bf16.msra.mxu0 %v9898_v53  ;;  %v9976_v53 = vld [vmem:[%s11093_s25 + $0xce4] ss:$8 sps:$4 sm:$0xff]  }
 0x1a7   : > { %7169 = vmatpush2.bf16.msra.mxu1 %v9901_v54  ;;  %7129 = vmatprep.subr.bf16.mxu0 %v9906_v19  ;;  %v9979_v54 = vld [vmem:[%s11093_s25 + $0xde4] ss:$8 sps:$4 sm:$0xff]   ;;  %v9974_v19 = vld [vmem:[%s11093_s25 + $0xce0] ss:$8 sps:$4 sm:$0xff]  }
 0x1a8   : > { %7170 = vmatprep.subr.bf16.mxu1 %v9909_v30  ;;  %v9977_v30 = vld [vmem:[%s11093_s25 + $0xde0] ss:$8 sps:$4 sm:$0xff]  }
 0x1aa   : > { %7130 = vmatpush2.bf16.msra.mxu0 %v9904_v55  ;;  %v9982_v55 = vld [vmem:[%s11093_s25 + $0xcd4] ss:$8 sps:$4 sm:$0xff]  }
 0x1ab   : > { %7171 = vmatpush2.bf16.msra.mxu1 %v9907_v56  ;;  %7131 = vmatprep.subr.bf16.mxu0 %v9912_v57  ;;  %v9985_v56 = vld [vmem:[%s11093_s25 + $0xdd4] ss:$8 sps:$4 sm:$0xff]   ;;  %v9980_v57 = vld [vmem:[%s11093_s25 + $0xcd0] ss:$8 sps:$4 sm:$0xff]  }
 0x1ac   : > { %7172 = vmatprep.subr.bf16.mxu1 %v9915_v58  ;;  %v9983_v58 = vld [vmem:[%s11093_s25 + $0xdd0] ss:$8 sps:$4 sm:$0xff]  }
 0x1ae   : > { %7132 = vmatpush2.bf16.msra.mxu0 %v9910_v59  ;;  %v9988_v59 = vld [vmem:[%s11093_s25 + $0xcc4] ss:$8 sps:$4 sm:$0xff]  }
 0x1af   : > { %7173 = vmatpush2.bf16.msra.mxu1 %v9913_v60  ;;  %7183 = vmatprep.subr.bf16.mxu0 %v9922_v61  ;;  %v9991_v60 = vld [vmem:[%s11093_s25 + $0xdc4] ss:$8 sps:$4 sm:$0xff]   ;;  %v9986_v61 = vld [vmem:[%s11093_s25 + $0xcc0] ss:$8 sps:$4 sm:$0xff]  }
 0x1b0   : > { %7224 = vmatprep.subr.bf16.mxu1 %v9925_v63  ;;  %v9989_v63 = vld [vmem:[%s11093_s25 + $0xdc0] ss:$8 sps:$4 sm:$0xff]  }
 0x1b1   : > { %v6889_v9 = vpop.f32.mrf.mxu0  ;;  %7134 = vmatmul.mubr.bf16.vlgmr.msra.gmra.mxu0 %v8187_v39  ;;  %v9992_v39 = vld [vmem:[%s11093_s25 + $0xcb0] ss:$8 sps:$4 sm:$0xff]  }
 0x1b2   : > { %v6930_v10 = vpop.f32.mrf.mxu1  ;;  %7175 = vmatmul.mubr.bf16.vlgmr.msra.gmra.mxu1 %v8189_v2  ;;  %v6890_v11 = vadd.f32 %v6889_v9, %v11509_v62  ;;  %7184 = vmatpush1.bf16.msra.mxu0 %v9920_v0  ;;  %v9994_v0 = vld [vmem:[%s11093_s25 + $0xcb4] ss:$8 sps:$4 sm:$0xff]   ;;  %v9995_v2 = vld [vmem:[%s11093_s25 + $0xdb0] ss:$8 sps:$4 sm:$0xff]  }
 0x1b3   : > { %7225 = vmatpush1.bf16.msra.mxu1 %v9923_v1  ;;  %v6891_v12 = vpop.f32.mrf.mxu0  ;;  %7185 = vmatprep.subr.bf16.mxu0 %v9928_v44  ;;  %v9997_v1 = vld [vmem:[%s11093_s25 + $0xdb4] ss:$8 sps:$4 sm:$0xff]   ;;  %v10000_v44 = vld [vmem:[%s11093_s25 + $0xca4] ss:$8 sps:$4 sm:$0xff]   ;;  %v10004_v9 = vld [vmem:[%s11093_s25 + $0xc90] ss:$8 sps:$4 sm:$0xff]  }
 0x1b4   : > { %v6932_v13 = vpop.f32.mrf.mxu1  ;;  %7226 = vmatprep.subr.bf16.mxu1 %v9931_v6  ;;  %v11593_v16 = vadd.f32 %v6930_v10, %v6890_v11  ;;  %v6892_v17 = vadd.f32 %v6891_v12, %v11514_v3  ;;  %7215 = vmatprep.mubr.bf16.mxu0 %v8192_v49  ;;  %v9940_v3 = vld [vmem:[%s11093_s25 + $0xc44] ss:$8 sps:$4 sm:$0xff]   ;;  %v10006_v49 = vld [vmem:[%s11093_s25 + $0xc94] ss:$8 sps:$4 sm:$0xff]   ;;  %v10007_v10 = vld [vmem:[%s11093_s25 + $0xd90] ss:$8 sps:$4 sm:$0xff]  }
 0x1b5   : > { %7256 = vmatprep.mubr.bf16.mxu1 %v8194_v50  ;;  %v6893_v62 = vpop.f32.mrf.mxu0  ;;  %v10003_v6 = vld [vmem:[%s11093_s25 + $0xda4] ss:$8 sps:$4 sm:$0xff]   ;;  %v10009_v50 = vld [vmem:[%s11093_s25 + $0xd94] ss:$8 sps:$4 sm:$0xff]  }
 0x1b6   : > { %v6934_v22 = vpop.f32.mrf.mxu1  ;;  %v11598_v23 = vadd.f32 %v6932_v13, %v6892_v17  ;;  %7186 = vmatpush1.bf16.msra.mxu0 %v9926_v7  ;;  %v9998_v7 = vld [vmem:[%s11093_s25 + $0xca0] ss:$8 sps:$4 sm:$0xff]   ;;  %v10012_v11 = vld [vmem:[%s11093_s25 + $0xc84] ss:$8 sps:$4 sm:$0xff]   ;;  %v10025_v17 = vld [vmem:[%s11093_s25 + $0xf74] ss:$8 sps:$4 sm:$0xff]   ;;  %v8191_v62 = vcombine.low %v11577_v4, %v11577_v4 }
 0x1b7   : > { %7227 = vmatpush1.bf16.msra.mxu1 %v9929_v8  ;;  %v6894_v24 = vpop.f32.mrf.mxu0  ;;  %7187 = vmatprep.subr.bf16.mxu0 %v9934_v14  ;;  %v10001_v8 = vld [vmem:[%s11093_s25 + $0xda0] ss:$8 sps:$4 sm:$0xff]   ;;  %v10015_v12 = vld [vmem:[%s11093_s25 + $0xd84] ss:$8 sps:$4 sm:$0xff]   ;;  %v8193_v22 = vcombine.low %v11580_v5, %v11580_v5 }
 0x1b8   : > { %v6935_v27 = vpop.f32.mrf.mxu1  ;;  %7228 = vmatprep.subr.bf16.mxu1 %v9937_v15  ;;  %v10010_v13 = vld [vmem:[%s11093_s25 + $0xc80] ss:$8 sps:$4 sm:$0xff]   ;;  %v10022_v15 = vld [vmem:[%s11093_s25 + $0xe74] ss:$8 sps:$4 sm:$0xff]  }
 0x1b9   : > { %v10013_v14 = vld [vmem:[%s11093_s25 + $0xd80] ss:$8 sps:$4 sm:$0xff]  }
 0x1ba   : > { %7188 = vmatpush1.bf16.msra.mxu0 %v9932_v18  ;;  %v10020_v18 = vld [vmem:[%s11093_s25 + $0xe70] ss:$8 sps:$4 sm:$0xff]   ;;  %v11661_v24 = vld [vmem:[%s11103_s30 + $0x70] sm:$0xff]  ;;  %v11664_v27 = vld [vmem:[%s11103_s30 + $0x78] sm:$0xff] }
 0x1bb   : > { %7229 = vmatpush1.bf16.msra.mxu1 %v9935_v21  ;;  %7189 = vmatprep.subr.bf16.mxu0 %v9940_v3  ;;  %v10023_v21 = vld [vmem:[%s11093_s25 + $0xf70] ss:$8 sps:$4 sm:$0xff]   ;;  %v10028_v3 = vld [vmem:[%s11093_s25 + $0xe64] ss:$8 sps:$4 sm:$0xff]   ;;  %v8196_v4 = vcombine.high %v11661_v24, %v11661_v24  ;;  %v8198_v5 = vcombine.high %v11664_v27, %v11664_v27 }
 0x1bc   : > { %7230 = vmatprep.subr.bf16.mxu1 %v9943_v28  ;;  %v10031_v28 = vld [vmem:[%s11093_s25 + $0xf64] ss:$8 sps:$4 sm:$0xff]  }
 0x1be   : > { %7190 = vmatpush1.bf16.msra.mxu0 %v9938_v20  ;;  %v10026_v20 = vld [vmem:[%s11093_s25 + $0xe60] ss:$8 sps:$4 sm:$0xff]  }
 0x1bf   : > { %7231 = vmatpush1.bf16.msra.mxu1 %v9941_v29  ;;  %7191 = vmatprep.subr.bf16.mxu0 %v9946_v31  ;;  %v10029_v29 = vld [vmem:[%s11093_s25 + $0xf60] ss:$8 sps:$4 sm:$0xff]  }
 0x1c0   : > { %7232 = vmatprep.subr.bf16.mxu1 %v9949_v32 }
 0x1c2   : > { %7192 = vmatpush1.bf16.msra.mxu0 %v9944_v33 }
 0x1c3   : > { %7233 = vmatpush1.bf16.msra.mxu1 %v9947_v34  ;;  %7193 = vmatprep.subr.bf16.mxu0 %v9952_v35 }
 0x1c4   : > { %7234 = vmatprep.subr.bf16.mxu1 %v9955_v25  ;;  %v10034_v25 = vld [vmem:[%s11093_s25 + $0xe54] ss:$8 sps:$4 sm:$0xff]  }
 0x1c6   : > { %7194 = vmatpush1.bf16.msra.mxu0 %v9950_v26  ;;  %v10037_v26 = vld [vmem:[%s11093_s25 + $0xf54] ss:$8 sps:$4 sm:$0xff]  }
 0x1c7   : > { %7235 = vmatpush1.bf16.msra.mxu1 %v9953_v36  ;;  %7195 = vmatprep.subr.bf16.mxu0 %v9958_v37 }
 0x1c8   : > { %7236 = vmatprep.subr.bf16.mxu1 %v9961_v38  ;;  %v10032_v38 = vld [vmem:[%s11093_s25 + $0xe50] ss:$8 sps:$4 sm:$0xff]  }
 0x1ca   : > { %7196 = vmatpush1.bf16.msra.mxu0 %v9956_v40  ;;  %v10035_v40 = vld [vmem:[%s11093_s25 + $0xf50] ss:$8 sps:$4 sm:$0xff]  }
 0x1cb   : > { %7237 = vmatpush1.bf16.msra.mxu1 %v9959_v41  ;;  %7197 = vmatprep.subr.bf16.mxu0 %v9964_v42 }
 0x1cc   : > { %7238 = vmatprep.subr.bf16.mxu1 %v9967_v43 }
 0x1ce   : > { %7198 = vmatpush1.bf16.msra.mxu0 %v9962_v45 }
 0x1cf   : > { %7239 = vmatpush1.bf16.msra.mxu1 %v9965_v46  ;;  %7199 = vmatprep.subr.bf16.mxu0 %v9970_v47  ;;  %v10043_v46 = vld [vmem:[%s11093_s25 + $0xf44] ss:$8 sps:$4 sm:$0xff]   ;;  %v10038_v47 = vld [vmem:[%s11093_s25 + $0xe40] ss:$8 sps:$4 sm:$0xff]  }
 0x1d0   : > { %7240 = vmatprep.subr.bf16.mxu1 %v9973_v48  ;;  %v10041_v48 = vld [vmem:[%s11093_s25 + $0xf40] ss:$8 sps:$4 sm:$0xff]  }
 0x1d2   : > { %7200 = vmatpush2.bf16.msra.mxu0 %v9968_v51  ;;  %v10046_v51 = vld [vmem:[%s11093_s25 + $0xe34] ss:$8 sps:$4 sm:$0xff]  }
 0x1d3   : > { %7241 = vmatpush2.bf16.msra.mxu1 %v9971_v52  ;;  %7201 = vmatprep.subr.bf16.mxu0 %v9976_v53  ;;  %v10049_v52 = vld [vmem:[%s11093_s25 + $0xf34] ss:$8 sps:$4 sm:$0xff]   ;;  %v10044_v53 = vld [vmem:[%s11093_s25 + $0xe30] ss:$8 sps:$4 sm:$0xff]  }
 0x1d4   : > { %7242 = vmatprep.subr.bf16.mxu1 %v9979_v54  ;;  %v10047_v54 = vld [vmem:[%s11093_s25 + $0xf30] ss:$8 sps:$4 sm:$0xff]  }
 0x1d6   : > { %7202 = vmatpush2.bf16.msra.mxu0 %v9974_v19  ;;  %v10052_v19 = vld [vmem:[%s11093_s25 + $0xe24] ss:$8 sps:$4 sm:$0xff]  }
 0x1d7   : > { %7243 = vmatpush2.bf16.msra.mxu1 %v9977_v30  ;;  %7203 = vmatprep.subr.bf16.mxu0 %v9982_v55  ;;  %v10055_v30 = vld [vmem:[%s11093_s25 + $0xf24] ss:$8 sps:$4 sm:$0xff]   ;;  %v10050_v55 = vld [vmem:[%s11093_s25 + $0xe20] ss:$8 sps:$4 sm:$0xff]  }
 0x1d8   : > { %7244 = vmatprep.subr.bf16.mxu1 %v9985_v56  ;;  %v10053_v56 = vld [vmem:[%s11093_s25 + $0xf20] ss:$8 sps:$4 sm:$0xff]  }
 0x1da   : > { %7204 = vmatpush2.bf16.msra.mxu0 %v9980_v57  ;;  %v10058_v57 = vld [vmem:[%s11093_s25 + $0xe14] ss:$8 sps:$4 sm:$0xff]  }
 0x1db   : > { %7245 = vmatpush2.bf16.msra.mxu1 %v9983_v58  ;;  %7205 = vmatprep.subr.bf16.mxu0 %v9988_v59  ;;  %v10061_v58 = vld [vmem:[%s11093_s25 + $0xf14] ss:$8 sps:$4 sm:$0xff]   ;;  %v10056_v59 = vld [vmem:[%s11093_s25 + $0xe10] ss:$8 sps:$4 sm:$0xff]  }
 0x1dc   : > { %7246 = vmatprep.subr.bf16.mxu1 %v9991_v60  ;;  %v10059_v60 = vld [vmem:[%s11093_s25 + $0xf10] ss:$8 sps:$4 sm:$0xff]  }
 0x1de   : > { %7206 = vmatpush2.bf16.msra.mxu0 %v9986_v61  ;;  %v10064_v61 = vld [vmem:[%s11093_s25 + $0xe04] ss:$8 sps:$4 sm:$0xff]  }
 0x1df   : > { %7247 = vmatpush2.bf16.msra.mxu1 %v9989_v63  ;;  %7207 = vmatprep.subr.bf16.mxu0 %v9994_v0  ;;  %v10067_v63 = vld [vmem:[%s11093_s25 + $0xf04] ss:$8 sps:$4 sm:$0xff]   ;;  %v10062_v0 = vld [vmem:[%s11093_s25 + $0xe00] ss:$8 sps:$4 sm:$0xff]  }
 0x1e0   : > { %7248 = vmatprep.subr.bf16.mxu1 %v9997_v1  ;;  %v10065_v1 = vld [vmem:[%s11093_s25 + $0xf00] ss:$8 sps:$4 sm:$0xff]  }
 0x1e2   : > { %7208 = vmatpush2.bf16.msra.mxu0 %v9992_v39  ;;  %v10070_v39 = vld [vmem:[%s11093_s25 + $0xef4] ss:$8 sps:$4 sm:$0xff]  }
 0x1e3   : > { %7249 = vmatpush2.bf16.msra.mxu1 %v9995_v2  ;;  %7209 = vmatprep.subr.bf16.mxu0 %v10000_v44  ;;  %v10073_v2 = vld [vmem:[%s11093_s25 + $0xff4] ss:$8 sps:$4 sm:$0xff]   ;;  %v10068_v44 = vld [vmem:[%s11093_s25 + $0xef0] ss:$8 sps:$4 sm:$0xff]  }
 0x1e4   : > { %7250 = vmatprep.subr.bf16.mxu1 %v10003_v6  ;;  %v10071_v6 = vld [vmem:[%s11093_s25 + $0xff0] ss:$8 sps:$4 sm:$0xff]  }
 0x1e6   : > { %7210 = vmatpush2.bf16.msra.mxu0 %v9998_v7  ;;  %v10076_v7 = vld [vmem:[%s11093_s25 + $0xee4] ss:$8 sps:$4 sm:$0xff]  }
 0x1e7   : > { %7251 = vmatpush2.bf16.msra.mxu1 %v10001_v8  ;;  %7211 = vmatprep.subr.bf16.mxu0 %v10006_v49  ;;  %v10079_v8 = vld [vmem:[%s11093_s25 + $0xfe4] ss:$8 sps:$4 sm:$0xff]   ;;  %v10074_v49 = vld [vmem:[%s11093_s25 + $0xee0] ss:$8 sps:$4 sm:$0xff]  }
 0x1e8   : > { %7252 = vmatprep.subr.bf16.mxu1 %v10009_v50  ;;  %v10077_v50 = vld [vmem:[%s11093_s25 + $0xfe0] ss:$8 sps:$4 sm:$0xff]  }
 0x1ea   : > { %7212 = vmatpush2.bf16.msra.mxu0 %v10004_v9  ;;  %v10082_v9 = vld [vmem:[%s11093_s25 + $0xed4] ss:$8 sps:$4 sm:$0xff]  }
 0x1eb   : > { %7253 = vmatpush2.bf16.msra.mxu1 %v10007_v10  ;;  %7213 = vmatprep.subr.bf16.mxu0 %v10012_v11  ;;  %v10085_v10 = vld [vmem:[%s11093_s25 + $0xfd4] ss:$8 sps:$4 sm:$0xff]   ;;  %v10080_v11 = vld [vmem:[%s11093_s25 + $0xed0] ss:$8 sps:$4 sm:$0xff]  }
 0x1ec   : > { %7254 = vmatprep.subr.bf16.mxu1 %v10015_v12  ;;  %v10083_v12 = vld [vmem:[%s11093_s25 + $0xfd0] ss:$8 sps:$4 sm:$0xff]  }
 0x1ee   : > { %7214 = vmatpush2.bf16.msra.mxu0 %v10010_v13  ;;  %v10088_v13 = vld [vmem:[%s11093_s25 + $0xec4] ss:$8 sps:$4 sm:$0xff]  }
 0x1ef   : > { %7255 = vmatpush2.bf16.msra.mxu1 %v10013_v14  ;;  %7265 = vmatprep.subr.bf16.mxu0 %v10022_v15  ;;  %v10091_v14 = vld [vmem:[%s11093_s25 + $0xfc4] ss:$8 sps:$4 sm:$0xff]   ;;  %v10086_v15 = vld [vmem:[%s11093_s25 + $0xec0] ss:$8 sps:$4 sm:$0xff]  }
 0x1f0   : > { %7306 = vmatprep.subr.bf16.mxu1 %v10025_v17  ;;  %v10089_v17 = vld [vmem:[%s11093_s25 + $0xfc0] ss:$8 sps:$4 sm:$0xff]  }
 0x1f1   : > { %v6971_v31 = vpop.f32.mrf.mxu0  ;;  %7216 = vmatmul.mubr.bf16.vlgmr.msra.gmra.mxu0 %v8191_v62  ;;  %v10092_v62 = vld [vmem:[%s11093_s25 + $0xeb0] ss:$8 sps:$4 sm:$0xff]  }
 0x1f2   : > { %v7012_v32 = vpop.f32.mrf.mxu1  ;;  %7257 = vmatmul.mubr.bf16.vlgmr.msra.gmra.mxu1 %v8193_v22  ;;  %v6972_v33 = vadd.f32 %v6971_v31, %v11593_v16  ;;  %7266 = vmatpush1.bf16.msra.mxu0 %v10020_v18  ;;  %v10094_v18 = vld [vmem:[%s11093_s25 + $0xeb4] ss:$8 sps:$4 sm:$0xff]   ;;  %v10095_v22 = vld [vmem:[%s11093_s25 + $0xfb0] ss:$8 sps:$4 sm:$0xff]  }
 0x1f3   : > { %7307 = vmatpush1.bf16.msra.mxu1 %v10023_v21  ;;  %v6973_v34 = vpop.f32.mrf.mxu0  ;;  %7267 = vmatprep.subr.bf16.mxu0 %v10028_v3  ;;  %v10097_v21 = vld [vmem:[%s11093_s25 + $0xfb4] ss:$8 sps:$4 sm:$0xff]   ;;  %v10100_v3 = vld [vmem:[%s11093_s25 + $0xea4] ss:$8 sps:$4 sm:$0xff]   ;;  %v10104_v31 = vld [vmem:[%s11093_s25 + $0xe90] ss:$8 sps:$4 sm:$0xff]  }
 0x1f4   : > { %v7014_v35 = vpop.f32.mrf.mxu1  ;;  %7308 = vmatprep.subr.bf16.mxu1 %v10031_v28  ;;  %v11677_v36 = vadd.f32 %v7012_v32, %v6972_v33  ;;  %v6974_v37 = vadd.f32 %v6973_v34, %v11598_v23  ;;  %7297 = vmatprep.mubr.bf16.mxu0 %v8196_v4  ;;  %v10040_v23 = vld [vmem:[%s11093_s25 + $0xe44] ss:$8 sps:$4 sm:$0xff]   ;;  %v10106_v4 = vld [vmem:[%s11093_s25 + $0xe94] ss:$8 sps:$4 sm:$0xff]   ;;  %v10107_v32 = vld [vmem:[%s11093_s25 + $0xf90] ss:$8 sps:$4 sm:$0xff]  }
 0x1f5   : > { %7338 = vmatprep.mubr.bf16.mxu1 %v8198_v5  ;;  %v6975_v16 = vpop.f32.mrf.mxu0  ;;  %v10103_v28 = vld [vmem:[%s11093_s25 + $0xfa4] ss:$8 sps:$4 sm:$0xff]   ;;  %v10109_v5 = vld [vmem:[%s11093_s25 + $0xf94] ss:$8 sps:$4 sm:$0xff]  }
 0x1f6   : > { %v7016_v41 = vpop.f32.mrf.mxu1  ;;  %v11682_v42 = vadd.f32 %v7014_v35, %v6974_v37  ;;  %7268 = vmatpush1.bf16.msra.mxu0 %v10026_v20  ;;  %v10098_v20 = vld [vmem:[%s11093_s25 + $0xea0] ss:$8 sps:$4 sm:$0xff]   ;;  %v10112_v33 = vld [vmem:[%s11093_s25 + $0xe84] ss:$8 sps:$4 sm:$0xff]   ;;  %v10125_v37 = vld [vmem:[%s11093_s25 + $0x1174] ss:$8 sps:$4 sm:$0xff]   ;;  %v8195_v16 = vcombine.low %v11661_v24, %v11661_v24 }
 0x1f7   : > { %7309 = vmatpush1.bf16.msra.mxu1 %v10029_v29  ;;  %v6976_v43 = vpop.f32.mrf.mxu0  ;;  %7269 = vmatprep.subr.bf16.mxu0 %v10034_v25  ;;  %v10101_v29 = vld [vmem:[%s11093_s25 + $0xfa0] ss:$8 sps:$4 sm:$0xff]   ;;  %v10115_v34 = vld [vmem:[%s11093_s25 + $0xf84] ss:$8 sps:$4 sm:$0xff]   ;;  %v8197_v41 = vcombine.low %v11664_v27, %v11664_v27 }
 0x1f8   : > { %v7017_v45 = vpop.f32.mrf.mxu1  ;;  %7310 = vmatprep.subr.bf16.mxu1 %v10037_v26  ;;  %v10110_v35 = vld [vmem:[%s11093_s25 + $0xe80] ss:$8 sps:$4 sm:$0xff]   ;;  %v10122_v26 = vld [vmem:[%s11093_s25 + $0x1074] ss:$8 sps:$4 sm:$0xff]  }
 0x1f9   : > { %v10113_v25 = vld [vmem:[%s11093_s25 + $0xf80] ss:$8 sps:$4 sm:$0xff]   ;;  %v11745_v43 = vld [vmem:[%s11103_s30 + $0x80] sm:$0xff]  ;;  %v11748_v45 = vld [vmem:[%s11103_s30 + $0x88] sm:$0xff] }
 0x1fa   : > { %7270 = vmatpush1.bf16.msra.mxu0 %v10032_v38  ;;  %v10120_v38 = vld [vmem:[%s11093_s25 + $0x1070] ss:$8 sps:$4 sm:$0xff]   ;;  %v8200_v24 = vcombine.high %v11745_v43, %v11745_v43  ;;  %v8202_v27 = vcombine.high %v11748_v45, %v11748_v45 }
 0x1fb   : > { %7311 = vmatpush1.bf16.msra.mxu1 %v10035_v40  ;;  %7271 = vmatprep.subr.bf16.mxu0 %v10040_v23  ;;  %v10123_v40 = vld [vmem:[%s11093_s25 + $0x1170] ss:$8 sps:$4 sm:$0xff]   ;;  %v10128_v23 = vld [vmem:[%s11093_s25 + $0x1064] ss:$8 sps:$4 sm:$0xff]  }
 0x1fc   : > { %7312 = vmatprep.subr.bf16.mxu1 %v10043_v46  ;;  %v10131_v46 = vld [vmem:[%s11093_s25 + $0x1164] ss:$8 sps:$4 sm:$0xff]  }
 0x1fe   : > { %7272 = vmatpush1.bf16.msra.mxu0 %v10038_v47  ;;  %v10126_v47 = vld [vmem:[%s11093_s25 + $0x1060] ss:$8 sps:$4 sm:$0xff]  }
 0x1ff   : > { %7313 = vmatpush1.bf16.msra.mxu1 %v10041_v48  ;;  %7273 = vmatprep.subr.bf16.mxu0 %v10046_v51  ;;  %v10129_v48 = vld [vmem:[%s11093_s25 + $0x1160] ss:$8 sps:$4 sm:$0xff]  }
 0x200   : > { %7314 = vmatprep.subr.bf16.mxu1 %v10049_v52 }
 0x202   : > { %7274 = vmatpush1.bf16.msra.mxu0 %v10044_v53 }
 0x203   : > { %7315 = vmatpush1.bf16.msra.mxu1 %v10047_v54  ;;  %7275 = vmatprep.subr.bf16.mxu0 %v10052_v19 }
 0x204   : > { %7316 = vmatprep.subr.bf16.mxu1 %v10055_v30  ;;  %v10134_v30 = vld [vmem:[%s11093_s25 + $0x1054] ss:$8 sps:$4 sm:$0xff]  }
 0x206   : > { %7276 = vmatpush1.bf16.msra.mxu0 %v10050_v55  ;;  %v10137_v55 = vld [vmem:[%s11093_s25 + $0x1154] ss:$8 sps:$4 sm:$0xff]  }
 0x207   : > { %7317 = vmatpush1.bf16.msra.mxu1 %v10053_v56  ;;  %7277 = vmatprep.subr.bf16.mxu0 %v10058_v57 }
 0x208   : > { %7318 = vmatprep.subr.bf16.mxu1 %v10061_v58  ;;  %v10132_v58 = vld [vmem:[%s11093_s25 + $0x1050] ss:$8 sps:$4 sm:$0xff]  }
 0x20a   : > { %7278 = vmatpush1.bf16.msra.mxu0 %v10056_v59  ;;  %v10135_v59 = vld [vmem:[%s11093_s25 + $0x1150] ss:$8 sps:$4 sm:$0xff]  }
 0x20b   : > { %7319 = vmatpush1.bf16.msra.mxu1 %v10059_v60  ;;  %7279 = vmatprep.subr.bf16.mxu0 %v10064_v61 }
 0x20c   : > { %7320 = vmatprep.subr.bf16.mxu1 %v10067_v63 }
 0x20e   : > { %7280 = vmatpush1.bf16.msra.mxu0 %v10062_v0 }
 0x20f   : > { %7321 = vmatpush1.bf16.msra.mxu1 %v10065_v1  ;;  %7281 = vmatprep.subr.bf16.mxu0 %v10070_v39  ;;  %v10143_v1 = vld [vmem:[%s11093_s25 + $0x1144] ss:$8 sps:$4 sm:$0xff]   ;;  %v10138_v39 = vld [vmem:[%s11093_s25 + $0x1040] ss:$8 sps:$4 sm:$0xff]  }
 0x210   : > { %7322 = vmatprep.subr.bf16.mxu1 %v10073_v2  ;;  %v10141_v2 = vld [vmem:[%s11093_s25 + $0x1140] ss:$8 sps:$4 sm:$0xff]  }
 0x212   : > { %7282 = vmatpush2.bf16.msra.mxu0 %v10068_v44  ;;  %v10146_v44 = vld [vmem:[%s11093_s25 + $0x1034] ss:$8 sps:$4 sm:$0xff]  }
 0x213   : > { %7323 = vmatpush2.bf16.msra.mxu1 %v10071_v6  ;;  %7283 = vmatprep.subr.bf16.mxu0 %v10076_v7  ;;  %v10149_v6 = vld [vmem:[%s11093_s25 + $0x1134] ss:$8 sps:$4 sm:$0xff]   ;;  %v10144_v7 = vld [vmem:[%s11093_s25 + $0x1030] ss:$8 sps:$4 sm:$0xff]  }
 0x214   : > { %7324 = vmatprep.subr.bf16.mxu1 %v10079_v8  ;;  %v10147_v8 = vld [vmem:[%s11093_s25 + $0x1130] ss:$8 sps:$4 sm:$0xff]  }
 0x216   : > { %7284 = vmatpush2.bf16.msra.mxu0 %v10074_v49  ;;  %v10152_v49 = vld [vmem:[%s11093_s25 + $0x1024] ss:$8 sps:$4 sm:$0xff]  }
 0x217   : > { %7325 = vmatpush2.bf16.msra.mxu1 %v10077_v50  ;;  %7285 = vmatprep.subr.bf16.mxu0 %v10082_v9  ;;  %v10155_v50 = vld [vmem:[%s11093_s25 + $0x1124] ss:$8 sps:$4 sm:$0xff]   ;;  %v10150_v9 = vld [vmem:[%s11093_s25 + $0x1020] ss:$8 sps:$4 sm:$0xff]  }
 0x218   : > { %7326 = vmatprep.subr.bf16.mxu1 %v10085_v10  ;;  %v10153_v10 = vld [vmem:[%s11093_s25 + $0x1120] ss:$8 sps:$4 sm:$0xff]  }
 0x21a   : > { %7286 = vmatpush2.bf16.msra.mxu0 %v10080_v11  ;;  %v10158_v11 = vld [vmem:[%s11093_s25 + $0x1014] ss:$8 sps:$4 sm:$0xff]  }
 0x21b   : > { %7327 = vmatpush2.bf16.msra.mxu1 %v10083_v12  ;;  %7287 = vmatprep.subr.bf16.mxu0 %v10088_v13  ;;  %v10161_v12 = vld [vmem:[%s11093_s25 + $0x1114] ss:$8 sps:$4 sm:$0xff]   ;;  %v10156_v13 = vld [vmem:[%s11093_s25 + $0x1010] ss:$8 sps:$4 sm:$0xff]  }
 0x21c   : > { %7328 = vmatprep.subr.bf16.mxu1 %v10091_v14  ;;  %v10159_v14 = vld [vmem:[%s11093_s25 + $0x1110] ss:$8 sps:$4 sm:$0xff]  }
 0x21e   : > { %7288 = vmatpush2.bf16.msra.mxu0 %v10086_v15  ;;  %v10164_v15 = vld [vmem:[%s11093_s25 + $0x1004] ss:$8 sps:$4 sm:$0xff]  }
 0x21f   : > { %7329 = vmatpush2.bf16.msra.mxu1 %v10089_v17  ;;  %7289 = vmatprep.subr.bf16.mxu0 %v10094_v18  ;;  %v10167_v17 = vld [vmem:[%s11093_s25 + $0x1104] ss:$8 sps:$4 sm:$0xff]   ;;  %v10162_v18 = vld [vmem:[%s11093_s25 + $0x1000] ss:$8 sps:$4 sm:$0xff]  }
 0x220   : > { %7330 = vmatprep.subr.bf16.mxu1 %v10097_v21  ;;  %v10165_v21 = vld [vmem:[%s11093_s25 + $0x1100] ss:$8 sps:$4 sm:$0xff]  }
 0x222   : > { %7290 = vmatpush2.bf16.msra.mxu0 %v10092_v62  ;;  %v10170_v62 = vld [vmem:[%s11093_s25 + $0x10f4] ss:$8 sps:$4 sm:$0xff]  }
 0x223   : > { %7331 = vmatpush2.bf16.msra.mxu1 %v10095_v22  ;;  %7291 = vmatprep.subr.bf16.mxu0 %v10100_v3  ;;  %v10173_v22 = vld [vmem:[%s11093_s25 + $0x11f4] ss:$8 sps:$4 sm:$0xff]   ;;  %v10168_v3 = vld [vmem:[%s11093_s25 + $0x10f0] ss:$8 sps:$4 sm:$0xff]  }
 0x224   : > { %7332 = vmatprep.subr.bf16.mxu1 %v10103_v28  ;;  %v10171_v28 = vld [vmem:[%s11093_s25 + $0x11f0] ss:$8 sps:$4 sm:$0xff]  }
 0x226   : > { %7292 = vmatpush2.bf16.msra.mxu0 %v10098_v20  ;;  %v10176_v20 = vld [vmem:[%s11093_s25 + $0x10e4] ss:$8 sps:$4 sm:$0xff]  }
 0x227   : > { %7333 = vmatpush2.bf16.msra.mxu1 %v10101_v29  ;;  %7293 = vmatprep.subr.bf16.mxu0 %v10106_v4  ;;  %v10179_v29 = vld [vmem:[%s11093_s25 + $0x11e4] ss:$8 sps:$4 sm:$0xff]   ;;  %v10174_v4 = vld [vmem:[%s11093_s25 + $0x10e0] ss:$8 sps:$4 sm:$0xff]  }
 0x228   : > { %7334 = vmatprep.subr.bf16.mxu1 %v10109_v5  ;;  %v10177_v5 = vld [vmem:[%s11093_s25 + $0x11e0] ss:$8 sps:$4 sm:$0xff]  }
 0x22a   : > { %7294 = vmatpush2.bf16.msra.mxu0 %v10104_v31  ;;  %v10182_v31 = vld [vmem:[%s11093_s25 + $0x10d4] ss:$8 sps:$4 sm:$0xff]  }
 0x22b   : > { %7335 = vmatpush2.bf16.msra.mxu1 %v10107_v32  ;;  %7295 = vmatprep.subr.bf16.mxu0 %v10112_v33  ;;  %v10185_v32 = vld [vmem:[%s11093_s25 + $0x11d4] ss:$8 sps:$4 sm:$0xff]   ;;  %v10180_v33 = vld [vmem:[%s11093_s25 + $0x10d0] ss:$8 sps:$4 sm:$0xff]  }
 0x22c   : > { %7336 = vmatprep.subr.bf16.mxu1 %v10115_v34  ;;  %v10183_v34 = vld [vmem:[%s11093_s25 + $0x11d0] ss:$8 sps:$4 sm:$0xff]  }
 0x22e   : > { %7296 = vmatpush2.bf16.msra.mxu0 %v10110_v35  ;;  %v10188_v35 = vld [vmem:[%s11093_s25 + $0x10c4] ss:$8 sps:$4 sm:$0xff]  }
 0x22f   : > { %7337 = vmatpush2.bf16.msra.mxu1 %v10113_v25  ;;  %7347 = vmatprep.subr.bf16.mxu0 %v10122_v26  ;;  %v10191_v25 = vld [vmem:[%s11093_s25 + $0x11c4] ss:$8 sps:$4 sm:$0xff]   ;;  %v10186_v26 = vld [vmem:[%s11093_s25 + $0x10c0] ss:$8 sps:$4 sm:$0xff]  }
 0x230   : > { %7388 = vmatprep.subr.bf16.mxu1 %v10125_v37  ;;  %v10189_v37 = vld [vmem:[%s11093_s25 + $0x11c0] ss:$8 sps:$4 sm:$0xff]  }
 0x231   : > { %v7053_v51 = vpop.f32.mrf.mxu0  ;;  %7298 = vmatmul.mubr.bf16.vlgmr.msra.gmra.mxu0 %v8195_v16  ;;  %v10192_v16 = vld [vmem:[%s11093_s25 + $0x10b0] ss:$8 sps:$4 sm:$0xff]  }
 0x232   : > { %v7094_v52 = vpop.f32.mrf.mxu1  ;;  %7339 = vmatmul.mubr.bf16.vlgmr.msra.gmra.mxu1 %v8197_v41  ;;  %v7054_v53 = vadd.f32 %v7053_v51, %v11677_v36  ;;  %7348 = vmatpush1.bf16.msra.mxu0 %v10120_v38  ;;  %v10194_v38 = vld [vmem:[%s11093_s25 + $0x10b4] ss:$8 sps:$4 sm:$0xff]   ;;  %v10195_v41 = vld [vmem:[%s11093_s25 + $0x11b0] ss:$8 sps:$4 sm:$0xff]  }
 0x233   : > { %7389 = vmatpush1.bf16.msra.mxu1 %v10123_v40  ;;  %v7055_v54 = vpop.f32.mrf.mxu0  ;;  %7349 = vmatprep.subr.bf16.mxu0 %v10128_v23  ;;  %v10197_v40 = vld [vmem:[%s11093_s25 + $0x11b4] ss:$8 sps:$4 sm:$0xff]   ;;  %v10200_v23 = vld [vmem:[%s11093_s25 + $0x10a4] ss:$8 sps:$4 sm:$0xff]   ;;  %v10204_v51 = vld [vmem:[%s11093_s25 + $0x1090] ss:$8 sps:$4 sm:$0xff]  }
 0x234   : > { %v7096_v19 = vpop.f32.mrf.mxu1  ;;  %7390 = vmatprep.subr.bf16.mxu1 %v10131_v46  ;;  %v11761_v56 = vadd.f32 %v7094_v52, %v7054_v53  ;;  %v7056_v57 = vadd.f32 %v7055_v54, %v11682_v42  ;;  %7379 = vmatprep.mubr.bf16.mxu0 %v8200_v24  ;;  %v10140_v42 = vld [vmem:[%s11093_s25 + $0x1044] ss:$8 sps:$4 sm:$0xff]   ;;  %v10206_v24 = vld [vmem:[%s11093_s25 + $0x1094] ss:$8 sps:$4 sm:$0xff]   ;;  %v10207_v52 = vld [vmem:[%s11093_s25 + $0x1190] ss:$8 sps:$4 sm:$0xff]  }
 0x235   : > { %7420 = vmatprep.mubr.bf16.mxu1 %v8202_v27  ;;  %v7057_v36 = vpop.f32.mrf.mxu0  ;;  %v10203_v46 = vld [vmem:[%s11093_s25 + $0x11a4] ss:$8 sps:$4 sm:$0xff]   ;;  %v10209_v27 = vld [vmem:[%s11093_s25 + $0x1194] ss:$8 sps:$4 sm:$0xff]  }
 0x236   : > { %v7098_v60 = vpop.f32.mrf.mxu1  ;;  %v11766_v61 = vadd.f32 %v7096_v19, %v7056_v57  ;;  %7350 = vmatpush1.bf16.msra.mxu0 %v10126_v47  ;;  %v10198_v47 = vld [vmem:[%s11093_s25 + $0x10a0] ss:$8 sps:$4 sm:$0xff]   ;;  %v10212_v53 = vld [vmem:[%s11093_s25 + $0x1084] ss:$8 sps:$4 sm:$0xff]   ;;  %v10225_v57 = vld [vmem:[%s11093_s25 + $0x1374] ss:$8 sps:$4 sm:$0xff]   ;;  %v8199_v36 = vcombine.low %v11745_v43, %v11745_v43 }
 0x237   : > { %7391 = vmatpush1.bf16.msra.mxu1 %v10129_v48  ;;  %v7058_v63 = vpop.f32.mrf.mxu0  ;;  %7351 = vmatprep.subr.bf16.mxu0 %v10134_v30  ;;  %v10201_v48 = vld [vmem:[%s11093_s25 + $0x11a0] ss:$8 sps:$4 sm:$0xff]   ;;  %v10215_v54 = vld [vmem:[%s11093_s25 + $0x1184] ss:$8 sps:$4 sm:$0xff]   ;;  %v8201_v60 = vcombine.low %v11748_v45, %v11748_v45 }
 0x238   : > { %v7099_v0 = vpop.f32.mrf.mxu1  ;;  %7392 = vmatprep.subr.bf16.mxu1 %v10137_v55  ;;  %v10210_v19 = vld [vmem:[%s11093_s25 + $0x1080] ss:$8 sps:$4 sm:$0xff]   ;;  %v10222_v55 = vld [vmem:[%s11093_s25 + $0x1274] ss:$8 sps:$4 sm:$0xff]  }
 0x239   : > { %v10213_v30 = vld [vmem:[%s11093_s25 + $0x1180] ss:$8 sps:$4 sm:$0xff]  }
 0x23a   : > { %7352 = vmatpush1.bf16.msra.mxu0 %v10132_v58  ;;  %v10220_v58 = vld [vmem:[%s11093_s25 + $0x1270] ss:$8 sps:$4 sm:$0xff]   ;;  %v11829_v63 = vld [vmem:[%s11103_s30 + $0x90] sm:$0xff]  ;;  %v11832_v0 = vld [vmem:[%s11103_s30 + $0x98] sm:$0xff] }
 0x23b   : > { %7393 = vmatpush1.bf16.msra.mxu1 %v10135_v59  ;;  %7353 = vmatprep.subr.bf16.mxu0 %v10140_v42  ;;  %v10223_v59 = vld [vmem:[%s11093_s25 + $0x1370] ss:$8 sps:$4 sm:$0xff]   ;;  %v10228_v42 = vld [vmem:[%s11093_s25 + $0x1264] ss:$8 sps:$4 sm:$0xff]   ;;  %v8204_v43 = vcombine.high %v11829_v63, %v11829_v63  ;;  %v8206_v45 = vcombine.high %v11832_v0, %v11832_v0 }
 0x23c   : > { %7394 = vmatprep.subr.bf16.mxu1 %v10143_v1  ;;  %v10231_v1 = vld [vmem:[%s11093_s25 + $0x1364] ss:$8 sps:$4 sm:$0xff]  }
 0x23e   : > { %7354 = vmatpush1.bf16.msra.mxu0 %v10138_v39  ;;  %v10226_v39 = vld [vmem:[%s11093_s25 + $0x1260] ss:$8 sps:$4 sm:$0xff]  }
 0x23f   : > { %7395 = vmatpush1.bf16.msra.mxu1 %v10141_v2  ;;  %7355 = vmatprep.subr.bf16.mxu0 %v10146_v44  ;;  %v10229_v2 = vld [vmem:[%s11093_s25 + $0x1360] ss:$8 sps:$4 sm:$0xff]  }
 0x240   : > { %7396 = vmatprep.subr.bf16.mxu1 %v10149_v6 }
 0x242   : > { %7356 = vmatpush1.bf16.msra.mxu0 %v10144_v7 }
 0x243   : > { %7397 = vmatpush1.bf16.msra.mxu1 %v10147_v8  ;;  %7357 = vmatprep.subr.bf16.mxu0 %v10152_v49 }
 0x244   : > { %7398 = vmatprep.subr.bf16.mxu1 %v10155_v50  ;;  %v10234_v50 = vld [vmem:[%s11093_s25 + $0x1254] ss:$8 sps:$4 sm:$0xff]  }
 0x246   : > { %7358 = vmatpush1.bf16.msra.mxu0 %v10150_v9  ;;  %v10237_v9 = vld [vmem:[%s11093_s25 + $0x1354] ss:$8 sps:$4 sm:$0xff]  }
 0x247   : > { %7399 = vmatpush1.bf16.msra.mxu1 %v10153_v10  ;;  %7359 = vmatprep.subr.bf16.mxu0 %v10158_v11 }
 0x248   : > { %7400 = vmatprep.subr.bf16.mxu1 %v10161_v12  ;;  %v10232_v12 = vld [vmem:[%s11093_s25 + $0x1250] ss:$8 sps:$4 sm:$0xff]  }
 0x24a   : > { %7360 = vmatpush1.bf16.msra.mxu0 %v10156_v13  ;;  %v10235_v13 = vld [vmem:[%s11093_s25 + $0x1350] ss:$8 sps:$4 sm:$0xff]  }
 0x24b   : > { %7401 = vmatpush1.bf16.msra.mxu1 %v10159_v14  ;;  %7361 = vmatprep.subr.bf16.mxu0 %v10164_v15 }
 0x24c   : > { %7402 = vmatprep.subr.bf16.mxu1 %v10167_v17 }
 0x24e   : > { %7362 = vmatpush1.bf16.msra.mxu0 %v10162_v18 }
 0x24f   : > { %7403 = vmatpush1.bf16.msra.mxu1 %v10165_v21  ;;  %7363 = vmatprep.subr.bf16.mxu0 %v10170_v62  ;;  %v10243_v21 = vld [vmem:[%s11093_s25 + $0x1344] ss:$8 sps:$4 sm:$0xff]   ;;  %v10238_v62 = vld [vmem:[%s11093_s25 + $0x1240] ss:$8 sps:$4 sm:$0xff]  }
 0x250   : > { %7404 = vmatprep.subr.bf16.mxu1 %v10173_v22  ;;  %v10241_v22 = vld [vmem:[%s11093_s25 + $0x1340] ss:$8 sps:$4 sm:$0xff]  }
 0x252   : > { %7364 = vmatpush2.bf16.msra.mxu0 %v10168_v3  ;;  %v10246_v3 = vld [vmem:[%s11093_s25 + $0x1234] ss:$8 sps:$4 sm:$0xff]  }
 0x253   : > { %7405 = vmatpush2.bf16.msra.mxu1 %v10171_v28  ;;  %7365 = vmatprep.subr.bf16.mxu0 %v10176_v20  ;;  %v10249_v28 = vld [vmem:[%s11093_s25 + $0x1334] ss:$8 sps:$4 sm:$0xff]   ;;  %v10244_v20 = vld [vmem:[%s11093_s25 + $0x1230] ss:$8 sps:$4 sm:$0xff]  }
 0x254   : > { %7406 = vmatprep.subr.bf16.mxu1 %v10179_v29  ;;  %v10247_v29 = vld [vmem:[%s11093_s25 + $0x1330] ss:$8 sps:$4 sm:$0xff]  }
 0x256   : > { %7366 = vmatpush2.bf16.msra.mxu0 %v10174_v4  ;;  %v10252_v4 = vld [vmem:[%s11093_s25 + $0x1224] ss:$8 sps:$4 sm:$0xff]  }
 0x257   : > { %7407 = vmatpush2.bf16.msra.mxu1 %v10177_v5  ;;  %7367 = vmatprep.subr.bf16.mxu0 %v10182_v31  ;;  %v10255_v5 = vld [vmem:[%s11093_s25 + $0x1324] ss:$8 sps:$4 sm:$0xff]   ;;  %v10250_v31 = vld [vmem:[%s11093_s25 + $0x1220] ss:$8 sps:$4 sm:$0xff]  }
 0x258   : > { %7408 = vmatprep.subr.bf16.mxu1 %v10185_v32  ;;  %v10253_v32 = vld [vmem:[%s11093_s25 + $0x1320] ss:$8 sps:$4 sm:$0xff]  }
 0x25a   : > { %7368 = vmatpush2.bf16.msra.mxu0 %v10180_v33  ;;  %v10258_v33 = vld [vmem:[%s11093_s25 + $0x1214] ss:$8 sps:$4 sm:$0xff]  }
 0x25b   : > { %7409 = vmatpush2.bf16.msra.mxu1 %v10183_v34  ;;  %7369 = vmatprep.subr.bf16.mxu0 %v10188_v35  ;;  %v10261_v34 = vld [vmem:[%s11093_s25 + $0x1314] ss:$8 sps:$4 sm:$0xff]   ;;  %v10256_v35 = vld [vmem:[%s11093_s25 + $0x1210] ss:$8 sps:$4 sm:$0xff]  }
 0x25c   : > { %7410 = vmatprep.subr.bf16.mxu1 %v10191_v25  ;;  %v10259_v25 = vld [vmem:[%s11093_s25 + $0x1310] ss:$8 sps:$4 sm:$0xff]  }
 0x25e   : > { %7370 = vmatpush2.bf16.msra.mxu0 %v10186_v26  ;;  %v10264_v26 = vld [vmem:[%s11093_s25 + $0x1204] ss:$8 sps:$4 sm:$0xff]  }
 0x25f   : > { %7411 = vmatpush2.bf16.msra.mxu1 %v10189_v37  ;;  %7371 = vmatprep.subr.bf16.mxu0 %v10194_v38  ;;  %v10267_v37 = vld [vmem:[%s11093_s25 + $0x1304] ss:$8 sps:$4 sm:$0xff]   ;;  %v10262_v38 = vld [vmem:[%s11093_s25 + $0x1200] ss:$8 sps:$4 sm:$0xff]  }
 0x260   : > { %7412 = vmatprep.subr.bf16.mxu1 %v10197_v40  ;;  %v10265_v40 = vld [vmem:[%s11093_s25 + $0x1300] ss:$8 sps:$4 sm:$0xff]  }
 0x262   : > { %7372 = vmatpush2.bf16.msra.mxu0 %v10192_v16  ;;  %v10270_v16 = vld [vmem:[%s11093_s25 + $0x12f4] ss:$8 sps:$4 sm:$0xff]  }
 0x263   : > { %7413 = vmatpush2.bf16.msra.mxu1 %v10195_v41  ;;  %7373 = vmatprep.subr.bf16.mxu0 %v10200_v23  ;;  %v10273_v41 = vld [vmem:[%s11093_s25 + $0x13f4] ss:$8 sps:$4 sm:$0xff]   ;;  %v10268_v23 = vld [vmem:[%s11093_s25 + $0x12f0] ss:$8 sps:$4 sm:$0xff]  }
 0x264   : > { %7414 = vmatprep.subr.bf16.mxu1 %v10203_v46  ;;  %v10271_v46 = vld [vmem:[%s11093_s25 + $0x13f0] ss:$8 sps:$4 sm:$0xff]  }
 0x266   : > { %7374 = vmatpush2.bf16.msra.mxu0 %v10198_v47  ;;  %v10276_v47 = vld [vmem:[%s11093_s25 + $0x12e4] ss:$8 sps:$4 sm:$0xff]  }
 0x267   : > { %7415 = vmatpush2.bf16.msra.mxu1 %v10201_v48  ;;  %7375 = vmatprep.subr.bf16.mxu0 %v10206_v24  ;;  %v10279_v48 = vld [vmem:[%s11093_s25 + $0x13e4] ss:$8 sps:$4 sm:$0xff]   ;;  %v10274_v24 = vld [vmem:[%s11093_s25 + $0x12e0] ss:$8 sps:$4 sm:$0xff]  }
 0x268   : > { %7416 = vmatprep.subr.bf16.mxu1 %v10209_v27  ;;  %v10277_v27 = vld [vmem:[%s11093_s25 + $0x13e0] ss:$8 sps:$4 sm:$0xff]  }
 0x26a   : > { %7376 = vmatpush2.bf16.msra.mxu0 %v10204_v51  ;;  %v10282_v51 = vld [vmem:[%s11093_s25 + $0x12d4] ss:$8 sps:$4 sm:$0xff]  }
 0x26b   : > { %7417 = vmatpush2.bf16.msra.mxu1 %v10207_v52  ;;  %7377 = vmatprep.subr.bf16.mxu0 %v10212_v53  ;;  %v10285_v52 = vld [vmem:[%s11093_s25 + $0x13d4] ss:$8 sps:$4 sm:$0xff]   ;;  %v10280_v53 = vld [vmem:[%s11093_s25 + $0x12d0] ss:$8 sps:$4 sm:$0xff]  }
 0x26c   : > { %7418 = vmatprep.subr.bf16.mxu1 %v10215_v54  ;;  %v10283_v54 = vld [vmem:[%s11093_s25 + $0x13d0] ss:$8 sps:$4 sm:$0xff]  }
 0x26e   : > { %7378 = vmatpush2.bf16.msra.mxu0 %v10210_v19  ;;  %v10288_v19 = vld [vmem:[%s11093_s25 + $0x12c4] ss:$8 sps:$4 sm:$0xff]  }
 0x26f   : > { %7419 = vmatpush2.bf16.msra.mxu1 %v10213_v30  ;;  %7429 = vmatprep.subr.bf16.mxu0 %v10222_v55  ;;  %v10291_v30 = vld [vmem:[%s11093_s25 + $0x13c4] ss:$8 sps:$4 sm:$0xff]   ;;  %v10286_v55 = vld [vmem:[%s11093_s25 + $0x12c0] ss:$8 sps:$4 sm:$0xff]  }
 0x270   : > { %7470 = vmatprep.subr.bf16.mxu1 %v10225_v57  ;;  %v10289_v57 = vld [vmem:[%s11093_s25 + $0x13c0] ss:$8 sps:$4 sm:$0xff]  }
 0x271   : > { %v7135_v44 = vpop.f32.mrf.mxu0  ;;  %7380 = vmatmul.mubr.bf16.vlgmr.msra.gmra.mxu0 %v8199_v36  ;;  %v10292_v36 = vld [vmem:[%s11093_s25 + $0x12b0] ss:$8 sps:$4 sm:$0xff]  }
 0x272   : > { %v7176_v6 = vpop.f32.mrf.mxu1  ;;  %7421 = vmatmul.mubr.bf16.vlgmr.msra.gmra.mxu1 %v8201_v60  ;;  %v7136_v7 = vadd.f32 %v7135_v44, %v11761_v56  ;;  %7430 = vmatpush1.bf16.msra.mxu0 %v10220_v58  ;;  %v10294_v58 = vld [vmem:[%s11093_s25 + $0x12b4] ss:$8 sps:$4 sm:$0xff]   ;;  %v10295_v60 = vld [vmem:[%s11093_s25 + $0x13b0] ss:$8 sps:$4 sm:$0xff]  }
 0x273   : > { %7471 = vmatpush1.bf16.msra.mxu1 %v10223_v59  ;;  %v7137_v8 = vpop.f32.mrf.mxu0  ;;  %7431 = vmatprep.subr.bf16.mxu0 %v10228_v42  ;;  %v10297_v59 = vld [vmem:[%s11093_s25 + $0x13b4] ss:$8 sps:$4 sm:$0xff]   ;;  %v10300_v42 = vld [vmem:[%s11093_s25 + $0x12a4] ss:$8 sps:$4 sm:$0xff]   ;;  %v10304_v44 = vld [vmem:[%s11093_s25 + $0x1290] ss:$8 sps:$4 sm:$0xff]  }
 0x274   : > { %v7178_v49 = vpop.f32.mrf.mxu1  ;;  %7472 = vmatprep.subr.bf16.mxu1 %v10231_v1  ;;  %v11845_v10 = vadd.f32 %v7176_v6, %v7136_v7  ;;  %v7138_v11 = vadd.f32 %v7137_v8, %v11766_v61  ;;  %7461 = vmatprep.mubr.bf16.mxu0 %v8204_v43  ;;  %v10240_v61 = vld [vmem:[%s11093_s25 + $0x1244] ss:$8 sps:$4 sm:$0xff]   ;;  %v10306_v43 = vld [vmem:[%s11093_s25 + $0x1294] ss:$8 sps:$4 sm:$0xff]   ;;  %v10307_v6 = vld [vmem:[%s11093_s25 + $0x1390] ss:$8 sps:$4 sm:$0xff]  }
 0x275   : > { %7502 = vmatprep.mubr.bf16.mxu1 %v8206_v45  ;;  %v7139_v56 = vpop.f32.mrf.mxu0  ;;  %v10303_v1 = vld [vmem:[%s11093_s25 + $0x13a4] ss:$8 sps:$4 sm:$0xff]   ;;  %v10309_v45 = vld [vmem:[%s11093_s25 + $0x1394] ss:$8 sps:$4 sm:$0xff]  }
 0x276   : > { %v7180_v14 = vpop.f32.mrf.mxu1  ;;  %v11850_v15 = vadd.f32 %v7178_v49, %v7138_v11  ;;  %7432 = vmatpush1.bf16.msra.mxu0 %v10226_v39  ;;  %v10298_v39 = vld [vmem:[%s11093_s25 + $0x12a0] ss:$8 sps:$4 sm:$0xff]   ;;  %v10312_v7 = vld [vmem:[%s11093_s25 + $0x1284] ss:$8 sps:$4 sm:$0xff]   ;;  %v10325_v11 = vld [vmem:[%s11093_s25 + $0x1574] ss:$8 sps:$4 sm:$0xff]  }
 0x277   : > { %7473 = vmatpush1.bf16.msra.mxu1 %v10229_v2  ;;  %v7140_v17 = vpop.f32.mrf.mxu0  ;;  %7433 = vmatprep.subr.bf16.mxu0 %v10234_v50  ;;  %v10301_v2 = vld [vmem:[%s11093_s25 + $0x13a0] ss:$8 sps:$4 sm:$0xff]   ;;  %v10315_v8 = vld [vmem:[%s11093_s25 + $0x1384] ss:$8 sps:$4 sm:$0xff]   ;;  %v11911_v56 = vld [vmem:[%s11103_s30 + $0xa0] sm:$0xff] }
 0x278   : > { %v7181_v18 = vpop.f32.mrf.mxu1  ;;  %7474 = vmatprep.subr.bf16.mxu1 %v10237_v9  ;;  %v10310_v49 = vld [vmem:[%s11093_s25 + $0x1280] ss:$8 sps:$4 sm:$0xff]   ;;  %v10322_v9 = vld [vmem:[%s11093_s25 + $0x1474] ss:$8 sps:$4 sm:$0xff]   ;;  %v10320_v17 = vld [vmem:[%s11093_s25 + $0x1470] ss:$8 sps:$4 sm:$0xff]  }
 0x279   : > { %v10313_v50 = vld [vmem:[%s11093_s25 + $0x1380] ss:$8 sps:$4 sm:$0xff]   ;;  %v11914_v14 = vld [vmem:[%s11103_s30 + $0xa8] sm:$0xff] }
 0x27a   : > { %7434 = vmatpush1.bf16.msra.mxu0 %v10232_v12  ;;  %v8203_v12 = vcombine.low %v11829_v63, %v11829_v63  ;;  %v10323_v18 = vld [vmem:[%s11093_s25 + $0x1570] ss:$8 sps:$4 sm:$0xff]   ;;  %v8208_v63 = vcombine.high %v11911_v56, %v11911_v56 }
 0x27b   : > { %7475 = vmatpush1.bf16.msra.mxu1 %v10235_v13  ;;  %7435 = vmatprep.subr.bf16.mxu0 %v10240_v61  ;;  %v8205_v13 = vcombine.low %v11832_v0, %v11832_v0  ;;  %v10328_v61 = vld [vmem:[%s11093_s25 + $0x1464] ss:$8 sps:$4 sm:$0xff]   ;;  %v8210_v0 = vcombine.high %v11914_v14, %v11914_v14 }
 0x27c   : > { %7476 = vmatprep.subr.bf16.mxu1 %v10243_v21  ;;  %v10331_v21 = vld [vmem:[%s11093_s25 + $0x1564] ss:$8 sps:$4 sm:$0xff]  }
 0x27e   : > { %7436 = vmatpush1.bf16.msra.mxu0 %v10238_v62 }
 0x27f   : > { %7477 = vmatpush1.bf16.msra.mxu1 %v10241_v22  ;;  %7437 = vmatprep.subr.bf16.mxu0 %v10246_v3 }
 0x280   : > { %7478 = vmatprep.subr.bf16.mxu1 %v10249_v28  ;;  %v10326_v28 = vld [vmem:[%s11093_s25 + $0x1460] ss:$8 sps:$4 sm:$0xff]  }
 0x282   : > { %7438 = vmatpush1.bf16.msra.mxu0 %v10244_v20  ;;  %v10329_v20 = vld [vmem:[%s11093_s25 + $0x1560] ss:$8 sps:$4 sm:$0xff]  }
 0x283   : > { %7479 = vmatpush1.bf16.msra.mxu1 %v10247_v29  ;;  %7439 = vmatprep.subr.bf16.mxu0 %v10252_v4 }
 0x284   : > { %7480 = vmatprep.subr.bf16.mxu1 %v10255_v5  ;;  %v10334_v5 = vld [vmem:[%s11093_s25 + $0x1454] ss:$8 sps:$4 sm:$0xff]  }
 0x286   : > { %7440 = vmatpush1.bf16.msra.mxu0 %v10250_v31  ;;  %v10337_v31 = vld [vmem:[%s11093_s25 + $0x1554] ss:$8 sps:$4 sm:$0xff]  }
 0x287   : > { %7481 = vmatpush1.bf16.msra.mxu1 %v10253_v32  ;;  %7441 = vmatprep.subr.bf16.mxu0 %v10258_v33 }
 0x288   : > { %7482 = vmatprep.subr.bf16.mxu1 %v10261_v34 }
 0x28a   : > { %7442 = vmatpush1.bf16.msra.mxu0 %v10256_v35 }
 0x28b   : > { %7483 = vmatpush1.bf16.msra.mxu1 %v10259_v25  ;;  %7443 = vmatprep.subr.bf16.mxu0 %v10264_v26  ;;  %v10332_v25 = vld [vmem:[%s11093_s25 + $0x1450] ss:$8 sps:$4 sm:$0xff]  }
 0x28c   : > { %7484 = vmatprep.subr.bf16.mxu1 %v10267_v37  ;;  %v10335_v26 = vld [vmem:[%s11093_s25 + $0x1550] ss:$8 sps:$4 sm:$0xff]  }
 0x28e   : > { %7444 = vmatpush1.bf16.msra.mxu0 %v10262_v38 }
 0x28f   : > { %7485 = vmatpush1.bf16.msra.mxu1 %v10265_v40  ;;  %7445 = vmatprep.subr.bf16.mxu0 %v10270_v16  ;;  %v10343_v40 = vld [vmem:[%s11093_s25 + $0x1544] ss:$8 sps:$4 sm:$0xff]   ;;  %v10338_v16 = vld [vmem:[%s11093_s25 + $0x1440] ss:$8 sps:$4 sm:$0xff]  }
 0x290   : > { %7486 = vmatprep.subr.bf16.mxu1 %v10273_v41  ;;  %v10341_v41 = vld [vmem:[%s11093_s25 + $0x1540] ss:$8 sps:$4 sm:$0xff]  }
 0x292   : > { %7446 = vmatpush2.bf16.msra.mxu0 %v10268_v23  ;;  %v10346_v23 = vld [vmem:[%s11093_s25 + $0x1434] ss:$8 sps:$4 sm:$0xff]  }
 0x293   : > { %7487 = vmatpush2.bf16.msra.mxu1 %v10271_v46  ;;  %7447 = vmatprep.subr.bf16.mxu0 %v10276_v47  ;;  %v10349_v46 = vld [vmem:[%s11093_s25 + $0x1534] ss:$8 sps:$4 sm:$0xff]   ;;  %v10344_v47 = vld [vmem:[%s11093_s25 + $0x1430] ss:$8 sps:$4 sm:$0xff]  }
 0x294   : > { %7488 = vmatprep.subr.bf16.mxu1 %v10279_v48  ;;  %v10347_v48 = vld [vmem:[%s11093_s25 + $0x1530] ss:$8 sps:$4 sm:$0xff]  }
 0x296   : > { %7448 = vmatpush2.bf16.msra.mxu0 %v10274_v24  ;;  %v10352_v24 = vld [vmem:[%s11093_s25 + $0x1424] ss:$8 sps:$4 sm:$0xff]  }
 0x297   : > { %7489 = vmatpush2.bf16.msra.mxu1 %v10277_v27  ;;  %7449 = vmatprep.subr.bf16.mxu0 %v10282_v51  ;;  %v10355_v27 = vld [vmem:[%s11093_s25 + $0x1524] ss:$8 sps:$4 sm:$0xff]   ;;  %v10350_v51 = vld [vmem:[%s11093_s25 + $0x1420] ss:$8 sps:$4 sm:$0xff]  }
 0x298   : > { %7490 = vmatprep.subr.bf16.mxu1 %v10285_v52  ;;  %v10353_v52 = vld [vmem:[%s11093_s25 + $0x1520] ss:$8 sps:$4 sm:$0xff]  }
 0x29a   : > { %7450 = vmatpush2.bf16.msra.mxu0 %v10280_v53  ;;  %v10358_v53 = vld [vmem:[%s11093_s25 + $0x1414] ss:$8 sps:$4 sm:$0xff]  }
 0x29b   : > { %7491 = vmatpush2.bf16.msra.mxu1 %v10283_v54  ;;  %7451 = vmatprep.subr.bf16.mxu0 %v10288_v19  ;;  %v10361_v54 = vld [vmem:[%s11093_s25 + $0x1514] ss:$8 sps:$4 sm:$0xff]   ;;  %v10356_v19 = vld [vmem:[%s11093_s25 + $0x1410] ss:$8 sps:$4 sm:$0xff]  }
 0x29c   : > { %7492 = vmatprep.subr.bf16.mxu1 %v10291_v30  ;;  %v10359_v30 = vld [vmem:[%s11093_s25 + $0x1510] ss:$8 sps:$4 sm:$0xff]  }
 0x29e   : > { %7452 = vmatpush2.bf16.msra.mxu0 %v10286_v55  ;;  %v10364_v55 = vld [vmem:[%s11093_s25 + $0x1404] ss:$8 sps:$4 sm:$0xff]  }
 0x29f   : > { %7493 = vmatpush2.bf16.msra.mxu1 %v10289_v57  ;;  %7453 = vmatprep.subr.bf16.mxu0 %v10294_v58  ;;  %v10367_v57 = vld [vmem:[%s11093_s25 + $0x1504] ss:$8 sps:$4 sm:$0xff]   ;;  %v10362_v58 = vld [vmem:[%s11093_s25 + $0x1400] ss:$8 sps:$4 sm:$0xff]  }
 0x2a0   : > { %7494 = vmatprep.subr.bf16.mxu1 %v10297_v59  ;;  %v10365_v59 = vld [vmem:[%s11093_s25 + $0x1500] ss:$8 sps:$4 sm:$0xff]  }
 0x2a2   : > { %7454 = vmatpush2.bf16.msra.mxu0 %v10292_v36  ;;  %v10370_v36 = vld [vmem:[%s11093_s25 + $0x14f4] ss:$8 sps:$4 sm:$0xff]  }
 0x2a3   : > { %7495 = vmatpush2.bf16.msra.mxu1 %v10295_v60  ;;  %7455 = vmatprep.subr.bf16.mxu0 %v10300_v42  ;;  %v10373_v60 = vld [vmem:[%s11093_s25 + $0x15f4] ss:$8 sps:$4 sm:$0xff]   ;;  %v10368_v42 = vld [vmem:[%s11093_s25 + $0x14f0] ss:$8 sps:$4 sm:$0xff]  }
 0x2a4   : > { %7496 = vmatprep.subr.bf16.mxu1 %v10303_v1  ;;  %v10371_v1 = vld [vmem:[%s11093_s25 + $0x15f0] ss:$8 sps:$4 sm:$0xff]  }
 0x2a6   : > { %7456 = vmatpush2.bf16.msra.mxu0 %v10298_v39  ;;  %v10376_v39 = vld [vmem:[%s11093_s25 + $0x14e4] ss:$8 sps:$4 sm:$0xff]  }
 0x2a7   : > { %7497 = vmatpush2.bf16.msra.mxu1 %v10301_v2  ;;  %7457 = vmatprep.subr.bf16.mxu0 %v10306_v43  ;;  %v10379_v2 = vld [vmem:[%s11093_s25 + $0x15e4] ss:$8 sps:$4 sm:$0xff]   ;;  %v10374_v43 = vld [vmem:[%s11093_s25 + $0x14e0] ss:$8 sps:$4 sm:$0xff]  }
 0x2a8   : > { %7498 = vmatprep.subr.bf16.mxu1 %v10309_v45  ;;  %v10377_v45 = vld [vmem:[%s11093_s25 + $0x15e0] ss:$8 sps:$4 sm:$0xff]  }
 0x2aa   : > { %7458 = vmatpush2.bf16.msra.mxu0 %v10304_v44  ;;  %v10382_v44 = vld [vmem:[%s11093_s25 + $0x14d4] ss:$8 sps:$4 sm:$0xff]  }
 0x2ab   : > { %7499 = vmatpush2.bf16.msra.mxu1 %v10307_v6  ;;  %7459 = vmatprep.subr.bf16.mxu0 %v10312_v7  ;;  %v10385_v6 = vld [vmem:[%s11093_s25 + $0x15d4] ss:$8 sps:$4 sm:$0xff]   ;;  %v10380_v7 = vld [vmem:[%s11093_s25 + $0x14d0] ss:$8 sps:$4 sm:$0xff]  }
 0x2ac   : > { %7500 = vmatprep.subr.bf16.mxu1 %v10315_v8  ;;  %v10383_v8 = vld [vmem:[%s11093_s25 + $0x15d0] ss:$8 sps:$4 sm:$0xff]  }
 0x2ae   : > { %7460 = vmatpush2.bf16.msra.mxu0 %v10310_v49  ;;  %v10388_v49 = vld [vmem:[%s11093_s25 + $0x14c4] ss:$8 sps:$4 sm:$0xff]  }
 0x2af   : > { %7501 = vmatpush2.bf16.msra.mxu1 %v10313_v50  ;;  %7511 = vmatprep.subr.bf16.mxu0 %v10322_v9  ;;  %v10391_v50 = vld [vmem:[%s11093_s25 + $0x15c4] ss:$8 sps:$4 sm:$0xff]   ;;  %v10386_v9 = vld [vmem:[%s11093_s25 + $0x14c0] ss:$8 sps:$4 sm:$0xff]  }
 0x2b0   : > { %7552 = vmatprep.subr.bf16.mxu1 %v10325_v11  ;;  %v10389_v11 = vld [vmem:[%s11093_s25 + $0x15c0] ss:$8 sps:$4 sm:$0xff]  }
 0x2b1   : > { %v7217_v62 = vpop.f32.mrf.mxu0  ;;  %7462 = vmatmul.mubr.bf16.vlgmr.msra.gmra.mxu0 %v8203_v12  ;;  %v10394_v12 = vld [vmem:[%s11093_s25 + $0x14b4] ss:$8 sps:$4 sm:$0xff]  }
 0x2b2   : > { %v7258_v22 = vpop.f32.mrf.mxu1  ;;  %7503 = vmatmul.mubr.bf16.vlgmr.msra.gmra.mxu1 %v8205_v13  ;;  %v7218_v3 = vadd.f32 %v7217_v62, %v11845_v10  ;;  %7512 = vmatpush1.bf16.msra.mxu0 %v10320_v17  ;;  %v10397_v13 = vld [vmem:[%s11093_s25 + $0x15b4] ss:$8 sps:$4 sm:$0xff]   ;;  %v10392_v17 = vld [vmem:[%s11093_s25 + $0x14b0] ss:$8 sps:$4 sm:$0xff]  }
 0x2b3   : > { %7553 = vmatpush1.bf16.msra.mxu1 %v10323_v18  ;;  %v7219_v29 = vpop.f32.mrf.mxu0  ;;  %7513 = vmatprep.subr.bf16.mxu0 %v10328_v61  ;;  %v10395_v18 = vld [vmem:[%s11093_s25 + $0x15b0] ss:$8 sps:$4 sm:$0xff]   ;;  %v10400_v61 = vld [vmem:[%s11093_s25 + $0x14a4] ss:$8 sps:$4 sm:$0xff]   ;;  %v10406_v62 = vld [vmem:[%s11093_s25 + $0x1494] ss:$8 sps:$4 sm:$0xff]  }
 0x2b4   : > { %v7260_v4 = vpop.f32.mrf.mxu1  ;;  %7554 = vmatprep.subr.bf16.mxu1 %v10331_v21  ;;  %v11929_v32 = vadd.f32 %v7258_v22, %v7218_v3  ;;  %v7220_v33 = vadd.f32 %v7219_v29, %v11850_v15  ;;  %7543 = vmatprep.mubr.bf16.mxu0 %v8208_v63  ;;  %v10340_v15 = vld [vmem:[%s11093_s25 + $0x1444] ss:$8 sps:$4 sm:$0xff]   ;;  %v10398_v63 = vld [vmem:[%s11093_s25 + $0x14a0] ss:$8 sps:$4 sm:$0xff]   ;;  %v10409_v22 = vld [vmem:[%s11093_s25 + $0x1594] ss:$8 sps:$4 sm:$0xff]  }
 0x2b5   : > { %7584 = vmatprep.mubr.bf16.mxu1 %v8210_v0  ;;  %v7221_v10 = vpop.f32.mrf.mxu0  ;;  %v10403_v21 = vld [vmem:[%s11093_s25 + $0x15a4] ss:$8 sps:$4 sm:$0xff]   ;;  %v10401_v0 = vld [vmem:[%s11093_s25 + $0x15a0] ss:$8 sps:$4 sm:$0xff]   ;;  %v10404_v3 = vld [vmem:[%s11093_s25 + $0x1490] ss:$8 sps:$4 sm:$0xff]  }
 0x2b6   : > { %v7262_v34 = vpop.f32.mrf.mxu1  ;;  %v11932_v35 = vadd.f32 %v7260_v4, %v7220_v33  ;;  %7514 = vmatpush1.bf16.msra.mxu0 %v10326_v28  ;;  %v10407_v28 = vld [vmem:[%s11093_s25 + $0x1590] ss:$8 sps:$4 sm:$0xff]   ;;  %v10415_v29 = vld [vmem:[%s11093_s25 + $0x1584] ss:$8 sps:$4 sm:$0xff]   ;;  %v10410_v4 = vld [vmem:[%s11093_s25 + $0x1480] ss:$8 sps:$4 sm:$0xff]   ;;  %v8207_v10 = vcombine.low %v11911_v56, %v11911_v56 }
 0x2b7   : > { %7555 = vmatpush1.bf16.msra.mxu1 %v10329_v20  ;;  %v7222_v37 = vpop.f32.mrf.mxu0  ;;  %7515 = vmatprep.subr.bf16.mxu0 %v10334_v5  ;;  %v10412_v20 = vld [vmem:[%s11093_s25 + $0x1484] ss:$8 sps:$4 sm:$0xff]   ;;  %v10413_v5 = vld [vmem:[%s11093_s25 + $0x1580] ss:$8 sps:$4 sm:$0xff]   ;;  %v10425_v33 = vld [vmem:[%s11093_s25 + $0x1774] ss:$8 sps:$4 sm:$0xff]   ;;  %v8209_v34 = vcombine.low %v11914_v14, %v11914_v14 }
 0x2b8   : > { %v7263_v38 = vpop.f32.mrf.mxu1  ;;  %7556 = vmatprep.subr.bf16.mxu1 %v10337_v31  ;;  %v10422_v31 = vld [vmem:[%s11093_s25 + $0x1674] ss:$8 sps:$4 sm:$0xff]   ;;  %v10420_v37 = vld [vmem:[%s11093_s25 + $0x1670] ss:$8 sps:$4 sm:$0xff]  }
 0x2b9   : > { %v10423_v38 = vld [vmem:[%s11093_s25 + $0x1770] ss:$8 sps:$4 sm:$0xff]  }
 0x2ba   : > { %7516 = vmatpush1.bf16.msra.mxu0 %v10332_v25  ;;  %v11995_v25 = vld [vmem:[%s11103_s30 + $0xb0] sm:$0xff] }
 0x2bb   : > { %7557 = vmatpush1.bf16.msra.mxu1 %v10335_v26  ;;  %7517 = vmatprep.subr.bf16.mxu0 %v10340_v15  ;;  %v11998_v26 = vld [vmem:[%s11103_s30 + $0xb8] sm:$0xff]  ;;  %v8212_v56 = vcombine.high %v11995_v25, %v11995_v25 }
 0x2bc   : > { %7558 = vmatprep.subr.bf16.mxu1 %v10343_v40  ;;  %v10428_v15 = vld [vmem:[%s11093_s25 + $0x1664] ss:$8 sps:$4 sm:$0xff]   ;;  %v8214_v14 = vcombine.high %v11998_v26, %v11998_v26 }
 0x2bd   : > { %v10431_v40 = vld [vmem:[%s11093_s25 + $0x1764] ss:$8 sps:$4 sm:$0xff]  }
 0x2be   : > { %7518 = vmatpush1.bf16.msra.mxu0 %v10338_v16 }
 0x2bf   : > { %7559 = vmatpush1.bf16.msra.mxu1 %v10341_v41  ;;  %7519 = vmatprep.subr.bf16.mxu0 %v10346_v23 }
 0x2c0   : > { %7560 = vmatprep.subr.bf16.mxu1 %v10349_v46  ;;  %v10426_v46 = vld [vmem:[%s11093_s25 + $0x1660] ss:$8 sps:$4 sm:$0xff]  }
 0x2c2   : > { %7520 = vmatpush1.bf16.msra.mxu0 %v10344_v47  ;;  %v10429_v47 = vld [vmem:[%s11093_s25 + $0x1760] ss:$8 sps:$4 sm:$0xff]  }
 0x2c3   : > { %7561 = vmatpush1.bf16.msra.mxu1 %v10347_v48  ;;  %7521 = vmatprep.subr.bf16.mxu0 %v10352_v24 }
 0x2c4   : > { %7562 = vmatprep.subr.bf16.mxu1 %v10355_v27  ;;  %v10434_v27 = vld [vmem:[%s11093_s25 + $0x1654] ss:$8 sps:$4 sm:$0xff]  }
 0x2c6   : > { %7522 = vmatpush1.bf16.msra.mxu0 %v10350_v51  ;;  %v10437_v51 = vld [vmem:[%s11093_s25 + $0x1754] ss:$8 sps:$4 sm:$0xff]  }
 0x2c7   : > { %7563 = vmatpush1.bf16.msra.mxu1 %v10353_v52  ;;  %7523 = vmatprep.subr.bf16.mxu0 %v10358_v53 }
 0x2c8   : > { %7564 = vmatprep.subr.bf16.mxu1 %v10361_v54 }
 0x2ca   : > { %7524 = vmatpush1.bf16.msra.mxu0 %v10356_v19 }
 0x2cb   : > { %7565 = vmatpush1.bf16.msra.mxu1 %v10359_v30  ;;  %7525 = vmatprep.subr.bf16.mxu0 %v10364_v55  ;;  %v10432_v30 = vld [vmem:[%s11093_s25 + $0x1650] ss:$8 sps:$4 sm:$0xff]  }
 0x2cc   : > { %7566 = vmatprep.subr.bf16.mxu1 %v10367_v57  ;;  %v10435_v55 = vld [vmem:[%s11093_s25 + $0x1750] ss:$8 sps:$4 sm:$0xff]  }
 0x2ce   : > { %7526 = vmatpush1.bf16.msra.mxu0 %v10362_v58 }
 0x2cf   : > { %7567 = vmatpush1.bf16.msra.mxu1 %v10365_v59  ;;  %7527 = vmatprep.subr.bf16.mxu0 %v10370_v36  ;;  %v10443_v59 = vld [vmem:[%s11093_s25 + $0x1744] ss:$8 sps:$4 sm:$0xff]   ;;  %v10438_v36 = vld [vmem:[%s11093_s25 + $0x1640] ss:$8 sps:$4 sm:$0xff]  }
 0x2d0   : > { %7568 = vmatprep.subr.bf16.mxu1 %v10373_v60  ;;  %v10441_v60 = vld [vmem:[%s11093_s25 + $0x1740] ss:$8 sps:$4 sm:$0xff]  }
 0x2d2   : > { %7528 = vmatpush2.bf16.msra.mxu0 %v10368_v42  ;;  %v10446_v42 = vld [vmem:[%s11093_s25 + $0x1634] ss:$8 sps:$4 sm:$0xff]  }
 0x2d3   : > { %7569 = vmatpush2.bf16.msra.mxu1 %v10371_v1  ;;  %7529 = vmatprep.subr.bf16.mxu0 %v10376_v39  ;;  %v10449_v1 = vld [vmem:[%s11093_s25 + $0x1734] ss:$8 sps:$4 sm:$0xff]   ;;  %v10444_v39 = vld [vmem:[%s11093_s25 + $0x1630] ss:$8 sps:$4 sm:$0xff]  }
 0x2d4   : > { %7570 = vmatprep.subr.bf16.mxu1 %v10379_v2  ;;  %v10447_v2 = vld [vmem:[%s11093_s25 + $0x1730] ss:$8 sps:$4 sm:$0xff]  }
 0x2d6   : > { %7530 = vmatpush2.bf16.msra.mxu0 %v10374_v43  ;;  %v10452_v43 = vld [vmem:[%s11093_s25 + $0x1624] ss:$8 sps:$4 sm:$0xff]  }
 0x2d7   : > { %7571 = vmatpush2.bf16.msra.mxu1 %v10377_v45  ;;  %7531 = vmatprep.subr.bf16.mxu0 %v10382_v44  ;;  %v10455_v45 = vld [vmem:[%s11093_s25 + $0x1724] ss:$8 sps:$4 sm:$0xff]   ;;  %v10450_v44 = vld [vmem:[%s11093_s25 + $0x1620] ss:$8 sps:$4 sm:$0xff]  }
 0x2d8   : > { %7572 = vmatprep.subr.bf16.mxu1 %v10385_v6  ;;  %v10453_v6 = vld [vmem:[%s11093_s25 + $0x1720] ss:$8 sps:$4 sm:$0xff]  }
 0x2da   : > { %7532 = vmatpush2.bf16.msra.mxu0 %v10380_v7  ;;  %v10458_v7 = vld [vmem:[%s11093_s25 + $0x1614] ss:$8 sps:$4 sm:$0xff]  }
 0x2db   : > { %7573 = vmatpush2.bf16.msra.mxu1 %v10383_v8  ;;  %7533 = vmatprep.subr.bf16.mxu0 %v10388_v49  ;;  %v10461_v8 = vld [vmem:[%s11093_s25 + $0x1714] ss:$8 sps:$4 sm:$0xff]   ;;  %v10456_v49 = vld [vmem:[%s11093_s25 + $0x1610] ss:$8 sps:$4 sm:$0xff]  }
 0x2dc   : > { %7574 = vmatprep.subr.bf16.mxu1 %v10391_v50  ;;  %v10459_v50 = vld [vmem:[%s11093_s25 + $0x1710] ss:$8 sps:$4 sm:$0xff]  }
 0x2de   : > { %7534 = vmatpush2.bf16.msra.mxu0 %v10386_v9  ;;  %v10464_v9 = vld [vmem:[%s11093_s25 + $0x1604] ss:$8 sps:$4 sm:$0xff]  }
 0x2df   : > { %7575 = vmatpush2.bf16.msra.mxu1 %v10389_v11  ;;  %7535 = vmatprep.subr.bf16.mxu0 %v10394_v12  ;;  %v10467_v11 = vld [vmem:[%s11093_s25 + $0x1704] ss:$8 sps:$4 sm:$0xff]   ;;  %v10462_v12 = vld [vmem:[%s11093_s25 + $0x1600] ss:$8 sps:$4 sm:$0xff]  }
 0x2e0   : > { %7576 = vmatprep.subr.bf16.mxu1 %v10397_v13  ;;  %v10465_v13 = vld [vmem:[%s11093_s25 + $0x1700] ss:$8 sps:$4 sm:$0xff]  }
 0x2e2   : > { %7536 = vmatpush2.bf16.msra.mxu0 %v10392_v17  ;;  %v10470_v17 = vld [vmem:[%s11093_s25 + $0x16f4] ss:$8 sps:$4 sm:$0xff]  }
 0x2e3   : > { %7577 = vmatpush2.bf16.msra.mxu1 %v10395_v18  ;;  %7537 = vmatprep.subr.bf16.mxu0 %v10400_v61  ;;  %v10473_v18 = vld [vmem:[%s11093_s25 + $0x17f4] ss:$8 sps:$4 sm:$0xff]   ;;  %v10468_v61 = vld [vmem:[%s11093_s25 + $0x16f0] ss:$8 sps:$4 sm:$0xff]  }
 0x2e4   : > { %7578 = vmatprep.subr.bf16.mxu1 %v10403_v21  ;;  %v10471_v21 = vld [vmem:[%s11093_s25 + $0x17f0] ss:$8 sps:$4 sm:$0xff]  }
 0x2e6   : > { %7538 = vmatpush2.bf16.msra.mxu0 %v10398_v63  ;;  %v10476_v63 = vld [vmem:[%s11093_s25 + $0x16e4] ss:$8 sps:$4 sm:$0xff]  }
 0x2e7   : > { %7579 = vmatpush2.bf16.msra.mxu1 %v10401_v0  ;;  %7539 = vmatprep.subr.bf16.mxu0 %v10406_v62  ;;  %v10479_v0 = vld [vmem:[%s11093_s25 + $0x17e4] ss:$8 sps:$4 sm:$0xff]   ;;  %v10474_v62 = vld [vmem:[%s11093_s25 + $0x16e0] ss:$8 sps:$4 sm:$0xff]  }
 0x2e8   : > { %7580 = vmatprep.subr.bf16.mxu1 %v10409_v22  ;;  %v10477_v22 = vld [vmem:[%s11093_s25 + $0x17e0] ss:$8 sps:$4 sm:$0xff]  }
 0x2ea   : > { %7540 = vmatpush2.bf16.msra.mxu0 %v10404_v3  ;;  %v10482_v3 = vld [vmem:[%s11093_s25 + $0x16d4] ss:$8 sps:$4 sm:$0xff]  }
 0x2eb   : > { %7581 = vmatpush2.bf16.msra.mxu1 %v10407_v28  ;;  %7541 = vmatprep.subr.bf16.mxu0 %v10412_v20  ;;  %v10485_v28 = vld [vmem:[%s11093_s25 + $0x17d4] ss:$8 sps:$4 sm:$0xff]   ;;  %v10480_v20 = vld [vmem:[%s11093_s25 + $0x16d0] ss:$8 sps:$4 sm:$0xff]  }
 0x2ec   : > { %7582 = vmatprep.subr.bf16.mxu1 %v10415_v29  ;;  %v10483_v29 = vld [vmem:[%s11093_s25 + $0x17d0] ss:$8 sps:$4 sm:$0xff]  }
 0x2ee   : > { %7542 = vmatpush2.bf16.msra.mxu0 %v10410_v4  ;;  %v10488_v4 = vld [vmem:[%s11093_s25 + $0x16c4] ss:$8 sps:$4 sm:$0xff]  }
 0x2ef   : > { %7583 = vmatpush2.bf16.msra.mxu1 %v10413_v5  ;;  %7593 = vmatprep.subr.bf16.mxu0 %v10422_v31  ;;  %v10491_v5 = vld [vmem:[%s11093_s25 + $0x17c4] ss:$8 sps:$4 sm:$0xff]   ;;  %v10486_v31 = vld [vmem:[%s11093_s25 + $0x16c0] ss:$8 sps:$4 sm:$0xff]  }
 0x2f0   : > { %7634 = vmatprep.subr.bf16.mxu1 %v10425_v33  ;;  %v10489_v33 = vld [vmem:[%s11093_s25 + $0x17c0] ss:$8 sps:$4 sm:$0xff]  }
 0x2f1   : > { %v7299_v16 = vpop.f32.mrf.mxu0  ;;  %7544 = vmatmul.mubr.bf16.vlgmr.msra.gmra.mxu0 %v8207_v10  ;;  %v10494_v10 = vld [vmem:[%s11093_s25 + $0x16b4] ss:$8 sps:$4 sm:$0xff]  }
 0x2f2   : > { %v7340_v41 = vpop.f32.mrf.mxu1  ;;  %7585 = vmatmul.mubr.bf16.vlgmr.msra.gmra.mxu1 %v8209_v34  ;;  %v7300_v23 = vadd.f32 %v7299_v16, %v11929_v32  ;;  %7594 = vmatpush1.bf16.msra.mxu0 %v10420_v37  ;;  %v10497_v34 = vld [vmem:[%s11093_s25 + $0x17b4] ss:$8 sps:$4 sm:$0xff]   ;;  %v10492_v37 = vld [vmem:[%s11093_s25 + $0x16b0] ss:$8 sps:$4 sm:$0xff]  }
 0x2f3   : > { %7635 = vmatpush1.bf16.msra.mxu1 %v10423_v38  ;;  %v7301_v48 = vpop.f32.mrf.mxu0  ;;  %7595 = vmatprep.subr.bf16.mxu0 %v10428_v15  ;;  %v10495_v38 = vld [vmem:[%s11093_s25 + $0x17b0] ss:$8 sps:$4 sm:$0xff]   ;;  %v10500_v15 = vld [vmem:[%s11093_s25 + $0x16a4] ss:$8 sps:$4 sm:$0xff]   ;;  %v10506_v16 = vld [vmem:[%s11093_s25 + $0x1694] ss:$8 sps:$4 sm:$0xff]  }
 0x2f4   : > { %v7342_v24 = vpop.f32.mrf.mxu1  ;;  %7636 = vmatprep.subr.bf16.mxu1 %v10431_v40  ;;  %v12013_v52 = vadd.f32 %v7340_v41, %v7300_v23  ;;  %v7302_v53 = vadd.f32 %v7301_v48, %v11932_v35  ;;  %7625 = vmatprep.mubr.bf16.mxu0 %v8212_v56  ;;  %v10440_v35 = vld [vmem:[%s11093_s25 + $0x1644] ss:$8 sps:$4 sm:$0xff]   ;;  %v10498_v56 = vld [vmem:[%s11093_s25 + $0x16a0] ss:$8 sps:$4 sm:$0xff]   ;;  %v10509_v41 = vld [vmem:[%s11093_s25 + $0x1794] ss:$8 sps:$4 sm:$0xff]  }
 0x2f5   : > { %7666 = vmatprep.mubr.bf16.mxu1 %v8214_v14  ;;  %v7303_v32 = vpop.f32.mrf.mxu0  ;;  %v10503_v40 = vld [vmem:[%s11093_s25 + $0x17a4] ss:$8 sps:$4 sm:$0xff]   ;;  %v10501_v14 = vld [vmem:[%s11093_s25 + $0x17a0] ss:$8 sps:$4 sm:$0xff]   ;;  %v10504_v23 = vld [vmem:[%s11093_s25 + $0x1690] ss:$8 sps:$4 sm:$0xff]  }
 0x2f6   : > { %v7344_v54 = vpop.f32.mrf.mxu1  ;;  %v12016_v19 = vadd.f32 %v7342_v24, %v7302_v53  ;;  %7596 = vmatpush1.bf16.msra.mxu0 %v10426_v46  ;;  %v10507_v46 = vld [vmem:[%s11093_s25 + $0x1790] ss:$8 sps:$4 sm:$0xff]   ;;  %v10515_v48 = vld [vmem:[%s11093_s25 + $0x1784] ss:$8 sps:$4 sm:$0xff]   ;;  %v10510_v24 = vld [vmem:[%s11093_s25 + $0x1680] ss:$8 sps:$4 sm:$0xff]   ;;  %v8211_v32 = vcombine.low %v11995_v25, %v11995_v25 }
 0x2f7   : > { %7637 = vmatpush1.bf16.msra.mxu1 %v10429_v47  ;;  %v7304_v57 = vpop.f32.mrf.mxu0  ;;  %7597 = vmatprep.subr.bf16.mxu0 %v10434_v27  ;;  %v10512_v47 = vld [vmem:[%s11093_s25 + $0x1684] ss:$8 sps:$4 sm:$0xff]   ;;  %v10513_v27 = vld [vmem:[%s11093_s25 + $0x1780] ss:$8 sps:$4 sm:$0xff]   ;;  %v10525_v53 = vld [vmem:[%s11093_s25 + $0x1974] ss:$8 sps:$4 sm:$0xff]   ;;  %v8213_v54 = vcombine.low %v11998_v26, %v11998_v26 }
 0x2f8   : > { %v7345_v58 = vpop.f32.mrf.mxu1  ;;  %7638 = vmatprep.subr.bf16.mxu1 %v10437_v51  ;;  %v10522_v51 = vld [vmem:[%s11093_s25 + $0x1874] ss:$8 sps:$4 sm:$0xff]   ;;  %v10520_v57 = vld [vmem:[%s11093_s25 + $0x1870] ss:$8 sps:$4 sm:$0xff]  }
 0x2f9   : > { %v10523_v58 = vld [vmem:[%s11093_s25 + $0x1970] ss:$8 sps:$4 sm:$0xff]  }
 0x2fa   : > { %7598 = vmatpush1.bf16.msra.mxu0 %v10432_v30  ;;  %v12079_v30 = vld [vmem:[%s11103_s30 + $0xc0] sm:$0xff] }
 0x2fb   : > { %7639 = vmatpush1.bf16.msra.mxu1 %v10435_v55  ;;  %7599 = vmatprep.subr.bf16.mxu0 %v10440_v35  ;;  %v12082_v55 = vld [vmem:[%s11103_s30 + $0xc8] sm:$0xff]  ;;  %v10528_v35 = vld [vmem:[%s11093_s25 + $0x1864] ss:$8 sps:$4 sm:$0xff]   ;;  %v8216_v25 = vcombine.high %v12079_v30, %v12079_v30 }
 0x2fc   : > { %7640 = vmatprep.subr.bf16.mxu1 %v10443_v59  ;;  %v10531_v59 = vld [vmem:[%s11093_s25 + $0x1964] ss:$8 sps:$4 sm:$0xff]   ;;  %v8218_v26 = vcombine.high %v12082_v55, %v12082_v55 }
 0x2fe   : > { %7600 = vmatpush1.bf16.msra.mxu0 %v10438_v36 }
 0x2ff   : > { %7641 = vmatpush1.bf16.msra.mxu1 %v10441_v60  ;;  %7601 = vmatprep.subr.bf16.mxu0 %v10446_v42 }
 0x300   : > { %7642 = vmatprep.subr.bf16.mxu1 %v10449_v1  ;;  %v10526_v1 = vld [vmem:[%s11093_s25 + $0x1860] ss:$8 sps:$4 sm:$0xff]  }
 0x302   : > { %7602 = vmatpush1.bf16.msra.mxu0 %v10444_v39  ;;  %v10529_v39 = vld [vmem:[%s11093_s25 + $0x1960] ss:$8 sps:$4 sm:$0xff]  }
 0x303   : > { %7643 = vmatpush1.bf16.msra.mxu1 %v10447_v2  ;;  %7603 = vmatprep.subr.bf16.mxu0 %v10452_v43 }
 0x304   : > { %7644 = vmatprep.subr.bf16.mxu1 %v10455_v45  ;;  %v10534_v45 = vld [vmem:[%s11093_s25 + $0x1854] ss:$8 sps:$4 sm:$0xff]  }
 0x306   : > { %7604 = vmatpush1.bf16.msra.mxu0 %v10450_v44  ;;  %v10537_v44 = vld [vmem:[%s11093_s25 + $0x1954] ss:$8 sps:$4 sm:$0xff]  }
 0x307   : > { %7645 = vmatpush1.bf16.msra.mxu1 %v10453_v6  ;;  %7605 = vmatprep.subr.bf16.mxu0 %v10458_v7 }
 0x308   : > { %7646 = vmatprep.subr.bf16.mxu1 %v10461_v8 }
 0x30a   : > { %7606 = vmatpush1.bf16.msra.mxu0 %v10456_v49 }
 0x30b   : > { %7647 = vmatpush1.bf16.msra.mxu1 %v10459_v50  ;;  %7607 = vmatprep.subr.bf16.mxu0 %v10464_v9  ;;  %v10532_v50 = vld [vmem:[%s11093_s25 + $0x1850] ss:$8 sps:$4 sm:$0xff]  }
 0x30c   : > { %7648 = vmatprep.subr.bf16.mxu1 %v10467_v11  ;;  %v10535_v9 = vld [vmem:[%s11093_s25 + $0x1950] ss:$8 sps:$4 sm:$0xff]  }
 0x30e   : > { %7608 = vmatpush1.bf16.msra.mxu0 %v10462_v12 }
 0x30f   : > { %7649 = vmatpush1.bf16.msra.mxu1 %v10465_v13  ;;  %7609 = vmatprep.subr.bf16.mxu0 %v10470_v17  ;;  %v10543_v13 = vld [vmem:[%s11093_s25 + $0x1944] ss:$8 sps:$4 sm:$0xff]   ;;  %v10538_v17 = vld [vmem:[%s11093_s25 + $0x1840] ss:$8 sps:$4 sm:$0xff]  }
 0x310   : > { %7650 = vmatprep.subr.bf16.mxu1 %v10473_v18  ;;  %v10541_v18 = vld [vmem:[%s11093_s25 + $0x1940] ss:$8 sps:$4 sm:$0xff]  }
 0x312   : > { %7610 = vmatpush2.bf16.msra.mxu0 %v10468_v61  ;;  %v10546_v61 = vld [vmem:[%s11093_s25 + $0x1834] ss:$8 sps:$4 sm:$0xff]  }
 0x313   : > { %7651 = vmatpush2.bf16.msra.mxu1 %v10471_v21  ;;  %7611 = vmatprep.subr.bf16.mxu0 %v10476_v63  ;;  %v10549_v21 = vld [vmem:[%s11093_s25 + $0x1934] ss:$8 sps:$4 sm:$0xff]   ;;  %v10544_v63 = vld [vmem:[%s11093_s25 + $0x1830] ss:$8 sps:$4 sm:$0xff]  }
 0x314   : > { %7652 = vmatprep.subr.bf16.mxu1 %v10479_v0  ;;  %v10547_v0 = vld [vmem:[%s11093_s25 + $0x1930] ss:$8 sps:$4 sm:$0xff]  }
 0x316   : > { %7612 = vmatpush2.bf16.msra.mxu0 %v10474_v62  ;;  %v10552_v62 = vld [vmem:[%s11093_s25 + $0x1824] ss:$8 sps:$4 sm:$0xff]  }
 0x317   : > { %7653 = vmatpush2.bf16.msra.mxu1 %v10477_v22  ;;  %7613 = vmatprep.subr.bf16.mxu0 %v10482_v3  ;;  %v10555_v22 = vld [vmem:[%s11093_s25 + $0x1924] ss:$8 sps:$4 sm:$0xff]   ;;  %v10550_v3 = vld [vmem:[%s11093_s25 + $0x1820] ss:$8 sps:$4 sm:$0xff]  }
 0x318   : > { %7654 = vmatprep.subr.bf16.mxu1 %v10485_v28  ;;  %v10553_v28 = vld [vmem:[%s11093_s25 + $0x1920] ss:$8 sps:$4 sm:$0xff]  }
 0x31a   : > { %7614 = vmatpush2.bf16.msra.mxu0 %v10480_v20  ;;  %v10558_v20 = vld [vmem:[%s11093_s25 + $0x1814] ss:$8 sps:$4 sm:$0xff]  }
 0x31b   : > { %7655 = vmatpush2.bf16.msra.mxu1 %v10483_v29  ;;  %7615 = vmatprep.subr.bf16.mxu0 %v10488_v4  ;;  %v10561_v29 = vld [vmem:[%s11093_s25 + $0x1914] ss:$8 sps:$4 sm:$0xff]   ;;  %v10556_v4 = vld [vmem:[%s11093_s25 + $0x1810] ss:$8 sps:$4 sm:$0xff]  }
 0x31c   : > { %7656 = vmatprep.subr.bf16.mxu1 %v10491_v5  ;;  %v10559_v5 = vld [vmem:[%s11093_s25 + $0x1910] ss:$8 sps:$4 sm:$0xff]  }
 0x31e   : > { %7616 = vmatpush2.bf16.msra.mxu0 %v10486_v31  ;;  %v10564_v31 = vld [vmem:[%s11093_s25 + $0x1804] ss:$8 sps:$4 sm:$0xff]  }
 0x31f   : > { %7657 = vmatpush2.bf16.msra.mxu1 %v10489_v33  ;;  %7617 = vmatprep.subr.bf16.mxu0 %v10494_v10  ;;  %v10567_v33 = vld [vmem:[%s11093_s25 + $0x1904] ss:$8 sps:$4 sm:$0xff]   ;;  %v10562_v10 = vld [vmem:[%s11093_s25 + $0x1800] ss:$8 sps:$4 sm:$0xff]  }
 0x320   : > { %7658 = vmatprep.subr.bf16.mxu1 %v10497_v34  ;;  %v10565_v34 = vld [vmem:[%s11093_s25 + $0x1900] ss:$8 sps:$4 sm:$0xff]  }
 0x322   : > { %7618 = vmatpush2.bf16.msra.mxu0 %v10492_v37  ;;  %v10570_v37 = vld [vmem:[%s11093_s25 + $0x18f4] ss:$8 sps:$4 sm:$0xff]  }
 0x323   : > { %7659 = vmatpush2.bf16.msra.mxu1 %v10495_v38  ;;  %7619 = vmatprep.subr.bf16.mxu0 %v10500_v15  ;;  %v10573_v38 = vld [vmem:[%s11093_s25 + $0x19f4] ss:$8 sps:$4 sm:$0xff]   ;;  %v10568_v15 = vld [vmem:[%s11093_s25 + $0x18f0] ss:$8 sps:$4 sm:$0xff]  }
 0x324   : > { %7660 = vmatprep.subr.bf16.mxu1 %v10503_v40  ;;  %v10571_v40 = vld [vmem:[%s11093_s25 + $0x19f0] ss:$8 sps:$4 sm:$0xff]  }
 0x326   : > { %7620 = vmatpush2.bf16.msra.mxu0 %v10498_v56  ;;  %v10576_v56 = vld [vmem:[%s11093_s25 + $0x18e4] ss:$8 sps:$4 sm:$0xff]  }
 0x327   : > { %7661 = vmatpush2.bf16.msra.mxu1 %v10501_v14  ;;  %7621 = vmatprep.subr.bf16.mxu0 %v10506_v16  ;;  %v10579_v14 = vld [vmem:[%s11093_s25 + $0x19e4] ss:$8 sps:$4 sm:$0xff]   ;;  %v10574_v16 = vld [vmem:[%s11093_s25 + $0x18e0] ss:$8 sps:$4 sm:$0xff]  }
 0x328   : > { %7662 = vmatprep.subr.bf16.mxu1 %v10509_v41  ;;  %v10577_v41 = vld [vmem:[%s11093_s25 + $0x19e0] ss:$8 sps:$4 sm:$0xff]  }
 0x32a   : > { %7622 = vmatpush2.bf16.msra.mxu0 %v10504_v23  ;;  %v10582_v23 = vld [vmem:[%s11093_s25 + $0x18d4] ss:$8 sps:$4 sm:$0xff]  }
 0x32b   : > { %7663 = vmatpush2.bf16.msra.mxu1 %v10507_v46  ;;  %7623 = vmatprep.subr.bf16.mxu0 %v10512_v47  ;;  %v10585_v46 = vld [vmem:[%s11093_s25 + $0x19d4] ss:$8 sps:$4 sm:$0xff]   ;;  %v10580_v47 = vld [vmem:[%s11093_s25 + $0x18d0] ss:$8 sps:$4 sm:$0xff]  }
 0x32c   : > { %7664 = vmatprep.subr.bf16.mxu1 %v10515_v48  ;;  %v10583_v48 = vld [vmem:[%s11093_s25 + $0x19d0] ss:$8 sps:$4 sm:$0xff]  }
 0x32e   : > { %7624 = vmatpush2.bf16.msra.mxu0 %v10510_v24  ;;  %v10588_v24 = vld [vmem:[%s11093_s25 + $0x18c4] ss:$8 sps:$4 sm:$0xff]  }
 0x32f   : > { %7665 = vmatpush2.bf16.msra.mxu1 %v10513_v27  ;;  %7675 = vmatprep.subr.bf16.mxu0 %v10522_v51  ;;  %v10591_v27 = vld [vmem:[%s11093_s25 + $0x19c4] ss:$8 sps:$4 sm:$0xff]   ;;  %v10586_v51 = vld [vmem:[%s11093_s25 + $0x18c0] ss:$8 sps:$4 sm:$0xff]  }
 0x330   : > { %7716 = vmatprep.subr.bf16.mxu1 %v10525_v53  ;;  %v10589_v53 = vld [vmem:[%s11093_s25 + $0x19c0] ss:$8 sps:$4 sm:$0xff]  }
 0x331   : > { %v7381_v36 = vpop.f32.mrf.mxu0  ;;  %7626 = vmatmul.mubr.bf16.vlgmr.msra.gmra.mxu0 %v8211_v32  ;;  %v10594_v32 = vld [vmem:[%s11093_s25 + $0x18b4] ss:$8 sps:$4 sm:$0xff]  }
 0x332   : > { %v7422_v60 = vpop.f32.mrf.mxu1  ;;  %7667 = vmatmul.mubr.bf16.vlgmr.msra.gmra.mxu1 %v8213_v54  ;;  %v7382_v42 = vadd.f32 %v7381_v36, %v12013_v52  ;;  %7676 = vmatpush1.bf16.msra.mxu0 %v10520_v57  ;;  %v10597_v54 = vld [vmem:[%s11093_s25 + $0x19b4] ss:$8 sps:$4 sm:$0xff]   ;;  %v10592_v57 = vld [vmem:[%s11093_s25 + $0x18b0] ss:$8 sps:$4 sm:$0xff]  }
 0x333   : > { %7717 = vmatpush1.bf16.msra.mxu1 %v10523_v58  ;;  %v7383_v2 = vpop.f32.mrf.mxu0  ;;  %7677 = vmatprep.subr.bf16.mxu0 %v10528_v35  ;;  %v10595_v58 = vld [vmem:[%s11093_s25 + $0x19b0] ss:$8 sps:$4 sm:$0xff]   ;;  %v10600_v35 = vld [vmem:[%s11093_s25 + $0x18a4] ss:$8 sps:$4 sm:$0xff]   ;;  %v10606_v36 = vld [vmem:[%s11093_s25 + $0x1894] ss:$8 sps:$4 sm:$0xff]  }
 0x334   : > { %v7424_v43 = vpop.f32.mrf.mxu1  ;;  %7718 = vmatprep.subr.bf16.mxu1 %v10531_v59  ;;  %v12097_v6 = vadd.f32 %v7422_v60, %v7382_v42  ;;  %v7384_v7 = vadd.f32 %v7383_v2, %v12016_v19  ;;  %7707 = vmatprep.mubr.bf16.mxu0 %v8216_v25  ;;  %v10540_v19 = vld [vmem:[%s11093_s25 + $0x1844] ss:$8 sps:$4 sm:$0xff]   ;;  %v10598_v25 = vld [vmem:[%s11093_s25 + $0x18a0] ss:$8 sps:$4 sm:$0xff]   ;;  %v10609_v60 = vld [vmem:[%s11093_s25 + $0x1994] ss:$8 sps:$4 sm:$0xff]  }
 0x335   : > { %7748 = vmatprep.mubr.bf16.mxu1 %v8218_v26  ;;  %v7385_v52 = vpop.f32.mrf.mxu0  ;;  %v10603_v59 = vld [vmem:[%s11093_s25 + $0x19a4] ss:$8 sps:$4 sm:$0xff]   ;;  %v10601_v26 = vld [vmem:[%s11093_s25 + $0x19a0] ss:$8 sps:$4 sm:$0xff]   ;;  %v10604_v42 = vld [vmem:[%s11093_s25 + $0x1890] ss:$8 sps:$4 sm:$0xff]  }
 0x336   : > { %v7426_v8 = vpop.f32.mrf.mxu1  ;;  %v12100_v49 = vadd.f32 %v7424_v43, %v7384_v7  ;;  %7678 = vmatpush1.bf16.msra.mxu0 %v10526_v1  ;;  %v10607_v1 = vld [vmem:[%s11093_s25 + $0x1990] ss:$8 sps:$4 sm:$0xff]   ;;  %v10615_v2 = vld [vmem:[%s11093_s25 + $0x1984] ss:$8 sps:$4 sm:$0xff]   ;;  %v10610_v43 = vld [vmem:[%s11093_s25 + $0x1880] ss:$8 sps:$4 sm:$0xff]   ;;  %v8215_v52 = vcombine.low %v12079_v30, %v12079_v30 }
 0x337   : > { %7719 = vmatpush1.bf16.msra.mxu1 %v10529_v39  ;;  %v7386_v11 = vpop.f32.mrf.mxu0  ;;  %7679 = vmatprep.subr.bf16.mxu0 %v10534_v45  ;;  %v10612_v39 = vld [vmem:[%s11093_s25 + $0x1884] ss:$8 sps:$4 sm:$0xff]   ;;  %v10613_v45 = vld [vmem:[%s11093_s25 + $0x1980] ss:$8 sps:$4 sm:$0xff]   ;;  %v10625_v7 = vld [vmem:[%s11093_s25 + $0x1b74] ss:$8 sps:$4 sm:$0xff]   ;;  %v8217_v8 = vcombine.low %v12082_v55, %v12082_v55 }
 0x338   : > { %v7427_v12 = vpop.f32.mrf.mxu1  ;;  %7720 = vmatprep.subr.bf16.mxu1 %v10537_v44  ;;  %v10622_v44 = vld [vmem:[%s11093_s25 + $0x1a74] ss:$8 sps:$4 sm:$0xff]   ;;  %v10620_v11 = vld [vmem:[%s11093_s25 + $0x1a70] ss:$8 sps:$4 sm:$0xff]  }
 0x339   : > { %v10623_v12 = vld [vmem:[%s11093_s25 + $0x1b70] ss:$8 sps:$4 sm:$0xff]  }
 0x33a   : > { %7680 = vmatpush1.bf16.msra.mxu0 %v10532_v50  ;;  %v12163_v50 = vld [vmem:[%s11103_s30 + $0xd0] sm:$0xff] }
 0x33b   : > { %7721 = vmatpush1.bf16.msra.mxu1 %v10535_v9  ;;  %7681 = vmatprep.subr.bf16.mxu0 %v10540_v19  ;;  %v12166_v9 = vld [vmem:[%s11103_s30 + $0xd8] sm:$0xff]  ;;  %v8220_v30 = vcombine.high %v12163_v50, %v12163_v50 }
 0x33c   : > { %7722 = vmatprep.subr.bf16.mxu1 %v10543_v13  ;;  %v10628_v19 = vld [vmem:[%s11093_s25 + $0x1a64] ss:$8 sps:$4 sm:$0xff]   ;;  %v8222_v55 = vcombine.high %v12166_v9, %v12166_v9 }
 0x33d   : > { %v10631_v13 = vld [vmem:[%s11093_s25 + $0x1b64] ss:$8 sps:$4 sm:$0xff]  }
 0x33e   : > { %7682 = vmatpush1.bf16.msra.mxu0 %v10538_v17 }
 0x33f   : > { %7723 = vmatpush1.bf16.msra.mxu1 %v10541_v18  ;;  %7683 = vmatprep.subr.bf16.mxu0 %v10546_v61 }
 0x340   : > { %7724 = vmatprep.subr.bf16.mxu1 %v10549_v21  ;;  %v10626_v21 = vld [vmem:[%s11093_s25 + $0x1a60] ss:$8 sps:$4 sm:$0xff]  }
 0x342   : > { %7684 = vmatpush1.bf16.msra.mxu0 %v10544_v63  ;;  %v10629_v63 = vld [vmem:[%s11093_s25 + $0x1b60] ss:$8 sps:$4 sm:$0xff]  }
 0x343   : > { %7725 = vmatpush1.bf16.msra.mxu1 %v10547_v0  ;;  %7685 = vmatprep.subr.bf16.mxu0 %v10552_v62 }
 0x344   : > { %7726 = vmatprep.subr.bf16.mxu1 %v10555_v22  ;;  %v10634_v22 = vld [vmem:[%s11093_s25 + $0x1a54] ss:$8 sps:$4 sm:$0xff]  }
 0x346   : > { %7686 = vmatpush1.bf16.msra.mxu0 %v10550_v3  ;;  %v10637_v3 = vld [vmem:[%s11093_s25 + $0x1b54] ss:$8 sps:$4 sm:$0xff]  }
 0x347   : > { %7727 = vmatpush1.bf16.msra.mxu1 %v10553_v28  ;;  %7687 = vmatprep.subr.bf16.mxu0 %v10558_v20 }
 0x348   : > { %7728 = vmatprep.subr.bf16.mxu1 %v10561_v29 }
 0x34a   : > { %7688 = vmatpush1.bf16.msra.mxu0 %v10556_v4 }
 0x34b   : > { %7729 = vmatpush1.bf16.msra.mxu1 %v10559_v5  ;;  %7689 = vmatprep.subr.bf16.mxu0 %v10564_v31  ;;  %v10632_v5 = vld [vmem:[%s11093_s25 + $0x1a50] ss:$8 sps:$4 sm:$0xff]  }
 0x34c   : > { %7730 = vmatprep.subr.bf16.mxu1 %v10567_v33  ;;  %v10635_v31 = vld [vmem:[%s11093_s25 + $0x1b50] ss:$8 sps:$4 sm:$0xff]  }
 0x34e   : > { %7690 = vmatpush1.bf16.msra.mxu0 %v10562_v10 }
 0x34f   : > { %7731 = vmatpush1.bf16.msra.mxu1 %v10565_v34  ;;  %7691 = vmatprep.subr.bf16.mxu0 %v10570_v37  ;;  %v10643_v34 = vld [vmem:[%s11093_s25 + $0x1b44] ss:$8 sps:$4 sm:$0xff]   ;;  %v10638_v37 = vld [vmem:[%s11093_s25 + $0x1a40] ss:$8 sps:$4 sm:$0xff]  }
 0x350   : > { %7732 = vmatprep.subr.bf16.mxu1 %v10573_v38  ;;  %v10641_v38 = vld [vmem:[%s11093_s25 + $0x1b40] ss:$8 sps:$4 sm:$0xff]  }
 0x352   : > { %7692 = vmatpush2.bf16.msra.mxu0 %v10568_v15  ;;  %v10646_v15 = vld [vmem:[%s11093_s25 + $0x1a34] ss:$8 sps:$4 sm:$0xff]  }
 0x353   : > { %7733 = vmatpush2.bf16.msra.mxu1 %v10571_v40  ;;  %7693 = vmatprep.subr.bf16.mxu0 %v10576_v56  ;;  %v10649_v40 = vld [vmem:[%s11093_s25 + $0x1b34] ss:$8 sps:$4 sm:$0xff]   ;;  %v10644_v56 = vld [vmem:[%s11093_s25 + $0x1a30] ss:$8 sps:$4 sm:$0xff]  }
 0x354   : > { %7734 = vmatprep.subr.bf16.mxu1 %v10579_v14  ;;  %v10647_v14 = vld [vmem:[%s11093_s25 + $0x1b30] ss:$8 sps:$4 sm:$0xff]  }
 0x356   : > { %7694 = vmatpush2.bf16.msra.mxu0 %v10574_v16  ;;  %v10652_v16 = vld [vmem:[%s11093_s25 + $0x1a24] ss:$8 sps:$4 sm:$0xff]  }
 0x357   : > { %7735 = vmatpush2.bf16.msra.mxu1 %v10577_v41  ;;  %7695 = vmatprep.subr.bf16.mxu0 %v10582_v23  ;;  %v10655_v41 = vld [vmem:[%s11093_s25 + $0x1b24] ss:$8 sps:$4 sm:$0xff]   ;;  %v10650_v23 = vld [vmem:[%s11093_s25 + $0x1a20] ss:$8 sps:$4 sm:$0xff]  }
 0x358   : > { %7736 = vmatprep.subr.bf16.mxu1 %v10585_v46  ;;  %v10653_v46 = vld [vmem:[%s11093_s25 + $0x1b20] ss:$8 sps:$4 sm:$0xff]  }
 0x35a   : > { %7696 = vmatpush2.bf16.msra.mxu0 %v10580_v47  ;;  %v10658_v47 = vld [vmem:[%s11093_s25 + $0x1a14] ss:$8 sps:$4 sm:$0xff]  }
 0x35b   : > { %7737 = vmatpush2.bf16.msra.mxu1 %v10583_v48  ;;  %7697 = vmatprep.subr.bf16.mxu0 %v10588_v24  ;;  %v10661_v48 = vld [vmem:[%s11093_s25 + $0x1b14] ss:$8 sps:$4 sm:$0xff]   ;;  %v10656_v24 = vld [vmem:[%s11093_s25 + $0x1a10] ss:$8 sps:$4 sm:$0xff]  }
 0x35c   : > { %7738 = vmatprep.subr.bf16.mxu1 %v10591_v27  ;;  %v10659_v27 = vld [vmem:[%s11093_s25 + $0x1b10] ss:$8 sps:$4 sm:$0xff]  }
 0x35e   : > { %7698 = vmatpush2.bf16.msra.mxu0 %v10586_v51  ;;  %v10664_v51 = vld [vmem:[%s11093_s25 + $0x1a04] ss:$8 sps:$4 sm:$0xff]  }
 0x35f   : > { %7739 = vmatpush2.bf16.msra.mxu1 %v10589_v53  ;;  %7699 = vmatprep.subr.bf16.mxu0 %v10594_v32  ;;  %v10667_v53 = vld [vmem:[%s11093_s25 + $0x1b04] ss:$8 sps:$4 sm:$0xff]   ;;  %v10662_v32 = vld [vmem:[%s11093_s25 + $0x1a00] ss:$8 sps:$4 sm:$0xff]  }
 0x360   : > { %7740 = vmatprep.subr.bf16.mxu1 %v10597_v54  ;;  %v10665_v54 = vld [vmem:[%s11093_s25 + $0x1b00] ss:$8 sps:$4 sm:$0xff]  }
 0x362   : > { %7700 = vmatpush2.bf16.msra.mxu0 %v10592_v57  ;;  %v10670_v57 = vld [vmem:[%s11093_s25 + $0x1af4] ss:$8 sps:$4 sm:$0xff]  }
 0x363   : > { %7741 = vmatpush2.bf16.msra.mxu1 %v10595_v58  ;;  %7701 = vmatprep.subr.bf16.mxu0 %v10600_v35  ;;  %v10673_v58 = vld [vmem:[%s11093_s25 + $0x1bf4] ss:$8 sps:$4 sm:$0xff]   ;;  %v10668_v35 = vld [vmem:[%s11093_s25 + $0x1af0] ss:$8 sps:$4 sm:$0xff]  }
 0x364   : > { %7742 = vmatprep.subr.bf16.mxu1 %v10603_v59  ;;  %v10671_v59 = vld [vmem:[%s11093_s25 + $0x1bf0] ss:$8 sps:$4 sm:$0xff]  }
 0x366   : > { %7702 = vmatpush2.bf16.msra.mxu0 %v10598_v25  ;;  %v10676_v25 = vld [vmem:[%s11093_s25 + $0x1ae4] ss:$8 sps:$4 sm:$0xff]  }
 0x367   : > { %7743 = vmatpush2.bf16.msra.mxu1 %v10601_v26  ;;  %7703 = vmatprep.subr.bf16.mxu0 %v10606_v36  ;;  %v10679_v26 = vld [vmem:[%s11093_s25 + $0x1be4] ss:$8 sps:$4 sm:$0xff]   ;;  %v10674_v36 = vld [vmem:[%s11093_s25 + $0x1ae0] ss:$8 sps:$4 sm:$0xff]  }
 0x368   : > { %7744 = vmatprep.subr.bf16.mxu1 %v10609_v60  ;;  %v10677_v60 = vld [vmem:[%s11093_s25 + $0x1be0] ss:$8 sps:$4 sm:$0xff]  }
 0x36a   : > { %7704 = vmatpush2.bf16.msra.mxu0 %v10604_v42  ;;  %v10682_v42 = vld [vmem:[%s11093_s25 + $0x1ad4] ss:$8 sps:$4 sm:$0xff]  }
 0x36b   : > { %7745 = vmatpush2.bf16.msra.mxu1 %v10607_v1  ;;  %7705 = vmatprep.subr.bf16.mxu0 %v10612_v39  ;;  %v10685_v1 = vld [vmem:[%s11093_s25 + $0x1bd4] ss:$8 sps:$4 sm:$0xff]   ;;  %v10680_v39 = vld [vmem:[%s11093_s25 + $0x1ad0] ss:$8 sps:$4 sm:$0xff]  }
 0x36c   : > { %7746 = vmatprep.subr.bf16.mxu1 %v10615_v2  ;;  %v10683_v2 = vld [vmem:[%s11093_s25 + $0x1bd0] ss:$8 sps:$4 sm:$0xff]  }
 0x36e   : > { %7706 = vmatpush2.bf16.msra.mxu0 %v10610_v43  ;;  %v10688_v43 = vld [vmem:[%s11093_s25 + $0x1ac4] ss:$8 sps:$4 sm:$0xff]  }
 0x36f   : > { %7747 = vmatpush2.bf16.msra.mxu1 %v10613_v45  ;;  %7757 = vmatprep.subr.bf16.mxu0 %v10622_v44  ;;  %v10691_v45 = vld [vmem:[%s11093_s25 + $0x1bc4] ss:$8 sps:$4 sm:$0xff]   ;;  %v10686_v44 = vld [vmem:[%s11093_s25 + $0x1ac0] ss:$8 sps:$4 sm:$0xff]  }
 0x370   : > { %7798 = vmatprep.subr.bf16.mxu1 %v10625_v7  ;;  %v10689_v7 = vld [vmem:[%s11093_s25 + $0x1bc0] ss:$8 sps:$4 sm:$0xff]  }
 0x371   : > { %v7463_v17 = vpop.f32.mrf.mxu0  ;;  %7708 = vmatmul.mubr.bf16.vlgmr.msra.gmra.mxu0 %v8215_v52  ;;  %v10694_v52 = vld [vmem:[%s11093_s25 + $0x1ab4] ss:$8 sps:$4 sm:$0xff]  }
 0x372   : > { %v7504_v18 = vpop.f32.mrf.mxu1  ;;  %7749 = vmatmul.mubr.bf16.vlgmr.msra.gmra.mxu1 %v8217_v8  ;;  %v7464_v61 = vadd.f32 %v7463_v17, %v12097_v6  ;;  %7758 = vmatpush1.bf16.msra.mxu0 %v10620_v11  ;;  %v10697_v8 = vld [vmem:[%s11093_s25 + $0x1bb4] ss:$8 sps:$4 sm:$0xff]   ;;  %v10692_v11 = vld [vmem:[%s11093_s25 + $0x1ab0] ss:$8 sps:$4 sm:$0xff]  }
 0x373   : > { %7799 = vmatpush1.bf16.msra.mxu1 %v10623_v12  ;;  %v7465_v0 = vpop.f32.mrf.mxu0  ;;  %7759 = vmatprep.subr.bf16.mxu0 %v10628_v19  ;;  %v10695_v12 = vld [vmem:[%s11093_s25 + $0x1bb0] ss:$8 sps:$4 sm:$0xff]   ;;  %v10700_v19 = vld [vmem:[%s11093_s25 + $0x1aa4] ss:$8 sps:$4 sm:$0xff]   ;;  %v10706_v17 = vld [vmem:[%s11093_s25 + $0x1a94] ss:$8 sps:$4 sm:$0xff]  }
 0x374   : > { %v7506_v62 = vpop.f32.mrf.mxu1  ;;  %7800 = vmatprep.subr.bf16.mxu1 %v10631_v13  ;;  %v12181_v28 = vadd.f32 %v7504_v18, %v7464_v61  ;;  %v7466_v20 = vadd.f32 %v7465_v0, %v12100_v49  ;;  %7789 = vmatprep.mubr.bf16.mxu0 %v8220_v30  ;;  %v10640_v49 = vld [vmem:[%s11093_s25 + $0x1a44] ss:$8 sps:$4 sm:$0xff]   ;;  %v10698_v30 = vld [vmem:[%s11093_s25 + $0x1aa0] ss:$8 sps:$4 sm:$0xff]   ;;  %v10709_v18 = vld [vmem:[%s11093_s25 + $0x1b94] ss:$8 sps:$4 sm:$0xff]  }
 0x375   : > { %7830 = vmatprep.mubr.bf16.mxu1 %v8222_v55  ;;  %v7467_v6 = vpop.f32.mrf.mxu0  ;;  %v10703_v13 = vld [vmem:[%s11093_s25 + $0x1ba4] ss:$8 sps:$4 sm:$0xff]   ;;  %v10701_v55 = vld [vmem:[%s11093_s25 + $0x1ba0] ss:$8 sps:$4 sm:$0xff]   ;;  %v10704_v61 = vld [vmem:[%s11093_s25 + $0x1a90] ss:$8 sps:$4 sm:$0xff]  }
 0x376   : > { %v7508_v29 = vpop.f32.mrf.mxu1  ;;  %v12184_v4 = vadd.f32 %v7506_v62, %v7466_v20  ;;  %7760 = vmatpush1.bf16.msra.mxu0 %v10626_v21  ;;  %v10707_v21 = vld [vmem:[%s11093_s25 + $0x1b90] ss:$8 sps:$4 sm:$0xff]   ;;  %v10715_v0 = vld [vmem:[%s11093_s25 + $0x1b84] ss:$8 sps:$4 sm:$0xff]   ;;  %v10710_v62 = vld [vmem:[%s11093_s25 + $0x1a80] ss:$8 sps:$4 sm:$0xff]   ;;  %v8219_v6 = vcombine.low %v12163_v50, %v12163_v50 }
 0x377   : > { %7801 = vmatpush1.bf16.msra.mxu1 %v10629_v63  ;;  %v7468_v33 = vpop.f32.mrf.mxu0  ;;  %7761 = vmatprep.subr.bf16.mxu0 %v10634_v22  ;;  %v10712_v63 = vld [vmem:[%s11093_s25 + $0x1a84] ss:$8 sps:$4 sm:$0xff]   ;;  %v10713_v22 = vld [vmem:[%s11093_s25 + $0x1b80] ss:$8 sps:$4 sm:$0xff]   ;;  %v10725_v20 = vld [vmem:[%s11093_s25 + $0x1d74] ss:$8 sps:$4 sm:$0xff]   ;;  %v8221_v29 = vcombine.low %v12166_v9, %v12166_v9 }
 0x378   : > { %v7509_v10 = vpop.f32.mrf.mxu1  ;;  %7802 = vmatprep.subr.bf16.mxu1 %v10637_v3  ;;  %v10722_v3 = vld [vmem:[%s11093_s25 + $0x1c74] ss:$8 sps:$4 sm:$0xff]   ;;  %v10720_v33 = vld [vmem:[%s11093_s25 + $0x1c70] ss:$8 sps:$4 sm:$0xff]  }
 0x379   : > { %v10723_v10 = vld [vmem:[%s11093_s25 + $0x1d70] ss:$8 sps:$4 sm:$0xff]  }
 0x37a   : > { %7762 = vmatpush1.bf16.msra.mxu0 %v10632_v5  ;;  %v12247_v5 = vld [vmem:[%s11103_s30 + $0xe0] sm:$0xff] }
 0x37b   : > { %7803 = vmatpush1.bf16.msra.mxu1 %v10635_v31  ;;  %7763 = vmatprep.subr.bf16.mxu0 %v10640_v49  ;;  %v12250_v31 = vld [vmem:[%s11103_s30 + $0xe8] sm:$0xff]  ;;  %v10728_v49 = vld [vmem:[%s11093_s25 + $0x1c64] ss:$8 sps:$4 sm:$0xff]   ;;  %v8224_v50 = vcombine.high %v12247_v5, %v12247_v5 }
 0x37c   : > { %7804 = vmatprep.subr.bf16.mxu1 %v10643_v34  ;;  %v10731_v34 = vld [vmem:[%s11093_s25 + $0x1d64] ss:$8 sps:$4 sm:$0xff]   ;;  %v8226_v9 = vcombine.high %v12250_v31, %v12250_v31 }
 0x37e   : > { %7764 = vmatpush1.bf16.msra.mxu0 %v10638_v37 }
 0x37f   : > { %7805 = vmatpush1.bf16.msra.mxu1 %v10641_v38  ;;  %7765 = vmatprep.subr.bf16.mxu0 %v10646_v15 }
 0x380   : > { %7806 = vmatprep.subr.bf16.mxu1 %v10649_v40  ;;  %v10726_v40 = vld [vmem:[%s11093_s25 + $0x1c60] ss:$8 sps:$4 sm:$0xff]  }
 0x382   : > { %7766 = vmatpush1.bf16.msra.mxu0 %v10644_v56  ;;  %v10729_v56 = vld [vmem:[%s11093_s25 + $0x1d60] ss:$8 sps:$4 sm:$0xff]  }
 0x383   : > { %7807 = vmatpush1.bf16.msra.mxu1 %v10647_v14  ;;  %7767 = vmatprep.subr.bf16.mxu0 %v10652_v16 }
 0x384   : > { %7808 = vmatprep.subr.bf16.mxu1 %v10655_v41  ;;  %v10734_v41 = vld [vmem:[%s11093_s25 + $0x1c54] ss:$8 sps:$4 sm:$0xff]  }
 0x386   : > { %7768 = vmatpush1.bf16.msra.mxu0 %v10650_v23  ;;  %v10737_v23 = vld [vmem:[%s11093_s25 + $0x1d54] ss:$8 sps:$4 sm:$0xff]  }
 0x387   : > { %7809 = vmatpush1.bf16.msra.mxu1 %v10653_v46  ;;  %7769 = vmatprep.subr.bf16.mxu0 %v10658_v47 }
 0x388   : > { %7810 = vmatprep.subr.bf16.mxu1 %v10661_v48 }
 0x38a   : > { %7770 = vmatpush1.bf16.msra.mxu0 %v10656_v24 }
 0x38b   : > { %7811 = vmatpush1.bf16.msra.mxu1 %v10659_v27  ;;  %7771 = vmatprep.subr.bf16.mxu0 %v10664_v51  ;;  %v10732_v27 = vld [vmem:[%s11093_s25 + $0x1c50] ss:$8 sps:$4 sm:$0xff]  }
 0x38c   : > { %7812 = vmatprep.subr.bf16.mxu1 %v10667_v53  ;;  %v10735_v51 = vld [vmem:[%s11093_s25 + $0x1d50] ss:$8 sps:$4 sm:$0xff]  }
 0x38e   : > { %7772 = vmatpush1.bf16.msra.mxu0 %v10662_v32 }
 0x38f   : > { %7813 = vmatpush1.bf16.msra.mxu1 %v10665_v54  ;;  %7773 = vmatprep.subr.bf16.mxu0 %v10670_v57  ;;  %v10743_v54 = vld [vmem:[%s11093_s25 + $0x1d44] ss:$8 sps:$4 sm:$0xff]   ;;  %v10738_v57 = vld [vmem:[%s11093_s25 + $0x1c40] ss:$8 sps:$4 sm:$0xff]  }
 0x390   : > { %7814 = vmatprep.subr.bf16.mxu1 %v10673_v58  ;;  %v10741_v58 = vld [vmem:[%s11093_s25 + $0x1d40] ss:$8 sps:$4 sm:$0xff]  }
 0x392   : > { %7774 = vmatpush2.bf16.msra.mxu0 %v10668_v35  ;;  %v10746_v35 = vld [vmem:[%s11093_s25 + $0x1c34] ss:$8 sps:$4 sm:$0xff]  }
 0x393   : > { %7815 = vmatpush2.bf16.msra.mxu1 %v10671_v59  ;;  %7775 = vmatprep.subr.bf16.mxu0 %v10676_v25  ;;  %v10749_v59 = vld [vmem:[%s11093_s25 + $0x1d34] ss:$8 sps:$4 sm:$0xff]   ;;  %v10744_v25 = vld [vmem:[%s11093_s25 + $0x1c30] ss:$8 sps:$4 sm:$0xff]  }
 0x394   : > { %7816 = vmatprep.subr.bf16.mxu1 %v10679_v26  ;;  %v10747_v26 = vld [vmem:[%s11093_s25 + $0x1d30] ss:$8 sps:$4 sm:$0xff]  }
 0x396   : > { %7776 = vmatpush2.bf16.msra.mxu0 %v10674_v36  ;;  %v10752_v36 = vld [vmem:[%s11093_s25 + $0x1c24] ss:$8 sps:$4 sm:$0xff]  }
 0x397   : > { %7817 = vmatpush2.bf16.msra.mxu1 %v10677_v60  ;;  %7777 = vmatprep.subr.bf16.mxu0 %v10682_v42  ;;  %v10755_v60 = vld [vmem:[%s11093_s25 + $0x1d24] ss:$8 sps:$4 sm:$0xff]   ;;  %v10750_v42 = vld [vmem:[%s11093_s25 + $0x1c20] ss:$8 sps:$4 sm:$0xff]  }
 0x398   : > { %7818 = vmatprep.subr.bf16.mxu1 %v10685_v1  ;;  %v10753_v1 = vld [vmem:[%s11093_s25 + $0x1d20] ss:$8 sps:$4 sm:$0xff]  }
 0x39a   : > { %7778 = vmatpush2.bf16.msra.mxu0 %v10680_v39  ;;  %v10758_v39 = vld [vmem:[%s11093_s25 + $0x1c14] ss:$8 sps:$4 sm:$0xff]  }
 0x39b   : > { %7819 = vmatpush2.bf16.msra.mxu1 %v10683_v2  ;;  %7779 = vmatprep.subr.bf16.mxu0 %v10688_v43  ;;  %v10761_v2 = vld [vmem:[%s11093_s25 + $0x1d14] ss:$8 sps:$4 sm:$0xff]   ;;  %v10756_v43 = vld [vmem:[%s11093_s25 + $0x1c10] ss:$8 sps:$4 sm:$0xff]  }
 0x39c   : > { %7820 = vmatprep.subr.bf16.mxu1 %v10691_v45  ;;  %v10759_v45 = vld [vmem:[%s11093_s25 + $0x1d10] ss:$8 sps:$4 sm:$0xff]  }
 0x39e   : > { %7780 = vmatpush2.bf16.msra.mxu0 %v10686_v44  ;;  %v10764_v44 = vld [vmem:[%s11093_s25 + $0x1c04] ss:$8 sps:$4 sm:$0xff]  }
 0x39f   : > { %7821 = vmatpush2.bf16.msra.mxu1 %v10689_v7  ;;  %7781 = vmatprep.subr.bf16.mxu0 %v10694_v52  ;;  %v10767_v7 = vld [vmem:[%s11093_s25 + $0x1d04] ss:$8 sps:$4 sm:$0xff]   ;;  %v10762_v52 = vld [vmem:[%s11093_s25 + $0x1c00] ss:$8 sps:$4 sm:$0xff]  }
 0x3a0   : > { %7822 = vmatprep.subr.bf16.mxu1 %v10697_v8  ;;  %v10765_v8 = vld [vmem:[%s11093_s25 + $0x1d00] ss:$8 sps:$4 sm:$0xff]  }
 0x3a2   : > { %7782 = vmatpush2.bf16.msra.mxu0 %v10692_v11  ;;  %v10770_v11 = vld [vmem:[%s11093_s25 + $0x1cf4] ss:$8 sps:$4 sm:$0xff]  }
 0x3a3   : > { %7823 = vmatpush2.bf16.msra.mxu1 %v10695_v12  ;;  %7783 = vmatprep.subr.bf16.mxu0 %v10700_v19  ;;  %v10773_v12 = vld [vmem:[%s11093_s25 + $0x1df4] ss:$8 sps:$4 sm:$0xff]   ;;  %v10768_v19 = vld [vmem:[%s11093_s25 + $0x1cf0] ss:$8 sps:$4 sm:$0xff]  }
 0x3a4   : > { %7824 = vmatprep.subr.bf16.mxu1 %v10703_v13  ;;  %v10771_v13 = vld [vmem:[%s11093_s25 + $0x1df0] ss:$8 sps:$4 sm:$0xff]  }
 0x3a6   : > { %7784 = vmatpush2.bf16.msra.mxu0 %v10698_v30  ;;  %v10776_v30 = vld [vmem:[%s11093_s25 + $0x1ce4] ss:$8 sps:$4 sm:$0xff]  }
 0x3a7   : > { %7825 = vmatpush2.bf16.msra.mxu1 %v10701_v55  ;;  %7785 = vmatprep.subr.bf16.mxu0 %v10706_v17  ;;  %v10779_v55 = vld [vmem:[%s11093_s25 + $0x1de4] ss:$8 sps:$4 sm:$0xff]   ;;  %v10774_v17 = vld [vmem:[%s11093_s25 + $0x1ce0] ss:$8 sps:$4 sm:$0xff]  }
 0x3a8   : > { %7826 = vmatprep.subr.bf16.mxu1 %v10709_v18  ;;  %v10777_v18 = vld [vmem:[%s11093_s25 + $0x1de0] ss:$8 sps:$4 sm:$0xff]  }
 0x3aa   : > { %7786 = vmatpush2.bf16.msra.mxu0 %v10704_v61  ;;  %v10782_v61 = vld [vmem:[%s11093_s25 + $0x1cd4] ss:$8 sps:$4 sm:$0xff]  }
 0x3ab   : > { %7827 = vmatpush2.bf16.msra.mxu1 %v10707_v21  ;;  %7787 = vmatprep.subr.bf16.mxu0 %v10712_v63  ;;  %v10785_v21 = vld [vmem:[%s11093_s25 + $0x1dd4] ss:$8 sps:$4 sm:$0xff]   ;;  %v10780_v63 = vld [vmem:[%s11093_s25 + $0x1cd0] ss:$8 sps:$4 sm:$0xff]  }
 0x3ac   : > { %7828 = vmatprep.subr.bf16.mxu1 %v10715_v0  ;;  %v10783_v0 = vld [vmem:[%s11093_s25 + $0x1dd0] ss:$8 sps:$4 sm:$0xff]  }
 0x3ae   : > { %7788 = vmatpush2.bf16.msra.mxu0 %v10710_v62  ;;  %v10788_v62 = vld [vmem:[%s11093_s25 + $0x1cc4] ss:$8 sps:$4 sm:$0xff]  }
 0x3af   : > { %7829 = vmatpush2.bf16.msra.mxu1 %v10713_v22  ;;  %7839 = vmatprep.subr.bf16.mxu0 %v10722_v3  ;;  %v10791_v22 = vld [vmem:[%s11093_s25 + $0x1dc4] ss:$8 sps:$4 sm:$0xff]   ;;  %v10786_v3 = vld [vmem:[%s11093_s25 + $0x1cc0] ss:$8 sps:$4 sm:$0xff]  }
 0x3b0   : > { %7880 = vmatprep.subr.bf16.mxu1 %v10725_v20  ;;  %v10789_v20 = vld [vmem:[%s11093_s25 + $0x1dc0] ss:$8 sps:$4 sm:$0xff]  }
 0x3b1   : > { %v7545_v37 = vpop.f32.mrf.mxu0  ;;  %7790 = vmatmul.mubr.bf16.vlgmr.msra.gmra.mxu0 %v8219_v6  ;;  %v10794_v6 = vld [vmem:[%s11093_s25 + $0x1cb4] ss:$8 sps:$4 sm:$0xff]  }
 0x3b2   : > { %v7586_v38 = vpop.f32.mrf.mxu1  ;;  %7831 = vmatmul.mubr.bf16.vlgmr.msra.gmra.mxu1 %v8221_v29  ;;  %v7546_v15 = vadd.f32 %v7545_v37, %v12181_v28  ;;  %7840 = vmatpush1.bf16.msra.mxu0 %v10720_v33  ;;  %v10797_v29 = vld [vmem:[%s11093_s25 + $0x1db4] ss:$8 sps:$4 sm:$0xff]   ;;  %v10792_v33 = vld [vmem:[%s11093_s25 + $0x1cb0] ss:$8 sps:$4 sm:$0xff]  }
 0x3b3   : > { %7881 = vmatpush1.bf16.msra.mxu1 %v10723_v10  ;;  %v7547_v14 = vpop.f32.mrf.mxu0  ;;  %7841 = vmatprep.subr.bf16.mxu0 %v10728_v49  ;;  %v10795_v10 = vld [vmem:[%s11093_s25 + $0x1db0] ss:$8 sps:$4 sm:$0xff]   ;;  %v10800_v49 = vld [vmem:[%s11093_s25 + $0x1ca4] ss:$8 sps:$4 sm:$0xff]   ;;  %v10806_v37 = vld [vmem:[%s11093_s25 + $0x1c94] ss:$8 sps:$4 sm:$0xff]  }
 0x3b4   : > { %v7588_v16 = vpop.f32.mrf.mxu1  ;;  %7882 = vmatprep.subr.bf16.mxu1 %v10731_v34  ;;  %v12265_v46 = vadd.f32 %v7586_v38, %v7546_v15  ;;  %v7548_v47 = vadd.f32 %v7547_v14, %v12184_v4  ;;  %7871 = vmatprep.mubr.bf16.mxu0 %v8224_v50  ;;  %v10740_v4 = vld [vmem:[%s11093_s25 + $0x1c44] ss:$8 sps:$4 sm:$0xff]   ;;  %v10798_v50 = vld [vmem:[%s11093_s25 + $0x1ca0] ss:$8 sps:$4 sm:$0xff]   ;;  %v10809_v38 = vld [vmem:[%s11093_s25 + $0x1d94] ss:$8 sps:$4 sm:$0xff]  }
 0x3b5   : > { %7912 = vmatprep.mubr.bf16.mxu1 %v8226_v9  ;;  %v7549_v28 = vpop.f32.mrf.mxu0  ;;  %v10803_v34 = vld [vmem:[%s11093_s25 + $0x1da4] ss:$8 sps:$4 sm:$0xff]   ;;  %v10801_v9 = vld [vmem:[%s11093_s25 + $0x1da0] ss:$8 sps:$4 sm:$0xff]   ;;  %v10804_v15 = vld [vmem:[%s11093_s25 + $0x1c90] ss:$8 sps:$4 sm:$0xff]  }
 0x3b6   : > { %v7590_v48 = vpop.f32.mrf.mxu1  ;;  %v12268_v24 = vadd.f32 %v7588_v16, %v7548_v47  ;;  %7842 = vmatpush1.bf16.msra.mxu0 %v10726_v40  ;;  %v10807_v40 = vld [vmem:[%s11093_s25 + $0x1d90] ss:$8 sps:$4 sm:$0xff]   ;;  %v10815_v14 = vld [vmem:[%s11093_s25 + $0x1d84] ss:$8 sps:$4 sm:$0xff]   ;;  %v10810_v16 = vld [vmem:[%s11093_s25 + $0x1c80] ss:$8 sps:$4 sm:$0xff]   ;;  %v8223_v28 = vcombine.low %v12247_v5, %v12247_v5 }
 0x3b7   : > { %7883 = vmatpush1.bf16.msra.mxu1 %v10729_v56  ;;  %v7550_v53 = vpop.f32.mrf.mxu0  ;;  %7843 = vmatprep.subr.bf16.mxu0 %v10734_v41  ;;  %v10812_v56 = vld [vmem:[%s11093_s25 + $0x1c84] ss:$8 sps:$4 sm:$0xff]   ;;  %v10813_v41 = vld [vmem:[%s11093_s25 + $0x1d80] ss:$8 sps:$4 sm:$0xff]   ;;  %v10825_v47 = vld [vmem:[%s11093_s25 + $0x1f74] ss:$8 sps:$4 sm:$0xff]   ;;  %v8225_v48 = vcombine.low %v12250_v31, %v12250_v31 }
 0x3b8   : > { %v7591_v32 = vpop.f32.mrf.mxu1  ;;  %7884 = vmatprep.subr.bf16.mxu1 %v10737_v23  ;;  %v10822_v23 = vld [vmem:[%s11093_s25 + $0x1e74] ss:$8 sps:$4 sm:$0xff]   ;;  %v10820_v53 = vld [vmem:[%s11093_s25 + $0x1e70] ss:$8 sps:$4 sm:$0xff]  }
 0x3b9   : > { %v10823_v32 = vld [vmem:[%s11093_s25 + $0x1f70] ss:$8 sps:$4 sm:$0xff]  }
 0x3ba   : > { %7844 = vmatpush1.bf16.msra.mxu0 %v10732_v27  ;;  %v12331_v27 = vld [vmem:[%s11103_s30 + $0xf0] sm:$0xff] }
 0x3bb   : > { %7885 = vmatpush1.bf16.msra.mxu1 %v10735_v51  ;;  %7845 = vmatprep.subr.bf16.mxu0 %v10740_v4  ;;  %v12334_v51 = vld [vmem:[%s11103_s30 + $0xf8] sm:$0xff]  ;;  %v8228_v5 = vcombine.high %v12331_v27, %v12331_v27 }
 0x3bc   : > { %7886 = vmatprep.subr.bf16.mxu1 %v10743_v54  ;;  %v10828_v4 = vld [vmem:[%s11093_s25 + $0x1e64] ss:$8 sps:$4 sm:$0xff]   ;;  %v8230_v31 = vcombine.high %v12334_v51, %v12334_v51 }
 0x3bd   : > { %v10831_v54 = vld [vmem:[%s11093_s25 + $0x1f64] ss:$8 sps:$4 sm:$0xff]  }
 0x3be   : > { %7846 = vmatpush1.bf16.msra.mxu0 %v10738_v57 }
 0x3bf   : > { %7887 = vmatpush1.bf16.msra.mxu1 %v10741_v58  ;;  %7847 = vmatprep.subr.bf16.mxu0 %v10746_v35 }
 0x3c0   : > { %7888 = vmatprep.subr.bf16.mxu1 %v10749_v59  ;;  %v10826_v59 = vld [vmem:[%s11093_s25 + $0x1e60] ss:$8 sps:$4 sm:$0xff]  }
 0x3c2   : > { %7848 = vmatpush1.bf16.msra.mxu0 %v10744_v25  ;;  %v10829_v25 = vld [vmem:[%s11093_s25 + $0x1f60] ss:$8 sps:$4 sm:$0xff]  }
 0x3c3   : > { %7889 = vmatpush1.bf16.msra.mxu1 %v10747_v26  ;;  %7849 = vmatprep.subr.bf16.mxu0 %v10752_v36 }
 0x3c4   : > { %7890 = vmatprep.subr.bf16.mxu1 %v10755_v60  ;;  %v10834_v60 = vld [vmem:[%s11093_s25 + $0x1e54] ss:$8 sps:$4 sm:$0xff]  }
 0x3c6   : > { %7850 = vmatpush1.bf16.msra.mxu0 %v10750_v42  ;;  %v10837_v42 = vld [vmem:[%s11093_s25 + $0x1f54] ss:$8 sps:$4 sm:$0xff]  }
 0x3c7   : > { %7891 = vmatpush1.bf16.msra.mxu1 %v10753_v1  ;;  %7851 = vmatprep.subr.bf16.mxu0 %v10758_v39 }
 0x3c8   : > { %7892 = vmatprep.subr.bf16.mxu1 %v10761_v2 }
 0x3ca   : > { %7852 = vmatpush1.bf16.msra.mxu0 %v10756_v43 }
 0x3cb   : > { %7893 = vmatpush1.bf16.msra.mxu1 %v10759_v45  ;;  %7853 = vmatprep.subr.bf16.mxu0 %v10764_v44  ;;  %v10832_v45 = vld [vmem:[%s11093_s25 + $0x1e50] ss:$8 sps:$4 sm:$0xff]  }
 0x3cc   : > { %7894 = vmatprep.subr.bf16.mxu1 %v10767_v7  ;;  %v10835_v44 = vld [vmem:[%s11093_s25 + $0x1f50] ss:$8 sps:$4 sm:$0xff]  }
 0x3ce   : > { %7854 = vmatpush1.bf16.msra.mxu0 %v10762_v52 }
 0x3cf   : > { %7895 = vmatpush1.bf16.msra.mxu1 %v10765_v8  ;;  %7855 = vmatprep.subr.bf16.mxu0 %v10770_v11  ;;  %v10843_v8 = vld [vmem:[%s11093_s25 + $0x1f44] ss:$8 sps:$4 sm:$0xff]   ;;  %v10838_v11 = vld [vmem:[%s11093_s25 + $0x1e40] ss:$8 sps:$4 sm:$0xff]  }
 0x3d0   : > { %7896 = vmatprep.subr.bf16.mxu1 %v10773_v12  ;;  %v10841_v12 = vld [vmem:[%s11093_s25 + $0x1f40] ss:$8 sps:$4 sm:$0xff]  }
 0x3d2   : > { %7856 = vmatpush2.bf16.msra.mxu0 %v10768_v19  ;;  %v10846_v19 = vld [vmem:[%s11093_s25 + $0x1e34] ss:$8 sps:$4 sm:$0xff]  }
 0x3d3   : > { %7897 = vmatpush2.bf16.msra.mxu1 %v10771_v13  ;;  %7857 = vmatprep.subr.bf16.mxu0 %v10776_v30  ;;  %v10849_v13 = vld [vmem:[%s11093_s25 + $0x1f34] ss:$8 sps:$4 sm:$0xff]   ;;  %v10844_v30 = vld [vmem:[%s11093_s25 + $0x1e30] ss:$8 sps:$4 sm:$0xff]  }
 0x3d4   : > { %7898 = vmatprep.subr.bf16.mxu1 %v10779_v55  ;;  %v10847_v55 = vld [vmem:[%s11093_s25 + $0x1f30] ss:$8 sps:$4 sm:$0xff]  }
 0x3d6   : > { %7858 = vmatpush2.bf16.msra.mxu0 %v10774_v17  ;;  %v10852_v17 = vld [vmem:[%s11093_s25 + $0x1e24] ss:$8 sps:$4 sm:$0xff]  }
 0x3d7   : > { %7899 = vmatpush2.bf16.msra.mxu1 %v10777_v18  ;;  %7859 = vmatprep.subr.bf16.mxu0 %v10782_v61  ;;  %v10855_v18 = vld [vmem:[%s11093_s25 + $0x1f24] ss:$8 sps:$4 sm:$0xff]   ;;  %v10850_v61 = vld [vmem:[%s11093_s25 + $0x1e20] ss:$8 sps:$4 sm:$0xff]  }
 0x3d8   : > { %7900 = vmatprep.subr.bf16.mxu1 %v10785_v21  ;;  %v10853_v21 = vld [vmem:[%s11093_s25 + $0x1f20] ss:$8 sps:$4 sm:$0xff]  }
 0x3da   : > { %7860 = vmatpush2.bf16.msra.mxu0 %v10780_v63  ;;  %v10858_v63 = vld [vmem:[%s11093_s25 + $0x1e14] ss:$8 sps:$4 sm:$0xff]  }
 0x3db   : > { %7901 = vmatpush2.bf16.msra.mxu1 %v10783_v0  ;;  %7861 = vmatprep.subr.bf16.mxu0 %v10788_v62  ;;  %v10861_v0 = vld [vmem:[%s11093_s25 + $0x1f14] ss:$8 sps:$4 sm:$0xff]   ;;  %v10856_v62 = vld [vmem:[%s11093_s25 + $0x1e10] ss:$8 sps:$4 sm:$0xff]  }
 0x3dc   : > { %7902 = vmatprep.subr.bf16.mxu1 %v10791_v22  ;;  %v10859_v22 = vld [vmem:[%s11093_s25 + $0x1f10] ss:$8 sps:$4 sm:$0xff]  }
 0x3de   : > { %7862 = vmatpush2.bf16.msra.mxu0 %v10786_v3  ;;  %v10864_v3 = vld [vmem:[%s11093_s25 + $0x1e04] ss:$8 sps:$4 sm:$0xff]  }
 0x3df   : > { %7903 = vmatpush2.bf16.msra.mxu1 %v10789_v20  ;;  %7863 = vmatprep.subr.bf16.mxu0 %v10794_v6  ;;  %v10867_v20 = vld [vmem:[%s11093_s25 + $0x1f04] ss:$8 sps:$4 sm:$0xff]   ;;  %v10862_v6 = vld [vmem:[%s11093_s25 + $0x1e00] ss:$8 sps:$4 sm:$0xff]  }
 0x3e0   : > { %7904 = vmatprep.subr.bf16.mxu1 %v10797_v29  ;;  %v10865_v29 = vld [vmem:[%s11093_s25 + $0x1f00] ss:$8 sps:$4 sm:$0xff]  }
 0x3e2   : > { %7864 = vmatpush2.bf16.msra.mxu0 %v10792_v33  ;;  %v10870_v33 = vld [vmem:[%s11093_s25 + $0x1ef4] ss:$8 sps:$4 sm:$0xff]  }
 0x3e3   : > { %7905 = vmatpush2.bf16.msra.mxu1 %v10795_v10  ;;  %7865 = vmatprep.subr.bf16.mxu0 %v10800_v49  ;;  %v10873_v10 = vld [vmem:[%s11093_s25 + $0x1ff4] ss:$8 sps:$4 sm:$0xff]   ;;  %v10868_v49 = vld [vmem:[%s11093_s25 + $0x1ef0] ss:$8 sps:$4 sm:$0xff]  }
 0x3e4   : > { %7906 = vmatprep.subr.bf16.mxu1 %v10803_v34  ;;  %v10871_v34 = vld [vmem:[%s11093_s25 + $0x1ff0] ss:$8 sps:$4 sm:$0xff]  }
 0x3e6   : > { %7866 = vmatpush2.bf16.msra.mxu0 %v10798_v50  ;;  %v10876_v50 = vld [vmem:[%s11093_s25 + $0x1ee4] ss:$8 sps:$4 sm:$0xff]  }
 0x3e7   : > { %7907 = vmatpush2.bf16.msra.mxu1 %v10801_v9  ;;  %7867 = vmatprep.subr.bf16.mxu0 %v10806_v37  ;;  %v10879_v9 = vld [vmem:[%s11093_s25 + $0x1fe4] ss:$8 sps:$4 sm:$0xff]   ;;  %v10874_v37 = vld [vmem:[%s11093_s25 + $0x1ee0] ss:$8 sps:$4 sm:$0xff]  }
 0x3e8   : > { %7908 = vmatprep.subr.bf16.mxu1 %v10809_v38  ;;  %v10877_v38 = vld [vmem:[%s11093_s25 + $0x1fe0] ss:$8 sps:$4 sm:$0xff]  }
 0x3ea   : > { %7868 = vmatpush2.bf16.msra.mxu0 %v10804_v15  ;;  %v10882_v15 = vld [vmem:[%s11093_s25 + $0x1ed4] ss:$8 sps:$4 sm:$0xff]  }
 0x3eb   : > { %7909 = vmatpush2.bf16.msra.mxu1 %v10807_v40  ;;  %7869 = vmatprep.subr.bf16.mxu0 %v10812_v56  ;;  %v10885_v40 = vld [vmem:[%s11093_s25 + $0x1fd4] ss:$8 sps:$4 sm:$0xff]   ;;  %v10880_v56 = vld [vmem:[%s11093_s25 + $0x1ed0] ss:$8 sps:$4 sm:$0xff]  }
 0x3ec   : > { %7910 = vmatprep.subr.bf16.mxu1 %v10815_v14  ;;  %v10883_v14 = vld [vmem:[%s11093_s25 + $0x1fd0] ss:$8 sps:$4 sm:$0xff]  }
 0x3ee   : > { %7870 = vmatpush2.bf16.msra.mxu0 %v10810_v16  ;;  %v10888_v16 = vld [vmem:[%s11093_s25 + $0x1ec4] ss:$8 sps:$4 sm:$0xff]  }
 0x3ef   : > { %7911 = vmatpush2.bf16.msra.mxu1 %v10813_v41  ;;  %7921 = vmatprep.subr.bf16.mxu0 %v10822_v23  ;;  %v10891_v41 = vld [vmem:[%s11093_s25 + $0x1fc4] ss:$8 sps:$4 sm:$0xff]   ;;  %v10886_v23 = vld [vmem:[%s11093_s25 + $0x1ec0] ss:$8 sps:$4 sm:$0xff]  }
 0x3f0   : > { %7962 = vmatprep.subr.bf16.mxu1 %v10825_v47  ;;  %v10889_v47 = vld [vmem:[%s11093_s25 + $0x1fc0] ss:$8 sps:$4 sm:$0xff]  }
 0x3f1   : > { %v7627_v57 = vpop.f32.mrf.mxu0  ;;  %7872 = vmatmul.mubr.bf16.vlgmr.msra.gmra.mxu0 %v8223_v28  ;;  %v10894_v28 = vld [vmem:[%s11093_s25 + $0x1eb4] ss:$8 sps:$4 sm:$0xff]  }
 0x3f2   : > { %v7668_v58 = vpop.f32.mrf.mxu1  ;;  %7913 = vmatmul.mubr.bf16.vlgmr.msra.gmra.mxu1 %v8225_v48  ;;  %v7628_v35 = vadd.f32 %v7627_v57, %v12265_v46  ;;  %7922 = vmatpush1.bf16.msra.mxu0 %v10820_v53  ;;  %v10897_v48 = vld [vmem:[%s11093_s25 + $0x1fb4] ss:$8 sps:$4 sm:$0xff]   ;;  %v10892_v53 = vld [vmem:[%s11093_s25 + $0x1eb0] ss:$8 sps:$4 sm:$0xff]  }
 0x3f3   : > { %7963 = vmatpush1.bf16.msra.mxu1 %v10823_v32  ;;  %v7629_v26 = vpop.f32.mrf.mxu0  ;;  %7923 = vmatprep.subr.bf16.mxu0 %v10828_v4  ;;  %v10895_v32 = vld [vmem:[%s11093_s25 + $0x1fb0] ss:$8 sps:$4 sm:$0xff]   ;;  %v10900_v4 = vld [vmem:[%s11093_s25 + $0x1ea4] ss:$8 sps:$4 sm:$0xff]   ;;  %v10906_v57 = vld [vmem:[%s11093_s25 + $0x1e94] ss:$8 sps:$4 sm:$0xff]  }
 0x3f4   : > { %v7670_v36 = vpop.f32.mrf.mxu1  ;;  %7964 = vmatprep.subr.bf16.mxu1 %v10831_v54  ;;  %v12349_v1 = vadd.f32 %v7668_v58, %v7628_v35  ;;  %v7630_v39 = vadd.f32 %v7629_v26, %v12268_v24  ;;  %7953 = vmatprep.mubr.bf16.mxu0 %v8228_v5  ;;  %v10840_v24 = vld [vmem:[%s11093_s25 + $0x1e44] ss:$8 sps:$4 sm:$0xff]   ;;  %v10898_v5 = vld [vmem:[%s11093_s25 + $0x1ea0] ss:$8 sps:$4 sm:$0xff]   ;;  %v10909_v58 = vld [vmem:[%s11093_s25 + $0x1f94] ss:$8 sps:$4 sm:$0xff]  }
 0x3f5   : > { %7994 = vmatprep.mubr.bf16.mxu1 %v8230_v31  ;;  %v7631_v46 = vpop.f32.mrf.mxu0  ;;  %v10903_v54 = vld [vmem:[%s11093_s25 + $0x1fa4] ss:$8 sps:$4 sm:$0xff]   ;;  %v10901_v31 = vld [vmem:[%s11093_s25 + $0x1fa0] ss:$8 sps:$4 sm:$0xff]   ;;  %v10904_v35 = vld [vmem:[%s11093_s25 + $0x1e90] ss:$8 sps:$4 sm:$0xff]  }
 0x3f6   : > { %v7672_v2 = vpop.f32.mrf.mxu1  ;;  %v12352_v43 = vadd.f32 %v7670_v36, %v7630_v39  ;;  %7924 = vmatpush1.bf16.msra.mxu0 %v10826_v59  ;;  %v10907_v59 = vld [vmem:[%s11093_s25 + $0x1f90] ss:$8 sps:$4 sm:$0xff]   ;;  %v10915_v26 = vld [vmem:[%s11093_s25 + $0x1f84] ss:$8 sps:$4 sm:$0xff]   ;;  %v10910_v36 = vld [vmem:[%s11093_s25 + $0x1e80] ss:$8 sps:$4 sm:$0xff]   ;;  %v8229_v39 = vcombine.low %v12334_v51, %v12334_v51 }
 0x3f7   : > { %7965 = vmatpush1.bf16.msra.mxu1 %v10829_v25  ;;  %v7632_v7 = vpop.f32.mrf.mxu0  ;;  %7925 = vmatprep.subr.bf16.mxu0 %v10834_v60  ;;  %v10912_v25 = vld [vmem:[%s11093_s25 + $0x1e84] ss:$8 sps:$4 sm:$0xff]   ;;  %v10913_v60 = vld [vmem:[%s11093_s25 + $0x1f80] ss:$8 sps:$4 sm:$0xff]  }
 0x3f8   : > { %v7673_v52 = vpop.f32.mrf.mxu1  ;;  %7966 = vmatprep.subr.bf16.mxu1 %v10837_v42  ;;  %v8227_v42 = vcombine.low %v12331_v27, %v12331_v27 }
 0x3fa   : > { %7926 = vmatpush1.bf16.msra.mxu0 %v10832_v45 }
 0x3fb   : > { %7967 = vmatpush1.bf16.msra.mxu1 %v10835_v44  ;;  %7927 = vmatprep.subr.bf16.mxu0 %v10840_v24 }
 0x3fc   : > { %7968 = vmatprep.subr.bf16.mxu1 %v10843_v8 }
 0x3fe   : > { %7928 = vmatpush1.bf16.msra.mxu0 %v10838_v11 }
 0x3ff   : > { %7969 = vmatpush1.bf16.msra.mxu1 %v10841_v12  ;;  %7929 = vmatprep.subr.bf16.mxu0 %v10846_v19 }
 0x400   : > { %7970 = vmatprep.subr.bf16.mxu1 %v10849_v13 }
 0x402   : > { %7930 = vmatpush1.bf16.msra.mxu0 %v10844_v30 }
 0x403   : > { %7971 = vmatpush1.bf16.msra.mxu1 %v10847_v55  ;;  %7931 = vmatprep.subr.bf16.mxu0 %v10852_v17 }
 0x404   : > { %7972 = vmatprep.subr.bf16.mxu1 %v10855_v18 }
 0x406   : > { %7932 = vmatpush1.bf16.msra.mxu0 %v10850_v61 }
 0x407   : > { %7973 = vmatpush1.bf16.msra.mxu1 %v10853_v21  ;;  %7933 = vmatprep.subr.bf16.mxu0 %v10858_v63 }
 0x408   : > { %7974 = vmatprep.subr.bf16.mxu1 %v10861_v0 }
 0x40a   : > { %7934 = vmatpush1.bf16.msra.mxu0 %v10856_v62 }
 0x40b   : > { %7975 = vmatpush1.bf16.msra.mxu1 %v10859_v22  ;;  %7935 = vmatprep.subr.bf16.mxu0 %v10864_v3 }
 0x40c   : > { %7976 = vmatprep.subr.bf16.mxu1 %v10867_v20 }
 0x40e   : > { %7936 = vmatpush1.bf16.msra.mxu0 %v10862_v6 }
 0x40f   : > { %7977 = vmatpush1.bf16.msra.mxu1 %v10865_v29  ;;  %7937 = vmatprep.subr.bf16.mxu0 %v10870_v33 }
 0x410   : > { %7978 = vmatprep.subr.bf16.mxu1 %v10873_v10 }
 0x412   : > { %7938 = vmatpush2.bf16.msra.mxu0 %v10868_v49 }
 0x413   : > { %7979 = vmatpush2.bf16.msra.mxu1 %v10871_v34  ;;  %7939 = vmatprep.subr.bf16.mxu0 %v10876_v50 }
 0x414   : > { %7980 = vmatprep.subr.bf16.mxu1 %v10879_v9 }
 0x416   : > { %7940 = vmatpush2.bf16.msra.mxu0 %v10874_v37 }
 0x417   : > { %7981 = vmatpush2.bf16.msra.mxu1 %v10877_v38  ;;  %7941 = vmatprep.subr.bf16.mxu0 %v10882_v15 }
 0x418   : > { %7982 = vmatprep.subr.bf16.mxu1 %v10885_v40  ;;  %v289_v40 = vld [vmem:[#allocation2] sm:$0xff] }
 0x41a   : > { %7942 = vmatpush2.bf16.msra.mxu0 %v10880_v56 }
 0x41b   : > { %7983 = vmatpush2.bf16.msra.mxu1 %v10883_v14  ;;  %7943 = vmatprep.subr.bf16.mxu0 %v10888_v16 }
 0x41c   : > { %7984 = vmatprep.subr.bf16.mxu1 %v10891_v41 }
 0x41e   : > { %7944 = vmatpush2.bf16.msra.mxu0 %v10886_v23  ;;  %v290_v23 = vld [vmem:[#allocation2 + $0x8] sm:$0xff] }
 0x41f   : > { %7985 = vmatpush2.bf16.msra.mxu1 %v10889_v47  ;;  %7945 = vmatprep.subr.bf16.mxu0 %v10894_v28 }
 0x420   : > { %7986 = vmatprep.subr.bf16.mxu1 %v10897_v48 }
 0x422   : > { %7946 = vmatpush2.bf16.msra.mxu0 %v10892_v53 }
 0x423   : > { %7987 = vmatpush2.bf16.msra.mxu1 %v10895_v32  ;;  %7947 = vmatprep.subr.bf16.mxu0 %v10900_v4 }
 0x424   : > { %7988 = vmatprep.subr.bf16.mxu1 %v10903_v54 }
 0x426   : > { %7948 = vmatpush2.bf16.msra.mxu0 %v10898_v5 }
 0x427   : > { %7989 = vmatpush2.bf16.msra.mxu1 %v10901_v31  ;;  %7949 = vmatprep.subr.bf16.mxu0 %v10906_v57 }
 0x428   : > { %7990 = vmatprep.subr.bf16.mxu1 %v10909_v58 }
 0x42a   : > { %7950 = vmatpush2.bf16.msra.mxu0 %v10904_v35 }
 0x42b   : > { %7991 = vmatpush2.bf16.msra.mxu1 %v10907_v59  ;;  %7951 = vmatprep.subr.bf16.mxu0 %v10912_v25 }
 0x42c   : > { %7992 = vmatprep.subr.bf16.mxu1 %v10915_v26 }
 0x42e   : > { %7952 = vmatpush2.bf16.msra.mxu0 %v10910_v36 }
 0x42f   : > { %7993 = vmatpush2.bf16.msra.mxu1 %v10913_v60 }
 0x431   : > { %v7709_v46 = vpop.f32.mrf.mxu0  ;;  %7954 = vmatmul.mubr.bf16.vlgmr.msra.gmra.mxu0 %v8227_v42 }
 0x432   : > { %v7750_v2 = vpop.f32.mrf.mxu1  ;;  %7995 = vmatmul.mubr.bf16.vlgmr.msra.gmra.mxu1 %v8229_v39  ;;  %v7710_v45 = vadd.f32 %v7709_v46, %v12349_v1 }
 0x433   : > { %v7711_v44 = vpop.f32.mrf.mxu0 }
 0x434   : > { %v7752_v7 = vpop.f32.mrf.mxu1  ;;  %v7751_v52 = vadd.f32 %v7750_v2, %v7710_v45  ;;  %v7712_v24 = vadd.f32 %v7711_v44, %v12352_v43 }
 0x435   : > { %v7713_v8 = vpop.f32.mrf.mxu0 }
 0x436   : > { %v7754_v11 = vpop.f32.mrf.mxu1  ;;  %v7753_v12 = vadd.f32 %v7752_v7, %v7712_v24 }
 0x437   : > { %v7714_v27 = vpop.f32.mrf.mxu0 }
 0x438   : > { %v7755_v19 = vpop.f32.mrf.mxu1 }
 0x471   : > { %v7791_v13 = vpop.f32.mrf.mxu0 }
 0x472   : > { %v7832_v51 = vpop.f32.mrf.mxu1  ;;  %v7792_v30 = vadd.f32 %v7791_v13, %v7751_v52 }
 0x473   : > { %v7793_v55 = vpop.f32.mrf.mxu0 }
 0x474   : > { %v7834_v17 = vpop.f32.mrf.mxu1  ;;  %v7833_v18 = vadd.f32 %v7832_v51, %v7792_v30  ;;  %v7794_v61 = vadd.f32 %v7793_v55, %v7753_v12 }
 0x475   : > { %v7795_v21 = vpop.f32.mrf.mxu0 }
 0x476   : > { %v7836_v63 = vpop.f32.mrf.mxu1  ;;  %v7835_v1 = vadd.f32 %v7834_v17, %v7794_v61 }
 0x477   : > { %v7796_v0 = vpop.f32.mrf.mxu0 }
 0x478   : > { %v7837_v62 = vpop.f32.mrf.mxu1 }
 0x4b1   : > { %v7873_v22 = vpop.f32.mrf.mxu0 }
 0x4b2   : > { %v7914_v3 = vpop.f32.mrf.mxu1  ;;  %v7874_v49 = vadd.f32 %v7873_v22, %v7833_v18 }
 0x4b3   : > { %v7875_v43 = vpop.f32.mrf.mxu0 }
 0x4b4   : > { %v7916_v20 = vpop.f32.mrf.mxu1  ;;  %v7876_v34 = vadd.f32 %v7875_v43, %v7835_v1  ;;  %v7915_v50 = vadd.f32 %v7914_v3, %v7874_v49 }
 0x4b5   : > { %v7877_v6 = vpop.f32.mrf.mxu0 }
 0x4b6   : > { %v7918_v29 = vpop.f32.mrf.mxu1  ;;  %v7917_v38 = vadd.f32 %v7916_v20, %v7876_v34 }
 0x4b7   : > { %v7878_v33 = vpop.f32.mrf.mxu0 }
 0x4b8   : > { %v7919_v10 = vpop.f32.mrf.mxu1 }
 0x4f1   : > { %v7955_v9 = vpop.f32.mrf.mxu0 }
 0x4f2   : > { %v7996_v37 = vpop.f32.mrf.mxu1  ;;  %v7956_v15 = vadd.f32 %v7955_v9, %v7915_v50 }
 0x4f3   : > { %v7957_v56 = vpop.f32.mrf.mxu0 }
 0x4f4   : > { %v7998_v14 = vpop.f32.mrf.mxu1  ;;  %v7997_v16 = vadd.f32 %v7996_v37, %v7956_v15  ;;  %v7958_v41 = vadd.f32 %v7957_v56, %v7917_v38 }
 0x4f5   : > { %v7959_v47 = vpop.f32.mrf.mxu0 }
 0x4f6   : > { %v8000_v28 = vpop.f32.mrf.mxu1  ;;  %v8003_v48 = vadd.f32 %v7997_v16, %v289_v40  ;;  %v7999_v53 = vadd.f32 %v7998_v14, %v7958_v41  ;;  %8010 = sbr.rel (%p9255_p7) target bundleno = 1286 (0x506), region = 44 }
 0x4f7   : > { %v7960_v32 = vpop.f32.mrf.mxu0 }
 0x4f8   : > { %v8001_v4 = vpop.f32.mrf.mxu1  ;;  %8005 = vst [vmem:[#allocation2] sm:$0xff] %v8003_v48  ;;  %v8004_v54 = vadd.f32 %v7999_v53, %v290_v23 }
 0x4fa   : > { %8006 = vst [vmem:[#allocation2 + $0x8] sm:$0xff] %v8004_v54 }
 0x4fb   : > { %v8015_v5 = vlaneseq  ;;  %v8013_v57 = vld [vmem:[%s12444_s2] sm:$0x3] }
 0x4fd   : > { %v8016_v31 = vshrl.u32 %v8015_v5, 7 }
 0x4ff   : > { %v8017_v58 = vsub.s32 0, %v8016_v31  ;;  %v8021_v35 = vsub.s32 1, %v8016_v31  ;;  %v8011_v59 = vld [vmem:[#allocation2] sm:$0xff] }
 0x501   : > { %v8012_v25 = vld [vmem:[#allocation2 + $0x8] sm:$0xff]  ;;  %v8018_v26 = vrot.slane %v8013_v57, %v8017_v58  ;;  %v8022_v36 = vrot.slane %v8013_v57, %v8021_v35 }
 0x503   : > { %v8025_v60 = vadd.f32 %v8018_v26, %v8011_v59  ;;  %v8026_v42 = vadd.f32 %v8022_v36, %v8012_v25 }
 0x505   : > { %8027 = vst [vmem:[%s12445_s3] sm:$0xff] %v8025_v60  ;;  %8028 = vst [vmem:[%s12445_s3 + $0x8] sm:$0xff] %v8026_v42 }
 0x506 PF: > { %s16_s17 = sadd.s32 1, %s10998_s17   ;;  %s12449_s12 = smov %s10982_s13 }
 0x507   : > { %p13_p10 = scmp.ge.s32.totalorder %s16_s17, 51   ;;  %s12450_s13 = smov %s10986_s14 }
 0x508   : > { %s12451_s14 = smov %s11073_s24  ;;  %s12452_s15 = smov %s10994_s16 }
 0x509   : > { %s12453_s16 = smov %s12455_s19  ;;  %15 = sbr.rel (!%p13_p10) target bundleno = 4 (0x4), region = 86 }
 0x50e   :  { %8059 = vsyncpa [#allocation4], 1 }
 0x50f   :  { %8061 = vsyncpa [#allocation4 + $0x1], 1 }

</bundles_post_ra>
